<compile_context>
chip_gen: v7x
topology: tpu7x:2x2x1
jax: 0.10.0
libtpu: 0.0.40
codegen_flags: <defaults>
</compile_context>

<pallas_src>
import functools

import jax
import jax.numpy as jnp
from jax import lax
from jax.experimental import pallas as pl
from jax.experimental.pallas import tpu as pltpu


def _en_basic_kernel(
    x_ref,      # (1, H, W, Ci)  f32 input tile (one batch element, NHWC)
    w1_ref,     # (9*Ci, Cm)     bf16 conv1 weight (BN1 folded), K order = (tap, cin)
    b1_ref,     # (1, Cm)        f32 BN1 folded bias
    dw1_ref,    # (9, 1, Cm)     f32 depthwise conv1 weight (tap-major)
    db1_ref,    # (1, Cm)        f32 depthwise conv1 bias
    w2_ref,     # (9*Cm, Co)     bf16 conv2 weight (BN2 folded)
    b2_ref,     # (1, Co)        f32
    dw2_ref,    # (9, 1, Co)     f32
    db2_ref,    # (1, Co)        f32
    *rest,      # [ws_ref (Ci,Co) bf16, bs_ref (1,Co) f32,] o_ref, pad1..pad4 scratch
    H, W, is_shortcut,
):
    if is_shortcut:
        ws_ref, bs_ref, o_ref, pad1, pad2, pad3, pad4 = rest
    else:
        o_ref, pad1, pad2, pad3, pad4 = rest
    HW = H * W

    def zero_border(pad_ref):
        # Zero ONLY the 1-pixel border; interiors are fully overwritten each step.
        hp, wp, c = pad_ref.shape
        zrow = jnp.zeros((1, wp, c), pad_ref.dtype)
        zcol = jnp.zeros((hp, 1, c), pad_ref.dtype)
        pad_ref[0:1, :, :] = zrow
        pad_ref[hp - 1:hp, :, :] = zrow
        pad_ref[:, 0:1, :] = zcol
        pad_ref[:, wp - 1:wp, :] = zcol

    def conv3x3(pad_ref, w_ref):
        # 3x3 same-padding conv as im2col matmul(s): bf16 MXU inputs, f32 accumulate.
        cin = pad_ref.shape[-1]
        taps = [pad_ref[dy:dy + H, dx:dx + W, :]
                for dy in range(3) for dx in range(3)]
        if 9 * cin <= 1152:
            # Full 9-tap im2col: a single MXU push with K = 9*Cin.
            slab = jnp.concatenate(taps, axis=-1).reshape(HW, 9 * cin)
            return jnp.dot(slab.astype(jnp.bfloat16), w_ref[...],
                           preferred_element_type=jnp.float32)
        # Wide-channel fallback: fuse the 3 dx taps per row -> 3 pushes, K = 3*Cin.
        acc = None
        for dy in range(3):
            slab = jnp.concatenate(taps[3 * dy:3 * dy + 3], axis=-1)
            slab = slab.reshape(HW, 3 * cin)
            d = jnp.dot(slab.astype(jnp.bfloat16),
                        w_ref[3 * dy * cin:(3 * dy + 3) * cin, :],
                        preferred_element_type=jnp.float32)
            acc = d if acc is None else acc + d
        return acc

    def dwconv3x3(pad_ref, dw_ref):
        # Depthwise 3x3 same-padding conv: pure VPU multiply-adds in f32.
        acc = None
        for k in range(9):
            dy, dx = divmod(k, 3)
            d = pad_ref[dy:dy + H, dx:dx + W, :] * dw_ref[k]
            acc = d if acc is None else acc + d
        return acc

    zero_border(pad1)
    zero_border(pad2)
    zero_border(pad3)
    zero_border(pad4)

    cm = b1_ref.shape[-1]
    co = b2_ref.shape[-1]

    x = x_ref[0]                                      # (H, W, Ci) f32
    pad1[1:H + 1, 1:W + 1, :] = x

    # --- conv_bn1: dense 3x3 (BN folded) -> depthwise 3x3 + bias -> ReLU ----------------
    u = conv3x3(pad1, w1_ref) + b1_ref[...]           # (HW, Cm) f32
    pad2[1:H + 1, 1:W + 1, :] = u.reshape(H, W, cm)   # written straight into dw input
    v = dwconv3x3(pad2, dw1_ref) + db1_ref[...]       # (H, W, Cm) f32
    pad3[1:H + 1, 1:W + 1, :] = jnp.maximum(v, 0.0)

    # --- conv_bn2: dense 3x3 (BN folded) -> depthwise 3x3 + bias ------------------------
    p = conv3x3(pad3, w2_ref) + b2_ref[...]           # (HW, Co) f32
    pad4[1:H + 1, 1:W + 1, :] = p.reshape(H, W, co)
    q = dwconv3x3(pad4, dw2_ref) + db2_ref[...]       # (H, W, Co) f32

    # --- shortcut branch + residual add + ReLU (kept in f32) ----------------------------
    if is_shortcut:
        s = jnp.dot(x.reshape(HW, x.shape[-1]).astype(jnp.bfloat16), ws_ref[...],
                    preferred_element_type=jnp.float32) + bs_ref[...]
        s = s.reshape(H, W, co)
    else:
        s = x                                         # identity: requires Ci == Co

    o_ref[0] = jnp.maximum(q + s, 0.0).astype(o_ref.dtype)


def _fold_params(params, *, is_shortcut, eps):
    """Fold eval-mode BatchNorms into per-channel scale/bias and repack weights."""

    def fold_conv_bn(conv_w, mean, var):
        # conv (no bias) followed by BN(affine=False): scale out-channels, add bias.
        cout, cin = conv_w.shape[0], conv_w.shape[1]
        inv = lax.rsqrt(var + eps)                                   # (Cout,)
        wf = conv_w * inv[:, None, None, None]                       # (Cout, Cin, 3, 3)
        # (ky, kx, cin, cout) -> (9*Cin, Cout): K index = (ky*3+kx)*Cin + cin,
        # matching the kernel's tap concatenation order.
        wf = jnp.transpose(wf, (2, 3, 1, 0)).reshape(9 * cin, cout)
        return (wf.astype(jnp.bfloat16),
                (-mean * inv).reshape(1, cout).astype(jnp.float32))

    def fold_dw(dw_w, dw_b):
        c = dw_w.shape[0]
        wf = jnp.transpose(dw_w[:, 0], (1, 2, 0)).reshape(9, 1, c)   # tap-major
        return wf.astype(jnp.float32), dw_b.reshape(1, c).astype(jnp.float32)

    w1f, b1f = fold_conv_bn(params["w1"], params["m1"], params["v1"])
    dw1f, db1f = fold_dw(params["dw1"], params["db1"])
    w2f, b2f = fold_conv_bn(params["w2"], params["m2"], params["v2"])
    dw2f, db2f = fold_dw(params["dw2"], params["db2"])
    folded = [w1f, b1f, dw1f, db1f, w2f, b2f, dw2f, db2f]

    if is_shortcut:
        co = params["ws"].shape[0]
        invs = lax.rsqrt(params["sv"] + eps)
        scale = params["sg"] * invs                                  # (Co,)
        wsf = (params["ws"][:, :, 0, 0] * scale[:, None]).T.astype(jnp.bfloat16)
        bsf = (params["sb"] - params["sm"] * scale).reshape(1, co).astype(jnp.float32)
        folded += [wsf, bsf]
    return folded


def en_basic_forward_nhwc(x_nhwc, params, *, is_shortcut=True, eps=1e-5):
    """Channels-last (NHWC) forward — recommended entry point (no layout transposes)."""
    n, h, w, ci = x_nhwc.shape
    cm = params["w1"].shape[0]
    co = params["w2"].shape[0]
    if not is_shortcut:
        assert ci == co, "identity shortcut requires in_channel == out_channel"

    folded = _fold_params(params, is_shortcut=is_shortcut, eps=eps)

    def full_spec(a):
        ndim = a.ndim
        return pl.BlockSpec(a.shape, lambda i: (0,) * ndim)

    in_specs = ([pl.BlockSpec((1, h, w, ci), lambda i: (i, 0, 0, 0))]
                + [full_spec(a) for a in folded])

    hw = h * w
    flops = 2 * n * hw * (9 * ci * cm + 9 * cm * co + 9 * cm + 9 * co)
    if is_shortcut:
        flops += 2 * n * hw * ci * co
    weight_bytes = sum(int(a.size) * a.dtype.itemsize for a in folded)
    bytes_accessed = 4 * n * hw * (ci + co) + weight_bytes

    # VMEM budget: padded scratch + double-buffered in/out blocks + weights.
    scratch_bytes = 4 * (h + 2) * (w + 2) * (ci + 2 * cm + co)
    block_bytes = 2 * 4 * hw * (ci + co) + 2 * weight_bytes
    vmem_limit = int(min(128 * 1024 * 1024,
                         max(32 * 1024 * 1024, 2 * (scratch_bytes + block_bytes))))

    kernel = functools.partial(_en_basic_kernel, H=h, W=w, is_shortcut=is_shortcut)

    return pl.pallas_call(
        kernel,
        out_shape=jax.ShapeDtypeStruct((n, h, w, co), jnp.float32),
        grid=(n,),
        in_specs=in_specs,
        out_specs=pl.BlockSpec((1, h, w, co), lambda i: (i, 0, 0, 0)),
        scratch_shapes=[
            pltpu.VMEM((h + 2, w + 2, ci), jnp.float32),   # padded x (conv1 im2col)
            pltpu.VMEM((h + 2, w + 2, cm), jnp.float32),   # padded conv1 out (dw1 in)
            pltpu.VMEM((h + 2, w + 2, cm), jnp.float32),   # padded relu (conv2 im2col)
            pltpu.VMEM((h + 2, w + 2, co), jnp.float32),   # padded conv2 out (dw2 in)
        ],
        compiler_params=pltpu.CompilerParams(
            dimension_semantics=("parallel",),
            vmem_limit_bytes=vmem_limit,
        ),
        cost_estimate=pl.CostEstimate(flops=int(flops), transcendentals=0,
                                      bytes_accessed=int(bytes_accessed)),
    )(x_nhwc.astype(jnp.float32), *folded)


def en_basic_forward(x_nchw, params, *, is_shortcut=True, eps=1e-5):
    """NCHW (PyTorch-layout) compatibility shim around the channels-last kernel.

    NOTE: production callers should stay channels-last end-to-end
    (en_basic_forward_nhwc) to avoid the two layout transposes below — each is
    an extra HBM round trip of the activation.
    """
    x_nhwc = jnp.transpose(x_nchw, (0, 2, 3, 1))
    out = en_basic_forward_nhwc(x_nhwc, params, is_shortcut=is_shortcut, eps=eps)
    return jnp.transpose(out, (0, 3, 1, 2))


def en_basic_reference(x, params, *, is_shortcut=True, eps=1e-5):
    """Pure-JAX NCHW reference (eval-mode BatchNorm, f32, HIGHEST precision)."""
    P = lax.Precision.HIGHEST

    def conv(x, w, padding, groups=1):
        return lax.conv_general_dilated(
            x, w, window_strides=(1, 1),
            padding=((padding, padding), (padding, padding)),
            dimension_numbers=("NCHW", "OIHW", "NCHW"),
            feature_group_count=groups, precision=P)

    def bn(x, mean, var, gamma=None, beta=None):
        inv = lax.rsqrt(var + eps)
        y = (x - mean[None, :, None, None]) * inv[None, :, None, None]
        if gamma is not None:
            y = y * gamma[None, :, None, None] + beta[None, :, None, None]
        return y

    z = conv(x, params["w1"], 1)
    z = bn(z, params["m1"], params["v1"])
    z = conv(z, params["dw1"], 1, groups=params["dw1"].shape[0]) \
        + params["db1"][None, :, None, None]
    z = jnp.maximum(z, 0.0)

    z = conv(z, params["w2"], 1)
    z = bn(z, params["m2"], params["v2"])
    z = conv(z, params["dw2"], 1, groups=params["dw2"].shape[0]) \
        + params["db2"][None, :, None, None]

    if is_shortcut:
        s = conv(x, params["ws"], 0)
        s = bn(s, params["sm"], params["sv"], params["sg"], params["sb"])
    else:
        s = x
    return jnp.maximum(z + s, 0.0)


if __name__ == "__main__":
    key = jax.random.PRNGKey(0)

    def make_params(key, ci, cm, co):
        ks = jax.random.split(key, 15)
        return {
            "w1": 0.2 * jax.random.normal(ks[0], (cm, ci, 3, 3), jnp.float32),
            "m1": 0.1 * jax.random.normal(ks[1], (cm,), jnp.float32),
            "v1": jax.random.uniform(ks[2], (cm,), jnp.float32, 0.5, 1.5),
            "dw1": 0.2 * jax.random.normal(ks[3], (cm, 1, 3, 3), jnp.float32),
            "db1": 0.1 * jax.random.normal(ks[4], (cm,), jnp.float32),
            "w2": 0.2 * jax.random.normal(ks[5], (co, cm, 3, 3), jnp.float32),
            "m2": 0.1 * jax.random.normal(ks[6], (co,), jnp.float32),
            "v2": jax.random.uniform(ks[7], (co,), jnp.float32, 0.5, 1.5),
            "dw2": 0.2 * jax.random.normal(ks[8], (co, 1, 3, 3), jnp.float32),
            "db2": 0.1 * jax.random.normal(ks[9], (co,), jnp.float32),
            "ws": 0.2 * jax.random.normal(ks[10], (co, ci, 1, 1), jnp.float32),
            "sg": jax.random.uniform(ks[11], (co,), jnp.float32, 0.5, 1.5),
            "sb": 0.1 * jax.random.normal(ks[12], (co,), jnp.float32),
            "sm": 0.1 * jax.random.normal(ks[13], (co,), jnp.float32),
            "sv": jax.random.uniform(ks[14], (co,), jnp.float32, 0.5, 1.5),
        }

    k1, k2, k3, k4 = jax.random.split(key, 4)

    # --- test 1: projection shortcut (is_shortcut=True), Ci != Co -----------------------
    n, ci, cm, co, h, w = 2, 4, 8, 8, 16, 16
    params = make_params(k1, ci, cm, co)
    x = jax.random.normal(k2, (n, ci, h, w), jnp.float32)

    fwd = jax.jit(lambda xx, pp: en_basic_forward(xx, pp, is_shortcut=True))
    out = jax.block_until_ready(fwd(x, params))
    ref = en_basic_reference(x, params, is_shortcut=True)
    assert out.shape == ref.shape and out.dtype == ref.dtype
    err1 = float(jnp.max(jnp.abs(out - ref)))
    # bf16 MXU inputs with f32 accumulation -> looser tolerance than a pure-f32 path.
    assert err1 < 5e-2, f"is_shortcut=True max abs err {err1}"

    # --- test 2: identity shortcut (is_shortcut=False), Ci == Co ------------------------
    ci2 = co2 = 8
    params2 = make_params(k3, ci2, cm, co2)
    x2 = jax.random.normal(k4, (n, ci2, h, w), jnp.float32)

    fwd2 = jax.jit(lambda xx, pp: en_basic_forward(xx, pp, is_shortcut=False))
    out2 = jax.block_until_ready(fwd2(x2, params2))
    ref2 = en_basic_reference(x2, params2, is_shortcut=False)
    assert out2.shape == ref2.shape and out2.dtype == ref2.dtype
    err2 = float(jnp.max(jnp.abs(out2 - ref2)))
    assert err2 < 5e-2, f"is_shortcut=False max abs err {err2}"

    print("KERNEL_OK")
</pallas_src>

<mosaic_0001>
module attributes {stable_mosaic.version = 11 : i64} {
  func.func @_en_basic_kernel(%arg0: i32, %arg1: memref<1x16x16x4xf32, #tpu.memory_space<vmem>>, %arg2: memref<36x8xbf16, #tpu.memory_space<vmem>>, %arg3: memref<1x8xf32, #tpu.memory_space<vmem>>, %arg4: memref<9x1x8xf32, #tpu.memory_space<vmem>>, %arg5: memref<1x8xf32, #tpu.memory_space<vmem>>, %arg6: memref<72x8xbf16, #tpu.memory_space<vmem>>, %arg7: memref<1x8xf32, #tpu.memory_space<vmem>>, %arg8: memref<9x1x8xf32, #tpu.memory_space<vmem>>, %arg9: memref<1x8xf32, #tpu.memory_space<vmem>>, %arg10: memref<4x8xbf16, #tpu.memory_space<vmem>>, %arg11: memref<1x8xf32, #tpu.memory_space<vmem>>, %arg12: memref<1x16x16x8xf32, #tpu.memory_space<vmem>>, %arg13: memref<18x18x4xf32, #tpu.memory_space<vmem>>, %arg14: memref<18x18x8xf32, #tpu.memory_space<vmem>>, %arg15: memref<18x18x8xf32, #tpu.memory_space<vmem>>, %arg16: memref<18x18x8xf32, #tpu.memory_space<vmem>>) attributes {dimension_semantics = [#tpu.dimension_semantics<parallel>], iteration_bounds = array<i64: 2>, scalar_prefetch = 0 : i64, scratch_operands = 4 : i64, tpu.core_type = #tpu.core_type<tc>, window_params = [{transform_indices = @transform_0, window_bounds = array<i64: 1, 16, 16, 4>}, {pipeline_mode = #tpu.pipeline_mode<synchronous>, transform_indices = @transform_1, window_bounds = array<i64: 36, 8>}, {pipeline_mode = #tpu.pipeline_mode<synchronous>, transform_indices = @transform_2, window_bounds = array<i64: 1, 8>}, {pipeline_mode = #tpu.pipeline_mode<synchronous>, transform_indices = @transform_3, window_bounds = array<i64: 9, 1, 8>}, {pipeline_mode = #tpu.pipeline_mode<synchronous>, transform_indices = @transform_4, window_bounds = array<i64: 1, 8>}, {pipeline_mode = #tpu.pipeline_mode<synchronous>, transform_indices = @transform_5, window_bounds = array<i64: 72, 8>}, {pipeline_mode = #tpu.pipeline_mode<synchronous>, transform_indices = @transform_6, window_bounds = array<i64: 1, 8>}, {pipeline_mode = #tpu.pipeline_mode<synchronous>, transform_indices = @transform_7, window_bounds = array<i64: 9, 1, 8>}, {pipeline_mode = #tpu.pipeline_mode<synchronous>, transform_indices = @transform_8, window_bounds = array<i64: 1, 8>}, {pipeline_mode = #tpu.pipeline_mode<synchronous>, transform_indices = @transform_9, window_bounds = array<i64: 4, 8>}, {pipeline_mode = #tpu.pipeline_mode<synchronous>, transform_indices = @transform_10, window_bounds = array<i64: 1, 8>}, {transform_indices = @transform_11, window_bounds = array<i64: 1, 16, 16, 8>}]} {
    %cst = arith.constant 0.000000e+00 : f32
    %0 = vector.broadcast %cst : f32 to vector<1x18x4xf32>
    %cst_0 = arith.constant 0.000000e+00 : f32
    %1 = vector.broadcast %cst_0 : f32 to vector<18x1x4xf32>
    %c0 = arith.constant 0 : index
    %c0_1 = arith.constant 0 : index
    %c0_2 = arith.constant 0 : index
    %2 = vector.load %arg13[%c0, %c0_1, %c0_2] : memref<18x18x4xf32, #tpu.memory_space<vmem>>, vector<1x18x4xf32>
    tpu.vector_store %arg13[%c0, %c0_1, %c0_2], %0 {strides = array<i32>} : memref<18x18x4xf32, #tpu.memory_space<vmem>>, vector<1x18x4xf32>,
    %c17 = arith.constant 17 : index
    %c0_3 = arith.constant 0 : index
    %c0_4 = arith.constant 0 : index
    %3 = vector.load %arg13[%c17, %c0_3, %c0_4] : memref<18x18x4xf32, #tpu.memory_space<vmem>>, vector<1x18x4xf32>
    tpu.vector_store %arg13[%c17, %c0_3, %c0_4], %0 {strides = array<i32>} : memref<18x18x4xf32, #tpu.memory_space<vmem>>, vector<1x18x4xf32>,
    %c0_5 = arith.constant 0 : index
    %c0_6 = arith.constant 0 : index
    %c0_7 = arith.constant 0 : index
    %4 = vector.load %arg13[%c0_5, %c0_6, %c0_7] : memref<18x18x4xf32, #tpu.memory_space<vmem>>, vector<18x1x4xf32>
    tpu.vector_store %arg13[%c0_5, %c0_6, %c0_7], %1 {strides = array<i32>} : memref<18x18x4xf32, #tpu.memory_space<vmem>>, vector<18x1x4xf32>,
    %c0_8 = arith.constant 0 : index
    %c17_9 = arith.constant 17 : index
    %c0_10 = arith.constant 0 : index
    %5 = vector.load %arg13[%c0_8, %c17_9, %c0_10] : memref<18x18x4xf32, #tpu.memory_space<vmem>>, vector<18x1x4xf32>
    tpu.vector_store %arg13[%c0_8, %c17_9, %c0_10], %1 {strides = array<i32>} : memref<18x18x4xf32, #tpu.memory_space<vmem>>, vector<18x1x4xf32>,
    %cst_11 = arith.constant 0.000000e+00 : f32
    %6 = vector.broadcast %cst_11 : f32 to vector<1x18x8xf32>
    %cst_12 = arith.constant 0.000000e+00 : f32
    %7 = vector.broadcast %cst_12 : f32 to vector<18x1x8xf32>
    %c0_13 = arith.constant 0 : index
    %c0_14 = arith.constant 0 : index
    %c0_15 = arith.constant 0 : index
    %8 = vector.load %arg14[%c0_13, %c0_14, %c0_15] : memref<18x18x8xf32, #tpu.memory_space<vmem>>, vector<1x18x8xf32>
    tpu.vector_store %arg14[%c0_13, %c0_14, %c0_15], %6 {strides = array<i32>} : memref<18x18x8xf32, #tpu.memory_space<vmem>>, vector<1x18x8xf32>,
    %c17_16 = arith.constant 17 : index
    %c0_17 = arith.constant 0 : index
    %c0_18 = arith.constant 0 : index
    %9 = vector.load %arg14[%c17_16, %c0_17, %c0_18] : memref<18x18x8xf32, #tpu.memory_space<vmem>>, vector<1x18x8xf32>
    tpu.vector_store %arg14[%c17_16, %c0_17, %c0_18], %6 {strides = array<i32>} : memref<18x18x8xf32, #tpu.memory_space<vmem>>, vector<1x18x8xf32>,
    %c0_19 = arith.constant 0 : index
    %c0_20 = arith.constant 0 : index
    %c0_21 = arith.constant 0 : index
    %10 = vector.load %arg14[%c0_19, %c0_20, %c0_21] : memref<18x18x8xf32, #tpu.memory_space<vmem>>, vector<18x1x8xf32>
    tpu.vector_store %arg14[%c0_19, %c0_20, %c0_21], %7 {strides = array<i32>} : memref<18x18x8xf32, #tpu.memory_space<vmem>>, vector<18x1x8xf32>,
    %c0_22 = arith.constant 0 : index
    %c17_23 = arith.constant 17 : index
    %c0_24 = arith.constant 0 : index
    %11 = vector.load %arg14[%c0_22, %c17_23, %c0_24] : memref<18x18x8xf32, #tpu.memory_space<vmem>>, vector<18x1x8xf32>
    tpu.vector_store %arg14[%c0_22, %c17_23, %c0_24], %7 {strides = array<i32>} : memref<18x18x8xf32, #tpu.memory_space<vmem>>, vector<18x1x8xf32>,
    %cst_25 = arith.constant 0.000000e+00 : f32
    %12 = vector.broadcast %cst_25 : f32 to vector<1x18x8xf32>
    %cst_26 = arith.constant 0.000000e+00 : f32
    %13 = vector.broadcast %cst_26 : f32 to vector<18x1x8xf32>
    %c0_27 = arith.constant 0 : index
    %c0_28 = arith.constant 0 : index
    %c0_29 = arith.constant 0 : index
    %14 = vector.load %arg15[%c0_27, %c0_28, %c0_29] : memref<18x18x8xf32, #tpu.memory_space<vmem>>, vector<1x18x8xf32>
    tpu.vector_store %arg15[%c0_27, %c0_28, %c0_29], %12 {strides = array<i32>} : memref<18x18x8xf32, #tpu.memory_space<vmem>>, vector<1x18x8xf32>,
    %c17_30 = arith.constant 17 : index
    %c0_31 = arith.constant 0 : index
    %c0_32 = arith.constant 0 : index
    %15 = vector.load %arg15[%c17_30, %c0_31, %c0_32] : memref<18x18x8xf32, #tpu.memory_space<vmem>>, vector<1x18x8xf32>
    tpu.vector_store %arg15[%c17_30, %c0_31, %c0_32], %12 {strides = array<i32>} : memref<18x18x8xf32, #tpu.memory_space<vmem>>, vector<1x18x8xf32>,
    %c0_33 = arith.constant 0 : index
    %c0_34 = arith.constant 0 : index
    %c0_35 = arith.constant 0 : index
    %16 = vector.load %arg15[%c0_33, %c0_34, %c0_35] : memref<18x18x8xf32, #tpu.memory_space<vmem>>, vector<18x1x8xf32>
    tpu.vector_store %arg15[%c0_33, %c0_34, %c0_35], %13 {strides = array<i32>} : memref<18x18x8xf32, #tpu.memory_space<vmem>>, vector<18x1x8xf32>,
    %c0_36 = arith.constant 0 : index
    %c17_37 = arith.constant 17 : index
    %c0_38 = arith.constant 0 : index
    %17 = vector.load %arg15[%c0_36, %c17_37, %c0_38] : memref<18x18x8xf32, #tpu.memory_space<vmem>>, vector<18x1x8xf32>
    tpu.vector_store %arg15[%c0_36, %c17_37, %c0_38], %13 {strides = array<i32>} : memref<18x18x8xf32, #tpu.memory_space<vmem>>, vector<18x1x8xf32>,
    %cst_39 = arith.constant 0.000000e+00 : f32
    %18 = vector.broadcast %cst_39 : f32 to vector<1x18x8xf32>
    %cst_40 = arith.constant 0.000000e+00 : f32
    %19 = vector.broadcast %cst_40 : f32 to vector<18x1x8xf32>
    %c0_41 = arith.constant 0 : index
    %c0_42 = arith.constant 0 : index
    %c0_43 = arith.constant 0 : index
    %20 = vector.load %arg16[%c0_41, %c0_42, %c0_43] : memref<18x18x8xf32, #tpu.memory_space<vmem>>, vector<1x18x8xf32>
    tpu.vector_store %arg16[%c0_41, %c0_42, %c0_43], %18 {strides = array<i32>} : memref<18x18x8xf32, #tpu.memory_space<vmem>>, vector<1x18x8xf32>,
    %c17_44 = arith.constant 17 : index
    %c0_45 = arith.constant 0 : index
    %c0_46 = arith.constant 0 : index
    %21 = vector.load %arg16[%c17_44, %c0_45, %c0_46] : memref<18x18x8xf32, #tpu.memory_space<vmem>>, vector<1x18x8xf32>
    tpu.vector_store %arg16[%c17_44, %c0_45, %c0_46], %18 {strides = array<i32>} : memref<18x18x8xf32, #tpu.memory_space<vmem>>, vector<1x18x8xf32>,
    %c0_47 = arith.constant 0 : index
    %c0_48 = arith.constant 0 : index
    %c0_49 = arith.constant 0 : index
    %22 = vector.load %arg16[%c0_47, %c0_48, %c0_49] : memref<18x18x8xf32, #tpu.memory_space<vmem>>, vector<18x1x8xf32>
    tpu.vector_store %arg16[%c0_47, %c0_48, %c0_49], %19 {strides = array<i32>} : memref<18x18x8xf32, #tpu.memory_space<vmem>>, vector<18x1x8xf32>,
    %c0_50 = arith.constant 0 : index
    %c17_51 = arith.constant 17 : index
    %c0_52 = arith.constant 0 : index
    %23 = vector.load %arg16[%c0_50, %c17_51, %c0_52] : memref<18x18x8xf32, #tpu.memory_space<vmem>>, vector<18x1x8xf32>
    tpu.vector_store %arg16[%c0_50, %c17_51, %c0_52], %19 {strides = array<i32>} : memref<18x18x8xf32, #tpu.memory_space<vmem>>, vector<18x1x8xf32>,
    %c0_53 = arith.constant 0 : index
    %c0_54 = arith.constant 0 : index
    %c0_55 = arith.constant 0 : index
    %c0_56 = arith.constant 0 : index
    %24 = vector.load %arg1[%c0_53, %c0_54, %c0_55, %c0_56] : memref<1x16x16x4xf32, #tpu.memory_space<vmem>>, vector<1x16x16x4xf32>
    %25 = vector.shape_cast %24 : vector<1x16x16x4xf32> to vector<16x16x4xf32>
    %c1 = arith.constant 1 : index
    %c1_57 = arith.constant 1 : index
    %c0_58 = arith.constant 0 : index
    %26 = vector.load %arg13[%c1, %c1_57, %c0_58] : memref<18x18x4xf32, #tpu.memory_space<vmem>>, vector<16x16x4xf32>
    tpu.vector_store %arg13[%c1, %c1_57, %c0_58], %25 {strides = array<i32>} : memref<18x18x4xf32, #tpu.memory_space<vmem>>, vector<16x16x4xf32>,
    %c0_59 = arith.constant 0 : index
    %c0_60 = arith.constant 0 : index
    %c0_61 = arith.constant 0 : index
    %27 = vector.load %arg13[%c0_59, %c0_60, %c0_61] : memref<18x18x4xf32, #tpu.memory_space<vmem>>, vector<16x16x4xf32>
    %c0_62 = arith.constant 0 : index
    %c1_63 = arith.constant 1 : index
    %c0_64 = arith.constant 0 : index
    %28 = vector.load %arg13[%c0_62, %c1_63, %c0_64] : memref<18x18x4xf32, #tpu.memory_space<vmem>>, vector<16x16x4xf32>
    %c0_65 = arith.constant 0 : index
    %c2 = arith.constant 2 : index
    %c0_66 = arith.constant 0 : index
    %29 = vector.load %arg13[%c0_65, %c2, %c0_66] : memref<18x18x4xf32, #tpu.memory_space<vmem>>, vector<16x16x4xf32>
    %c1_67 = arith.constant 1 : index
    %c0_68 = arith.constant 0 : index
    %c0_69 = arith.constant 0 : index
    %30 = vector.load %arg13[%c1_67, %c0_68, %c0_69] : memref<18x18x4xf32, #tpu.memory_space<vmem>>, vector<16x16x4xf32>
    %c1_70 = arith.constant 1 : index
    %c1_71 = arith.constant 1 : index
    %c0_72 = arith.constant 0 : index
    %31 = vector.load %arg13[%c1_70, %c1_71, %c0_72] : memref<18x18x4xf32, #tpu.memory_space<vmem>>, vector<16x16x4xf32>
    %c1_73 = arith.constant 1 : index
    %c2_74 = arith.constant 2 : index
    %c0_75 = arith.constant 0 : index
    %32 = vector.load %arg13[%c1_73, %c2_74, %c0_75] : memref<18x18x4xf32, #tpu.memory_space<vmem>>, vector<16x16x4xf32>
    %c2_76 = arith.constant 2 : index
    %c0_77 = arith.constant 0 : index
    %c0_78 = arith.constant 0 : index
    %33 = vector.load %arg13[%c2_76, %c0_77, %c0_78] : memref<18x18x4xf32, #tpu.memory_space<vmem>>, vector<16x16x4xf32>
    %c2_79 = arith.constant 2 : index
    %c1_80 = arith.constant 1 : index
    %c0_81 = arith.constant 0 : index
    %34 = vector.load %arg13[%c2_79, %c1_80, %c0_81] : memref<18x18x4xf32, #tpu.memory_space<vmem>>, vector<16x16x4xf32>
    %c2_82 = arith.constant 2 : index
    %c2_83 = arith.constant 2 : index
    %c0_84 = arith.constant 0 : index
    %35 = vector.load %arg13[%c2_82, %c2_83, %c0_84] : memref<18x18x4xf32, #tpu.memory_space<vmem>>, vector<16x16x4xf32>
    %36 = tpu.concatenate %27, %28, %29, %30, %31, %32, %33, %34, %35 in 2 : vector<16x16x4xf32>, vector<16x16x4xf32>, vector<16x16x4xf32>, vector<16x16x4xf32>, vector<16x16x4xf32>, vector<16x16x4xf32>, vector<16x16x4xf32>, vector<16x16x4xf32>, vector<16x16x4xf32> -> vector<16x16x36xf32>
    %37 = vector.shape_cast %36 : vector<16x16x36xf32> to vector<256x36xf32>
    %38 = arith.truncf %37 : vector<256x36xf32> to vector<256x36xbf16>
    %c0_85 = arith.constant 0 : index
    %c0_86 = arith.constant 0 : index
    %39 = vector.load %arg2[%c0_85, %c0_86] : memref<36x8xbf16, #tpu.memory_space<vmem>>, vector<36x8xbf16>
    %cst_87 = arith.constant dense<0.000000e+00> : vector<256x8xf32>
    %40 = tpu.matmul %38, %39, %cst_87 {dimension_numbers = #tpu.dot_dimension_numbers<[1], [0], [0], [1], [0, 0, 1, 1], [], []>} : vector<256x36xbf16>, vector<36x8xbf16>, vector<256x8xf32> -> vector<256x8xf32>
    %c0_88 = arith.constant 0 : index
    %c0_89 = arith.constant 0 : index
    %41 = vector.load %arg3[%c0_88, %c0_89] : memref<1x8xf32, #tpu.memory_space<vmem>>, vector<1x8xf32>
    %42 = vector.broadcast %41 : vector<1x8xf32> to vector<256x8xf32>
    %43 = arith.addf %40, %42 : vector<256x8xf32>
    %44 = vector.shape_cast %43 : vector<256x8xf32> to vector<16x16x8xf32>
    %c1_90 = arith.constant 1 : index
    %c1_91 = arith.constant 1 : index
    %c0_92 = arith.constant 0 : index
    %45 = vector.load %arg14[%c1_90, %c1_91, %c0_92] : memref<18x18x8xf32, #tpu.memory_space<vmem>>, vector<16x16x8xf32>
    tpu.vector_store %arg14[%c1_90, %c1_91, %c0_92], %44 {strides = array<i32>} : memref<18x18x8xf32, #tpu.memory_space<vmem>>, vector<16x16x8xf32>,
    %c0_93 = arith.constant 0 : index
    %c0_94 = arith.constant 0 : index
    %c0_95 = arith.constant 0 : index
    %46 = vector.load %arg14[%c0_93, %c0_94, %c0_95] : memref<18x18x8xf32, #tpu.memory_space<vmem>>, vector<16x16x8xf32>
    %c0_96 = arith.constant 0 : index
    %c0_97 = arith.constant 0 : index
    %c0_98 = arith.constant 0 : index
    %47 = vector.load %arg4[%c0_96, %c0_97, %c0_98] : memref<9x1x8xf32, #tpu.memory_space<vmem>>, vector<1x1x8xf32>
    %48 = vector.shape_cast %47 : vector<1x1x8xf32> to vector<1x8xf32>
    %49 = vector.shape_cast %48 : vector<1x8xf32> to vector<1x1x8xf32>
    %50 = vector.broadcast %49 : vector<1x1x8xf32> to vector<16x16x8xf32>
    %51 = arith.mulf %46, %50 : vector<16x16x8xf32>
    %c0_99 = arith.constant 0 : index
    %c1_100 = arith.constant 1 : index
    %c0_101 = arith.constant 0 : index
    %52 = vector.load %arg14[%c0_99, %c1_100, %c0_101] : memref<18x18x8xf32, #tpu.memory_space<vmem>>, vector<16x16x8xf32>
    %c1_102 = arith.constant 1 : index
    %c0_103 = arith.constant 0 : index
    %c0_104 = arith.constant 0 : index
    %53 = vector.load %arg4[%c1_102, %c0_103, %c0_104] : memref<9x1x8xf32, #tpu.memory_space<vmem>>, vector<1x1x8xf32>
    %54 = vector.shape_cast %53 : vector<1x1x8xf32> to vector<1x8xf32>
    %55 = vector.shape_cast %54 : vector<1x8xf32> to vector<1x1x8xf32>
    %56 = vector.broadcast %55 : vector<1x1x8xf32> to vector<16x16x8xf32>
    %57 = arith.mulf %52, %56 : vector<16x16x8xf32>
    %58 = arith.addf %51, %57 : vector<16x16x8xf32>
    %c0_105 = arith.constant 0 : index
    %c2_106 = arith.constant 2 : index
    %c0_107 = arith.constant 0 : index
    %59 = vector.load %arg14[%c0_105, %c2_106, %c0_107] : memref<18x18x8xf32, #tpu.memory_space<vmem>>, vector<16x16x8xf32>
    %c2_108 = arith.constant 2 : index
    %c0_109 = arith.constant 0 : index
    %c0_110 = arith.constant 0 : index
    %60 = vector.load %arg4[%c2_108, %c0_109, %c0_110] : memref<9x1x8xf32, #tpu.memory_space<vmem>>, vector<1x1x8xf32>
    %61 = vector.shape_cast %60 : vector<1x1x8xf32> to vector<1x8xf32>
    %62 = vector.shape_cast %61 : vector<1x8xf32> to vector<1x1x8xf32>
    %63 = vector.broadcast %62 : vector<1x1x8xf32> to vector<16x16x8xf32>
    %64 = arith.mulf %59, %63 : vector<16x16x8xf32>
    %65 = arith.addf %58, %64 : vector<16x16x8xf32>
    %c1_111 = arith.constant 1 : index
    %c0_112 = arith.constant 0 : index
    %c0_113 = arith.constant 0 : index
    %66 = vector.load %arg14[%c1_111, %c0_112, %c0_113] : memref<18x18x8xf32, #tpu.memory_space<vmem>>, vector<16x16x8xf32>
    %c3 = arith.constant 3 : index
    %c0_114 = arith.constant 0 : index
    %c0_115 = arith.constant 0 : index
    %67 = vector.load %arg4[%c3, %c0_114, %c0_115] : memref<9x1x8xf32, #tpu.memory_space<vmem>>, vector<1x1x8xf32>
    %68 = vector.shape_cast %67 : vector<1x1x8xf32> to vector<1x8xf32>
    %69 = vector.shape_cast %68 : vector<1x8xf32> to vector<1x1x8xf32>
    %70 = vector.broadcast %69 : vector<1x1x8xf32> to vector<16x16x8xf32>
    %71 = arith.mulf %66, %70 : vector<16x16x8xf32>
    %72 = arith.addf %65, %71 : vector<16x16x8xf32>
    %c1_116 = arith.constant 1 : index
    %c1_117 = arith.constant 1 : index
    %c0_118 = arith.constant 0 : index
    %73 = vector.load %arg14[%c1_116, %c1_117, %c0_118] : memref<18x18x8xf32, #tpu.memory_space<vmem>>, vector<16x16x8xf32>
    %c4 = arith.constant 4 : index
    %c0_119 = arith.constant 0 : index
    %c0_120 = arith.constant 0 : index
    %74 = vector.load %arg4[%c4, %c0_119, %c0_120] : memref<9x1x8xf32, #tpu.memory_space<vmem>>, vector<1x1x8xf32>
    %75 = vector.shape_cast %74 : vector<1x1x8xf32> to vector<1x8xf32>
    %76 = vector.shape_cast %75 : vector<1x8xf32> to vector<1x1x8xf32>
    %77 = vector.broadcast %76 : vector<1x1x8xf32> to vector<16x16x8xf32>
    %78 = arith.mulf %73, %77 : vector<16x16x8xf32>
    %79 = arith.addf %72, %78 : vector<16x16x8xf32>
    %c1_121 = arith.constant 1 : index
    %c2_122 = arith.constant 2 : index
    %c0_123 = arith.constant 0 : index
    %80 = vector.load %arg14[%c1_121, %c2_122, %c0_123] : memref<18x18x8xf32, #tpu.memory_space<vmem>>, vector<16x16x8xf32>
    %c5 = arith.constant 5 : index
    %c0_124 = arith.constant 0 : index
    %c0_125 = arith.constant 0 : index
    %81 = vector.load %arg4[%c5, %c0_124, %c0_125] : memref<9x1x8xf32, #tpu.memory_space<vmem>>, vector<1x1x8xf32>
    %82 = vector.shape_cast %81 : vector<1x1x8xf32> to vector<1x8xf32>
    %83 = vector.shape_cast %82 : vector<1x8xf32> to vector<1x1x8xf32>
    %84 = vector.broadcast %83 : vector<1x1x8xf32> to vector<16x16x8xf32>
    %85 = arith.mulf %80, %84 : vector<16x16x8xf32>
    %86 = arith.addf %79, %85 : vector<16x16x8xf32>
    %c2_126 = arith.constant 2 : index
    %c0_127 = arith.constant 0 : index
    %c0_128 = arith.constant 0 : index
    %87 = vector.load %arg14[%c2_126, %c0_127, %c0_128] : memref<18x18x8xf32, #tpu.memory_space<vmem>>, vector<16x16x8xf32>
    %c6 = arith.constant 6 : index
    %c0_129 = arith.constant 0 : index
    %c0_130 = arith.constant 0 : index
    %88 = vector.load %arg4[%c6, %c0_129, %c0_130] : memref<9x1x8xf32, #tpu.memory_space<vmem>>, vector<1x1x8xf32>
    %89 = vector.shape_cast %88 : vector<1x1x8xf32> to vector<1x8xf32>
    %90 = vector.shape_cast %89 : vector<1x8xf32> to vector<1x1x8xf32>
    %91 = vector.broadcast %90 : vector<1x1x8xf32> to vector<16x16x8xf32>
    %92 = arith.mulf %87, %91 : vector<16x16x8xf32>
    %93 = arith.addf %86, %92 : vector<16x16x8xf32>
    %c2_131 = arith.constant 2 : index
    %c1_132 = arith.constant 1 : index
    %c0_133 = arith.constant 0 : index
    %94 = vector.load %arg14[%c2_131, %c1_132, %c0_133] : memref<18x18x8xf32, #tpu.memory_space<vmem>>, vector<16x16x8xf32>
    %c7 = arith.constant 7 : index
    %c0_134 = arith.constant 0 : index
    %c0_135 = arith.constant 0 : index
    %95 = vector.load %arg4[%c7, %c0_134, %c0_135] : memref<9x1x8xf32, #tpu.memory_space<vmem>>, vector<1x1x8xf32>
    %96 = vector.shape_cast %95 : vector<1x1x8xf32> to vector<1x8xf32>
    %97 = vector.shape_cast %96 : vector<1x8xf32> to vector<1x1x8xf32>
    %98 = vector.broadcast %97 : vector<1x1x8xf32> to vector<16x16x8xf32>
    %99 = arith.mulf %94, %98 : vector<16x16x8xf32>
    %100 = arith.addf %93, %99 : vector<16x16x8xf32>
    %c2_136 = arith.constant 2 : index
    %c2_137 = arith.constant 2 : index
    %c0_138 = arith.constant 0 : index
    %101 = vector.load %arg14[%c2_136, %c2_137, %c0_138] : memref<18x18x8xf32, #tpu.memory_space<vmem>>, vector<16x16x8xf32>
    %c8 = arith.constant 8 : index
    %c0_139 = arith.constant 0 : index
    %c0_140 = arith.constant 0 : index
    %102 = vector.load %arg4[%c8, %c0_139, %c0_140] : memref<9x1x8xf32, #tpu.memory_space<vmem>>, vector<1x1x8xf32>
    %103 = vector.shape_cast %102 : vector<1x1x8xf32> to vector<1x8xf32>
    %104 = vector.shape_cast %103 : vector<1x8xf32> to vector<1x1x8xf32>
    %105 = vector.broadcast %104 : vector<1x1x8xf32> to vector<16x16x8xf32>
    %106 = arith.mulf %101, %105 : vector<16x16x8xf32>
    %107 = arith.addf %100, %106 : vector<16x16x8xf32>
    %c0_141 = arith.constant 0 : index
    %c0_142 = arith.constant 0 : index
    %108 = vector.load %arg5[%c0_141, %c0_142] : memref<1x8xf32, #tpu.memory_space<vmem>>, vector<1x8xf32>
    %109 = vector.shape_cast %108 : vector<1x8xf32> to vector<1x1x8xf32>
    %110 = vector.broadcast %109 : vector<1x1x8xf32> to vector<16x16x8xf32>
    %111 = arith.addf %107, %110 : vector<16x16x8xf32>
    %cst_143 = arith.constant 0.000000e+00 : f32
    %112 = vector.broadcast %cst_143 : f32 to vector<16x16x8xf32>
    %113 = arith.maximumf %111, %112 : vector<16x16x8xf32>
    %c1_144 = arith.constant 1 : index
    %c1_145 = arith.constant 1 : index
    %c0_146 = arith.constant 0 : index
    %114 = vector.load %arg15[%c1_144, %c1_145, %c0_146] : memref<18x18x8xf32, #tpu.memory_space<vmem>>, vector<16x16x8xf32>
    tpu.vector_store %arg15[%c1_144, %c1_145, %c0_146], %113 {strides = array<i32>} : memref<18x18x8xf32, #tpu.memory_space<vmem>>, vector<16x16x8xf32>,
    %c0_147 = arith.constant 0 : index
    %c0_148 = arith.constant 0 : index
    %c0_149 = arith.constant 0 : index
    %115 = vector.load %arg15[%c0_147, %c0_148, %c0_149] : memref<18x18x8xf32, #tpu.memory_space<vmem>>, vector<16x16x8xf32>
    %c0_150 = arith.constant 0 : index
    %c1_151 = arith.constant 1 : index
    %c0_152 = arith.constant 0 : index
    %116 = vector.load %arg15[%c0_150, %c1_151, %c0_152] : memref<18x18x8xf32, #tpu.memory_space<vmem>>, vector<16x16x8xf32>
    %c0_153 = arith.constant 0 : index
    %c2_154 = arith.constant 2 : index
    %c0_155 = arith.constant 0 : index
    %117 = vector.load %arg15[%c0_153, %c2_154, %c0_155] : memref<18x18x8xf32, #tpu.memory_space<vmem>>, vector<16x16x8xf32>
    %c1_156 = arith.constant 1 : index
    %c0_157 = arith.constant 0 : index
    %c0_158 = arith.constant 0 : index
    %118 = vector.load %arg15[%c1_156, %c0_157, %c0_158] : memref<18x18x8xf32, #tpu.memory_space<vmem>>, vector<16x16x8xf32>
    %c1_159 = arith.constant 1 : index
    %c1_160 = arith.constant 1 : index
    %c0_161 = arith.constant 0 : index
    %119 = vector.load %arg15[%c1_159, %c1_160, %c0_161] : memref<18x18x8xf32, #tpu.memory_space<vmem>>, vector<16x16x8xf32>
    %c1_162 = arith.constant 1 : index
    %c2_163 = arith.constant 2 : index
    %c0_164 = arith.constant 0 : index
    %120 = vector.load %arg15[%c1_162, %c2_163, %c0_164] : memref<18x18x8xf32, #tpu.memory_space<vmem>>, vector<16x16x8xf32>
    %c2_165 = arith.constant 2 : index
    %c0_166 = arith.constant 0 : index
    %c0_167 = arith.constant 0 : index
    %121 = vector.load %arg15[%c2_165, %c0_166, %c0_167] : memref<18x18x8xf32, #tpu.memory_space<vmem>>, vector<16x16x8xf32>
    %c2_168 = arith.constant 2 : index
    %c1_169 = arith.constant 1 : index
    %c0_170 = arith.constant 0 : index
    %122 = vector.load %arg15[%c2_168, %c1_169, %c0_170] : memref<18x18x8xf32, #tpu.memory_space<vmem>>, vector<16x16x8xf32>
    %c2_171 = arith.constant 2 : index
    %c2_172 = arith.constant 2 : index
    %c0_173 = arith.constant 0 : index
    %123 = vector.load %arg15[%c2_171, %c2_172, %c0_173] : memref<18x18x8xf32, #tpu.memory_space<vmem>>, vector<16x16x8xf32>
    %124 = tpu.concatenate %115, %116, %117, %118, %119, %120, %121, %122, %123 in 2 : vector<16x16x8xf32>, vector<16x16x8xf32>, vector<16x16x8xf32>, vector<16x16x8xf32>, vector<16x16x8xf32>, vector<16x16x8xf32>, vector<16x16x8xf32>, vector<16x16x8xf32>, vector<16x16x8xf32> -> vector<16x16x72xf32>
    %125 = vector.shape_cast %124 : vector<16x16x72xf32> to vector<256x72xf32>
    %126 = arith.truncf %125 : vector<256x72xf32> to vector<256x72xbf16>
    %c0_174 = arith.constant 0 : index
    %c0_175 = arith.constant 0 : index
    %127 = vector.load %arg6[%c0_174, %c0_175] : memref<72x8xbf16, #tpu.memory_space<vmem>>, vector<72x8xbf16>
    %cst_176 = arith.constant dense<0.000000e+00> : vector<256x8xf32>
    %128 = tpu.matmul %126, %127, %cst_176 {dimension_numbers = #tpu.dot_dimension_numbers<[1], [0], [0], [1], [0, 0, 1, 1], [], []>} : vector<256x72xbf16>, vector<72x8xbf16>, vector<256x8xf32> -> vector<256x8xf32>
    %c0_177 = arith.constant 0 : index
    %c0_178 = arith.constant 0 : index
    %129 = vector.load %arg7[%c0_177, %c0_178] : memref<1x8xf32, #tpu.memory_space<vmem>>, vector<1x8xf32>
    %130 = vector.broadcast %129 : vector<1x8xf32> to vector<256x8xf32>
    %131 = arith.addf %128, %130 : vector<256x8xf32>
    %132 = vector.shape_cast %131 : vector<256x8xf32> to vector<16x16x8xf32>
    %c1_179 = arith.constant 1 : index
    %c1_180 = arith.constant 1 : index
    %c0_181 = arith.constant 0 : index
    %133 = vector.load %arg16[%c1_179, %c1_180, %c0_181] : memref<18x18x8xf32, #tpu.memory_space<vmem>>, vector<16x16x8xf32>
    tpu.vector_store %arg16[%c1_179, %c1_180, %c0_181], %132 {strides = array<i32>} : memref<18x18x8xf32, #tpu.memory_space<vmem>>, vector<16x16x8xf32>,
    %c0_182 = arith.constant 0 : index
    %c0_183 = arith.constant 0 : index
    %c0_184 = arith.constant 0 : index
    %134 = vector.load %arg16[%c0_182, %c0_183, %c0_184] : memref<18x18x8xf32, #tpu.memory_space<vmem>>, vector<16x16x8xf32>
    %c0_185 = arith.constant 0 : index
    %c0_186 = arith.constant 0 : index
    %c0_187 = arith.constant 0 : index
    %135 = vector.load %arg8[%c0_185, %c0_186, %c0_187] : memref<9x1x8xf32, #tpu.memory_space<vmem>>, vector<1x1x8xf32>
    %136 = vector.shape_cast %135 : vector<1x1x8xf32> to vector<1x8xf32>
    %137 = vector.shape_cast %136 : vector<1x8xf32> to vector<1x1x8xf32>
    %138 = vector.broadcast %137 : vector<1x1x8xf32> to vector<16x16x8xf32>
    %139 = arith.mulf %134, %138 : vector<16x16x8xf32>
    %c0_188 = arith.constant 0 : index
    %c1_189 = arith.constant 1 : index
    %c0_190 = arith.constant 0 : index
    %140 = vector.load %arg16[%c0_188, %c1_189, %c0_190] : memref<18x18x8xf32, #tpu.memory_space<vmem>>, vector<16x16x8xf32>
    %c1_191 = arith.constant 1 : index
    %c0_192 = arith.constant 0 : index
    %c0_193 = arith.constant 0 : index
    %141 = vector.load %arg8[%c1_191, %c0_192, %c0_193] : memref<9x1x8xf32, #tpu.memory_space<vmem>>, vector<1x1x8xf32>
    %142 = vector.shape_cast %141 : vector<1x1x8xf32> to vector<1x8xf32>
    %143 = vector.shape_cast %142 : vector<1x8xf32> to vector<1x1x8xf32>
    %144 = vector.broadcast %143 : vector<1x1x8xf32> to vector<16x16x8xf32>
    %145 = arith.mulf %140, %144 : vector<16x16x8xf32>
    %146 = arith.addf %139, %145 : vector<16x16x8xf32>
    %c0_194 = arith.constant 0 : index
    %c2_195 = arith.constant 2 : index
    %c0_196 = arith.constant 0 : index
    %147 = vector.load %arg16[%c0_194, %c2_195, %c0_196] : memref<18x18x8xf32, #tpu.memory_space<vmem>>, vector<16x16x8xf32>
    %c2_197 = arith.constant 2 : index
    %c0_198 = arith.constant 0 : index
    %c0_199 = arith.constant 0 : index
    %148 = vector.load %arg8[%c2_197, %c0_198, %c0_199] : memref<9x1x8xf32, #tpu.memory_space<vmem>>, vector<1x1x8xf32>
    %149 = vector.shape_cast %148 : vector<1x1x8xf32> to vector<1x8xf32>
    %150 = vector.shape_cast %149 : vector<1x8xf32> to vector<1x1x8xf32>
    %151 = vector.broadcast %150 : vector<1x1x8xf32> to vector<16x16x8xf32>
    %152 = arith.mulf %147, %151 : vector<16x16x8xf32>
    %153 = arith.addf %146, %152 : vector<16x16x8xf32>
    %c1_200 = arith.constant 1 : index
    %c0_201 = arith.constant 0 : index
    %c0_202 = arith.constant 0 : index
    %154 = vector.load %arg16[%c1_200, %c0_201, %c0_202] : memref<18x18x8xf32, #tpu.memory_space<vmem>>, vector<16x16x8xf32>
    %c3_203 = arith.constant 3 : index
    %c0_204 = arith.constant 0 : index
    %c0_205 = arith.constant 0 : index
    %155 = vector.load %arg8[%c3_203, %c0_204, %c0_205] : memref<9x1x8xf32, #tpu.memory_space<vmem>>, vector<1x1x8xf32>
    %156 = vector.shape_cast %155 : vector<1x1x8xf32> to vector<1x8xf32>
    %157 = vector.shape_cast %156 : vector<1x8xf32> to vector<1x1x8xf32>
    %158 = vector.broadcast %157 : vector<1x1x8xf32> to vector<16x16x8xf32>
    %159 = arith.mulf %154, %158 : vector<16x16x8xf32>
    %160 = arith.addf %153, %159 : vector<16x16x8xf32>
    %c1_206 = arith.constant 1 : index
    %c1_207 = arith.constant 1 : index
    %c0_208 = arith.constant 0 : index
    %161 = vector.load %arg16[%c1_206, %c1_207, %c0_208] : memref<18x18x8xf32, #tpu.memory_space<vmem>>, vector<16x16x8xf32>
    %c4_209 = arith.constant 4 : index
    %c0_210 = arith.constant 0 : index
    %c0_211 = arith.constant 0 : index
    %162 = vector.load %arg8[%c4_209, %c0_210, %c0_211] : memref<9x1x8xf32, #tpu.memory_space<vmem>>, vector<1x1x8xf32>
    %163 = vector.shape_cast %162 : vector<1x1x8xf32> to vector<1x8xf32>
    %164 = vector.shape_cast %163 : vector<1x8xf32> to vector<1x1x8xf32>
    %165 = vector.broadcast %164 : vector<1x1x8xf32> to vector<16x16x8xf32>
    %166 = arith.mulf %161, %165 : vector<16x16x8xf32>
    %167 = arith.addf %160, %166 : vector<16x16x8xf32>
    %c1_212 = arith.constant 1 : index
    %c2_213 = arith.constant 2 : index
    %c0_214 = arith.constant 0 : index
    %168 = vector.load %arg16[%c1_212, %c2_213, %c0_214] : memref<18x18x8xf32, #tpu.memory_space<vmem>>, vector<16x16x8xf32>
    %c5_215 = arith.constant 5 : index
    %c0_216 = arith.constant 0 : index
    %c0_217 = arith.constant 0 : index
    %169 = vector.load %arg8[%c5_215, %c0_216, %c0_217] : memref<9x1x8xf32, #tpu.memory_space<vmem>>, vector<1x1x8xf32>
    %170 = vector.shape_cast %169 : vector<1x1x8xf32> to vector<1x8xf32>
    %171 = vector.shape_cast %170 : vector<1x8xf32> to vector<1x1x8xf32>
    %172 = vector.broadcast %171 : vector<1x1x8xf32> to vector<16x16x8xf32>
    %173 = arith.mulf %168, %172 : vector<16x16x8xf32>
    %174 = arith.addf %167, %173 : vector<16x16x8xf32>
    %c2_218 = arith.constant 2 : index
    %c0_219 = arith.constant 0 : index
    %c0_220 = arith.constant 0 : index
    %175 = vector.load %arg16[%c2_218, %c0_219, %c0_220] : memref<18x18x8xf32, #tpu.memory_space<vmem>>, vector<16x16x8xf32>
    %c6_221 = arith.constant 6 : index
    %c0_222 = arith.constant 0 : index
    %c0_223 = arith.constant 0 : index
    %176 = vector.load %arg8[%c6_221, %c0_222, %c0_223] : memref<9x1x8xf32, #tpu.memory_space<vmem>>, vector<1x1x8xf32>
    %177 = vector.shape_cast %176 : vector<1x1x8xf32> to vector<1x8xf32>
    %178 = vector.shape_cast %177 : vector<1x8xf32> to vector<1x1x8xf32>
    %179 = vector.broadcast %178 : vector<1x1x8xf32> to vector<16x16x8xf32>
    %180 = arith.mulf %175, %179 : vector<16x16x8xf32>
    %181 = arith.addf %174, %180 : vector<16x16x8xf32>
    %c2_224 = arith.constant 2 : index
    %c1_225 = arith.constant 1 : index
    %c0_226 = arith.constant 0 : index
    %182 = vector.load %arg16[%c2_224, %c1_225, %c0_226] : memref<18x18x8xf32, #tpu.memory_space<vmem>>, vector<16x16x8xf32>
    %c7_227 = arith.constant 7 : index
    %c0_228 = arith.constant 0 : index
    %c0_229 = arith.constant 0 : index
    %183 = vector.load %arg8[%c7_227, %c0_228, %c0_229] : memref<9x1x8xf32, #tpu.memory_space<vmem>>, vector<1x1x8xf32>
    %184 = vector.shape_cast %183 : vector<1x1x8xf32> to vector<1x8xf32>
    %185 = vector.shape_cast %184 : vector<1x8xf32> to vector<1x1x8xf32>
    %186 = vector.broadcast %185 : vector<1x1x8xf32> to vector<16x16x8xf32>
    %187 = arith.mulf %182, %186 : vector<16x16x8xf32>
    %188 = arith.addf %181, %187 : vector<16x16x8xf32>
    %c2_230 = arith.constant 2 : index
    %c2_231 = arith.constant 2 : index
    %c0_232 = arith.constant 0 : index
    %189 = vector.load %arg16[%c2_230, %c2_231, %c0_232] : memref<18x18x8xf32, #tpu.memory_space<vmem>>, vector<16x16x8xf32>
    %c8_233 = arith.constant 8 : index
    %c0_234 = arith.constant 0 : index
    %c0_235 = arith.constant 0 : index
    %190 = vector.load %arg8[%c8_233, %c0_234, %c0_235] : memref<9x1x8xf32, #tpu.memory_space<vmem>>, vector<1x1x8xf32>
    %191 = vector.shape_cast %190 : vector<1x1x8xf32> to vector<1x8xf32>
    %192 = vector.shape_cast %191 : vector<1x8xf32> to vector<1x1x8xf32>
    %193 = vector.broadcast %192 : vector<1x1x8xf32> to vector<16x16x8xf32>
    %194 = arith.mulf %189, %193 : vector<16x16x8xf32>
    %195 = arith.addf %188, %194 : vector<16x16x8xf32>
    %c0_236 = arith.constant 0 : index
    %c0_237 = arith.constant 0 : index
    %196 = vector.load %arg9[%c0_236, %c0_237] : memref<1x8xf32, #tpu.memory_space<vmem>>, vector<1x8xf32>
    %197 = vector.shape_cast %196 : vector<1x8xf32> to vector<1x1x8xf32>
    %198 = vector.broadcast %197 : vector<1x1x8xf32> to vector<16x16x8xf32>
    %199 = arith.addf %195, %198 : vector<16x16x8xf32>
    %200 = vector.shape_cast %25 : vector<16x16x4xf32> to vector<256x4xf32>
    %201 = arith.truncf %200 : vector<256x4xf32> to vector<256x4xbf16>
    %c0_238 = arith.constant 0 : index
    %c0_239 = arith.constant 0 : index
    %202 = vector.load %arg10[%c0_238, %c0_239] : memref<4x8xbf16, #tpu.memory_space<vmem>>, vector<4x8xbf16>
    %cst_240 = arith.constant dense<0.000000e+00> : vector<256x8xf32>
    %203 = tpu.matmul %201, %202, %cst_240 {dimension_numbers = #tpu.dot_dimension_numbers<[1], [0], [0], [1], [0, 0, 1, 1], [], []>} : vector<256x4xbf16>, vector<4x8xbf16>, vector<256x8xf32> -> vector<256x8xf32>
    %c0_241 = arith.constant 0 : index
    %c0_242 = arith.constant 0 : index
    %204 = vector.load %arg11[%c0_241, %c0_242] : memref<1x8xf32, #tpu.memory_space<vmem>>, vector<1x8xf32>
    %205 = vector.broadcast %204 : vector<1x8xf32> to vector<256x8xf32>
    %206 = arith.addf %203, %205 : vector<256x8xf32>
    %207 = vector.shape_cast %206 : vector<256x8xf32> to vector<16x16x8xf32>
    %208 = arith.addf %199, %207 : vector<16x16x8xf32>
    %cst_243 = arith.constant 0.000000e+00 : f32
    %209 = vector.broadcast %cst_243 : f32 to vector<16x16x8xf32>
    %210 = arith.maximumf %208, %209 : vector<16x16x8xf32>
    %c0_244 = arith.constant 0 : index
    %c0_245 = arith.constant 0 : index
    %c0_246 = arith.constant 0 : index
    %c0_247 = arith.constant 0 : index
    %211 = vector.load %arg12[%c0_244, %c0_245, %c0_246, %c0_247] : memref<1x16x16x8xf32, #tpu.memory_space<vmem>>, vector<1x16x16x8xf32>
    %212 = vector.shape_cast %211 : vector<1x16x16x8xf32> to vector<16x16x8xf32>
    %213 = vector.shape_cast %210 : vector<16x16x8xf32> to vector<1x16x16x8xf32>
    tpu.vector_store %arg12[%c0_244, %c0_245, %c0_246, %c0_247], %213 {strides = array<i32>} : memref<1x16x16x8xf32, #tpu.memory_space<vmem>>, vector<1x16x16x8xf32>,
    return
  }
  func.func @transform_0(%arg0: i32) -> (i32, i32, i32, i32) {
    %c0_i32 = arith.constant 0 : i32
    %c0_i32_0 = arith.constant 0 : i32
    %c0_i32_1 = arith.constant 0 : i32
    %c0_i32_2 = arith.constant 0 : i32
    return %arg0, %c0_i32, %c0_i32_0, %c0_i32_1 : i32, i32, i32, i32
  }
  func.func @transform_1(%arg0: i32) -> (i32, i32) {
    %c0_i32 = arith.constant 0 : i32
    %c0_i32_0 = arith.constant 0 : i32
    %c0_i32_1 = arith.constant 0 : i32
    return %c0_i32, %c0_i32_0 : i32, i32
  }
  func.func @transform_2(%arg0: i32) -> (i32, i32) {
    %c0_i32 = arith.constant 0 : i32
    %c0_i32_0 = arith.constant 0 : i32
    %c0_i32_1 = arith.constant 0 : i32
    return %c0_i32, %c0_i32_0 : i32, i32
  }
  func.func @transform_3(%arg0: i32) -> (i32, i32, i32) {
    %c0_i32 = arith.constant 0 : i32
    %c0_i32_0 = arith.constant 0 : i32
    %c0_i32_1 = arith.constant 0 : i32
    %c0_i32_2 = arith.constant 0 : i32
    return %c0_i32, %c0_i32_0, %c0_i32_1 : i32, i32, i32
  }
  func.func @transform_4(%arg0: i32) -> (i32, i32) {
    %c0_i32 = arith.constant 0 : i32
    %c0_i32_0 = arith.constant 0 : i32
    %c0_i32_1 = arith.constant 0 : i32
    return %c0_i32, %c0_i32_0 : i32, i32
  }
  func.func @transform_5(%arg0: i32) -> (i32, i32) {
    %c0_i32 = arith.constant 0 : i32
    %c0_i32_0 = arith.constant 0 : i32
    %c0_i32_1 = arith.constant 0 : i32
    return %c0_i32, %c0_i32_0 : i32, i32
  }
  func.func @transform_6(%arg0: i32) -> (i32, i32) {
    %c0_i32 = arith.constant 0 : i32
    %c0_i32_0 = arith.constant 0 : i32
    %c0_i32_1 = arith.constant 0 : i32
    return %c0_i32, %c0_i32_0 : i32, i32
  }
  func.func @transform_7(%arg0: i32) -> (i32, i32, i32) {
    %c0_i32 = arith.constant 0 : i32
    %c0_i32_0 = arith.constant 0 : i32
    %c0_i32_1 = arith.constant 0 : i32
    %c0_i32_2 = arith.constant 0 : i32
    return %c0_i32, %c0_i32_0, %c0_i32_1 : i32, i32, i32
  }
  func.func @transform_8(%arg0: i32) -> (i32, i32) {
    %c0_i32 = arith.constant 0 : i32
    %c0_i32_0 = arith.constant 0 : i32
    %c0_i32_1 = arith.constant 0 : i32
    return %c0_i32, %c0_i32_0 : i32, i32
  }
  func.func @transform_9(%arg0: i32) -> (i32, i32) {
    %c0_i32 = arith.constant 0 : i32
    %c0_i32_0 = arith.constant 0 : i32
    %c0_i32_1 = arith.constant 0 : i32
    return %c0_i32, %c0_i32_0 : i32, i32
  }
  func.func @transform_10(%arg0: i32) -> (i32, i32) {
    %c0_i32 = arith.constant 0 : i32
    %c0_i32_0 = arith.constant 0 : i32
    %c0_i32_1 = arith.constant 0 : i32
    return %c0_i32, %c0_i32_0 : i32, i32
  }
  func.func @transform_11(%arg0: i32) -> (i32, i32, i32, i32) {
    %c0_i32 = arith.constant 0 : i32
    %c0_i32_0 = arith.constant 0 : i32
    %c0_i32_1 = arith.constant 0 : i32
    %c0_i32_2 = arith.constant 0 : i32
    return %arg0, %c0_i32, %c0_i32_0, %c0_i32_1 : i32, i32, i32, i32
  }
}

</mosaic_0001>

<bundles_post_ra>
// kernel: _lambda_.1
= control target key start
LH: loop header
LB: loop body
LE: loop exit
PB: predicated region body
PF: predicated region fallthrough
CT: control target
= control target key end

     0   :  { %s8418_s17 = smov 0   ;;  %s12904_s0 = inlined_call_operand.vmem [shape: f32[2,16,16,4], index: 0, kind: input, shape index: {}]   ;;  %s12905_s1 = inlined_call_operand.vmem [shape: bf16[36,8], index: 1, kind: input, shape index: {}]   ;;  %s12906_s2 = inlined_call_operand.vmem [shape: f32[1,8], index: 2, kind: input, shape index: {}]   ;;  %s12907_s3 = inlined_call_operand.vmem [shape: f32[9,1,8], index: 3, kind: input, shape index: {}]   ;;  %s12908_s4 = inlined_call_operand.vmem [shape: f32[1,8], index: 4, kind: input, shape index: {}]   ;;  %s12909_s5 = inlined_call_operand.vmem [shape: bf16[72,8], index: 5, kind: input, shape index: {}]   ;;  %s12910_s6 = inlined_call_operand.vmem [shape: f32[1,8], index: 6, kind: input, shape index: {}]   ;;  %s12911_s7 = inlined_call_operand.vmem [shape: f32[9,1,8], index: 7, kind: input, shape index: {}]   ;;  %s12912_s8 = inlined_call_operand.vmem [shape: f32[1,8], index: 8, kind: input, shape index: {}]   ;;  %s12913_s9 = inlined_call_operand.vmem [shape: bf16[4,8], index: 9, kind: input, shape index: {}]   ;;  %s12914_s10 = inlined_call_operand.vmem [shape: f32[1,8], index: 10, kind: input, shape index: {}]   ;;  %s12915_s11 = inlined_call_operand.vmem [shape: f32[2,16,16,8], index: 11, kind: output, shape index: {}]  }
   0x1 LB: > { %s6713_s18 = sadd.s32 4294967295, %s8343_s17   ;;  %p6717_p0 = scmp.ge.s32.totalorder %s8343_s17, 1  ;;  %s8343_s17 = sphi %s8418_s17, %s21_s17  }
   0x2   : > { %p337_p1 = scmp.lt.s32.totalorder %s8343_s17, 3 }
   0x4   : > { %p338_p2 = pnand %p6717_p0, %p337_p1 }
   0x6   : > { %341 = sbr.rel (%p338_p2) target bundleno = 1356 (0x54c), region = 64 }
   0xd   : > { %vm388_vm0 = vcmask 31744   ;;  %vm391_vm1 = vcmask 25600   ;;  %vm397_vm2 = vcmask 24576   ;;  %p8428_p3 = scmp.lt.s32.totalorder %s6713_s18, 1  ;;  %v12916_v0 = vmov 0.0   ;;  %s8346_s24 = smov 4  }
   0xe   : > { %389 = vst.msk [vmem:[#allocation2] sm:$0xff] %vm388_vm0, %v12916_v0  ;;  %390 = vst.msk [vmem:[#allocation2 + $0x8] sm:$0xff] %vm388_vm0, %v12916_v0  ;;  %vm434_vm3 = vcmask 64512   ;;  %s8347_s25 = smov 8   ;;  %s8348_s26 = smov 12   ;;  %vm2298_vm4 = vcmask 1041408  }
   0xf   : > { %392 = vst.msk [vmem:[#allocation2 + $0x10] sm:$0x3] %vm391_vm1, %v12916_v0  ;;  %396 = vst.msk [vmem:[#allocation2 + $0x1a8] sm:$0x3] %vm391_vm1, %v12916_v0  ;;  %s13253_s18 = smov (!%p8428_p3, %s6713_s18), 1  ;;  %s8349_s27 = smov 16  }
  0x10   : > { %394 = vst.msk [vmem:[#allocation2 + $0x198] sm:$0xff] %vm388_vm0, %v12916_v0  ;;  %395 = vst.msk [vmem:[#allocation2 + $0x1a0] sm:$0xff] %vm388_vm0, %v12916_v0  ;;  %s6819_s20 = sshll.u32 %s13253_s18, 8  ;;  %s8350_s28 = smov 20   ;;  %vm443_vm5 = vcmask 57344   ;;  %vm2008_vm6 = vcmask 97280  }
  0x11   : > { %399 = vst.msk [vmem:[#allocation2 + $0x18] sm:$0x1] %vm397_vm2, %v12916_v0  ;;  %400 = vst.msk [vmem:[#allocation2 + $0x30] sm:$0x1] %vm397_vm2, %v12916_v0  ;;  %s8526_s23 = scalar_lea.vmem %s12904_s0, %s6819_s20  ;;  %s8351_s14 = smov 24   ;;  %vm2041_vm7 = vcmask 130048  }
  0x12   : > { %401 = vst.msk [vmem:[#allocation2 + $0x48] sm:$0x1] %vm397_vm2, %v12916_v0  ;;  %402 = vst.msk [vmem:[#allocation2 + $0x60] sm:$0x1] %vm397_vm2, %v12916_v0  ;;  %v8529_v1 = vld [vmem:[%s8526_s23 + $0x10] sm:$0xff]  ;;  %v8532_v2 = vld [vmem:[%s8526_s23 + $0x18] sm:$0xff] }
  0x13   : > { %403 = vst.msk [vmem:[#allocation2 + $0x78] sm:$0x1] %vm397_vm2, %v12916_v0  ;;  %404 = vst.msk [vmem:[#allocation2 + $0x90] sm:$0x1] %vm397_vm2, %v12916_v0  ;;  %v8535_v3 = vld [vmem:[%s8526_s23] sm:$0xff]  ;;  %v8542_v4 = vld [vmem:[%s8526_s23 + $0x8] sm:$0xff] }
  0x14   : > { %405 = vst.msk [vmem:[#allocation2 + $0xa8] sm:$0x1] %vm397_vm2, %v12916_v0  ;;  %406 = vst.msk [vmem:[#allocation2 + $0xc0] sm:$0x1] %vm397_vm2, %v12916_v0  ;;  %v8547_v5 = vld [vmem:[%s8526_s23 + $0x20] sm:$0xff]  ;;  %v8550_v6 = vld [vmem:[%s8526_s23 + $0x28] sm:$0xff] }
  0x15   : > { %407 = vst.msk [vmem:[#allocation2 + $0xd8] sm:$0x1] %vm397_vm2, %v12916_v0  ;;  %408 = vst.msk [vmem:[#allocation2 + $0xf0] sm:$0x1] %vm397_vm2, %v12916_v0  ;;  %v663_v7 = vld [vmem:[#allocation2 + $0x1] sm:$0xff]  ;;  %v8559_v9 = vld [vmem:[%s8526_s23 + $0x30] sm:$0xff] }
  0x16   : > { %409 = vst.msk [vmem:[#allocation2 + $0x108] sm:$0x1] %vm397_vm2, %v12916_v0  ;;  %410 = vst.msk [vmem:[#allocation2 + $0x120] sm:$0x1] %vm397_vm2, %v12916_v0  ;;  %v664_v8 = vld [vmem:[#allocation2 + $0x9] sm:$0xff]  ;;  %v8562_v11 = vld [vmem:[%s8526_s23 + $0x38] sm:$0xff] }
  0x17   : > { %411 = vst.msk [vmem:[#allocation2 + $0x138] sm:$0x1] %vm397_vm2, %v12916_v0  ;;  %412 = vst.msk [vmem:[#allocation2 + $0x150] sm:$0x1] %vm397_vm2, %v12916_v0  ;;  %v7023_v10 = vpack.i.bf16 %v664_v8, %v663_v7  ;;  %v8567_v12 = vld [vmem:[%s8526_s23 + $0x40] sm:$0xff]  ;;  %v8570_v13 = vld [vmem:[%s8526_s23 + $0x48] sm:$0xff] }
  0x18   : > { %413 = vst.msk [vmem:[#allocation2 + $0x168] sm:$0x1] %vm397_vm2, %v12916_v0  ;;  %414 = vst.msk [vmem:[#allocation2 + $0x180] sm:$0x1] %vm397_vm2, %v12916_v0  ;;  %v8579_v14 = vld [vmem:[%s8526_s23 + $0x50] sm:$0xff]  ;;  %v8582_v15 = vld [vmem:[%s8526_s23 + $0x58] sm:$0xff] }
  0x19   : > { %417 = vst.msk [vmem:[#allocation2 + $0x29] sm:$0x1] %vm397_vm2, %v12916_v0  ;;  %418 = vst.msk [vmem:[#allocation2 + $0x41] sm:$0x1] %vm397_vm2, %v12916_v0  ;;  %v8585_v16 = vld [vmem:[%s8526_s23 + $0x60] sm:$0xff]  ;;  %7024 = vrot.lane.b32.xlu0 %v7023_v10, %s8346_s24  ;;  %v8593_v17 = vld [vmem:[%s8526_s23 + $0x68] sm:$0xff] }
  0x1a   : > { %419 = vst.msk [vmem:[#allocation2 + $0x59] sm:$0x1] %vm397_vm2, %v12916_v0  ;;  %420 = vst.msk [vmem:[#allocation2 + $0x71] sm:$0x1] %vm397_vm2, %v12916_v0  ;;  %v8598_v18 = vld [vmem:[%s8526_s23 + $0x70] sm:$0xff]  ;;  %v8601_v19 = vld [vmem:[%s8526_s23 + $0x78] sm:$0xff] }
  0x1b   : > { %421 = vst.msk [vmem:[#allocation2 + $0x89] sm:$0x1] %vm397_vm2, %v12916_v0  ;;  %422 = vst.msk [vmem:[#allocation2 + $0xa1] sm:$0x1] %vm397_vm2, %v12916_v0  ;;  %v8610_v20 = vld [vmem:[%s8526_s23 + $0x80] sm:$0xff]  ;;  %v8613_v21 = vld [vmem:[%s8526_s23 + $0x88] sm:$0xff] }
  0x1c   : > { %423 = vst.msk [vmem:[#allocation2 + $0xb9] sm:$0x1] %vm397_vm2, %v12916_v0  ;;  %424 = vst.msk [vmem:[#allocation2 + $0xd1] sm:$0x1] %vm397_vm2, %v12916_v0  ;;  %v8616_v22 = vld [vmem:[%s8526_s23 + $0x90] sm:$0xff]  ;;  %v8623_v23 = vld [vmem:[%s8526_s23 + $0x98] sm:$0xff] }
  0x1d   : > { %425 = vst.msk [vmem:[#allocation2 + $0xe9] sm:$0x1] %vm397_vm2, %v12916_v0  ;;  %426 = vst.msk [vmem:[#allocation2 + $0x101] sm:$0x1] %vm397_vm2, %v12916_v0  ;;  %v8628_v24 = vld [vmem:[%s8526_s23 + $0xa0] sm:$0xff]  ;;  %v8631_v25 = vld [vmem:[%s8526_s23 + $0xa8] sm:$0xff] }
  0x1e   : > { %427 = vst.msk [vmem:[#allocation2 + $0x119] sm:$0x1] %vm397_vm2, %v12916_v0  ;;  %428 = vst.msk [vmem:[#allocation2 + $0x131] sm:$0x1] %vm397_vm2, %v12916_v0  ;;  %v8644_v35 = vld [vmem:[%s8526_s23 + $0xb0] sm:$0xff]  ;;  %v8647_v36 = vld [vmem:[%s8526_s23 + $0xb8] sm:$0xff] }
  0x1f   : > { %429 = vst.msk [vmem:[#allocation2 + $0x149] sm:$0x1] %vm397_vm2, %v12916_v0  ;;  %430 = vst.msk [vmem:[#allocation2 + $0x161] sm:$0x1] %vm397_vm2, %v12916_v0  ;;  %v8670_v50 = vld [vmem:[%s8526_s23 + $0xc0] sm:$0xff]  ;;  %v8673_v51 = vld [vmem:[%s8526_s23 + $0xc8] sm:$0xff] }
  0x20   : > { %431 = vst.msk [vmem:[#allocation2 + $0x179] sm:$0x1] %vm397_vm2, %v12916_v0  ;;  %432 = vst.msk [vmem:[#allocation2 + $0x191] sm:$0x1] %vm397_vm2, %v12916_v0  ;;  %v8676_v52 = vld [vmem:[%s8526_s23 + $0xd0] sm:$0xff]  ;;  %v8683_v53 = vld [vmem:[%s8526_s23 + $0xd8] sm:$0xff] }
  0x21   : > { %416 = vst.msk [vmem:[#allocation2 + $0x11] sm:$0x1] %vm397_vm2, %v12916_v0  ;;  %433 = vst.msk [vmem:[#allocation2 + $0x1a9] sm:$0x1] %vm397_vm2, %v12916_v0  ;;  %v8688_v54 = vld [vmem:[%s8526_s23 + $0xe0] sm:$0xff]  ;;  %v8691_v55 = vld [vmem:[%s8526_s23 + $0xe8] sm:$0xff] }
  0x22   : > { %398 = vst.msk [vmem:[#allocation2] sm:$0x1] %vm397_vm2, %v12916_v0  ;;  %415 = vst.msk [vmem:[#allocation2 + $0x198] sm:$0x1] %vm397_vm2, %v12916_v0  ;;  %s8352_s19 = smov 28   ;;  %s8353_s21 = smov 32  }
  0x23   : > { %13016 = vst [vmem:[#allocation6_spill] sm:$0xff] %v8529_v1  ;;  %13017 = vst [vmem:[#allocation7_spill] sm:$0xff] %v8532_v2  ;;  %vm2074_vm8 = vcmask 162816   ;;  %vm2107_vm9 = vcmask 195584   ;;  %vm2140_vm10 = vcmask 228352   ;;  %vm2173_vm11 = vcmask 261120  }
  0x24   : > { %13018 = vst [vmem:[#allocation8_spill] sm:$0xff] %v8535_v3  ;;  %601 = vst.msk [vmem:[#allocation2 + $0x31] sm:$0xff] %vm388_vm0, %v8529_v1  ;;  %vm2249_vm12 = vcmask 293888   ;;  %vm437_vm13 = vcmask 58368   ;;  %s8354_s16 = smov 40   ;;  %s8356_s30 = smov 56  }
  0x25   : > { %602 = vst.msk [vmem:[#allocation2 + $0x39] sm:$0xff] %vm388_vm0, %v8532_v2  ;;  %13019 = vst [vmem:[#allocation9_spill] sm:$0xff] %v8542_v4  ;;  %s8357_s22 = smov 64   ;;  %vm5185_vm14 = vcmask 1043456   ;;  %vm4945_vm15 = vcmask 326656   ;;  %vm4978_vm1 = vcmask 392192  }
  0x26   : > { %599 = vst.msk [vmem:[#allocation2 + $0x19] sm:$0xff] %vm388_vm0, %v8535_v3  ;;  %13020 = vst [vmem:[#allocation10_spill] sm:$0xff] %v8547_v5  ;;  %vm5011_vm2 = vcmask 457728  }
  0x27   : > { %13021 = vst [vmem:[#allocation11_spill] sm:$0xff] %v8550_v6  ;;  %600 = vst.msk [vmem:[#allocation2 + $0x21] sm:$0xff] %vm388_vm0, %v8542_v4 }
  0x28   : > { %603 = vst.msk [vmem:[#allocation2 + $0x49] sm:$0xff] %vm388_vm0, %v8547_v5  ;;  %604 = vst.msk [vmem:[#allocation2 + $0x51] sm:$0xff] %vm388_vm0, %v8550_v6 }
  0x29   : > { %13022 = vst [vmem:[#allocation12_spill] sm:$0xff] %v8559_v9  ;;  %13023 = vst [vmem:[#allocation13_spill] sm:$0xff] %v8562_v11 }
  0x2a   : > { %605 = vst.msk [vmem:[#allocation2 + $0x61] sm:$0xff] %vm388_vm0, %v8559_v9  ;;  %13024 = vst [vmem:[#allocation14_spill] sm:$0xff] %v8567_v12 }
  0x2b   : > { %13025 = vst [vmem:[#allocation15_spill] sm:$0xff] %v8570_v13  ;;  %606 = vst.msk [vmem:[#allocation2 + $0x69] sm:$0xff] %vm388_vm0, %v8562_v11  ;;  %v667_v26 = vld [vmem:[#allocation2 + $0x31] sm:$0xff] }
  0x2c   : > { %607 = vst.msk [vmem:[#allocation2 + $0x79] sm:$0xff] %vm388_vm0, %v8567_v12  ;;  %608 = vst.msk [vmem:[#allocation2 + $0x81] sm:$0xff] %vm388_vm0, %v8570_v13  ;;  %v668_v27 = vld [vmem:[#allocation2 + $0x39] sm:$0xff] }
  0x2d   : > { %13026 = vst [vmem:[#allocation16_spill] sm:$0xff] %v8579_v14  ;;  %13027 = vst [vmem:[#allocation17_spill] sm:$0xff] %v8582_v15  ;;  %v665_v28 = vld [vmem:[#allocation2 + $0x19] sm:$0xff]  ;;  %v8639_v29 = vpack.i.bf16 %v668_v27, %v667_v26 }
  0x2e   : > { %13028 = vst [vmem:[#allocation18_spill] sm:$0xff] %v8585_v16  ;;  %609 = vst.msk [vmem:[#allocation2 + $0x91] sm:$0xff] %vm388_vm0, %v8579_v14  ;;  %v666_v30 = vld [vmem:[#allocation2 + $0x21] sm:$0xff] }
  0x2f   : > { %610 = vst.msk [vmem:[#allocation2 + $0x99] sm:$0xff] %vm388_vm0, %v8582_v15  ;;  %13029 = vst [vmem:[#allocation19_spill] sm:$0xff] %v8593_v17  ;;  %v669_v31 = vld [vmem:[#allocation2 + $0x49] sm:$0xff]  ;;  %v670_v32 = vld [vmem:[#allocation2 + $0x51] sm:$0xff]  ;;  %v8641_v33 = vpack.i.bf16 %v666_v30, %v665_v28  ;;  %7034 = vrot.lane.b32.xlu1 %v8639_v29, %s8346_s24 }
  0x30   : > { %611 = vst.msk [vmem:[#allocation2 + $0xa9] sm:$0xff] %vm388_vm0, %v8585_v16  ;;  %13030 = vst [vmem:[#allocation20_spill] sm:$0xff] %v8598_v18  ;;  %v8651_v37 = vpack.i.bf16 %v670_v32, %v669_v31 }
  0x31   : > { %13031 = vst [vmem:[#allocation21_spill] sm:$0xff] %v8601_v19  ;;  %612 = vst.msk [vmem:[#allocation2 + $0xb1] sm:$0xff] %vm388_vm0, %v8593_v17  ;;  %v671_v34 = vld [vmem:[#allocation2 + $0x61] sm:$0xff]  ;;  %7029 = vrot.lane.b32.xlu0 %v8641_v33, %s8346_s24 }
  0x32   : > { %613 = vst.msk [vmem:[#allocation2 + $0xc1] sm:$0xff] %vm388_vm0, %v8598_v18  ;;  %614 = vst.msk [vmem:[#allocation2 + $0xc9] sm:$0xff] %vm388_vm0, %v8601_v19  ;;  %v672_v38 = vld [vmem:[#allocation2 + $0x69] sm:$0xff] }
  0x33   : > { %13032 = vst [vmem:[#allocation22_spill] sm:$0xff] %v8610_v20  ;;  %13033 = vst [vmem:[#allocation23_spill] sm:$0xff] %v8613_v21  ;;  %v8659_v39 = vpack.i.bf16 %v672_v38, %v671_v34  ;;  %v673_v40 = vld [vmem:[#allocation2 + $0x79] sm:$0xff]  ;;  %v674_v41 = vld [vmem:[#allocation2 + $0x81] sm:$0xff]  ;;  %7039 = vrot.lane.b32.xlu1 %v8651_v37, %s8346_s24 }
  0x34   : > { %13034 = vst [vmem:[#allocation24_spill] sm:$0xff] %v8616_v22  ;;  %615 = vst.msk [vmem:[#allocation2 + $0xd9] sm:$0xff] %vm388_vm0, %v8610_v20  ;;  %v8663_v45 = vpack.i.bf16 %v674_v41, %v673_v40 }
  0x35   : > { %616 = vst.msk [vmem:[#allocation2 + $0xe1] sm:$0xff] %vm388_vm0, %v8613_v21  ;;  %13035 = vst [vmem:[#allocation25_spill] sm:$0xff] %v8623_v23  ;;  %v675_v42 = vld [vmem:[#allocation2 + $0x91] sm:$0xff]  ;;  %7044 = vrot.lane.b32.xlu0 %v8659_v39, %s8346_s24 }
  0x36   : > { %617 = vst.msk [vmem:[#allocation2 + $0xf1] sm:$0xff] %vm388_vm0, %v8616_v22  ;;  %13036 = vst [vmem:[#allocation26_spill] sm:$0xff] %v8628_v24  ;;  %v676_v43 = vld [vmem:[#allocation2 + $0x99] sm:$0xff] }
  0x37   : > { %13037 = vst [vmem:[#allocation27_spill] sm:$0xff] %v8631_v25  ;;  %618 = vst.msk [vmem:[#allocation2 + $0xf9] sm:$0xff] %vm388_vm0, %v8623_v23  ;;  %v677_v44 = vld [vmem:[#allocation2 + $0xa9] sm:$0xff]  ;;  %v8667_v49 = vpack.i.bf16 %v676_v43, %v675_v42  ;;  %7049 = vrot.lane.b32.xlu1 %v8663_v45, %s8346_s24  ;;  %v8879_v22 = vld [vmem:[#allocation2 + $0x98] sm:$0xff] }
  0x38   : > { %619 = vst.msk [vmem:[#allocation2 + $0x109] sm:$0xff] %vm388_vm0, %v8628_v24  ;;  %620 = vst.msk [vmem:[#allocation2 + $0x111] sm:$0xff] %vm388_vm0, %v8631_v25  ;;  %v678_v46 = vld [vmem:[#allocation2 + $0xb1] sm:$0xff]  ;;  %v695_v43 = vld [vmem:[#allocation2 + $0x2] sm:$0xff] }
  0x39   : > { %13038 = vst [vmem:[#allocation28_spill] sm:$0xff] %v8644_v35  ;;  %13039 = vst [vmem:[#allocation29_spill] sm:$0xff] %v8647_v36  ;;  %v679_v47 = vld [vmem:[#allocation2 + $0xc1] sm:$0xff]  ;;  %v680_v48 = vld [vmem:[#allocation2 + $0xc9] sm:$0xff]  ;;  %v8701_v56 = vpack.i.bf16 %v678_v46, %v677_v44  ;;  %7054 = vrot.lane.b32.xlu0 %v8667_v49, %s8346_s24 }
  0x3a   : > { %621 = vst.msk [vmem:[#allocation2 + $0x121] sm:$0xff] %vm388_vm0, %v8644_v35  ;;  %622 = vst.msk [vmem:[#allocation2 + $0x129] sm:$0xff] %vm388_vm0, %v8647_v36  ;;  %v8705_v57 = vpack.i.bf16 %v680_v48, %v679_v47  ;;  %v696_v44 = vld [vmem:[#allocation2 + $0xa] sm:$0xff]  ;;  %v697_v48 = vld [vmem:[#allocation2 + $0x1a] sm:$0xff] }
  0x3b   : > { %13040 = vst [vmem:[#allocation30_spill] sm:$0xff] %v8670_v50  ;;  %13041 = vst [vmem:[#allocation31_spill] sm:$0xff] %v8673_v51  ;;  %v681_v58 = vld [vmem:[#allocation2 + $0xd9] sm:$0xff]  ;;  %7059 = vrot.lane.b32.xlu1 %v8701_v56, %s8346_s24  ;;  %v7103_v47 = vpack.i.bf16 %v696_v44, %v695_v43  ;;  %v706_v43 = vld [vmem:[#allocation2 + $0x82] sm:$0xff] }
  0x3c   : > { %13042 = vst [vmem:[#allocation32_spill] sm:$0xff] %v8676_v52  ;;  %623 = vst.msk [vmem:[#allocation2 + $0x139] sm:$0xff] %vm388_vm0, %v8670_v50  ;;  %v682_v59 = vld [vmem:[#allocation2 + $0xe1] sm:$0xff]  ;;  %v707_v44 = vld [vmem:[#allocation2 + $0x92] sm:$0xff] }
  0x3d   : > { %624 = vst.msk [vmem:[#allocation2 + $0x141] sm:$0xff] %vm388_vm0, %v8673_v51  ;;  %13043 = vst [vmem:[#allocation33_spill] sm:$0xff] %v8683_v53  ;;  %v683_v60 = vld [vmem:[#allocation2 + $0xf1] sm:$0xff]  ;;  %v8709_v62 = vpack.i.bf16 %v682_v59, %v681_v58  ;;  %7064 = vrot.lane.b32.xlu0 %v8705_v57, %s8346_s24  ;;  %v698_v58 = vld [vmem:[#allocation2 + $0x22] sm:$0xff] }
  0x3e   : > { %625 = vst.msk [vmem:[#allocation2 + $0x151] sm:$0xff] %vm388_vm0, %v8676_v52  ;;  %13044 = vst [vmem:[#allocation34_spill] sm:$0xff] %v8688_v54  ;;  %v684_v61 = vld [vmem:[#allocation2 + $0xf9] sm:$0xff]  ;;  %v8844_v51 = vld [vmem:[#allocation2 + $0x50] sm:$0xff] }
  0x3f   : > { %13045 = vst [vmem:[#allocation35_spill] sm:$0xff] %v8691_v55  ;;  %626 = vst.msk [vmem:[#allocation2 + $0x159] sm:$0xff] %vm388_vm0, %v8683_v53  ;;  %v8713_v63 = vpack.i.bf16 %v684_v61, %v683_v60  ;;  %v685_v7 = vld [vmem:[#allocation2 + $0x109] sm:$0xff]  ;;  %v686_v8 = vld [vmem:[#allocation2 + $0x111] sm:$0xff]  ;;  %7069 = vrot.lane.b32.xlu1 %v8709_v62, %s8346_s24  ;;  %v8763_v61 = vpack.i.bf16 %v698_v58, %v697_v48 }
  0x40   : > { %627 = vst.msk [vmem:[#allocation2 + $0x169] sm:$0xff] %vm388_vm0, %v8688_v54  ;;  %628 = vst.msk [vmem:[#allocation2 + $0x171] sm:$0xff] %vm388_vm0, %v8691_v55  ;;  %v8717_v27 = vpack.i.bf16 %v686_v8, %v685_v7  ;;  %v699_v59 = vld [vmem:[#allocation2 + $0x32] sm:$0xff]  ;;  %v700_v60 = vld [vmem:[#allocation2 + $0x3a] sm:$0xff] }
  0x41   : > { %v687_v10 = vld [vmem:[#allocation2 + $0x121] sm:$0xff]  ;;  %v688_v26 = vld [vmem:[#allocation2 + $0x129] sm:$0xff]  ;;  %7074 = vrot.lane.b32.xlu0 %v8713_v63, %s8346_s24  ;;  %435 = vst.msk [vmem:[#allocation3] sm:$0xff] %vm434_vm3, %v12916_v0  ;;  %436 = vst.msk [vmem:[#allocation3 + $0x8] sm:$0xff] %vm434_vm3, %v12916_v0  ;;  %v8766_v7 = vpack.i.bf16 %v700_v60, %v699_v59 }
  0x42   : > { %v8721_v28 = vpack.i.bf16 %v688_v26, %v687_v10  ;;  %440 = vst.msk [vmem:[#allocation3 + $0x198] sm:$0xff] %vm434_vm3, %v12916_v0  ;;  %441 = vst.msk [vmem:[#allocation3 + $0x1a0] sm:$0xff] %vm434_vm3, %v12916_v0  ;;  %v701_v8 = vld [vmem:[#allocation2 + $0x4a] sm:$0xff]  ;;  %v702_v10 = vld [vmem:[#allocation2 + $0x52] sm:$0xff] }
  0x43   : > { %v689_v30 = vld [vmem:[#allocation2 + $0x139] sm:$0xff]  ;;  %480 = vst.msk [vmem:[#allocation4] sm:$0xff] %vm434_vm3, %v12916_v0  ;;  %481 = vst.msk [vmem:[#allocation4 + $0x8] sm:$0xff] %vm434_vm3, %v12916_v0  ;;  %7079 = vrot.lane.b32.xlu1 %v8717_v27, %s8346_s24  ;;  %v703_v26 = vld [vmem:[#allocation2 + $0x62] sm:$0xff] }
  0x44   : > { %v690_v31 = vld [vmem:[#allocation2 + $0x141] sm:$0xff]  ;;  %484 = vst.msk [vmem:[#allocation4 + $0x198] sm:$0xff] %vm434_vm3, %v12916_v0  ;;  %485 = vst.msk [vmem:[#allocation4 + $0x1a0] sm:$0xff] %vm434_vm3, %v12916_v0  ;;  %v709_v59 = vld [vmem:[#allocation2 + $0xaa] sm:$0xff] }
  0x45   : > { %v691_v32 = vld [vmem:[#allocation2 + $0x151] sm:$0xff]  ;;  %523 = vst.msk [vmem:[#allocation5] sm:$0xff] %vm434_vm3, %v12916_v0  ;;  %524 = vst.msk [vmem:[#allocation5 + $0x8] sm:$0xff] %vm434_vm3, %v12916_v0  ;;  %v8749_v38 = vpack.i.bf16 %v690_v31, %v689_v30  ;;  %7084 = vrot.lane.b32.xlu0 %v8721_v28, %s8346_s24  ;;  %v8857_v50 = vld [vmem:[#allocation2 + $0x60] sm:$0xff] }
  0x46   : > { %v692_v34 = vld [vmem:[#allocation2 + $0x159] sm:$0xff]  ;;  %527 = vst.msk [vmem:[#allocation5 + $0x198] sm:$0xff] %vm434_vm3, %v12916_v0  ;;  %528 = vst.msk [vmem:[#allocation5 + $0x1a0] sm:$0xff] %vm434_vm3, %v12916_v0  ;;  %v704_v30 = vld [vmem:[#allocation2 + $0x6a] sm:$0xff] }
  0x47   : > { %v8753_v40 = vpack.i.bf16 %v692_v34, %v691_v32  ;;  %v693_v41 = vld [vmem:[#allocation2 + $0x169] sm:$0xff]  ;;  %v694_v42 = vld [vmem:[#allocation2 + $0x171] sm:$0xff]  ;;  %7089 = vrot.lane.b32.xlu1 %v8749_v38, %s8346_s24  ;;  %v8780_v34 = vpack.i.bf16 %v702_v10, %v701_v8  ;;  %v724_v53 = vld [vmem:[#allocation2 + $0x15a] sm:$0xff] }
  0x48   : > { %v8757_v46 = vpack.i.bf16 %v694_v42, %v693_v41  ;;  %v8769_v31 = vld [vmem:[%s8526_s23 + $0xf0] sm:$0xff]  ;;  %v8772_v32 = vld [vmem:[%s8526_s23 + $0xf8] sm:$0xff]  ;;  %v8784_v41 = vpack.i.bf16 %v704_v30, %v703_v26  ;;  %v711_v8 = vld [vmem:[#allocation2 + $0xc2] sm:$0xff]  ;;  %s12046_s23 = scalar_lea.vmem %s12915_s11, %s6819_s20 }
  0x49   : > { %7094 = vrot.lane.b32.xlu0 %v8753_v40, %s8346_s24  ;;  %13046 = vst [vmem:[#allocation36_spill] sm:$0xff] %v8769_v31  ;;  %13047 = vst [vmem:[#allocation37_spill] sm:$0xff] %v8772_v32  ;;  %v705_v42 = vld [vmem:[#allocation2 + $0x7a] sm:$0xff]  ;;  %v710_v60 = vld [vmem:[#allocation2 + $0xb2] sm:$0xff] }
  0x4a   : > { %629 = vst.msk [vmem:[#allocation2 + $0x181] sm:$0xff] %vm388_vm0, %v8769_v31  ;;  %630 = vst.msk [vmem:[#allocation2 + $0x189] sm:$0xff] %vm388_vm0, %v8772_v32  ;;  %v8788_v48 = vpack.i.bf16 %v706_v43, %v705_v42  ;;  %v712_v10 = vld [vmem:[#allocation2 + $0xca] sm:$0xff]  ;;  %v8796_v26 = vpack.i.bf16 %v710_v60, %v709_v59  ;;  %v713_v42 = vld [vmem:[#allocation2 + $0xda] sm:$0xff] }
  0x4b   : > { %7099 = vrot.lane.b32.xlu1 %v8757_v46, %s8346_s24  ;;  %v8800_v30 = vpack.i.bf16 %v712_v10, %v711_v8  ;;  %v714_v43 = vld [vmem:[#allocation2 + $0xe2] sm:$0xff]  ;;  %v715_v0 = vld [vmem:[#allocation2 + $0xf2] sm:$0xff]  ;;  %v716_v32 = vld [vmem:[#allocation2 + $0xfa] sm:$0xff] }
  0x4c   : > { %v717_v59 = vld [vmem:[#allocation2 + $0x10a] sm:$0xff]  ;;  %v718_v60 = vld [vmem:[#allocation2 + $0x112] sm:$0xff]  ;;  %v719_v31 = vld [vmem:[#allocation2 + $0x122] sm:$0xff] }
  0x4d   : > { %7104 = vrot.lane.b32.xlu0 %v7103_v47, %s8347_s25  ;;  %v708_v47 = vld [vmem:[#allocation2 + $0x9a] sm:$0xff]  ;;  %v720_v55 = vld [vmem:[#allocation2 + $0x12a] sm:$0xff]  ;;  %v8812_v8 = vpack.i.bf16 %v718_v60, %v717_v59  ;;  %v723_v54 = vld [vmem:[#allocation2 + $0x152] sm:$0xff] }
  0x4e   : > { %v8792_v58 = vpack.i.bf16 %v708_v47, %v707_v44  ;;  %v8804_v44 = vpack.i.bf16 %v714_v43, %v713_v42  ;;  %v8808_v47 = vpack.i.bf16 %v716_v32, %v715_v0  ;;  %v8816_v10 = vpack.i.bf16 %v720_v55, %v719_v31  ;;  %v721_v42 = vld [vmem:[#allocation2 + $0x13a] sm:$0xff]  ;;  %v722_v43 = vld [vmem:[#allocation2 + $0x142] sm:$0xff]  ;;  %v725_v59 = vld [vmem:[#allocation2 + $0x16a] sm:$0xff] }
  0x4f   : > { %7109 = vrot.lane.b32.xlu1 %v8763_v61, %s8347_s25  ;;  %v8820_v0 = vpack.i.bf16 %v722_v43, %v721_v42  ;;  %v8824_v32 = vpack.i.bf16 %v724_v53, %v723_v54  ;;  %v726_v60 = vld [vmem:[#allocation2 + $0x172] sm:$0xff]  ;;  %v8828_v55 = vld [vmem:[#allocation2 + $0x20] sm:$0xff]  ;;  %v8842_v54 = vld [vmem:[#allocation2 + $0x48] sm:$0xff] }
  0x50   : > { %v8826_v52 = vld [vmem:[#allocation2 + $0x18] sm:$0xff]  ;;  %v8832_v31 = vpack.i.bf16 %v726_v60, %v725_v59  ;;  %v8838_v43 = vld [vmem:[#allocation2 + $0x30] sm:$0xff]  ;;  %v8855_v60 = vpack.i.bf16 %v8844_v51, %v8842_v54  ;;  %v8859_v36 = vld [vmem:[#allocation2 + $0x68] sm:$0xff] }
  0x51   : > { %7114 = vrot.lane.b32.xlu0 %v8766_v7, %s8347_s25  ;;  %v7183_v42 = vpack.i.bf16 %v8828_v55, %v8826_v52  ;;  %v8840_v53 = vld [vmem:[#allocation2 + $0x38] sm:$0xff]  ;;  %v8863_v25 = vld [vmem:[#allocation2 + $0x80] sm:$0xff]  ;;  %v8869_v24 = vpack.i.bf16 %v8859_v36, %v8857_v50  ;;  %v8877_v23 = vld [vmem:[#allocation2 + $0x90] sm:$0xff] }
  0x52   : > { %v8850_v59 = vpack.i.bf16 %v8840_v53, %v8838_v43  ;;  %v8861_v35 = vld [vmem:[#allocation2 + $0x78] sm:$0xff]  ;;  %v8881_v21 = vld [vmem:[#allocation2 + $0xa8] sm:$0xff]  ;;  %v8883_v20 = vld [vmem:[#allocation2 + $0xb0] sm:$0xff]  ;;  %v8889_v19 = vpack.i.bf16 %v8879_v22, %v8877_v23 }
  0x53   : > { %7119 = vrot.lane.b32.xlu1 %v8780_v34, %s8347_s25  ;;  %v8895_v18 = vpack.i.bf16 %v8883_v20, %v8881_v21  ;;  %v8897_v17 = vld [vmem:[#allocation2 + $0xc0] sm:$0xff]  ;;  %v8899_v16 = vld [vmem:[#allocation2 + $0xc8] sm:$0xff]  ;;  %v8901_v15 = vld [vmem:[#allocation2 + $0xd8] sm:$0xff] }
  0x54   : > { %13048 = vst [vmem:[#allocation38_spill] sm:$0xff] %v8897_v17  ;;  %13049 = vst [vmem:[#allocation39_spill] sm:$0xff] %v8899_v16  ;;  %v8903_v14 = vld [vmem:[#allocation2 + $0xe0] sm:$0xff]  ;;  %v8909_v13 = vpack.i.bf16 %v8899_v16, %v8897_v17  ;;  %v8917_v11 = vld [vmem:[#allocation2 + $0xf0] sm:$0xff] }
  0x55   : > { %7124 = vrot.lane.b32.xlu0 %v8784_v41, %s8347_s25  ;;  %13050 = vst [vmem:[#allocation40_spill] sm:$0xff] %v8901_v15  ;;  %13051 = vst [vmem:[#allocation41_spill] sm:$0xff] %v8903_v14  ;;  %v8915_v12 = vpack.i.bf16 %v8903_v14, %v8901_v15  ;;  %v8919_v9 = vld [vmem:[#allocation2 + $0xf8] sm:$0xff]  ;;  %v8921_v6 = vld [vmem:[#allocation2 + $0x108] sm:$0xff] }
  0x56   : > { %13052 = vst [vmem:[#allocation42_spill] sm:$0xff] %v8917_v11  ;;  %13053 = vst [vmem:[#allocation43_spill] sm:$0xff] %v8919_v9  ;;  %v8923_v5 = vld [vmem:[#allocation2 + $0x110] sm:$0xff]  ;;  %v7228_v2 = vpack.i.bf16 %v8919_v9, %v8917_v11  ;;  %v8933_v4 = vld [vmem:[#allocation2 + $0x120] sm:$0xff] }
  0x57   : > { %7129 = vrot.lane.b32.xlu1 %v8788_v48, %s8347_s25  ;;  %13054 = vst [vmem:[#allocation44_spill] sm:$0xff] %v8921_v6  ;;  %13055 = vst [vmem:[#allocation45_spill] sm:$0xff] %v8923_v5  ;;  %v7233_v1 = vpack.i.bf16 %v8923_v5, %v8921_v6  ;;  %v8935_v3 = vld [vmem:[#allocation2 + $0x128] sm:$0xff]  ;;  %v8937_v15 = vld [vmem:[#allocation2 + $0x138] sm:$0xff] }
  0x58   : > { %13056 = vst [vmem:[#allocation46_spill] sm:$0xff] %v8933_v4  ;;  %13057 = vst [vmem:[#allocation47_spill] sm:$0xff] %v8937_v15  ;;  %v8939_v14 = vld [vmem:[#allocation2 + $0x140] sm:$0xff]  ;;  %v7238_v17 = vpack.i.bf16 %v8935_v3, %v8933_v4  ;;  %v8947_v9 = vld [vmem:[#allocation2 + $0x150] sm:$0xff] }
  0x59   : > { %7134 = vrot.lane.b32.xlu0 %v8792_v58, %s8347_s25  ;;  %13058 = vst [vmem:[#allocation48_spill] sm:$0xff] %v8939_v14  ;;  %v7243_v11 = vpack.i.bf16 %v8939_v14, %v8937_v15  ;;  %13059 = vst [vmem:[#allocation49_spill] sm:$0xff] %v8947_v9  ;;  %v8949_v6 = vld [vmem:[#allocation2 + $0x158] sm:$0xff]  ;;  %v8951_v5 = vld [vmem:[#allocation2 + $0x168] sm:$0xff] }
  0x5a   : > { %13060 = vst [vmem:[#allocation50_spill] sm:$0xff] %v8951_v5  ;;  %v8953_v16 = vld [vmem:[#allocation2 + $0x170] sm:$0xff]  ;;  %v757_v4 = vld [vmem:[#allocation2 + $0x180] sm:$0xff]  ;;  %v758_v15 = vld [vmem:[#allocation2 + $0x188] sm:$0xff] }
  0x5b   : > { %7139 = vrot.lane.b32.xlu1 %v8796_v26, %s8347_s25  ;;  %13061 = vst [vmem:[#allocation51_spill] sm:$0xff] %v8953_v16  ;;  %v7258_v14 = vpack.i.bf16 %v758_v15, %v757_v4  ;;  %v789_v15 = vld [vmem:[#allocation2 + $0x181] sm:$0xff] }
  0x5d   : > { %7144 = vrot.lane.b32.xlu0 %v8800_v30, %s8347_s25 }
  0x5f   : > { %7149 = vrot.lane.b32.xlu1 %v8804_v44, %s8347_s25 }
  0x61   : > { %7154 = vrot.lane.b32.xlu0 %v8808_v47, %s8347_s25 }
  0x63   : > { %7159 = vrot.lane.b32.xlu1 %v8812_v8, %s8347_s25 }
  0x65   : > { %7164 = vrot.lane.b32.xlu0 %v8816_v10, %s8347_s25 }
  0x67   : > { %7169 = vrot.lane.b32.xlu1 %v8820_v0, %s8347_s25 }
  0x69   : > { %7174 = vrot.lane.b32.xlu0 %v8824_v32, %s8347_s25 }
  0x6b   : > { %7179 = vrot.lane.b32.xlu1 %v8832_v31, %s8347_s25 }
  0x6d   : > { %7184 = vrot.lane.b32.xlu0 %v7183_v42, %s8348_s26  ;;  %v8875_v42 = vpack.i.bf16 %v8863_v25, %v8861_v35 }
  0x6f   : > { %7189 = vrot.lane.b32.xlu1 %v8850_v59, %s8348_s26 }
  0x71   : > { %7194 = vrot.lane.b32.xlu0 %v8855_v60, %s8348_s26 }
  0x73   : > { %7199 = vrot.lane.b32.xlu1 %v8869_v24, %s8348_s26 }
  0x75   : > { %7204 = vrot.lane.b32.xlu0 %v8875_v42, %s8348_s26 }
  0x77   : > { %7209 = vrot.lane.b32.xlu1 %v8889_v19, %s8348_s26 }
  0x79   : > { %7214 = vrot.lane.b32.xlu0 %v8895_v18, %s8348_s26 }
  0x7b   : > { %7219 = vrot.lane.b32.xlu1 %v8909_v13, %s8348_s26 }
  0x7d   : > { %7224 = vrot.lane.b32.xlu0 %v8915_v12, %s8348_s26 }
  0x7f   : > { %7229 = vrot.lane.b32.xlu1 %v7228_v2, %s8348_s26  ;;  %v7248_v2 = vpack.i.bf16 %v8949_v6, %v8947_v9  ;;  %v9235_v9 = vld [vmem:[#allocation2 + $0x1a0] sm:$0xff] }
  0x81   : > { %7234 = vrot.lane.b32.xlu0 %v7233_v1, %s8348_s26  ;;  %v7253_v1 = vpack.i.bf16 %v8953_v16, %v8951_v5  ;;  %v9227_v5 = vld [vmem:[#allocation2 + $0x198] sm:$0xff] }
  0x83   : > { %7239 = vrot.lane.b32.xlu1 %v7238_v17, %s8348_s26  ;;  %v790_v17 = vld [vmem:[#allocation2 + $0x189] sm:$0xff] }
  0x85   : > { %7244 = vrot.lane.b32.xlu0 %v7243_v11, %s8348_s26 }
  0x87   : > { %7249 = vrot.lane.b32.xlu1 %v7248_v2, %s8348_s26 }
  0x89   : > { %7254 = vrot.lane.b32.xlu0 %v7253_v1, %s8348_s26  ;;  %v8304_v1 = vld [vmem:[%s12905_s1 + $0x8] sm:$0xff]  }
  0x8b   : > { %7259 = vrot.lane.b32.xlu1 %v7258_v14, %s8348_s26  ;;  %v8982_v4 = vpop.permute.xlu0 %7024  ;;  %s8355_s26 = smov 48  }
  0x8d   : > { %7264 = vrot.lane.b32.xlu0 %v8641_v33, %s8349_s27 }
  0x8f   : > { %7269 = vrot.lane.b32.xlu1 %v8639_v29, %s8349_s27 }
  0x91   : > { %7274 = vrot.lane.b32.xlu0 %v8651_v37, %s8349_s27  ;;  %v7338_v37 = vpack.i.bf16 %v790_v17, %v789_v15  ;;  %v857_v15 = vld [vmem:[#allocation2 + $0x39] sm:$0xff] }
  0x93   : > { %7279 = vrot.lane.b32.xlu1 %v8659_v39, %s8349_s27 }
  0x95   : > { %7284 = vrot.lane.b32.xlu0 %v8663_v45, %s8349_s27 }
  0x97   : > { %7289 = vrot.lane.b32.xlu1 %v8667_v49, %s8349_s27 }
  0x99   : > { %7294 = vrot.lane.b32.xlu0 %v8701_v56, %s8349_s27 }
  0x9b   : > { %7299 = vrot.lane.b32.xlu1 %v8705_v57, %s8349_s27 }
  0x9d   : > { %7304 = vrot.lane.b32.xlu0 %v8709_v62, %s8349_s27 }
  0x9f   : > { %7309 = vrot.lane.b32.xlu1 %v8713_v63, %s8349_s27 }
  0xa1   : > { %7314 = vrot.lane.b32.xlu0 %v8717_v27, %s8349_s27  ;;  %v8988_v11 = vpop.permute.xlu1 %7034 }
  0xa3   : > { %v8990_v14 = vpop.permute.xlu0 %7029  ;;  %7319 = vrot.lane.b32.xlu1 %v8721_v28, %s8349_s27 }
  0xa5   : > { %7324 = vrot.lane.b32.xlu0 %v8749_v38, %s8349_s27  ;;  %v8996_v29 = vpop.permute.xlu1 %7039 }
  0xa7   : > { %v8998_v33 = vpop.permute.xlu0 %7044  ;;  %7329 = vrot.lane.b32.xlu1 %v8753_v40, %s8349_s27 }
  0xa9   : > { %7334 = vrot.lane.b32.xlu0 %v8757_v46, %s8349_s27  ;;  %v9004_v39 = vpop.permute.xlu1 %7049 }
  0xab   : > { %v9006_v45 = vpop.permute.xlu0 %7054  ;;  %7339 = vrot.lane.b32.xlu1 %v7338_v37, %s8349_s27  ;;  %v8305_v37 = vld [vmem:[%s12905_s1 + $0x10] ss:$0 sps:$4 sm:$0x33]  }
  0xad   : > { %7344 = vrot.lane.b32.xlu0 %v8763_v61, %s8350_s28  ;;  %v9011_v49 = vpop.permute.xlu1 %7059 }
  0xaf   : > { %v9013_v56 = vpop.permute.xlu0 %7064  ;;  %7349 = vrot.lane.b32.xlu1 %v8766_v7, %s8350_s28 }
  0xb1   : > { %7354 = vrot.lane.b32.xlu0 %v8780_v34, %s8350_s28  ;;  %v9019_v57 = vpop.permute.xlu1 %7069 }
  0xb3   : > { %v9021_v62 = vpop.permute.xlu0 %7074  ;;  %7359 = vrot.lane.b32.xlu1 %v8784_v41, %s8350_s28 }
  0xb5   : > { %7364 = vrot.lane.b32.xlu0 %v8788_v48, %s8350_s28  ;;  %v9027_v63 = vpop.permute.xlu1 %7079 }
  0xb7   : > { %v9029_v27 = vpop.permute.xlu0 %7084  ;;  %7369 = vrot.lane.b32.xlu1 %v8792_v58, %s8350_s28 }
  0xb9   : > { %7374 = vrot.lane.b32.xlu0 %v8796_v26, %s8350_s28  ;;  %v9035_v28 = vpop.permute.xlu1 %7089  ;;  %v821_v26 = vld [vmem:[#allocation2 + $0x182] sm:$0xff] }
  0xbb   : > { %v9037_v38 = vpop.permute.xlu0 %7094  ;;  %7379 = vrot.lane.b32.xlu1 %v8800_v30, %s8350_s28  ;;  %v822_v30 = vld [vmem:[#allocation2 + $0x18a] sm:$0xff] }
  0xbd   : > { %7384 = vrot.lane.b32.xlu0 %v8804_v44, %s8350_s28  ;;  %v9043_v40 = vpop.permute.xlu1 %7099 }
  0xbf   : > { %v9045_v46 = vpop.permute.xlu0 %7104  ;;  %7389 = vrot.lane.b32.xlu1 %v8808_v47, %s8350_s28  ;;  %v8303_v47 = vld [vmem:[%s12905_s1] sm:$0xff]  }
  0xc0   : > { %6878 = vmatprep.subr.bf16.mxu0 %v8303_v47  ;;  %6992 = vmatprep.subr.bf16.mxu1 %v8303_v47 }
  0xc1   : > { %7394 = vrot.lane.b32.xlu0 %v8812_v8, %s8350_s28  ;;  %v9051_v61 = vpop.permute.xlu1 %7109  ;;  %v9068_v8 = vpack.i.bf16 %v822_v30, %v821_v26  ;;  %6879 = vmatpush3.bf16.msra.mxu0 %v8303_v47  ;;  %v858_v26 = vld [vmem:[#allocation2 + $0x49] sm:$0xff]  ;;  %v859_v30 = vld [vmem:[#allocation2 + $0x51] sm:$0xff] }
  0xc2   : > { %6995 = vmatpush3.bf16.msra.mxu1 %v8303_v47  ;;  %6880 = vmatprep.subr.bf16.mxu0 %v8304_v1  ;;  %v2300_v47 = vsel %vm2298_vm4, %v8305_v37, 0 }
  0xc3   : > { %v9053_v58 = vpop.permute.xlu0 %7114  ;;  %7399 = vrot.lane.b32.xlu1 %v8816_v10, %s8350_s28  ;;  %13065 = vst [vmem:[#allocation55_spill] sm:$0xff] %v9068_v8  ;;  %6993 = vmatprep.subr.bf16.mxu1 %v8304_v1 }
  0xc4   : > { %13062 = vst [vmem:[#allocation52_spill] sm:$0xff] %v9053_v58 }
  0xc5   : > { %7404 = vrot.lane.b32.xlu0 %v8820_v0, %s8350_s28  ;;  %v9059_v44 = vpop.permute.xlu1 %7119  ;;  %6881 = vmatpush3.bf16.msra.mxu0 %v8304_v1 }
  0xc6   : > { %13063 = vst [vmem:[#allocation53_spill] sm:$0xff] %v9059_v44  ;;  %6996 = vmatpush3.bf16.msra.mxu1 %v8304_v1  ;;  %6998 = vmatprep.subr.msk.bf16.mxu0 %vm2298_vm4, %v8305_v37  ;;  %v9225_v44 = vld [vmem:[#allocation2 + $0x188] sm:$0xff] }
  0xc7   : > { %v9061_v2 = vpop.permute.xlu0 %7124  ;;  %7409 = vrot.lane.b32.xlu1 %v8824_v32, %s8350_s28  ;;  %6999 = vmatprep.subr.msk.bf16.mxu1 %vm2298_vm4, %v8305_v37 }
  0xc8   : > { %13064 = vst [vmem:[#allocation54_spill] sm:$0xff] %v9061_v2  ;;  %v7036_v2 = vunpack.i.l.bf16 %v8988_v11 }
  0xc9   : > { %7414 = vrot.lane.b32.xlu0 %v8832_v31, %s8350_s28  ;;  %v9072_v10 = vpop.permute.xlu1 %7129  ;;  %v856_v31 = vld [vmem:[#allocation2 + $0x31] sm:$0xff]  ;;  %6883 = vmatpush3.bf16.msra.mxu0 %v2300_v47 }
  0xca   : > { %13066 = vst [vmem:[#allocation56_spill] sm:$0xff] %v9072_v10  ;;  %6997 = vmatpush3.bf16.msra.mxu1 %v2300_v47  ;;  %v862_v47 = vld [vmem:[#allocation2 + $0x79] sm:$0xff] }
  0xcb   : > { %v9074_v0 = vpop.permute.xlu0 %7134  ;;  %7419 = vrot.lane.b32.xlu1 %v9068_v8, %s8350_s28  ;;  %v9218_v10 = vld [vmem:[#allocation2 + $0x172] sm:$0xff] }
  0xcc   : > { %13067 = vst [vmem:[#allocation57_spill] sm:$0xff] %v9074_v0  ;;  %v9216_v0 = vld [vmem:[#allocation2 + $0x16a] sm:$0xff] }
  0xcd   : > { %7424 = vrot.lane.b32.xlu0 %v8850_v59, %s8351_s14  ;;  %v9083_v32 = vpop.permute.xlu1 %7139  ;;  %v7443_v59 = vpack.i.bf16 %v857_v15, %v856_v31  ;;  %v860_v31 = vld [vmem:[#allocation2 + $0x61] sm:$0xff]  ;;  %v861_v15 = vld [vmem:[#allocation2 + $0x69] sm:$0xff] }
  0xce   : > { %13068 = vst [vmem:[#allocation58_spill] sm:$0xff] %v9083_v32  ;;  %v7463_v37 = vpack.i.bf16 %v861_v15, %v860_v31  ;;  %v864_v31 = vld [vmem:[#allocation2 + $0x91] sm:$0xff]  ;;  %v865_v15 = vld [vmem:[#allocation2 + $0x99] sm:$0xff] }
  0xcf   : > { %v9085_v17 = vpop.permute.xlu0 %7144  ;;  %7429 = vrot.lane.b32.xlu1 %v8855_v60, %s8351_s14  ;;  %v7448_v60 = vpack.i.bf16 %v859_v30, %v858_v26  ;;  %v9209_v32 = vld [vmem:[#allocation2 + $0x152] sm:$0xff] }
  0xd0   : > { %13069 = vst [vmem:[#allocation59_spill] sm:$0xff] %v9085_v17 }
  0xd1   : > { %7434 = vrot.lane.b32.xlu0 %v8869_v24, %s8351_s14  ;;  %v9096_v8 = vpop.permute.xlu1 %7149 }
  0xd2   : > { %13070 = vst [vmem:[#allocation60_spill] sm:$0xff] %v9096_v8  ;;  %v9207_v8 = vld [vmem:[#allocation2 + $0x171] sm:$0xff] }
  0xd3   : > { %v9099_v1 = vpop.permute.xlu0 %7154  ;;  %7439 = vrot.lane.b32.xlu1 %v8875_v42, %s8351_s14 }
  0xd4   : > { %13071 = vst [vmem:[#allocation61_spill] sm:$0xff] %v9099_v1  ;;  %v863_v1 = vld [vmem:[#allocation2 + $0x81] sm:$0xff] }
  0xd5   : > { %7444 = vrot.lane.b32.xlu0 %v7443_v59, %s8352_s19  ;;  %v9104_v24 = vpop.permute.xlu1 %7159  ;;  %v7468_v59 = vpack.i.bf16 %v863_v1, %v862_v47  ;;  %v866_v1 = vld [vmem:[#allocation2 + $0xa9] sm:$0xff] }
  0xd6   : > { %13072 = vst [vmem:[#allocation62_spill] sm:$0xff] %v9104_v24 }
  0xd7   : > { %v9106_v17 = vpop.permute.xlu0 %7164  ;;  %7449 = vrot.lane.b32.xlu1 %v7448_v60, %s8352_s19 }
  0xd8   : > { %13073 = vst [vmem:[#allocation63_spill] sm:$0xff] %v9106_v17  ;;  %v9194_v17 = vld [vmem:[#allocation2 + $0x168] sm:$0xff] }
  0xd9   : > { %7454 = vrot.lane.b32.xlu0 %v8766_v7, %s8353_s21  ;;  %v9111_v42 = vpop.permute.xlu1 %7169 }
  0xda   : > { %13074 = vst [vmem:[#allocation64_spill] sm:$0xff] %v9111_v42  ;;  %v849_v42 = vld [vmem:[#allocation2 + $0x158] sm:$0xff] }
  0xdb   : > { %v9113_v26 = vpop.permute.xlu0 %7174  ;;  %7459 = vrot.lane.b32.xlu1 %v8780_v34, %s8353_s21  ;;  %v7493_v34 = vpack.i.bf16 %v865_v15, %v864_v31 }
  0xdc   : > { %13075 = vst [vmem:[#allocation65_spill] sm:$0xff] %v9113_v26 }
  0xdd   : > { %7464 = vrot.lane.b32.xlu0 %v7463_v37, %s8352_s19  ;;  %v9118_v30 = vpop.permute.xlu1 %7179  ;;  %v867_v37 = vld [vmem:[#allocation2 + $0xb1] sm:$0xff] }
  0xde   : > { %13076 = vst [vmem:[#allocation66_spill] sm:$0xff] %v9118_v30  ;;  %v899_v30 = vld [vmem:[#allocation2 + $0xb2] sm:$0xff] }
  0xdf   : > { %v9120_v60 = vpop.permute.xlu0 %7184  ;;  %7469 = vrot.lane.b32.xlu1 %v7468_v59, %s8352_s19  ;;  %v896_v59 = vld [vmem:[#allocation2 + $0x92] sm:$0xff] }
  0xe0   : > { %13077 = vst [vmem:[#allocation67_spill] sm:$0xff] %v9120_v60  ;;  %v897_v60 = vld [vmem:[#allocation2 + $0x9a] sm:$0xff] }
  0xe1   : > { %7474 = vrot.lane.b32.xlu0 %v8784_v41, %s8353_s21  ;;  %v9125_v7 = vpop.permute.xlu1 %7189 }
  0xe2   : > { %13078 = vst [vmem:[#allocation68_spill] sm:$0xff] %v9125_v7  ;;  %v7498_v7 = vpack.i.bf16 %v867_v37, %v866_v1  ;;  %v871_v1 = vld [vmem:[#allocation2 + $0xe1] sm:$0xff] }
  0xe3   : > { %v9127_v24 = vpop.permute.xlu0 %7194  ;;  %7479 = vrot.lane.b32.xlu1 %v8788_v48, %s8353_s21  ;;  %v898_v48 = vld [vmem:[#allocation2 + $0xaa] sm:$0xff] }
  0xe4   : > { %13079 = vst [vmem:[#allocation69_spill] sm:$0xff] %v9127_v24  ;;  %v7503_v24 = vpack.i.bf16 %v897_v60, %v896_v59  ;;  %v7508_v31 = vpack.i.bf16 %v899_v30, %v898_v48  ;;  %v901_v30 = vld [vmem:[#allocation2 + $0xca] sm:$0xff] }
  0xe5   : > { %7484 = vrot.lane.b32.xlu0 %v8889_v19, %s8351_s14  ;;  %v9133_v47 = vpop.permute.xlu1 %7199 }
  0xe6   : > { %13080 = vst [vmem:[#allocation70_spill] sm:$0xff] %v9133_v47  ;;  %v869_v47 = vld [vmem:[#allocation2 + $0xc9] sm:$0xff] }
  0xe7   : > { %v9135_v41 = vpop.permute.xlu0 %7204  ;;  %7489 = vrot.lane.b32.xlu1 %v8895_v18, %s8351_s14 }
  0xe8   : > { %13081 = vst [vmem:[#allocation71_spill] sm:$0xff] %v9135_v41  ;;  %v868_v41 = vld [vmem:[#allocation2 + $0xc1] sm:$0xff] }
  0xe9   : > { %7494 = vrot.lane.b32.xlu0 %v7493_v34, %s8352_s19  ;;  %v9140_v26 = vpop.permute.xlu1 %7209  ;;  %v7523_v60 = vpack.i.bf16 %v869_v47, %v868_v41  ;;  %v870_v34 = vld [vmem:[#allocation2 + $0xd9] sm:$0xff] }
  0xea   : > { %13082 = vst [vmem:[#allocation72_spill] sm:$0xff] %v9140_v26  ;;  %v841_v47 = vld [vmem:[#allocation2 + $0xf8] sm:$0xff]  ;;  %v874_v26 = vld [vmem:[#allocation2 + $0x109] sm:$0xff] }
  0xeb   : > { %v9142_v19 = vpop.permute.xlu0 %7214  ;;  %7499 = vrot.lane.b32.xlu1 %v7498_v7, %s8352_s19  ;;  %v900_v7 = vld [vmem:[#allocation2 + $0xc2] sm:$0xff] }
  0xec   : > { %13083 = vst [vmem:[#allocation73_spill] sm:$0xff] %v9142_v19  ;;  %v7533_v48 = vpack.i.bf16 %v901_v30, %v900_v7  ;;  %v842_v19 = vld [vmem:[#allocation2 + $0x108] sm:$0xff] }
  0xed   : > { %7504 = vrot.lane.b32.xlu0 %v7503_v24, %s8353_s21  ;;  %v9146_v15 = vpop.permute.xlu1 %7219  ;;  %v7528_v24 = vpack.i.bf16 %v871_v1, %v870_v34  ;;  %v873_v1 = vld [vmem:[#allocation2 + $0xf9] sm:$0xff] }
  0xee   : > { %13084 = vst [vmem:[#allocation74_spill] sm:$0xff] %v9146_v15 }
  0xef   : > { %v9148_v18 = vpop.permute.xlu0 %7224  ;;  %7509 = vrot.lane.b32.xlu1 %v7508_v31, %s8353_s21  ;;  %v902_v31 = vld [vmem:[#allocation2 + $0xda] sm:$0xff] }
  0xf0   : > { %13085 = vst [vmem:[#allocation75_spill] sm:$0xff] %v9148_v18  ;;  %v903_v18 = vld [vmem:[#allocation2 + $0xe2] sm:$0xff] }
  0xf1   : > { %7514 = vrot.lane.b32.xlu0 %v8909_v13, %s8351_s14  ;;  %v9153_v37 = vpop.permute.xlu1 %7229  ;;  %v840_v13 = vld [vmem:[#allocation2 + $0xf0] sm:$0xff] }
  0xf2   : > { %13086 = vst [vmem:[#allocation76_spill] sm:$0xff] %v9153_v37  ;;  %v7538_v37 = vpack.i.bf16 %v903_v18, %v902_v31  ;;  %v905_v31 = vld [vmem:[#allocation2 + $0xfa] sm:$0xff] }
  0xf3   : > { %v9155_v59 = vpop.permute.xlu0 %7234  ;;  %7519 = vrot.lane.b32.xlu1 %v8915_v12, %s8351_s14  ;;  %v843_v12 = vld [vmem:[#allocation2 + $0x110] sm:$0xff] }
  0xf4   : > { %13087 = vst [vmem:[#allocation77_spill] sm:$0xff] %v9155_v59  ;;  %v7543_v59 = vpack.i.bf16 %v841_v47, %v840_v13  ;;  %v7548_v30 = vpack.i.bf16 %v843_v12, %v842_v19  ;;  %v845_v12 = vld [vmem:[#allocation2 + $0x128] sm:$0xff] }
  0xf5   : > { %7524 = vrot.lane.b32.xlu0 %v7523_v60, %s8352_s19  ;;  %v9160_v15 = vpop.permute.xlu1 %7239  ;;  %v872_v60 = vld [vmem:[#allocation2 + $0xf1] sm:$0xff] }
  0xf6   : > { %13088 = vst [vmem:[#allocation78_spill] sm:$0xff] %v9160_v15  ;;  %v7553_v15 = vpack.i.bf16 %v873_v1, %v872_v60 }
  0xf7   : > { %v9162_v41 = vpop.permute.xlu0 %7244  ;;  %7529 = vrot.lane.b32.xlu1 %v7528_v24, %s8352_s19  ;;  %v875_v24 = vld [vmem:[#allocation2 + $0x111] sm:$0xff] }
  0xf8   : > { %13089 = vst [vmem:[#allocation79_spill] sm:$0xff] %v9162_v41  ;;  %v7558_v47 = vpack.i.bf16 %v875_v24, %v874_v26  ;;  %v877_v24 = vld [vmem:[#allocation2 + $0x129] sm:$0xff] }
  0xf9   : > { %7534 = vrot.lane.b32.xlu0 %v7533_v48, %s8353_s21  ;;  %v9166_v34 = vpop.permute.xlu1 %7249  ;;  %v904_v48 = vld [vmem:[#allocation2 + $0xf2] sm:$0xff] }
  0xfa   : > { %13090 = vst [vmem:[#allocation80_spill] sm:$0xff] %v9166_v34  ;;  %v906_v34 = vld [vmem:[#allocation2 + $0x10a] sm:$0xff] }
  0xfb   : > { %v9168_v7 = vpop.permute.xlu0 %7254  ;;  %7539 = vrot.lane.b32.xlu1 %v7538_v37, %s8353_s21  ;;  %v907_v37 = vld [vmem:[#allocation2 + $0x112] sm:$0xff] }
  0xfc   : > { %13091 = vst [vmem:[#allocation81_spill] sm:$0xff] %v9168_v7  ;;  %v7563_v7 = vpack.i.bf16 %v905_v31, %v904_v48  ;;  %v7568_v1 = vpack.i.bf16 %v907_v37, %v906_v34  ;;  %v908_v34 = vld [vmem:[#allocation2 + $0x122] sm:$0xff] }
  0xfd   : > { %7544 = vrot.lane.b32.xlu0 %v7543_v59, %s8351_s14  ;;  %v9172_v18 = vpop.permute.xlu1 %7259  ;;  %v844_v59 = vld [vmem:[#allocation2 + $0x120] sm:$0xff] }
  0xfe   : > { %13092 = vst [vmem:[#allocation82_spill] sm:$0xff] %v9172_v18  ;;  %v846_v18 = vld [vmem:[#allocation2 + $0x138] sm:$0xff] }
  0xff   : > { %v9174_v13 = vpop.permute.xlu0 %7264  ;;  %7549 = vrot.lane.b32.xlu1 %v7548_v30, %s8351_s14  ;;  %v847_v30 = vld [vmem:[#allocation2 + $0x140] sm:$0xff] }
 0x100   : > { %13093 = vst [vmem:[#allocation83_spill] sm:$0xff] %v9174_v13  ;;  %v7573_v13 = vpack.i.bf16 %v845_v12, %v844_v59  ;;  %v7578_v31 = vpack.i.bf16 %v847_v30, %v846_v18  ;;  %v910_v59 = vld [vmem:[#allocation2 + $0x13a] sm:$0xff]  ;;  %v911_v12 = vld [vmem:[#allocation2 + $0x142] sm:$0xff] }
 0x101   : > { %7554 = vrot.lane.b32.xlu0 %v7553_v15, %s8352_s19  ;;  %v9178_v19 = vpop.permute.xlu1 %7269  ;;  %v876_v15 = vld [vmem:[#allocation2 + $0x121] sm:$0xff]  ;;  %v9201_v30 = vld [vmem:[#allocation2 + $0x159] sm:$0xff] }
 0x102   : > { %13094 = vst [vmem:[#allocation84_spill] sm:$0xff] %v9178_v19  ;;  %v878_v19 = vld [vmem:[#allocation2 + $0x139] sm:$0xff] }
 0x103   : > { %v9180_v60 = vpop.permute.xlu0 %7274  ;;  %7559 = vrot.lane.b32.xlu1 %v7558_v47, %s8352_s19  ;;  %v879_v47 = vld [vmem:[#allocation2 + $0x141] sm:$0xff] }
 0x104   : > { %13095 = vst [vmem:[#allocation85_spill] sm:$0xff] %v9180_v60  ;;  %v7583_v60 = vpack.i.bf16 %v877_v24, %v876_v15  ;;  %v7588_v18 = vpack.i.bf16 %v879_v47, %v878_v19  ;;  %v7027_v15 = vunpack.i.h.bf16 %v8982_v4  ;;  %v631_v24 = vld [vmem:[#allocation2] sm:$0xff]  ;;  %v7026_v19 = vunpack.i.l.bf16 %v8982_v4 }
 0x105   : > { %7564 = vrot.lane.b32.xlu0 %v7563_v7, %s8353_s21  ;;  %v9184_v26 = vpop.permute.xlu1 %7279  ;;  %v909_v7 = vld [vmem:[#allocation2 + $0x12a] sm:$0xff]  ;;  %v9214_v47 = vld [vmem:[#allocation2 + $0x15a] sm:$0xff]  ;;  %v7037_v4 = vunpack.i.h.bf16 %v8988_v11  ;;  %v7031_v11 = vunpack.i.l.bf16 %v8990_v14 }
 0x106   : > { %13096 = vst [vmem:[#allocation86_spill] sm:$0xff] %v9184_v26  ;;  %v848_v26 = vld [vmem:[#allocation2 + $0x150] sm:$0xff] }
 0x107   : > { %v9186_v48 = vpop.permute.xlu0 %7284  ;;  %7569 = vrot.lane.b32.xlu1 %v7568_v1, %s8353_s21  ;;  %v9199_v1 = vld [vmem:[#allocation2 + $0x151] sm:$0xff] }
 0x108   : > { %13097 = vst [vmem:[#allocation87_spill] sm:$0xff] %v9186_v48  ;;  %v632_v48 = vld [vmem:[#allocation2 + $0x8] sm:$0xff]  ;;  %v7613_v58 = vpack.i.bf16 %v9201_v30, %v9199_v1  ;;  %v9285_v30 = vsel %vm388_vm0, %v8826_v52, %v7031_v11  ;;  %v7061_v11 = vunpack.i.l.bf16 %v9011_v49 }
 0x109   : > { %7574 = vrot.lane.b32.xlu0 %v7573_v13, %s8351_s14  ;;  %v9190_v37 = vpop.permute.xlu1 %7289  ;;  %v9197_v13 = vld [vmem:[#allocation2 + $0x170] sm:$0xff] }
 0x10a   : > { %13098 = vst [vmem:[#allocation88_spill] sm:$0xff] %v9190_v37  ;;  %v9205_v37 = vld [vmem:[#allocation2 + $0x169] sm:$0xff]  ;;  %v7608_v16 = vpack.i.bf16 %v9197_v13, %v9194_v17  ;;  %v7042_v13 = vunpack.i.h.bf16 %v8996_v29  ;;  %v7057_v17 = vunpack.i.h.bf16 %v9006_v45 }
 0x10b   : > { %v9192_v41 = vpop.permute.xlu0 %7294  ;;  %7579 = vrot.lane.b32.xlu1 %v7578_v31, %s8351_s14 }
 0x10c   : > { %13099 = vst [vmem:[#allocation89_spill] sm:$0xff] %v9192_v41  ;;  %v7593_v41 = vpack.i.bf16 %v909_v7, %v908_v34  ;;  %v7598_v34 = vpack.i.bf16 %v911_v12, %v910_v59  ;;  %v9223_v7 = vld [vmem:[#allocation2 + $0x180] sm:$0xff]  ;;  %v9239_v12 = vld [vmem:[#allocation2 + $0x189] sm:$0xff]  ;;  %v9301_v52 = vsel %vm388_vm0, %v8844_v51, %v7042_v13 }
 0x10d   : > { %7584 = vrot.lane.b32.xlu0 %v7583_v60, %s8352_s19  ;;  %v9212_v31 = vpop.permute.xlu1 %7299  ;;  %v9237_v59 = vld [vmem:[#allocation2 + $0x181] sm:$0xff] }
 0x10e   : > { %13100 = vst [vmem:[#allocation90_spill] sm:$0xff] %v9212_v31  ;;  %v7603_v31 = vpack.i.bf16 %v849_v42, %v848_v26  ;;  %v7618_v42 = vpack.i.bf16 %v9207_v8, %v9205_v37  ;;  %v9251_v26 = vsel %vm388_vm0, %v631_v24, %v7026_v19  ;;  %v9273_v24 = vld [vmem:[#allocation2 + $0x1a1] sm:$0xff]  ;;  %v9277_v19 = vsel %vm388_vm0, %v8840_v53, %v7037_v4 }
 0x10f   : > { %v9221_v60 = vpop.permute.xlu0 %7304  ;;  %7589 = vrot.lane.b32.xlu1 %v7588_v18, %s8352_s19  ;;  %v7032_v18 = vunpack.i.h.bf16 %v8990_v14  ;;  %v7046_v37 = vunpack.i.l.bf16 %v8998_v33  ;;  %v7052_v14 = vunpack.i.h.bf16 %v9004_v39  ;;  %v9291_v53 = vld [vmem:[#allocation2 + $0x19a] sm:$0xff] }
 0x110   : > { %13101 = vst [vmem:[#allocation91_spill] sm:$0xff] %v9221_v60  ;;  %v9242_v60 = vsel %vm388_vm0, %v632_v48, %v7027_v15  ;;  %v9271_v15 = vld [vmem:[#allocation2 + $0x199] sm:$0xff]  ;;  %v7051_v48 = vunpack.i.l.bf16 %v9004_v39  ;;  %v7102_v39 = vunpack.i.h.bf16 %v9043_v40 }
 0x111   : > { %7594 = vrot.lane.b32.xlu0 %v7593_v41, %s8353_s21  ;;  %v9255_v1 = vpop.permute.xlu1 %7309  ;;  %v9261_v41 = vsel %vm388_vm0, %v8838_v43, %v7036_v2  ;;  %v7041_v43 = vunpack.i.l.bf16 %v8996_v29  ;;  %v7047_v2 = vunpack.i.h.bf16 %v8998_v33  ;;  %v9293_v29 = vld [vmem:[#allocation2 + $0x1a2] sm:$0xff]  ;;  %v9297_v33 = vsel %vm388_vm0, %v8828_v55, %v7032_v18 }
 0x112   : > { %13102 = vst [vmem:[#allocation92_spill] sm:$0xff] %v9255_v1  ;;  %v7066_v55 = vunpack.i.l.bf16 %v9013_v56  ;;  %v9324_v13 = vsel %vm388_vm0, %v8857_v50, %v7046_v37  ;;  %v7072_v50 = vunpack.i.h.bf16 %v9019_v57  ;;  %v7071_v37 = vunpack.i.l.bf16 %v9019_v57 }
 0x113   : > { %v9263_v8 = vpop.permute.xlu0 %7314  ;;  %7599 = vrot.lane.b32.xlu1 %v7598_v34, %s8353_s21  ;;  %v7056_v34 = vunpack.i.l.bf16 %v9006_v45  ;;  %v9316_v51 = vsel %vm388_vm0, %v8842_v54, %v7041_v43  ;;  %v9320_v45 = vsel %vm388_vm0, %v8859_v36, %v7047_v2  ;;  %v9335_v54 = vsel %vm388_vm0, %v8861_v35, %v7051_v48  ;;  %v13106_v48 = vld [vmem:[#allocation38_spill] sm:$0xff] }
 0x114   : > { %13103 = vst [vmem:[#allocation93_spill] sm:$0xff] %v9263_v8  ;;  %v7067_v8 = vunpack.i.h.bf16 %v9013_v56  ;;  %v9331_v56 = vsel %vm388_vm0, %v8863_v25, %v7052_v14  ;;  %v9339_v36 = vsel %vm388_vm0, %v8879_v22, %v7057_v17  ;;  %v7077_v25 = vunpack.i.h.bf16 %v9021_v62 }
 0x115   : > { %7604 = vrot.lane.b32.xlu0 %v7603_v31, %s8351_s14  ;;  %v9304_v4 = vpop.permute.xlu1 %7319  ;;  %v7062_v31 = vunpack.i.h.bf16 %v9011_v49  ;;  %v7076_v14 = vunpack.i.l.bf16 %v9021_v62  ;;  %v9358_v17 = vsel %vm388_vm0, %v8881_v21, %v7061_v11  ;;  %v9366_v57 = vsel %vm388_vm0, %v13106_v48, %v7066_v55  ;;  %v13107_v21 = vld [vmem:[#allocation41_spill] sm:$0xff] }
 0x116   : > { %13104 = vst [vmem:[#allocation94_spill] sm:$0xff] %v9304_v4  ;;  %v7082_v62 = vunpack.i.h.bf16 %v9027_v63  ;;  %v7081_v2 = vunpack.i.l.bf16 %v9027_v63  ;;  %v7091_v11 = vunpack.i.l.bf16 %v9035_v28  ;;  %v7097_v55 = vunpack.i.h.bf16 %v9037_v38  ;;  %v13118_v4 = vld [vmem:[#allocation48_spill] sm:$0xff] }
 0x117   : > { %v9312_v18 = vpop.permute.xlu0 %7324  ;;  %7609 = vrot.lane.b32.xlu1 %v7608_v16, %s8351_s14  ;;  %v9345_v16 = vsel %vm388_vm0, %v8877_v23, %v7056_v34  ;;  %v9354_v22 = vsel %vm388_vm0, %v8883_v20, %v7062_v31  ;;  %v7087_v20 = vunpack.i.h.bf16 %v9029_v27  ;;  %v7086_v34 = vunpack.i.l.bf16 %v9029_v27 }
 0x118   : > { %v7092_v31 = vunpack.i.h.bf16 %v9035_v28  ;;  %v13108_v63 = vpack.i.bf16 %v9214_v47, %v9209_v32  ;;  %v7096_v28 = vunpack.i.l.bf16 %v9037_v38  ;;  %v7101_v32 = vunpack.i.l.bf16 %v9043_v40 }
 0x119   : > { %7614 = vrot.lane.b32.xlu0 %v7613_v58, %s8352_s19  ;;  %v9350_v35 = vpop.permute.xlu1 %7329  ;;  %v13105_v58 = vld [vmem:[#allocation39_spill] sm:$0xff]  ;;  %v7107_v47 = vunpack.i.h.bf16 %v9045_v46  ;;  %v9417_v38 = vsel %vm388_vm0, %v8935_v3, %v7087_v20  ;;  %v9437_v3 = vsel %vm388_vm0, %v8949_v6, %v7097_v55  ;;  %v7111_v20 = vunpack.i.l.bf16 %v9051_v61 }
 0x11a   : > { %v9362_v23 = vsel %vm388_vm0, %v13105_v58, %v7067_v8  ;;  %v9377_v8 = vsel %vm388_vm0, %v13107_v21, %v7072_v50  ;;  %v13109_v58 = vld [vmem:[#allocation40_spill] sm:$0xff]  ;;  %v13111_v50 = vld [vmem:[#allocation42_spill] sm:$0xff]  ;;  %v13123_v6 = vld [vmem:[#allocation51_spill] sm:$0xff] }
 0x11b   : > { %v9368_v43 = vpop.permute.xlu0 %7334  ;;  %7619 = vrot.lane.b32.xlu1 %v7618_v42, %s8352_s19  ;;  %v9388_v27 = vsel %vm388_vm0, %v13109_v58, %v7071_v37  ;;  %v13110_v42 = vld [vmem:[#allocation43_spill] sm:$0xff]  ;;  %v9396_v21 = vsel %vm388_vm0, %v13111_v50, %v7076_v14  ;;  %v7106_v37 = vunpack.i.l.bf16 %v9045_v46  ;;  %v13114_v14 = vld [vmem:[#allocation44_spill] sm:$0xff]  ;;  %v13116_v50 = vld [vmem:[#allocation46_spill] sm:$0xff]  ;;  %v13117_v46 = vpack.i.bf16 %v9218_v10, %v9216_v0 }
 0x11c   : > { %v9392_v48 = vsel %vm388_vm0, %v13110_v42, %v7077_v25  ;;  %v13112_v25 = vld [vmem:[#allocation45_spill] sm:$0xff]  ;;  %v9413_v42 = vsel %vm388_vm0, %v13114_v14, %v7081_v2  ;;  %v9421_v40 = vsel %vm388_vm0, %v13116_v50, %v7086_v34  ;;  %v13120_v34 = vpack.i.bf16 %v9225_v44, %v9223_v7 }
 0x11d   : > { %7624 = vrot.lane.b32.xlu0 %v13108_v63, %s8353_s21  ;;  %v9399_v49 = vpop.permute.xlu1 %7339  ;;  %v9409_v58 = vsel %vm388_vm0, %v13112_v25, %v7082_v62  ;;  %13115 = vst [vmem:[#allocation38_spill] sm:$0xff] %v9413_v42  ;;  %v9429_v62 = vsel %vm388_vm0, %v13118_v4, %v7092_v31  ;;  %v13119_v25 = vld [vmem:[#allocation47_spill] sm:$0xff]  ;;  %v13121_v10 = vld [vmem:[#allocation49_spill] sm:$0xff]  ;;  %v7112_v4 = vunpack.i.h.bf16 %v9051_v61  ;;  %v13122_v31 = vld [vmem:[#allocation52_spill] sm:$0xff]  ;;  %v9455_v55 = vsel %vm388_vm0, %v13123_v6, %v7102_v39 }
 0x11e   : > { %13113 = vst [vmem:[#allocation39_spill] sm:$0xff] %v9409_v58  ;;  %v9433_v2 = vsel %vm388_vm0, %v13119_v25, %v7091_v11  ;;  %v9446_v0 = vsel %vm388_vm0, %v13121_v10, %v7096_v28  ;;  %v7117_v11 = vunpack.i.h.bf16 %v13122_v31  ;;  %v9463_v7 = vsel %vm434_vm3, %v9242_v60, %v7107_v47  ;;  %v13126_v39 = vld [vmem:[#allocation54_spill] sm:$0xff]  ;;  %v13128_v47 = vld [vmem:[#allocation56_spill] sm:$0xff] }
 0x11f   : > { %v9405_v63 = vpop.permute.xlu0 %7344  ;;  %7629 = vrot.lane.b32.xlu1 %v13117_v46, %s8353_s21  ;;  %v13124_v46 = vld [vmem:[#allocation50_spill] sm:$0xff]  ;;  %v9467_v28 = vsel %vm434_vm3, %v9251_v26, %v7106_v37  ;;  %v9480_v60 = vsel %vm434_vm3, %v9285_v30, %v7111_v20  ;;  %v7127_v26 = vunpack.i.h.bf16 %v13126_v39  ;;  %v13129_v6 = vpack.i.bf16 %v9239_v12, %v9237_v59  ;;  %v13132_v30 = vld [vmem:[#allocation57_spill] sm:$0xff] }
 0x120   : > { %v9459_v44 = vsel %vm388_vm0, %v13124_v46, %v7101_v32  ;;  %v13127_v32 = vpack.i.bf16 %v9235_v9, %v9227_v5  ;;  %v13130_v14 = vmov 0.0   ;;  %v9697_v5 = vsel %vm434_vm3, %v9297_v33, %v7112_v4  ;;  %v13133_v33 = vld [vmem:[#allocation58_spill] sm:$0xff]  ;;  %v13134_v46 = vld [vmem:[#allocation59_spill] sm:$0xff] }
 0x121   : > { %7634 = vrot.lane.b32.xlu0 %v13120_v34, %s8351_s14  ;;  %v9451_v50 = vpop.permute.xlu1 %7349  ;;  %v13125_v34 = vld [vmem:[#allocation53_spill] sm:$0xff]  ;;  %446 = vst.msk [vmem:[#allocation3 + $0x30] sm:$0x1] %vm443_vm5, %v13130_v14  ;;  %444 = vst.msk [vmem:[#allocation3] sm:$0x1] %vm443_vm5, %v13130_v14  ;;  %v9703_v9 = vsel %vm434_vm3, %v9277_v19, %v7117_v11  ;;  %v13131_v59 = vunpack.i.l.bf16 %v13122_v31  ;;  %v7136_v20 = vunpack.i.l.bf16 %v13132_v30  ;;  %v7137_v61 = vunpack.i.h.bf16 %v13132_v30 }
 0x122   : > { %v7122_v10 = vunpack.i.h.bf16 %v13125_v34  ;;  %445 = vst.msk [vmem:[#allocation3 + $0x18] sm:$0x1] %vm443_vm5, %v13130_v14  ;;  %447 = vst.msk [vmem:[#allocation3 + $0x48] sm:$0x1] %vm443_vm5, %v13130_v14  ;;  %v7142_v4 = vunpack.i.h.bf16 %v13133_v33  ;;  %v7146_v37 = vunpack.i.l.bf16 %v13134_v46  ;;  %v13135_v31 = vunpack.i.l.bf16 %v13125_v34 }
 0x123   : > { %v9469_v25 = vpop.permute.xlu0 %7354  ;;  %7639 = vrot.lane.b32.xlu1 %v13127_v32, %s8351_s14  ;;  %448 = vst.msk [vmem:[#allocation3 + $0x60] sm:$0x1] %vm443_vm5, %v13130_v14  ;;  %449 = vst.msk [vmem:[#allocation3 + $0x78] sm:$0x1] %vm443_vm5, %v13130_v14  ;;  %v9709_v12 = vsel %vm434_vm3, %v9261_v41, %v13131_v59  ;;  %v7141_v32 = vunpack.i.l.bf16 %v13133_v33  ;;  %v13136_v59 = vunpack.i.l.bf16 %v13126_v39  ;;  %v7147_v33 = vunpack.i.h.bf16 %v13134_v46  ;;  %v13141_v39 = vld [vmem:[#allocation55_spill] sm:$0xff] }
 0x124   : > { %450 = vst.msk [vmem:[#allocation3 + $0x90] sm:$0x1] %vm443_vm5, %v13130_v14  ;;  %451 = vst.msk [vmem:[#allocation3 + $0xa8] sm:$0x1] %vm443_vm5, %v13130_v14  ;;  %v9724_v41 = vsel %vm434_vm3, %v9301_v52, %v7122_v10  ;;  %v9730_v11 = vsel %vm434_vm3, %v9316_v51, %v13135_v31  ;;  %v13137_v52 = vpack.i.bf16 %v9273_v24, %v9271_v15  ;;  %v13138_v34 = vunpack.i.h.bf16 %v13128_v47  ;;  %v13140_v15 = vld [vmem:[#allocation60_spill] sm:$0xff]  ;;  %v13142_v31 = vld [vmem:[#allocation61_spill] sm:$0xff] }
 0x125   : > { %7644 = vrot.lane.b32.xlu0 %v13129_v6, %s8352_s19  ;;  %452 = vst.msk [vmem:[#allocation3 + $0xc0] sm:$0x1] %vm443_vm5, %v13130_v14  ;;  %453 = vst.msk [vmem:[#allocation3 + $0xd8] sm:$0x1] %vm443_vm5, %v13130_v14  ;;  %v9712_v6 = vpop.permute.xlu1 %7359  ;;  %v9736_v30 = vsel %vm434_vm3, %v9324_v13, %v13136_v59  ;;  %v9747_v51 = vsel %vm434_vm3, %v9320_v45, %v7127_v26  ;;  %v13139_v10 = vunpack.i.l.bf16 %v13128_v47  ;;  %v7152_v24 = vunpack.i.h.bf16 %v13140_v15 }
 0x126   : > { %454 = vst.msk [vmem:[#allocation3 + $0xf0] sm:$0x1] %vm443_vm5, %v13130_v14  ;;  %455 = vst.msk [vmem:[#allocation3 + $0x108] sm:$0x1] %vm443_vm5, %v13130_v14  ;;  %v9753_v13 = vsel %vm434_vm3, %v9331_v56, %v13138_v34  ;;  %v9766_v45 = vsel %vm434_vm3, %v9345_v16, %v7136_v20  ;;  %v7151_v26 = vunpack.i.l.bf16 %v13140_v15  ;;  %v7157_v56 = vunpack.i.h.bf16 %v13142_v31 }
 0x127   : > { %456 = vst.msk [vmem:[#allocation3 + $0x120] sm:$0x1] %vm443_vm5, %v13130_v14  ;;  %457 = vst.msk [vmem:[#allocation3 + $0x138] sm:$0x1] %vm443_vm5, %v13130_v14  ;;  %v9718_v19 = vpop.permute.xlu0 %7364  ;;  %7649 = vrot.lane.b32.xlu1 %v13137_v52, %s8352_s19  ;;  %v9759_v46 = vsel %vm434_vm3, %v9335_v54, %v13139_v10  ;;  %v7156_v59 = vunpack.i.l.bf16 %v13142_v31  ;;  %v9775_v54 = vsel %vm434_vm3, %v9339_v36, %v7137_v61  ;;  %v13143_v36 = vld [vmem:[#allocation63_spill] sm:$0xff]  ;;  %v7332_v58 = vunpack.i.h.bf16 %v9350_v35 }
 0x128   : > { %458 = vst.msk [vmem:[#allocation3 + $0x150] sm:$0x1] %vm443_vm5, %v13130_v14  ;;  %459 = vst.msk [vmem:[#allocation3 + $0x168] sm:$0x1] %vm443_vm5, %v13130_v14  ;;  %v9779_v52 = vsel %vm434_vm3, %v9354_v22, %v7142_v4  ;;  %v9783_v16 = vsel %vm434_vm3, %v9358_v17, %v7141_v32  ;;  %v9787_v20 = vsel %vm434_vm3, %v9366_v57, %v7146_v37  ;;  %v7167_v61 = vunpack.i.h.bf16 %v13143_v36  ;;  %v13144_v22 = vld [vmem:[#allocation64_spill] sm:$0xff]  ;;  %v13146_v32 = vld [vmem:[#allocation65_spill] sm:$0xff] }
 0x129   : > { %460 = vst.msk [vmem:[#allocation3 + $0x180] sm:$0x1] %vm443_vm5, %v13130_v14  ;;  %461 = vst.msk [vmem:[#allocation3 + $0x198] sm:$0x1] %vm443_vm5, %v13130_v14  ;;  %7654 = vrot.lane.b32.xlu0 %v13141_v39, %s8353_s21  ;;  %v9771_v47 = vpop.permute.xlu1 %7369  ;;  %v9793_v10 = vsel %vm434_vm3, %v9362_v23, %v7147_v33  ;;  %v7166_v15 = vunpack.i.l.bf16 %v13143_v36  ;;  %v7172_v4 = vunpack.i.h.bf16 %v13144_v22  ;;  %v13145_v17 = vpack.i.bf16 %v9293_v29, %v9291_v53  ;;  %v13149_v29 = vld [vmem:[#allocation66_spill] sm:$0xff] }
 0x12a   : > { %463 = vst.msk [vmem:[#allocation3 + $0x29] sm:$0x1] %vm443_vm5, %v13130_v14  ;;  %464 = vst.msk [vmem:[#allocation3 + $0x41] sm:$0x1] %vm443_vm5, %v13130_v14  ;;  %v9804_v57 = vsel %vm434_vm3, %v9377_v8, %v7152_v24  ;;  %v7171_v37 = vunpack.i.l.bf16 %v13144_v22  ;;  %v7177_v23 = vunpack.i.h.bf16 %v13146_v32  ;;  %v7176_v33 = vunpack.i.l.bf16 %v13146_v32 }
 0x12b   : > { %465 = vst.msk [vmem:[#allocation3 + $0x59] sm:$0x1] %vm443_vm5, %v13130_v14  ;;  %466 = vst.msk [vmem:[#allocation3 + $0x71] sm:$0x1] %vm443_vm5, %v13130_v14  ;;  %v9789_v34 = vpop.permute.xlu0 %7374  ;;  %7659 = vrot.lane.b32.xlu1 %v13145_v17, %s8353_s21  ;;  %v9811_v39 = vsel %vm434_vm3, %v9388_v27, %v7151_v26  ;;  %v9815_v31 = vsel %vm434_vm3, %v9396_v21, %v7156_v59  ;;  %v9819_v53 = vsel %vm434_vm3, %v9392_v48, %v7157_v56  ;;  %v13151_v27 = vld [vmem:[#allocation67_spill] sm:$0xff] }
 0x12c   : > { %467 = vst.msk [vmem:[#allocation3 + $0x89] sm:$0x1] %vm443_vm5, %v13130_v14  ;;  %468 = vst.msk [vmem:[#allocation3 + $0xa1] sm:$0x1] %vm443_vm5, %v13130_v14  ;;  %v7182_v8 = vunpack.i.h.bf16 %v13149_v29  ;;  %v7181_v32 = vunpack.i.l.bf16 %v13149_v29  ;;  %v7186_v26 = vunpack.i.l.bf16 %v13151_v27  ;;  %v2000_v21 = vsel %vm434_vm3, %v9421_v40, %v7166_v15 }
 0x12d   : > { %469 = vst.msk [vmem:[#allocation3 + $0xb9] sm:$0x1] %vm443_vm5, %v13130_v14  ;;  %470 = vst.msk [vmem:[#allocation3 + $0xd1] sm:$0x1] %vm443_vm5, %v13130_v14  ;;  %v9822_v24 = vpop.permute.xlu1 %7379  ;;  %v2001_v48 = vsel %vm434_vm3, %v9417_v38, %v7167_v61  ;;  %v2003_v56 = vsel %vm434_vm3, %v9429_v62, %v7172_v4  ;;  %v7187_v59 = vunpack.i.h.bf16 %v13151_v27  ;;  %v2002_v17 = vsel %vm434_vm3, %v9433_v2, %v7171_v37  ;;  %v13153_v61 = vld [vmem:[#allocation79_spill] sm:$0xff] }
 0x12e   : > { %471 = vst.msk [vmem:[#allocation3 + $0xe9] sm:$0x1] %vm443_vm5, %v13130_v14  ;;  %472 = vst.msk [vmem:[#allocation3 + $0x101] sm:$0x1] %vm443_vm5, %v13130_v14  ;;  %v2004_v29 = vsel %vm434_vm3, %v9446_v0, %v7176_v33  ;;  %v2005_v22 = vsel %vm434_vm3, %v9437_v3, %v7177_v23  ;;  %v2007_v38 = vsel %vm434_vm3, %v9455_v55, %v7182_v8  ;;  %v7247_v15 = vunpack.i.h.bf16 %v13153_v61  ;;  %v13155_v0 = vld [vmem:[#allocation80_spill] sm:$0xff] }
 0x12f   : > { %473 = vst.msk [vmem:[#allocation3 + $0x119] sm:$0x1] %vm443_vm5, %v13130_v14  ;;  %474 = vst.msk [vmem:[#allocation3 + $0x131] sm:$0x1] %vm443_vm5, %v13130_v14  ;;  %v7246_v4 = vunpack.i.l.bf16 %v13153_v61  ;;  %v2006_v2 = vsel %vm434_vm3, %v9459_v44, %v7181_v32  ;;  %v9855_v3 = vsel %vm2008_vm6, %v9467_v28, %v7186_v26  ;;  %v7252_v37 = vunpack.i.h.bf16 %v13155_v0  ;;  %v13158_v61 = vld [vmem:[#allocation81_spill] sm:$0xff] }
 0x130   : > { %475 = vst.msk [vmem:[#allocation3 + $0x149] sm:$0x1] %vm443_vm5, %v13130_v14  ;;  %476 = vst.msk [vmem:[#allocation3 + $0x161] sm:$0x1] %vm443_vm5, %v13130_v14  ;;  %v7251_v23 = vunpack.i.l.bf16 %v13155_v0  ;;  %v9863_v33 = vsel %vm2008_vm6, %v9463_v7, %v7187_v59  ;;  %v7256_v44 = vunpack.i.l.bf16 %v13158_v61  ;;  %v7327_v26 = vunpack.i.h.bf16 %v9312_v18  ;;  %v13159_v59 = vld [vmem:[#allocation70_spill] sm:$0xff] }
 0x131   : > { %477 = vst.msk [vmem:[#allocation3 + $0x179] sm:$0x1] %vm443_vm5, %v13130_v14  ;;  %478 = vst.msk [vmem:[#allocation3 + $0x191] sm:$0x1] %vm443_vm5, %v13130_v14  ;;  %v9849_v27 = vpop.permute.xlu1 %7389  ;;  %v7326_v0 = vunpack.i.l.bf16 %v9312_v18  ;;  %v7202_v8 = vunpack.i.h.bf16 %v13159_v59  ;;  %v7331_v18 = vunpack.i.l.bf16 %v9350_v35 }
 0x132   : > { %487 = vst.msk [vmem:[#allocation4] sm:$0x1] %vm443_vm5, %v13130_v14  ;;  %488 = vst.msk [vmem:[#allocation4 + $0x18] sm:$0x1] %vm443_vm5, %v13130_v14 }
 0x133   : > { %489 = vst.msk [vmem:[#allocation4 + $0x30] sm:$0x1] %vm443_vm5, %v13130_v14  ;;  %490 = vst.msk [vmem:[#allocation4 + $0x48] sm:$0x1] %vm443_vm5, %v13130_v14 }
 0x134   : > { %491 = vst.msk [vmem:[#allocation4 + $0x60] sm:$0x1] %vm443_vm5, %v13130_v14  ;;  %492 = vst.msk [vmem:[#allocation4 + $0x78] sm:$0x1] %vm443_vm5, %v13130_v14 }
 0x135   : > { %493 = vst.msk [vmem:[#allocation4 + $0x90] sm:$0x1] %vm443_vm5, %v13130_v14  ;;  %494 = vst.msk [vmem:[#allocation4 + $0xa8] sm:$0x1] %vm443_vm5, %v13130_v14  ;;  %v9882_v42 = vpop.permute.xlu1 %7399 }
 0x136   : > { %495 = vst.msk [vmem:[#allocation4 + $0xc0] sm:$0x1] %vm443_vm5, %v13130_v14  ;;  %496 = vst.msk [vmem:[#allocation4 + $0xd8] sm:$0x1] %vm443_vm5, %v13130_v14 }
 0x137   : > { %497 = vst.msk [vmem:[#allocation4 + $0xf0] sm:$0x1] %vm443_vm5, %v13130_v14  ;;  %498 = vst.msk [vmem:[#allocation4 + $0x108] sm:$0x1] %vm443_vm5, %v13130_v14 }
 0x138   : > { %499 = vst.msk [vmem:[#allocation4 + $0x120] sm:$0x1] %vm443_vm5, %v13130_v14  ;;  %500 = vst.msk [vmem:[#allocation4 + $0x138] sm:$0x1] %vm443_vm5, %v13130_v14 }
 0x139   : > { %501 = vst.msk [vmem:[#allocation4 + $0x150] sm:$0x1] %vm443_vm5, %v13130_v14  ;;  %502 = vst.msk [vmem:[#allocation4 + $0x168] sm:$0x1] %vm443_vm5, %v13130_v14 }
 0x13a   : > { %503 = vst.msk [vmem:[#allocation4 + $0x180] sm:$0x1] %vm443_vm5, %v13130_v14  ;;  %504 = vst.msk [vmem:[#allocation4 + $0x198] sm:$0x1] %vm443_vm5, %v13130_v14 }
 0x13b   : > { %506 = vst.msk [vmem:[#allocation4 + $0x29] sm:$0x1] %vm443_vm5, %v13130_v14  ;;  %507 = vst.msk [vmem:[#allocation4 + $0x41] sm:$0x1] %vm443_vm5, %v13130_v14 }
 0x13c   : > { %508 = vst.msk [vmem:[#allocation4 + $0x59] sm:$0x1] %vm443_vm5, %v13130_v14  ;;  %509 = vst.msk [vmem:[#allocation4 + $0x71] sm:$0x1] %vm443_vm5, %v13130_v14 }
 0x13d   : > { %510 = vst.msk [vmem:[#allocation4 + $0x89] sm:$0x1] %vm443_vm5, %v13130_v14  ;;  %511 = vst.msk [vmem:[#allocation4 + $0xa1] sm:$0x1] %vm443_vm5, %v13130_v14 }
 0x13e   : > { %512 = vst.msk [vmem:[#allocation4 + $0xb9] sm:$0x1] %vm443_vm5, %v13130_v14  ;;  %513 = vst.msk [vmem:[#allocation4 + $0xd1] sm:$0x1] %vm443_vm5, %v13130_v14 }
 0x13f   : > { %514 = vst.msk [vmem:[#allocation4 + $0xe9] sm:$0x1] %vm443_vm5, %v13130_v14  ;;  %515 = vst.msk [vmem:[#allocation4 + $0x101] sm:$0x1] %vm443_vm5, %v13130_v14 }
 0x140   : > { %516 = vst.msk [vmem:[#allocation4 + $0x119] sm:$0x1] %vm443_vm5, %v13130_v14  ;;  %517 = vst.msk [vmem:[#allocation4 + $0x131] sm:$0x1] %vm443_vm5, %v13130_v14 }
 0x141   : > { %518 = vst.msk [vmem:[#allocation4 + $0x149] sm:$0x1] %vm443_vm5, %v13130_v14  ;;  %519 = vst.msk [vmem:[#allocation4 + $0x161] sm:$0x1] %vm443_vm5, %v13130_v14 }
 0x142   : > { %520 = vst.msk [vmem:[#allocation4 + $0x179] sm:$0x1] %vm443_vm5, %v13130_v14  ;;  %521 = vst.msk [vmem:[#allocation4 + $0x191] sm:$0x1] %vm443_vm5, %v13130_v14 }
 0x143   : > { %530 = vst.msk [vmem:[#allocation5] sm:$0x1] %vm443_vm5, %v13130_v14  ;;  %531 = vst.msk [vmem:[#allocation5 + $0x18] sm:$0x1] %vm443_vm5, %v13130_v14 }
 0x144   : > { %532 = vst.msk [vmem:[#allocation5 + $0x30] sm:$0x1] %vm443_vm5, %v13130_v14  ;;  %533 = vst.msk [vmem:[#allocation5 + $0x48] sm:$0x1] %vm443_vm5, %v13130_v14 }
 0x145   : > { %534 = vst.msk [vmem:[#allocation5 + $0x60] sm:$0x1] %vm443_vm5, %v13130_v14  ;;  %535 = vst.msk [vmem:[#allocation5 + $0x78] sm:$0x1] %vm443_vm5, %v13130_v14 }
 0x146   : > { %536 = vst.msk [vmem:[#allocation5 + $0x90] sm:$0x1] %vm443_vm5, %v13130_v14  ;;  %537 = vst.msk [vmem:[#allocation5 + $0xa8] sm:$0x1] %vm443_vm5, %v13130_v14 }
 0x147   : > { %538 = vst.msk [vmem:[#allocation5 + $0xc0] sm:$0x1] %vm443_vm5, %v13130_v14  ;;  %539 = vst.msk [vmem:[#allocation5 + $0xd8] sm:$0x1] %vm443_vm5, %v13130_v14 }
 0x148   : > { %540 = vst.msk [vmem:[#allocation5 + $0xf0] sm:$0x1] %vm443_vm5, %v13130_v14  ;;  %541 = vst.msk [vmem:[#allocation5 + $0x108] sm:$0x1] %vm443_vm5, %v13130_v14 }
 0x149   : > { %542 = vst.msk [vmem:[#allocation5 + $0x120] sm:$0x1] %vm443_vm5, %v13130_v14  ;;  %543 = vst.msk [vmem:[#allocation5 + $0x138] sm:$0x1] %vm443_vm5, %v13130_v14 }
 0x14a   : > { %544 = vst.msk [vmem:[#allocation5 + $0x150] sm:$0x1] %vm443_vm5, %v13130_v14  ;;  %545 = vst.msk [vmem:[#allocation5 + $0x168] sm:$0x1] %vm443_vm5, %v13130_v14 }
 0x14b   : > { %546 = vst.msk [vmem:[#allocation5 + $0x180] sm:$0x1] %vm443_vm5, %v13130_v14  ;;  %547 = vst.msk [vmem:[#allocation5 + $0x198] sm:$0x1] %vm443_vm5, %v13130_v14 }
 0x14c   : > { %549 = vst.msk [vmem:[#allocation5 + $0x29] sm:$0x1] %vm443_vm5, %v13130_v14  ;;  %550 = vst.msk [vmem:[#allocation5 + $0x41] sm:$0x1] %vm443_vm5, %v13130_v14 }
 0x14d   : > { %551 = vst.msk [vmem:[#allocation5 + $0x59] sm:$0x1] %vm443_vm5, %v13130_v14  ;;  %552 = vst.msk [vmem:[#allocation5 + $0x71] sm:$0x1] %vm443_vm5, %v13130_v14 }
 0x14e   : > { %553 = vst.msk [vmem:[#allocation5 + $0x89] sm:$0x1] %vm443_vm5, %v13130_v14  ;;  %554 = vst.msk [vmem:[#allocation5 + $0xa1] sm:$0x1] %vm443_vm5, %v13130_v14 }
 0x14f   : > { %555 = vst.msk [vmem:[#allocation5 + $0xb9] sm:$0x1] %vm443_vm5, %v13130_v14  ;;  %556 = vst.msk [vmem:[#allocation5 + $0xd1] sm:$0x1] %vm443_vm5, %v13130_v14 }
 0x150   : > { %557 = vst.msk [vmem:[#allocation5 + $0xe9] sm:$0x1] %vm443_vm5, %v13130_v14  ;;  %558 = vst.msk [vmem:[#allocation5 + $0x101] sm:$0x1] %vm443_vm5, %v13130_v14 }
 0x151   : > { %559 = vst.msk [vmem:[#allocation5 + $0x119] sm:$0x1] %vm443_vm5, %v13130_v14  ;;  %560 = vst.msk [vmem:[#allocation5 + $0x131] sm:$0x1] %vm443_vm5, %v13130_v14 }
 0x152   : > { %561 = vst.msk [vmem:[#allocation5 + $0x149] sm:$0x1] %vm443_vm5, %v13130_v14  ;;  %562 = vst.msk [vmem:[#allocation5 + $0x161] sm:$0x1] %vm443_vm5, %v13130_v14 }
 0x153   : > { %563 = vst.msk [vmem:[#allocation5 + $0x179] sm:$0x1] %vm443_vm5, %v13130_v14  ;;  %564 = vst.msk [vmem:[#allocation5 + $0x191] sm:$0x1] %vm443_vm5, %v13130_v14  ;;  %v9828_v14 = vpop.permute.xlu0 %7384 }
 0x154   : > { %13147 = vst [vmem:[#allocation41_spill] sm:$0xff] %v9815_v31  ;;  %13148 = vst [vmem:[#allocation40_spill] sm:$0xff] %v9819_v53  ;;  %v13152_v53 = vld [vmem:[#allocation68_spill] sm:$0xff]  ;;  %v7257_v31 = vunpack.i.h.bf16 %v13158_v61  ;;  %v2034_v61 = vsel %vm2008_vm6, %v2001_v48, %v7247_v15  ;;  %v7337_v15 = vunpack.i.h.bf16 %v9368_v43 }
 0x155   : > { %v7191_v40 = vunpack.i.l.bf16 %v13152_v53  ;;  %v7192_v62 = vunpack.i.h.bf16 %v13152_v53  ;;  %13154 = vst [vmem:[#allocation43_spill] sm:$0xff] %v9849_v27  ;;  %v13157_v53 = vld [vmem:[#allocation69_spill] sm:$0xff]  ;;  %v2067_v48 = vsel %vm2041_vm7, %v2034_v61, %v7327_v26  ;;  %v7341_v26 = vunpack.i.l.bf16 %v9399_v49 }
 0x156   : > { %v7196_v32 = vunpack.i.l.bf16 %v13157_v53 }
 0x157   : > { %v9859_v55 = vpop.permute.xlu0 %7394  ;;  %v9870_v28 = vsel %vm2008_vm6, %v9480_v60, %v7191_v40  ;;  %v9877_v7 = vsel %vm2008_vm6, %v9697_v5, %v7192_v62  ;;  %v2035_v60 = vsel %vm2008_vm6, %v2002_v17, %v7251_v23  ;;  %v2036_v40 = vsel %vm2008_vm6, %v2003_v56, %v7252_v37  ;;  %v13160_v56 = vld [vmem:[#allocation82_spill] sm:$0xff] }
 0x158   : > { %13156 = vst [vmem:[#allocation42_spill] sm:$0xff] %v9859_v55  ;;  %v2033_v55 = vsel %vm2008_vm6, %v2000_v21, %v7246_v4  ;;  %v2037_v5 = vsel %vm2008_vm6, %v2004_v29, %v7256_v44  ;;  %v2038_v62 = vsel %vm2008_vm6, %v2005_v22, %v7257_v31  ;;  %v7336_v17 = vunpack.i.l.bf16 %v9368_v43  ;;  %v7410_v31 = vpop.permute.xlu1 %7409 }
 0x159   : > { %v2066_v21 = vsel %vm2041_vm7, %v2033_v55, %v7326_v0  ;;  %v7262_v4 = vunpack.i.h.bf16 %v13160_v56  ;;  %v7261_v37 = vunpack.i.l.bf16 %v13160_v56  ;;  %v2069_v22 = vsel %vm2041_vm7, %v2036_v40, %v7332_v58  ;;  %v13161_v40 = vld [vmem:[#allocation71_spill] sm:$0xff] }
 0x15a   : > { %v7412_v23 = vunpack.i.h.bf16 %v7410_v31  ;;  %v7411_v55 = vunpack.i.l.bf16 %v7410_v31  ;;  %v7342_v43 = vunpack.i.h.bf16 %v9399_v49  ;;  %v7201_v58 = vunpack.i.l.bf16 %v13159_v59 }
 0x15b   : > { %v7405_v36 = vpop.permute.xlu0 %7404  ;;  %v7207_v59 = vunpack.i.h.bf16 %v13161_v40 }
 0x15c   : > { %v7407_v27 = vunpack.i.h.bf16 %v7405_v36  ;;  %v7406_v1 = vunpack.i.l.bf16 %v7405_v36  ;;  %v2068_v36 = vsel %vm2041_vm7, %v2035_v60, %v7331_v18  ;;  %v9912_v60 = vsel %vm2074_vm8, %v2069_v22, %v7412_v23  ;;  %v7420_v56 = vpop.permute.xlu1 %7419 }
 0x15d   : > { %v7206_v18 = vunpack.i.l.bf16 %v13161_v40  ;;  %v9950_v40 = vsel %vm2008_vm6, %v9724_v41, %v7202_v8 }
 0x15e   : > { %v9897_v35 = vsel %vm2074_vm8, %v2066_v21, %v7406_v1  ;;  %v9900_v29 = vsel %vm2074_vm8, %v2067_v48, %v7407_v27  ;;  %v2070_v1 = vsel %vm2041_vm7, %v2037_v5, %v7336_v17  ;;  %v2071_v21 = vsel %vm2041_vm7, %v2038_v62, %v7337_v15 }
 0x15f   : > { %v7415_v44 = vpop.permute.xlu0 %7414  ;;  %v9909_v27 = vsel %vm2074_vm8, %v2068_v36, %v7411_v55  ;;  %v2039_v5 = vsel %vm2008_vm6, %v2006_v2, %v7261_v37  ;;  %v2040_v62 = vsel %vm2008_vm6, %v2007_v38, %v7262_v4  ;;  %v7422_v15 = vunpack.i.h.bf16 %v7420_v56  ;;  %v13162_v55 = vld [vmem:[#allocation72_spill] sm:$0xff] }
 0x160   : > { %v7417_v0 = vunpack.i.h.bf16 %v7415_v44  ;;  %v7416_v61 = vunpack.i.l.bf16 %v7415_v44  ;;  %v7421_v17 = vunpack.i.l.bf16 %v7420_v56  ;;  %v2013_v36 = vsel %vm2008_vm6, %v9709_v12, %v7196_v32  ;;  %v13164_v32 = vld [vmem:[#allocation83_spill] sm:$0xff] }
 0x161   : > { %v2072_v22 = vsel %vm2041_vm7, %v2039_v5, %v7341_v26  ;;  %v2073_v23 = vsel %vm2041_vm7, %v2040_v62, %v7342_v43  ;;  %v7212_v44 = vunpack.i.h.bf16 %v13162_v55  ;;  %v13163_v4 = vunpack.i.h.bf16 %v13157_v53  ;;  %v13165_v26 = vld [vmem:[#allocation84_spill] sm:$0xff]  ;;  %v13166_v62 = vld [vmem:[#allocation73_spill] sm:$0xff] }
 0x162   : > { %v9917_v48 = vsel %vm2074_vm8, %v2070_v1, %v7416_v61  ;;  %v9920_v49 = vsel %vm2074_vm8, %v2071_v21, %v7417_v0  ;;  %v7211_v0 = vunpack.i.l.bf16 %v13162_v55  ;;  %v9932_v2 = vsel %vm2074_vm8, %v2072_v22, %v7421_v17  ;;  %v7430_v1 = vpop.permute.xlu1 %7429 }
 0x163   : > { %v7425_v31 = vpop.permute.xlu0 %7424  ;;  %v9935_v38 = vsel %vm2074_vm8, %v2073_v23, %v7422_v15  ;;  %v2014_v12 = vsel %vm2008_vm6, %v9703_v9, %v13163_v4  ;;  %v7267_v37 = vunpack.i.h.bf16 %v13164_v32  ;;  %v7266_v43 = vunpack.i.l.bf16 %v13164_v32  ;;  %v13168_v32 = vld [vmem:[#allocation86_spill] sm:$0xff] }
 0x164   : > { %v7271_v61 = vunpack.i.l.bf16 %v13165_v26  ;;  %v9946_v21 = vsel %vm2008_vm6, %v9730_v11, %v7201_v58  ;;  %v9954_v53 = vsel %vm2008_vm6, %v9736_v30, %v7206_v18  ;;  %v7272_v9 = vunpack.i.h.bf16 %v13165_v26  ;;  %v13167_v58 = vld [vmem:[#allocation85_spill] sm:$0xff] }
 0x165   : > { %v9961_v5 = vsel %vm2008_vm6, %v9747_v51, %v7207_v59  ;;  %v7277_v15 = vunpack.i.h.bf16 %v13167_v58  ;;  %v7276_v41 = vunpack.i.l.bf16 %v13167_v58  ;;  %v9968_v8 = vsel %vm2008_vm6, %v9759_v46, %v7211_v0 }
 0x166   : > { %v9972_v30 = vsel %vm2008_vm6, %v9753_v13, %v7212_v44  ;;  %v7346_v17 = vunpack.i.l.bf16 %v9405_v63  ;;  %v2042_v51 = vsel %vm2041_vm7, %v9855_v3, %v7266_v43  ;;  %v2043_v59 = vsel %vm2041_vm7, %v9863_v33, %v7267_v37  ;;  %v9983_v23 = vpop.permute.xlu1 %7439 }
 0x167   : > { %v9957_v56 = vpop.permute.xlu0 %7434  ;;  %v2044_v22 = vsel %vm2041_vm7, %v9870_v28, %v7271_v61  ;;  %v7347_v46 = vunpack.i.h.bf16 %v9405_v63  ;;  %v2045_v13 = vsel %vm2041_vm7, %v9877_v7, %v7272_v9  ;;  %v7351_v55 = vunpack.i.l.bf16 %v9451_v50 }
 0x168   : > { %v7427_v44 = vunpack.i.h.bf16 %v7425_v31  ;;  %v7426_v0 = vunpack.i.l.bf16 %v7425_v31  ;;  %v2046_v3 = vsel %vm2041_vm7, %v2013_v36, %v7276_v41  ;;  %v2047_v33 = vsel %vm2041_vm7, %v2014_v12, %v7277_v15 }
 0x169   : > { %v7282_v37 = vunpack.i.h.bf16 %v13168_v32  ;;  %v7281_v28 = vunpack.i.l.bf16 %v13168_v32  ;;  %v2075_v63 = vsel %vm2074_vm8, %v2042_v51, %v7346_v17  ;;  %v7352_v43 = vunpack.i.h.bf16 %v9451_v50 }
 0x16a   : > { %v2076_v7 = vsel %vm2074_vm8, %v2043_v59, %v7347_v46  ;;  %v7357_v9 = vunpack.i.h.bf16 %v9469_v25  ;;  %v7356_v31 = vunpack.i.l.bf16 %v9469_v25  ;;  %v7431_v58 = vunpack.i.l.bf16 %v7430_v1  ;;  %v7450_v36 = vpop.permute.xlu1 %7449 }
 0x16b   : > { %v7445_v4 = vpop.permute.xlu0 %7444  ;;  %v2077_v12 = vsel %vm2074_vm8, %v2044_v22, %v7351_v55  ;;  %v7432_v15 = vunpack.i.h.bf16 %v7430_v1  ;;  %v2108_v32 = vsel %vm2107_vm9, %v2075_v63, %v7426_v0  ;;  %v2109_v17 = vsel %vm2107_vm9, %v2076_v7, %v7427_v44 }
 0x16c   : > { %v7447_v26 = vunpack.i.h.bf16 %v7445_v4  ;;  %v7446_v61 = vunpack.i.l.bf16 %v7445_v4  ;;  %v7452_v51 = vunpack.i.h.bf16 %v7450_v36  ;;  %v7451_v50 = vunpack.i.l.bf16 %v7450_v36 }
 0x16d   : > { %v2078_v59 = vsel %vm2074_vm8, %v2045_v13, %v7352_v43  ;;  %v7437_v46 = vunpack.i.h.bf16 %v9957_v56  ;;  %v2110_v22 = vsel %vm2107_vm9, %v2077_v12, %v7431_v58  ;;  %v7436_v1 = vunpack.i.l.bf16 %v9957_v56 }
 0x16e   : > { %v2141_v25 = vsel %vm2140_vm10, %v2108_v32, %v7446_v61  ;;  %v2142_v18 = vsel %vm2140_vm10, %v2109_v17, %v7447_v26  ;;  %v7460_v55 = vpop.permute.xlu1 %7459  ;;  %v2111_v63 = vsel %vm2107_vm9, %v2078_v59, %v7432_v15  ;;  %v7361_v61 = vunpack.i.l.bf16 %v9712_v6 }
 0x16f   : > { %v7455_v41 = vpop.permute.xlu0 %7454  ;;  %v7462_v7 = vunpack.i.h.bf16 %v7460_v55  ;;  %v7461_v36 = vunpack.i.l.bf16 %v7460_v55  ;;  %v2143_v26 = vsel %vm2140_vm10, %v2110_v22, %v7451_v50  ;;  %v2144_v58 = vsel %vm2140_vm10, %v2111_v63, %v7452_v51 }
 0x170   : > { %v7457_v11 = vunpack.i.h.bf16 %v7455_v41  ;;  %v7456_v4 = vunpack.i.l.bf16 %v7455_v41  ;;  %v2079_v41 = vsel %vm2074_vm8, %v2046_v3, %v7356_v31  ;;  %v7362_v15 = vunpack.i.h.bf16 %v9712_v6 }
 0x171   : > { %v2176_v56 = vsel %vm2173_vm11, %v2143_v26, %v7461_v36  ;;  %v2177_v12 = vsel %vm2173_vm11, %v2144_v58, %v7462_v7  ;;  %v7441_v3 = vunpack.i.l.bf16 %v9983_v23  ;;  %v2048_v50 = vsel %vm2041_vm7, %v9946_v21, %v7281_v28 }
 0x172   : > { %v2174_v0 = vsel %vm2173_vm11, %v2141_v25, %v7456_v4  ;;  %v2175_v44 = vsel %vm2173_vm11, %v2142_v18, %v7457_v11  ;;  %v2080_v18 = vsel %vm2074_vm8, %v2047_v33, %v7357_v9  ;;  %v7470_v31 = vpop.permute.xlu1 %7469  ;;  %v2207_v17 = vpack.c.bf16 %v2177_v12, %v2176_v56 }
 0x173   : > { %v7465_v13 = vpop.permute.xlu0 %7464  ;;  %v2206_v43 = vpack.c.bf16 %v2175_v44, %v2174_v0  ;;  %v2112_v51 = vsel %vm2107_vm9, %v2079_v41, %v7436_v1  ;;  %v2113_v4 = vsel %vm2107_vm9, %v2080_v18, %v7437_v46  ;;  %v7442_v59 = vunpack.i.h.bf16 %v9983_v23 }
 0x174   : > { %v7467_v32 = vunpack.i.h.bf16 %v7465_v13  ;;  %v7466_v11 = vunpack.i.l.bf16 %v7465_v13  ;;  %v7472_v22 = vunpack.i.h.bf16 %v7470_v31  ;;  %v7471_v55 = vunpack.i.l.bf16 %v7470_v31 }
 0x175   : > { %6884 = vmatprep.mubr.msk.bf16.mxu0 %vm2249_vm12, %v2206_v43  ;;  %v2049_v6 = vsel %vm2041_vm7, %v9950_v40, %v7282_v37  ;;  %v2081_v9 = vsel %vm2074_vm8, %v2048_v50, %v7361_v61  ;;  %v13169_v43 = vld [vmem:[#allocation87_spill] sm:$0xff]  ;;  %v13170_v56 = vunpack.i.l.bf16 %v13166_v62  ;;  %v7366_v50 = vunpack.i.l.bf16 %v9718_v19 }
 0x176   : > { %6885 = vmatmul.mubr.msk.bf16.vlgmr.msra.gmra.mrb[0].mxu0 %vm2249_vm12, %v2207_v17  ;;  %v2145_v21 = vsel %vm2140_vm10, %v2112_v51, %v7466_v11  ;;  %v2146_v28 = vsel %vm2140_vm10, %v2113_v4, %v7467_v32  ;;  %v2082_v46 = vsel %vm2074_vm8, %v2049_v6, %v7362_v15  ;;  %v2114_v23 = vsel %vm2107_vm9, %v2081_v9, %v7441_v3  ;;  %v7480_v63 = vpop.permute.xlu1 %7479  ;;  %v13172_v3 = vld [vmem:[#allocation74_spill] sm:$0xff]  ;;  %v13173_v4 = vld [vmem:[#allocation88_spill] sm:$0xff] }
 0x177   : > { %v7475_v25 = vpop.permute.xlu0 %7474  ;;  %v2115_v7 = vsel %vm2107_vm9, %v2082_v46, %v7442_v59  ;;  %v7482_v36 = vunpack.i.h.bf16 %v7480_v63  ;;  %v7481_v13 = vunpack.i.l.bf16 %v7480_v63  ;;  %v7287_v41 = vunpack.i.h.bf16 %v13169_v43 }
 0x178   : > { %v7477_v0 = vunpack.i.h.bf16 %v7475_v25  ;;  %v7476_v33 = vunpack.i.l.bf16 %v7475_v25  ;;  %v7286_v61 = vunpack.i.l.bf16 %v13169_v43  ;;  %v2147_v26 = vsel %vm2140_vm10, %v2114_v23, %v7471_v55  ;;  %v13174_v55 = vld [vmem:[#allocation75_spill] sm:$0xff] }
 0x179   : > { %v2148_v58 = vsel %vm2140_vm10, %v2115_v7, %v7472_v22  ;;  %v10043_v12 = vsel %vm2008_vm6, %v9766_v45, %v13170_v56  ;;  %v13171_v32 = vunpack.i.h.bf16 %v13166_v62  ;;  %v2180_v18 = vsel %vm2173_vm11, %v2147_v26, %v7481_v13 }
 0x17a   : > { %v2178_v1 = vsel %vm2173_vm11, %v2145_v21, %v7476_v33  ;;  %v2179_v44 = vsel %vm2173_vm11, %v2146_v28, %v7477_v0  ;;  %v2181_v15 = vsel %vm2173_vm11, %v2148_v58, %v7482_v36  ;;  %v7222_v31 = vunpack.i.h.bf16 %v13172_v3  ;;  %v7490_v45 = vpop.permute.xlu1 %7489 }
 0x17b   : > { %v7485_v40 = vpop.permute.xlu0 %7484  ;;  %v2208_v37 = vpack.c.bf16 %v2179_v44, %v2178_v1  ;;  %v10049_v11 = vsel %vm2008_vm6, %v9775_v54, %v13171_v32  ;;  %v7367_v17 = vunpack.i.h.bf16 %v9718_v19  ;;  %v2209_v51 = vpack.c.bf16 %v2181_v15, %v2180_v18 }
 0x17c   : > { %v7221_v62 = vunpack.i.l.bf16 %v13172_v3  ;;  %v7291_v59 = vunpack.i.l.bf16 %v13173_v4  ;;  %v7487_v54 = vunpack.i.h.bf16 %v7485_v40  ;;  %v7486_v25 = vunpack.i.l.bf16 %v7485_v40 }
 0x17d   : > { %6888 = vmatprep.mubr.msk.bf16.mxu0 %vm2249_vm12, %v2208_v37  ;;  %v7227_v0 = vunpack.i.h.bf16 %v13174_v55  ;;  %v7226_v33 = vunpack.i.l.bf16 %v13174_v55  ;;  %v2050_v6 = vsel %vm2041_vm7, %v9954_v53, %v7286_v61  ;;  %v2051_v9 = vsel %vm2041_vm7, %v9961_v5, %v7287_v41 }
 0x17e   : > { %6889 = vmatmul.mubr.msk.bf16.gmra.mrb[4].mxu0 %vm2249_vm12, %v2209_v51  ;;  %v7292_v19 = vunpack.i.h.bf16 %v13173_v4  ;;  %v7371_v21 = vunpack.i.l.bf16 %v9771_v47  ;;  %v2083_v23 = vsel %vm2074_vm8, %v2050_v6, %v7366_v50  ;;  %v2084_v1 = vsel %vm2074_vm8, %v2051_v9, %v7367_v17  ;;  %v7500_v7 = vpop.permute.xlu1 %7499  ;;  %v13175_v4 = vld [vmem:[#allocation89_spill] sm:$0xff] }
 0x17f   : > { %v7495_v22 = vpop.permute.xlu0 %7494  ;;  %v7372_v44 = vunpack.i.h.bf16 %v9771_v47  ;;  %v7491_v63 = vunpack.i.l.bf16 %v7490_v45  ;;  %v2052_v53 = vsel %vm2041_vm7, %v9968_v8, %v7291_v59  ;;  %v2116_v5 = vsel %vm2107_vm9, %v2083_v23, %v7486_v25 }
 0x180   : > { %v7497_v28 = vunpack.i.h.bf16 %v7495_v22  ;;  %v7496_v46 = vunpack.i.l.bf16 %v7495_v22  ;;  %v2117_v36 = vsel %vm2107_vm9, %v2084_v1, %v7487_v54  ;;  %v7492_v13 = vunpack.i.h.bf16 %v7490_v45 }
 0x181   : > { %v7502_v37 = vunpack.i.h.bf16 %v7500_v7  ;;  %v7501_v43 = vunpack.i.l.bf16 %v7500_v7  ;;  %v2053_v26 = vsel %vm2041_vm7, %v9972_v30, %v7292_v19  ;;  %v2085_v47 = vsel %vm2074_vm8, %v2052_v53, %v7371_v21  ;;  %v13177_v7 = vld [vmem:[#allocation76_spill] sm:$0xff] }
 0x182   : > { %v2149_v58 = vsel %vm2140_vm10, %v2116_v5, %v7496_v46  ;;  %v2150_v56 = vsel %vm2140_vm10, %v2117_v36, %v7497_v28  ;;  %v2086_v8 = vsel %vm2074_vm8, %v2053_v26, %v7372_v44  ;;  %v2118_v32 = vsel %vm2107_vm9, %v2085_v47, %v7491_v63  ;;  %v7510_v3 = vpop.permute.xlu1 %7509 }
 0x183   : > { %v7505_v40 = vpop.permute.xlu0 %7504  ;;  %v2119_v17 = vsel %vm2107_vm9, %v2086_v8, %v7492_v13  ;;  %v7512_v50 = vunpack.i.h.bf16 %v7510_v3  ;;  %v7511_v45 = vunpack.i.l.bf16 %v7510_v3  ;;  %v7297_v59 = vunpack.i.h.bf16 %v13175_v4 }
 0x184   : > { %v7507_v41 = vunpack.i.h.bf16 %v7505_v40  ;;  %v7506_v61 = vunpack.i.l.bf16 %v7505_v40  ;;  %v7296_v54 = vunpack.i.l.bf16 %v13175_v4  ;;  %v2151_v25 = vsel %vm2140_vm10, %v2118_v32, %v7501_v43 }
 0x185   : > { %v2152_v22 = vsel %vm2140_vm10, %v2119_v17, %v7502_v37  ;;  %v2023_v55 = vsel %vm2008_vm6, %v9783_v16, %v7221_v62  ;;  %v2024_v6 = vsel %vm2008_vm6, %v9779_v52, %v7222_v31  ;;  %v2184_v9 = vsel %vm2173_vm11, %v2151_v25, %v7511_v45  ;;  %v13176_v52 = vld [vmem:[#allocation90_spill] sm:$0xff] }
 0x186   : > { %v2182_v18 = vsel %vm2173_vm11, %v2149_v58, %v7506_v61  ;;  %v2183_v15 = vsel %vm2173_vm11, %v2150_v56, %v7507_v41  ;;  %v2185_v19 = vsel %vm2173_vm11, %v2152_v22, %v7512_v50  ;;  %v10098_v21 = vsel %vm2008_vm6, %v9787_v20, %v7226_v33  ;;  %v7520_v23 = vpop.permute.xlu1 %7519 }
 0x187   : > { %v7515_v30 = vpop.permute.xlu0 %7514  ;;  %v2210_v51 = vpack.c.bf16 %v2183_v15, %v2182_v18  ;;  %v7377_v28 = vunpack.i.h.bf16 %v9789_v34  ;;  %v7376_v46 = vunpack.i.l.bf16 %v9789_v34  ;;  %v2211_v1 = vpack.c.bf16 %v2185_v19, %v2184_v9 }
 0x188   : > { %v10104_v16 = vsel %vm2008_vm6, %v9793_v10, %v7227_v0  ;;  %v7301_v31 = vunpack.i.l.bf16 %v13176_v52  ;;  %v7517_v62 = vunpack.i.h.bf16 %v7515_v30  ;;  %v7516_v44 = vunpack.i.l.bf16 %v7515_v30 }
 0x189   : > { %6892 = vmatprep.mubr.msk.bf16.mxu0 %vm2249_vm12, %v2210_v51  ;;  %v7232_v53 = vunpack.i.h.bf16 %v13177_v7  ;;  %v7231_v20 = vunpack.i.l.bf16 %v13177_v7  ;;  %v2054_v33 = vsel %vm2041_vm7, %v10043_v12, %v7296_v54  ;;  %v2055_v34 = vsel %vm2041_vm7, %v10049_v11, %v7297_v59 }
 0x18a   : > { %6893 = vmatmul.mubr.msk.bf16.gmra.mrb[8].mxu0 %vm2249_vm12, %v2211_v1  ;;  %v7302_v10 = vunpack.i.h.bf16 %v13176_v52  ;;  %v7381_v0 = vunpack.i.l.bf16 %v9822_v24  ;;  %v2087_v13 = vsel %vm2074_vm8, %v2054_v33, %v7376_v46  ;;  %v2088_v40 = vsel %vm2074_vm8, %v2055_v34, %v7377_v28  ;;  %v7530_v41 = vpop.permute.xlu1 %7529  ;;  %v13179_v46 = vld [vmem:[#allocation77_spill] sm:$0xff] }
 0x18b   : > { %v7525_v63 = vpop.permute.xlu0 %7524  ;;  %v7382_v37 = vunpack.i.h.bf16 %v9822_v24  ;;  %v7521_v43 = vunpack.i.l.bf16 %v7520_v23  ;;  %v2056_v12 = vsel %vm2041_vm7, %v2023_v55, %v7301_v31  ;;  %v2120_v11 = vsel %vm2107_vm9, %v2087_v13, %v7516_v44  ;;  %v13178_v55 = vld [vmem:[#allocation91_spill] sm:$0xff] }
 0x18c   : > { %v7527_v5 = vunpack.i.h.bf16 %v7525_v63  ;;  %v7526_v36 = vunpack.i.l.bf16 %v7525_v63  ;;  %v2121_v61 = vsel %vm2107_vm9, %v2088_v40, %v7517_v62  ;;  %v7522_v26 = vunpack.i.h.bf16 %v7520_v23  ;;  %v13181_v40 = vld [vmem:[#allocation78_spill] sm:$0xff] }
 0x18d   : > { %v7532_v58 = vunpack.i.h.bf16 %v7530_v41  ;;  %v7531_v56 = vunpack.i.l.bf16 %v7530_v41  ;;  %v2057_v18 = vsel %vm2041_vm7, %v2024_v6, %v7302_v10  ;;  %v2089_v15 = vsel %vm2074_vm8, %v2056_v12, %v7381_v0  ;;  %v13180_v10 = vld [vmem:[#allocation92_spill] sm:$0xff] }
 0x18e   : > { %v2153_v24 = vsel %vm2140_vm10, %v2120_v11, %v7526_v36  ;;  %v2154_v3 = vsel %vm2140_vm10, %v2121_v61, %v7527_v5  ;;  %v2090_v17 = vsel %vm2074_vm8, %v2057_v18, %v7382_v37  ;;  %v2122_v50 = vsel %vm2107_vm9, %v2089_v15, %v7521_v43  ;;  %v7540_v51 = vpop.permute.xlu1 %7539 }
 0x18f   : > { %v7535_v47 = vpop.permute.xlu0 %7534  ;;  %v2123_v4 = vsel %vm2107_vm9, %v2090_v17, %v7522_v26  ;;  %v7542_v59 = vunpack.i.h.bf16 %v7540_v51  ;;  %v7541_v54 = vunpack.i.l.bf16 %v7540_v51  ;;  %v7307_v6 = vunpack.i.h.bf16 %v13178_v55 }
 0x190   : > { %v7537_v8 = vunpack.i.h.bf16 %v7535_v47  ;;  %v7536_v32 = vunpack.i.l.bf16 %v7535_v47  ;;  %v7306_v9 = vunpack.i.l.bf16 %v13178_v55  ;;  %v2155_v19 = vsel %vm2140_vm10, %v2122_v50, %v7531_v56 }
 0x191   : > { %v2156_v28 = vsel %vm2140_vm10, %v2123_v4, %v7532_v58  ;;  %v7237_v23 = vunpack.i.h.bf16 %v13179_v46  ;;  %v7236_v1 = vunpack.i.l.bf16 %v13179_v46  ;;  %v2188_v52 = vsel %vm2173_vm11, %v2155_v19, %v7541_v54 }
 0x192   : > { %v2186_v45 = vsel %vm2173_vm11, %v2153_v24, %v7536_v32  ;;  %v2187_v30 = vsel %vm2173_vm11, %v2154_v3, %v7537_v8  ;;  %v2189_v31 = vsel %vm2173_vm11, %v2156_v28, %v7542_v59  ;;  %v2027_v62 = vsel %vm2008_vm6, %v9811_v39, %v7231_v20  ;;  %v7550_v7 = vpop.permute.xlu1 %7549  ;;  %v13183_v28 = vld [vmem:[#allocation93_spill] sm:$0xff] }
 0x193   : > { %v7545_v25 = vpop.permute.xlu0 %7544  ;;  %v2212_v22 = vpack.c.bf16 %v2187_v30, %v2186_v45  ;;  %v7387_v44 = vunpack.i.h.bf16 %v9828_v14  ;;  %v7386_v63 = vunpack.i.l.bf16 %v9828_v14  ;;  %v2213_v33 = vpack.c.bf16 %v2189_v31, %v2188_v52 }
 0x194   : > { %v2028_v34 = vsel %vm2008_vm6, %v9804_v57, %v7232_v53  ;;  %v7311_v0 = vunpack.i.l.bf16 %v13180_v10  ;;  %v7547_v5 = vunpack.i.h.bf16 %v7545_v25  ;;  %v7546_v36 = vunpack.i.l.bf16 %v7545_v25  ;;  %v13182_v57 = vld [vmem:[#allocation43_spill] sm:$0xff] }
 0x195   : > { %6896 = vmatprep.mubr.msk.bf16.mxu0 %vm2249_vm12, %v2212_v22  ;;  %v7242_v37 = vunpack.i.h.bf16 %v13181_v40  ;;  %v7241_v43 = vunpack.i.l.bf16 %v13181_v40  ;;  %v2058_v39 = vsel %vm2041_vm7, %v10098_v21, %v7306_v9  ;;  %v2059_v14 = vsel %vm2041_vm7, %v10104_v16, %v7307_v6  ;;  %v13189_v40 = vld [vmem:[#allocation41_spill] sm:$0xff] }
 0x196   : > { %6897 = vmatmul.mubr.msk.bf16.gmra.mrb[12].mxu0 %vm2249_vm12, %v2213_v33  ;;  %v7312_v20 = vunpack.i.h.bf16 %v13180_v10  ;;  %v7391_v53 = vunpack.i.l.bf16 %v13182_v57  ;;  %v2091_v11 = vsel %vm2074_vm8, %v2058_v39, %v7386_v63  ;;  %v2092_v61 = vsel %vm2074_vm8, %v2059_v14, %v7387_v44  ;;  %v7560_v58 = vpop.permute.xlu1 %7559  ;;  %v13184_v63 = vld [vmem:[#allocation62_spill] sm:$0xff]  ;;  %v13186_v33 = vld [vmem:[#allocation39_spill] sm:$0xff] }
 0x197   : > { %v7555_v13 = vpop.permute.xlu0 %7554  ;;  %v7392_v26 = vunpack.i.h.bf16 %v13182_v57  ;;  %v7551_v47 = vunpack.i.l.bf16 %v7550_v7  ;;  %v2060_v21 = vsel %vm2041_vm7, %v2027_v62, %v7311_v0  ;;  %v7552_v56 = vunpack.i.h.bf16 %v7550_v7  ;;  %v13188_v0 = vld [vmem:[#allocation38_spill] sm:$0xff] }
 0x198   : > { %v7557_v41 = vunpack.i.h.bf16 %v7555_v13  ;;  %v7556_v12 = vunpack.i.l.bf16 %v7555_v13  ;;  %v2124_v8 = vsel %vm2107_vm9, %v2091_v11, %v7546_v36  ;;  %v2125_v32 = vsel %vm2107_vm9, %v2092_v61, %v7547_v5  ;;  %v13190_v14 = vld [vmem:[#allocation42_spill] sm:$0xff] }
 0x199   : > { %v7562_v18 = vunpack.i.h.bf16 %v7560_v58  ;;  %v7561_v15 = vunpack.i.l.bf16 %v7560_v58  ;;  %v2061_v17 = vsel %vm2041_vm7, %v2028_v34, %v7312_v20  ;;  %v2093_v50 = vsel %vm2074_vm8, %v2060_v21, %v7391_v53  ;;  %v13192_v61 = vld [vmem:[#allocation94_spill] sm:$0xff] }
 0x19a   : > { %v2157_v45 = vsel %vm2140_vm10, %v2124_v8, %v7556_v12  ;;  %v2158_v30 = vsel %vm2140_vm10, %v2125_v32, %v7557_v41  ;;  %v2094_v51 = vsel %vm2074_vm8, %v2061_v17, %v7392_v26  ;;  %v2126_v4 = vsel %vm2107_vm9, %v2093_v50, %v7551_v47  ;;  %v7570_v59 = vpop.permute.xlu1 %7569  ;;  %v13191_v12 = vld [vmem:[#allocation40_spill] sm:$0xff] }
 0x19b   : > { %v7565_v16 = vpop.permute.xlu0 %7564  ;;  %v2127_v22 = vsel %vm2107_vm9, %v2094_v51, %v7552_v56  ;;  %v7572_v55 = vunpack.i.h.bf16 %v7570_v59  ;;  %v7571_v6 = vunpack.i.l.bf16 %v7570_v59  ;;  %v7317_v52 = vunpack.i.h.bf16 %v13183_v28 }
 0x19c   : > { %v7567_v24 = vunpack.i.h.bf16 %v7565_v16  ;;  %v7566_v3 = vunpack.i.l.bf16 %v7565_v16  ;;  %v7316_v31 = vunpack.i.l.bf16 %v13183_v28  ;;  %v2159_v62 = vsel %vm2140_vm10, %v2126_v4, %v7561_v15 }
 0x19d   : > { %v2160_v44 = vsel %vm2140_vm10, %v2127_v22, %v7562_v18  ;;  %v13185_v7 = vunpack.i.h.bf16 %v13184_v63  ;;  %v13187_v10 = vunpack.i.l.bf16 %v13184_v63  ;;  %v2192_v36 = vsel %vm2173_vm11, %v2159_v62, %v7571_v6 }
 0x19e   : > { %v2190_v54 = vsel %vm2173_vm11, %v2157_v45, %v7566_v3  ;;  %v2191_v25 = vsel %vm2173_vm11, %v2158_v30, %v7567_v24  ;;  %v2193_v13 = vsel %vm2173_vm11, %v2160_v44, %v7572_v55  ;;  %v2029_v39 = vsel %vm2008_vm6, %v13189_v40, %v7236_v1  ;;  %v7580_v53 = vpop.permute.xlu1 %7579 }
 0x19f   : > { %v7575_v9 = vpop.permute.xlu0 %7574  ;;  %v2214_v19 = vpack.c.bf16 %v2191_v25, %v2190_v54  ;;  %v1999_v34 = vsel %vm434_vm3, %v13186_v33, %v13185_v7  ;;  %v1998_v5 = vsel %vm434_vm3, %v13188_v0, %v13187_v10  ;;  %v7397_v20 = vunpack.i.h.bf16 %v13190_v14 }
 0x1a0   : > { %v7396_v57 = vunpack.i.l.bf16 %v13190_v14  ;;  %v2215_v41 = vpack.c.bf16 %v2193_v13, %v2192_v36  ;;  %v2030_v11 = vsel %vm2008_vm6, %v13191_v12, %v7237_v23  ;;  %v7321_v26 = vunpack.i.l.bf16 %v13192_v61 }
 0x1a1   : > { %6900 = vmatprep.mubr.msk.bf16.mxu1 %vm2249_vm12, %v2214_v19  ;;  %v7577_v47 = vunpack.i.h.bf16 %v7575_v9  ;;  %v7576_v58 = vunpack.i.l.bf16 %v7575_v9  ;;  %v2031_v56 = vsel %vm2008_vm6, %v1998_v5, %v7241_v43  ;;  %v2032_v1 = vsel %vm2008_vm6, %v1999_v34, %v7242_v37 }
 0x1a2   : > { %v2062_v16 = vsel %vm2041_vm7, %v2029_v39, %v7316_v31  ;;  %v2063_v8 = vsel %vm2041_vm7, %v2030_v11, %v7317_v52  ;;  %6901 = vmatmul.mubr.msk.bf16.vlgmr.msra.gmra.mrb[0].mxu1 %vm2249_vm12, %v2215_v41  ;;  %v7322_v46 = vunpack.i.h.bf16 %v13192_v61  ;;  %v7401_v32 = vunpack.i.l.bf16 %v9882_v42  ;;  %v7590_v37 = vpop.permute.xlu1 %7589 }
 0x1a3   : > { %v7585_v21 = vpop.permute.xlu0 %7584  ;;  %v2095_v15 = vsel %vm2074_vm8, %v2062_v16, %v7396_v57  ;;  %v2096_v24 = vsel %vm2074_vm8, %v2063_v8, %v7397_v20  ;;  %v7402_v43 = vunpack.i.h.bf16 %v9882_v42  ;;  %v7581_v3 = vunpack.i.l.bf16 %v7580_v53 }
 0x1a4   : > { %v7587_v23 = vunpack.i.h.bf16 %v7585_v21  ;;  %v7586_v18 = vunpack.i.l.bf16 %v7585_v21  ;;  %v2064_v17 = vsel %vm2041_vm7, %v2031_v56, %v7321_v26  ;;  %v2128_v50 = vsel %vm2107_vm9, %v2095_v15, %v7576_v58 }
 0x1a5   : > { %v2129_v45 = vsel %vm2107_vm9, %v2096_v24, %v7577_v47  ;;  %v7582_v30 = vunpack.i.h.bf16 %v7580_v53  ;;  %v7592_v4 = vunpack.i.h.bf16 %v7590_v37  ;;  %v7591_v59 = vunpack.i.l.bf16 %v7590_v37 }
 0x1a6   : > { %v2065_v22 = vsel %vm2041_vm7, %v2032_v1, %v7322_v46  ;;  %v2097_v55 = vsel %vm2074_vm8, %v2064_v17, %v7401_v32  ;;  %v2161_v42 = vsel %vm2140_vm10, %v2128_v50, %v7586_v18  ;;  %v2162_v6 = vsel %vm2140_vm10, %v2129_v45, %v7587_v23  ;;  %v7600_v31 = vpop.permute.xlu1 %7599 }
 0x1a7   : > { %v7595_v51 = vpop.permute.xlu0 %7594  ;;  %v2098_v9 = vsel %vm2074_vm8, %v2065_v22, %v7402_v43  ;;  %v2130_v19 = vsel %vm2107_vm9, %v2097_v55, %v7581_v3  ;;  %v7602_v44 = vunpack.i.h.bf16 %v7600_v31  ;;  %v7601_v63 = vunpack.i.l.bf16 %v7600_v31 }
 0x1a8   : > { %v7597_v54 = vunpack.i.h.bf16 %v7595_v51  ;;  %v7596_v25 = vunpack.i.l.bf16 %v7595_v51  ;;  %v2131_v62 = vsel %vm2107_vm9, %v2098_v9, %v7582_v30  ;;  %v2163_v34 = vsel %vm2140_vm10, %v2130_v19, %v7591_v59 }
 0x1a9   : > { %v2164_v10 = vsel %vm2140_vm10, %v2131_v62, %v7592_v4  ;;  %v2196_v0 = vsel %vm2173_vm11, %v2163_v34, %v7601_v63 }
 0x1aa   : > { %v2194_v28 = vsel %vm2173_vm11, %v2161_v42, %v7596_v25  ;;  %v2195_v52 = vsel %vm2173_vm11, %v2162_v6, %v7597_v54  ;;  %v2197_v5 = vsel %vm2173_vm11, %v2164_v10, %v7602_v44  ;;  %v7610_v36 = vpop.permute.xlu1 %7609 }
 0x1ab   : > { %v7605_v7 = vpop.permute.xlu0 %7604  ;;  %v2216_v33 = vpack.c.bf16 %v2195_v52, %v2194_v28  ;;  %v2217_v13 = vpack.c.bf16 %v2197_v5, %v2196_v0  ;;  %v7611_v53 = vunpack.i.l.bf16 %v7610_v36  ;;  %v7612_v61 = vunpack.i.h.bf16 %v7610_v36 }
 0x1ac   : > { %v7607_v40 = vunpack.i.h.bf16 %v7605_v7  ;;  %v7606_v39 = vunpack.i.l.bf16 %v7605_v7 }
 0x1ad   : > { %6904 = vmatprep.mubr.msk.bf16.mxu1 %vm2249_vm12, %v2216_v33  ;;  %v2134_v8 = vsel %vm2107_vm9, %v9909_v27, %v7611_v53  ;;  %v10282_v53 = vld [vmem:[%s12906_s2] ss:$0 sm:$0xff] }
 0x1ae   : > { %6905 = vmatmul.mubr.msk.bf16.gmra.mrb[4].mxu1 %vm2249_vm12, %v2217_v13  ;;  %v7620_v41 = vpop.permute.xlu1 %7619  ;;  %v2132_v12 = vsel %vm2107_vm9, %v9897_v35, %v7606_v39  ;;  %v2133_v11 = vsel %vm2107_vm9, %v9900_v29, %v7607_v40  ;;  %v2135_v29 = vsel %vm2107_vm9, %v9912_v60, %v7612_v61  ;;  %v13193_v13 = vmov 0.0   ;;  %v2496_v61 = vld [vmem:[#allocation3] sm:$0xff] }
 0x1af   : > { %v7615_v14 = vpop.permute.xlu0 %7614  ;;  %v7622_v47 = vunpack.i.h.bf16 %v7620_v41  ;;  %v7621_v58 = vunpack.i.l.bf16 %v7620_v41  ;;  %438 = vst.msk [vmem:[#allocation3 + $0x10] sm:$0x3] %vm437_vm13, %v13193_v13  ;;  %442 = vst.msk [vmem:[#allocation3 + $0x1a8] sm:$0x3] %vm437_vm13, %v13193_v13  ;;  %v10287_v41 = vld [vmem:[%s12907_s3] ss:$0 sm:$0xff] }
 0x1b0   : > { %v7617_v20 = vunpack.i.h.bf16 %v7615_v14  ;;  %v7616_v57 = vunpack.i.l.bf16 %v7615_v14  ;;  %482 = vst.msk [vmem:[#allocation4 + $0x10] sm:$0x3] %vm437_vm13, %v13193_v13  ;;  %486 = vst.msk [vmem:[#allocation4 + $0x1a8] sm:$0x3] %vm437_vm13, %v13193_v13  ;;  %v3568_v14 = vld [vmem:[#allocation4 + $0x2] sm:$0xff] }
 0x1b1   : > { %v2167_v43 = vsel %vm2140_vm10, %v2134_v8, %v7621_v58  ;;  %v2168_v3 = vsel %vm2140_vm10, %v2135_v29, %v7622_v47  ;;  %525 = vst.msk [vmem:[#allocation5 + $0x10] sm:$0x3] %vm437_vm13, %v13193_v13  ;;  %529 = vst.msk [vmem:[#allocation5 + $0x1a8] sm:$0x3] %vm437_vm13, %v13193_v13 }
 0x1b2   : > { %v2165_v1 = vsel %vm2140_vm10, %v2132_v12, %v7616_v57  ;;  %v2166_v16 = vsel %vm2140_vm10, %v2133_v11, %v7617_v20  ;;  %v7630_v32 = vpop.permute.xlu1 %7629  ;;  %462 = vst.msk [vmem:[#allocation3 + $0x11] sm:$0x1] %vm443_vm5, %v13193_v13  ;;  %479 = vst.msk [vmem:[#allocation3 + $0x1a9] sm:$0x1] %vm443_vm5, %v13193_v13  ;;  %v10292_v11 = vld [vmem:[%s12907_s3 + $0x1] ss:$0 sm:$0xff] }
 0x1b3   : > { %v7625_v26 = vpop.permute.xlu0 %7624  ;;  %v7632_v23 = vunpack.i.h.bf16 %v7630_v32  ;;  %v7631_v18 = vunpack.i.l.bf16 %v7630_v32  ;;  %505 = vst.msk [vmem:[#allocation4 + $0x11] sm:$0x1] %vm443_vm5, %v13193_v13  ;;  %522 = vst.msk [vmem:[#allocation4 + $0x1a9] sm:$0x1] %vm443_vm5, %v13193_v13  ;;  %v10304_v32 = vld [vmem:[%s12907_s3 + $0x2] ss:$0 sm:$0xff] }
 0x1b4   : > { %v7627_v21 = vunpack.i.h.bf16 %v7625_v26  ;;  %v7626_v56 = vunpack.i.l.bf16 %v7625_v26  ;;  %548 = vst.msk [vmem:[#allocation5 + $0x11] sm:$0x1] %vm443_vm5, %v13193_v13  ;;  %565 = vst.msk [vmem:[#allocation5 + $0x1a9] sm:$0x1] %vm443_vm5, %v13193_v13  ;;  %v2567_v26 = vld [vmem:[#allocation3 + $0x1] sm:$0xff]  ;;  %vm5136_vm5 = vcmask 588800  }
 0x1b5   : > { %v2200_v37 = vsel %vm2173_vm11, %v2167_v43, %v7631_v18  ;;  %v2201_v27 = vsel %vm2173_vm11, %v2168_v3, %v7632_v23  ;;  %13194 = vst [vmem:[#allocation45_spill] sm:$0xff] %v10287_v41  ;;  %13195 = vst [vmem:[#allocation44_spill] sm:$0xff] %v10292_v11  ;;  %v2497_v23 = vld [vmem:[#allocation3 + $0x8] sm:$0xff] }
 0x1b6   : > { %v2198_v46 = vsel %vm2173_vm11, %v2165_v1, %v7626_v56  ;;  %v2199_v35 = vsel %vm2173_vm11, %v2166_v16, %v7627_v21  ;;  %v7640_v17 = vpop.permute.xlu1 %7639  ;;  %v2219_v50 = vpack.c.bf16 %v2201_v27, %v2200_v37  ;;  %v2535_v1 = vmul.f32 %v10287_v41, %v2496_v61  ;;  %v2568_v18 = vld [vmem:[#allocation3 + $0x9] sm:$0xff]  ;;  %v10315_v27 = vld [vmem:[%s12907_s3 + $0x3] ss:$0 sm:$0xff] }
 0x1b7   : > { %v7635_v15 = vpop.permute.xlu0 %7634  ;;  %v2218_v24 = vpack.c.bf16 %v2199_v35, %v2198_v46  ;;  %v7641_v59 = vunpack.i.l.bf16 %v7640_v17  ;;  %v7642_v55 = vunpack.i.h.bf16 %v7640_v17  ;;  %v3537_v40 = vld [vmem:[#allocation4 + $0x9] sm:$0xff]  ;;  %v2607_v16 = vmul.f32 %v10292_v11, %v2567_v26  ;;  %v2671_v35 = vld [vmem:[#allocation3 + $0x2] sm:$0xff] }
 0x1b8   : > { %v7637_v45 = vunpack.i.h.bf16 %v7635_v15  ;;  %v7636_v30 = vunpack.i.l.bf16 %v7635_v15  ;;  %v2536_v43 = vmul.f32 %v10287_v41, %v2497_v23  ;;  %v2608_v3 = vmul.f32 %v10292_v11, %v2568_v18 }
 0x1b9   : > { %6908 = vmatprep.mubr.msk.bf16.mxu1 %vm2249_vm12, %v2218_v24  ;;  %v2138_v62 = vsel %vm2107_vm9, %v9932_v2, %v7641_v59  ;;  %v2639_v15 = vadd.f32 %v2607_v16, %v2535_v1  ;;  %v2711_v24 = vmul.f32 %v10304_v32, %v2671_v35  ;;  %v10378_v1 = vld [vmem:[%s12907_s3 + $0x7] ss:$0 sm:$0xff] }
 0x1ba   : > { %6909 = vmatmul.mubr.msk.bf16.gmra.mrb[8].mxu1 %vm2249_vm12, %v2219_v50  ;;  %v7650_v54 = vpop.permute.xlu1 %7649  ;;  %v2136_v25 = vsel %vm2107_vm9, %v9917_v48, %v7636_v30  ;;  %v2137_v22 = vsel %vm2107_vm9, %v9920_v49, %v7637_v45  ;;  %v2139_v49 = vsel %vm2107_vm9, %v9935_v38, %v7642_v55  ;;  %v3536_v38 = vld [vmem:[#allocation4 + $0x1] sm:$0xff]  ;;  %v3569_v20 = vld [vmem:[#allocation4 + $0xa] sm:$0xff] }
 0x1bb   : > { %v7645_v51 = vpop.permute.xlu0 %7644  ;;  %v7652_v6 = vunpack.i.h.bf16 %v7650_v54  ;;  %v7651_v9 = vunpack.i.l.bf16 %v7650_v54  ;;  %v7663_v39 = vpack.i.bf16 %v3537_v40, %v3536_v38  ;;  %v7668_v57 = vpack.i.bf16 %v3569_v20, %v3568_v14  ;;  %v10359_v14 = vld [vmem:[%s12907_s3 + $0x5] ss:$0 sm:$0xff]  ;;  %v10364_v20 = vld [vmem:[%s12907_s3 + $0x6] ss:$0 sm:$0xff] }
 0x1bc   : > { %v7647_v60 = vunpack.i.h.bf16 %v7645_v51  ;;  %v7646_v4 = vunpack.i.l.bf16 %v7645_v51  ;;  %v2672_v51 = vld [vmem:[#allocation3 + $0xa] sm:$0xff] }
 0x1bd   : > { %v2171_v10 = vsel %vm2140_vm10, %v2138_v62, %v7651_v9  ;;  %v2172_v0 = vsel %vm2140_vm10, %v2139_v49, %v7652_v6  ;;  %7664 = vrot.lane.b32.xlu0 %v7663_v39, %s8347_s25  ;;  %v2640_v62 = vadd.f32 %v2608_v3, %v2536_v43 }
 0x1be   : > { %v2169_v52 = vsel %vm2140_vm10, %v2136_v25, %v7646_v4  ;;  %v2170_v31 = vsel %vm2140_vm10, %v2137_v22, %v7647_v60  ;;  %v7660_v63 = vpop.permute.xlu1 %7659  ;;  %v10329_v25 = vld [vmem:[%s12907_s3 + $0x4] ss:$0 sm:$0xff] }
 0x1bf   : > { %v7655_v42 = vpop.permute.xlu0 %7654  ;;  %v7662_v7 = vunpack.i.h.bf16 %v7660_v63  ;;  %v7661_v33 = vunpack.i.l.bf16 %v7660_v63 }
 0x1c0   : > { %v7657_v19 = vunpack.i.h.bf16 %v7655_v42  ;;  %v7656_v28 = vunpack.i.l.bf16 %v7655_v42  ;;  %v2743_v42 = vadd.f32 %v2711_v24, %v2639_v15 }
 0x1c1   : > { %v2204_v5 = vsel %vm2173_vm11, %v2171_v10, %v7661_v33  ;;  %v2205_v36 = vsel %vm2173_vm11, %v2172_v0, %v7662_v7  ;;  %7669 = vrot.lane.b32.xlu0 %v7668_v57, %s8349_s27  ;;  %v2712_v7 = vmul.f32 %v10304_v32, %v2672_v51 }
 0x1c2   : > { %v2202_v44 = vsel %vm2173_vm11, %v2169_v52, %v7656_v28  ;;  %v2203_v48 = vsel %vm2173_vm11, %v2170_v31, %v7657_v19  ;;  %v2221_v2 = vpack.c.bf16 %v2205_v36, %v2204_v5 }
 0x1c3   : > { %v2220_v34 = vpack.c.bf16 %v2203_v48, %v2202_v44 }
 0x1c5   : > { %6912 = vmatprep.mubr.msk.bf16.mxu1 %vm2249_vm12, %v2220_v34 }
 0x1c6   : > { %6913 = vmatmul.mubr.msk.bf16.gmra.mrb[12].mxu1 %vm2249_vm12, %v2221_v2 }
 0x249   : > { %v6886_v12 = vpop.f32.mrb[0].mxu0 }
 0x24a   : > { %v2345_v47 = vadd.f32 %v6886_v12, %v10282_v53  ;;  %v2336_v58 = vpop.f32.mrb[1].mxu0  ;;  %v2744_v12 = vadd.f32 %v2712_v7, %v2640_v62 }
 0x24b   : > { %v2337_v21 = vadd.f32 %v10282_v53, %v2336_v58  ;;  %v6887_v56 = vpop.f32.mrb[2].mxu0 }
 0x24c   : > { %2466 = vst.msk [vmem:[#allocation3 + $0x31] sm:$0xff] %vm434_vm3, %v2345_v47  ;;  %v2348_v8 = vadd.f32 %v6887_v56, %v10282_v53  ;;  %v2339_v46 = vpop.f32.mrb[3].mxu0 }
 0x24d   : > { %2464 = vst.msk [vmem:[#allocation3 + $0x19] sm:$0xff] %vm434_vm3, %v2337_v21  ;;  %v2340_v29 = vadd.f32 %v10282_v53, %v2339_v46 }
 0x24e   : > { %2467 = vst.msk [vmem:[#allocation3 + $0x39] sm:$0xff] %vm434_vm3, %v2348_v8 }
 0x24f   : > { %2465 = vst.msk [vmem:[#allocation3 + $0x21] sm:$0xff] %vm434_vm3, %v2340_v29 }
 0x251   : > { %v6890_v37 = vpop.f32.mrb[4].mxu0 }
 0x252   : > { %v2361_v17 = vadd.f32 %v6890_v37, %v10282_v53  ;;  %v2352_v50 = vpop.f32.mrb[5].mxu0 }
 0x253   : > { %v2500_v45 = vld [vmem:[#allocation3 + $0x30] sm:$0xff]  ;;  %v2353_v60 = vadd.f32 %v10282_v53, %v2352_v50  ;;  %v10321_v4 = vpop.f32.mrb[6].mxu0 }
 0x254   : > { %v10318_v30 = vld [vmem:[#allocation3 + $0x31] sm:$0xff]  ;;  %v2539_v59 = vmul.f32 %v10287_v41, %v2500_v45  ;;  %v2569_v55 = vld [vmem:[#allocation3 + $0x19] sm:$0xff]  ;;  %2470 = vst.msk [vmem:[#allocation3 + $0x61] sm:$0xff] %vm434_vm3, %v2361_v17  ;;  %v10332_v6 = vpop.f32.mrb[7].mxu0  ;;  %v3128_v46 = vmul.f32 %v10364_v20, %v2500_v45  ;;  %v2817_v50 = vmul.f32 %v10315_v27, %v2500_v45 }
 0x255   : > { %v2611_v54 = vmul.f32 %v10292_v11, %v10318_v30  ;;  %v2498_v22 = vld [vmem:[#allocation3 + $0x18] sm:$0xff]  ;;  %v2609_v19 = vmul.f32 %v10292_v11, %v2569_v55  ;;  %2468 = vst.msk [vmem:[#allocation3 + $0x49] sm:$0xff] %vm434_vm3, %v2353_v60  ;;  %v2919_v0 = vmul.f32 %v10329_v25, %v2569_v55  ;;  %v3232_v51 = vmul.f32 %v10378_v1, %v10318_v30 }
 0x256   : > { %v2537_v9 = vmul.f32 %v10287_v41, %v2498_v22  ;;  %v10336_v28 = vld [vmem:[#allocation3 + $0x38] sm:$0xff]  ;;  %v2815_v48 = vmul.f32 %v10315_v27, %v2498_v22  ;;  %v2499_v5 = vld [vmem:[#allocation3 + $0x20] sm:$0xff] }
 0x257   : > { %v10338_v52 = vld [vmem:[#allocation3 + $0x39] sm:$0xff]  ;;  %v2643_v44 = vadd.f32 %v2611_v54, %v2539_v59  ;;  %v2540_v63 = vmul.f32 %v10287_v41, %v10336_v28  ;;  %v2570_v36 = vld [vmem:[#allocation3 + $0x21] sm:$0xff]  ;;  %v2538_v26 = vmul.f32 %v10287_v41, %v2499_v5  ;;  %v2816_v16 = vmul.f32 %v10315_v27, %v2499_v5  ;;  %v10394_v60 = vld [vmem:[%s12907_s3 + $0x8] ss:$0 sm:$0xff] }
 0x258   : > { %v10340_v31 = vld [vmem:[#allocation3 + $0x32] sm:$0xff]  ;;  %v10346_v49 = vld [vmem:[#allocation3 + $0x3a] sm:$0xff]  ;;  %v2612_v33 = vmul.f32 %v10292_v11, %v10338_v52  ;;  %v2847_v10 = vadd.f32 %v2815_v48, %v2743_v42  ;;  %v2641_v13 = vadd.f32 %v2609_v19, %v2537_v9  ;;  %v2610_v47 = vmul.f32 %v10292_v11, %v2570_v36  ;;  %v2674_v35 = vld [vmem:[#allocation3 + $0x22] sm:$0xff] }
 0x259   : > { %v2715_v34 = vmul.f32 %v10304_v32, %v10340_v31  ;;  %v2673_v2 = vld [vmem:[#allocation3 + $0x1a] sm:$0xff]  ;;  %v2716_v40 = vmul.f32 %v10304_v32, %v10346_v49  ;;  %v2848_v15 = vadd.f32 %v2816_v16, %v2744_v12  ;;  %v2920_v24 = vmul.f32 %v10329_v25, %v2570_v36 }
 0x25a   : > { %v2644_v38 = vadd.f32 %v2612_v33, %v2540_v63  ;;  %v2951_v57 = vadd.f32 %v2919_v0, %v2847_v10  ;;  %v2713_v58 = vmul.f32 %v10304_v32, %v2673_v2  ;;  %v3023_v8 = vmul.f32 %v10359_v14, %v2673_v2 }
 0x25b   : > { %v2747_v39 = vadd.f32 %v2715_v34, %v2643_v44  ;;  %v10371_v21 = vld [vmem:[#allocation3 + $0x60] sm:$0xff]  ;;  %v2642_v59 = vadd.f32 %v2610_v47, %v2538_v26  ;;  %v2952_v22 = vadd.f32 %v2920_v24, %v2848_v15  ;;  %v3024_v55 = vmul.f32 %v10359_v14, %v2674_v35 }
 0x25c   : > { %v10366_v61 = vadd.f32 %v2716_v40, %v2644_v38  ;;  %v10373_v56 = vld [vmem:[#allocation3 + $0x61] sm:$0xff]  ;;  %v2745_v29 = vadd.f32 %v2713_v58, %v2641_v13  ;;  %v2543_v23 = vmul.f32 %v10287_v41, %v10371_v21  ;;  %v3055_v43 = vadd.f32 %v3023_v8, %v2951_v57  ;;  %v10399_v19 = vld [vmem:[#allocation3 + $0x49] sm:$0xff] }
 0x25d   : > { %v6894_v18 = vpop.f32.mrb[8].mxu0  ;;  %v2615_v3 = vmul.f32 %v10292_v11, %v10373_v56  ;;  %v2502_v37 = vld [vmem:[#allocation3 + $0x48] sm:$0xff]  ;;  %v3129_v45 = vmul.f32 %v10364_v20, %v10336_v28  ;;  %v3336_v63 = vmul.f32 %v10394_v60, %v10340_v31  ;;  %v2714_v7 = vmul.f32 %v10304_v32, %v2674_v35  ;;  %v10418_v57 = vld [vmem:[%s12908_s4] ss:$0 sm:$0xff] }
 0x25e   : > { %v2368_v17 = vpop.f32.mrb[9].mxu0  ;;  %v3160_v42 = vadd.f32 %v3128_v46, %v3055_v43  ;;  %v2849_v44 = vadd.f32 %v2817_v50, %v2745_v29  ;;  %v2819_v48 = vmul.f32 %v10315_v27, %v2502_v37  ;;  %v3056_v33 = vadd.f32 %v3024_v55, %v2952_v22 }
 0x25f   : > { %v6895_v54 = vpop.f32.mrb[10].mxu0  ;;  %v10397_v9 = vadd.f32 %v2615_v3, %v2543_v23  ;;  %v2921_v10 = vmul.f32 %v10329_v25, %v10318_v30  ;;  %v3233_v0 = vmul.f32 %v10378_v1, %v10338_v52  ;;  %v2923_v36 = vmul.f32 %v10329_v25, %v10399_v19 }
 0x260   : > { %v2371_v62 = vpop.f32.mrb[11].mxu0  ;;  %v3264_v34 = vadd.f32 %v3232_v51, %v3160_v42  ;;  %v2851_v5 = vadd.f32 %v2819_v48, %v2747_v39  ;;  %v2746_v2 = vadd.f32 %v2714_v7, %v2642_v59  ;;  %v3161_v13 = vadd.f32 %v3129_v45, %v3056_v33 }
 0x261   : > { %v2364_v40 = vadd.f32 %v10321_v4, %v10282_v53  ;;  %v2953_v12 = vadd.f32 %v2921_v10, %v2849_v44  ;;  %v2356_v39 = vadd.f32 %v10282_v53, %v10332_v6  ;;  %v2377_v26 = vadd.f32 %v6894_v18, %v10282_v53 }
 0x262   : > { %v3368_v38 = vadd.f32 %v3336_v63, %v3264_v34  ;;  %v10420_v30 = vadd.f32 %v2923_v36, %v2851_v5  ;;  %v3337_v47 = vmul.f32 %v10394_v60, %v10346_v49  ;;  %v3265_v58 = vadd.f32 %v3233_v0, %v3161_v13 }
 0x263   : > { %2471 = vst.msk [vmem:[#allocation3 + $0x69] sm:$0xff] %vm434_vm3, %v2364_v40  ;;  %v2369_v4 = vadd.f32 %v10282_v53, %v2368_v17  ;;  %v2380_v16 = vadd.f32 %v6895_v54, %v10282_v53  ;;  %v2818_v8 = vmul.f32 %v10315_v27, %v10336_v28  ;;  %v3025_v46 = vmul.f32 %v10359_v14, %v10340_v31 }
 0x264   : > { %2469 = vst.msk [vmem:[#allocation3 + $0x51] sm:$0xff] %vm434_vm3, %v2356_v39  ;;  %2474 = vst.msk [vmem:[#allocation3 + $0x91] sm:$0xff] %vm434_vm3, %v2377_v26  ;;  %v2372_v6 = vadd.f32 %v10282_v53, %v2371_v62  ;;  %v3407_v35 = vadd.f32 %v10418_v57, %v3368_v38  ;;  %v3369_v29 = vadd.f32 %v3337_v47, %v3265_v58 }
 0x265   : > { %2472 = vst.msk [vmem:[#allocation3 + $0x79] sm:$0xff] %vm434_vm3, %v2369_v4  ;;  %2475 = vst.msk [vmem:[#allocation3 + $0x99] sm:$0xff] %vm434_vm3, %v2380_v16  ;;  %v2850_v23 = vadd.f32 %v2818_v8, %v2746_v2  ;;  %v3057_v18 = vadd.f32 %v3025_v46, %v2953_v12  ;;  %v2922_v3 = vmul.f32 %v10329_v25, %v10338_v52 }
 0x266   : > { %2473 = vst.msk [vmem:[#allocation3 + $0x81] sm:$0xff] %vm434_vm3, %v2372_v6  ;;  %v3439_v15 = vmax.f32 %v3407_v35, 0.0  ;;  %v3408_v43 = vadd.f32 %v10418_v57, %v3369_v29  ;;  %v3130_v17 = vmul.f32 %v10364_v20, %v2502_v37  ;;  %v2541_v59 = vmul.f32 %v10287_v41, %v2502_v37 }
 0x267   : > { %v2613_v54 = vmul.f32 %v10292_v11, %v10399_v19  ;;  %v2954_v48 = vadd.f32 %v2922_v3, %v2850_v23  ;;  %v3026_v37 = vmul.f32 %v10359_v14, %v10346_v49  ;;  %v2821_v0 = vmul.f32 %v10315_v27, %v10371_v21 }
 0x268   : > { %3472 = vst.msk [vmem:[#allocation4 + $0x19] sm:$0xff] %vm434_vm3, %v3439_v15  ;;  %v3440_v42 = vmax.f32 %v3408_v43, 0.0  ;;  %v3162_v62 = vadd.f32 %v3130_v17, %v3057_v18  ;;  %v10471_v5 = vmul.f32 %v10329_v25, %v10373_v56  ;;  %v3132_v49 = vmul.f32 %v10364_v20, %v10371_v21 }
 0x269   : > { %v6898_v28 = vpop.f32.mrb[12].mxu0  ;;  %v3234_v36 = vmul.f32 %v10378_v1, %v10399_v19  ;;  %v2645_v38 = vadd.f32 %v2613_v54, %v2541_v59  ;;  %v3236_v47 = vmul.f32 %v10378_v1, %v10373_v56  ;;  %v3058_v19 = vadd.f32 %v3026_v37, %v2954_v48 }
 0x26a   : > { %v2393_v31 = vadd.f32 %v6898_v28, %v10282_v53  ;;  %v2384_v24 = vpop.f32.mrb[13].mxu0  ;;  %v2505_v52 = vld [vmem:[#allocation3 + $0x68] sm:$0xff]  ;;  %3473 = vst.msk [vmem:[#allocation4 + $0x21] sm:$0xff] %vm434_vm3, %v3440_v42 }
 0x26b   : > { %v2385_v50 = vadd.f32 %v10282_v53, %v2384_v24  ;;  %v6899_v51 = vpop.f32.mrb[14].mxu0  ;;  %v10453_v45 = vld [vmem:[#allocation3 + $0x69] sm:$0xff]  ;;  %v2544_v7 = vmul.f32 %v10287_v41, %v2505_v52  ;;  %v2574_v26 = vld [vmem:[#allocation3 + $0x51] sm:$0xff]  ;;  %v3266_v21 = vadd.f32 %v3234_v36, %v3162_v62  ;;  %v10486_v58 = vmul.f32 %v10315_v27, %v2505_v52 }
 0x26c   : > { %2478 = vst.msk [vmem:[#allocation3 + $0xc1] sm:$0xff] %vm434_vm3, %v2393_v31  ;;  %v2396_v22 = vadd.f32 %v6899_v51, %v10282_v53  ;;  %v2387_v55 = vpop.f32.mrb[15].mxu0  ;;  %v2679_v44 = vld [vmem:[#allocation3 + $0x62] sm:$0xff]  ;;  %v2616_v33 = vmul.f32 %v10292_v11, %v10453_v45  ;;  %v10462_v34 = vld [vmem:[#allocation3 + $0x6a] sm:$0xff]  ;;  %v2678_v8 = vld [vmem:[#allocation3 + $0x52] sm:$0xff]  ;;  %v2614_v56 = vmul.f32 %v10292_v11, %v2574_v26  ;;  %v2924_v15 = vmul.f32 %v10329_v25, %v2574_v26 }
 0x26d   : > { %2476 = vst.msk [vmem:[#allocation3 + $0xa9] sm:$0xff] %vm434_vm3, %v2385_v50  ;;  %v2388_v63 = vadd.f32 %v10282_v53, %v2387_v55  ;;  %v2719_v10 = vmul.f32 %v10304_v32, %v2679_v44  ;;  %v2503_v2 = vld [vmem:[#allocation3 + $0x50] sm:$0xff]  ;;  %v2720_v12 = vmul.f32 %v10304_v32, %v10462_v34  ;;  %v3029_v16 = vmul.f32 %v10359_v14, %v2679_v44 }
 0x26e   : > { %2479 = vst.msk [vmem:[#allocation3 + $0xc9] sm:$0xff] %vm434_vm3, %v2396_v22  ;;  %v2677_v13 = vld [vmem:[#allocation3 + $0x4a] sm:$0xff]  ;;  %v2648_v40 = vadd.f32 %v2616_v33, %v2544_v7  ;;  %v2820_v6 = vmul.f32 %v10315_v27, %v2503_v2  ;;  %v2542_v35 = vmul.f32 %v10287_v41, %v2503_v2  ;;  %v3131_v31 = vmul.f32 %v10364_v20, %v2503_v2  ;;  %v2506_v33 = vld [vmem:[#allocation3 + $0x78] sm:$0xff] }
 0x26f   : > { %2477 = vst.msk [vmem:[#allocation3 + $0xb1] sm:$0xff] %vm434_vm3, %v2388_v63  ;;  %v10481_v39 = vadd.f32 %v2719_v10, %v10397_v9  ;;  %v2717_v46 = vmul.f32 %v10304_v32, %v2677_v13  ;;  %v3133_v9 = vmul.f32 %v10364_v20, %v2505_v52  ;;  %v3027_v29 = vmul.f32 %v10359_v14, %v2677_v13  ;;  %v10497_v23 = vld [vmem:[#allocation3 + $0x90] sm:$0xff] }
 0x270   : > { %v10488_v4 = vadd.f32 %v2720_v12, %v2648_v40  ;;  %v2852_v28 = vadd.f32 %v2820_v6, %v10366_v61  ;;  %v10502_v24 = vld [vmem:[#allocation3 + $0x91] sm:$0xff]  ;;  %v3340_v43 = vmul.f32 %v10394_v60, %v2679_v44  ;;  %v3028_v3 = vmul.f32 %v10359_v14, %v2678_v8 }
 0x271   : > { %v2749_v18 = vadd.f32 %v2717_v46, %v2645_v38  ;;  %v3059_v17 = vadd.f32 %v3027_v29, %v10420_v30  ;;  %v3338_v50 = vmul.f32 %v10394_v60, %v2677_v13  ;;  %v3163_v54 = vadd.f32 %v3131_v31, %v3058_v19 }
 0x272   : > { %v2956_v59 = vadd.f32 %v2924_v15, %v2852_v28  ;;  %v3235_v61 = vmul.f32 %v10378_v1, %v2574_v26  ;;  %v2547_v22 = vmul.f32 %v10287_v41, %v10497_v23  ;;  %v2646_v42 = vadd.f32 %v2614_v56, %v2542_v35  ;;  %v2577_v26 = vld [vmem:[#allocation3 + $0x79] sm:$0xff] }
 0x273   : > { %v3164_v62 = vadd.f32 %v3132_v49, %v3059_v17  ;;  %v3370_v52 = vadd.f32 %v3338_v50, %v3266_v21  ;;  %v2619_v44 = vmul.f32 %v10292_v11, %v10502_v24  ;;  %v2853_v48 = vadd.f32 %v2821_v0, %v2749_v18  ;;  %v10534_v18 = vld [vmem:[#allocation3 + $0x99] sm:$0xff] }
 0x274   : > { %v3060_v63 = vadd.f32 %v3028_v3, %v2956_v59  ;;  %v3267_v37 = vadd.f32 %v3235_v61, %v3163_v54  ;;  %v3339_v7 = vmul.f32 %v10394_v60, %v2678_v8  ;;  %v2718_v36 = vmul.f32 %v10304_v32, %v2678_v8  ;;  %v2509_v8 = vld [vmem:[#allocation3 + $0x98] sm:$0xff] }
 0x275   : > { %v10508_v51 = vpop.f32.mrb[0].mxu1  ;;  %v3268_v2 = vadd.f32 %v3236_v47, %v3164_v62  ;;  %v3409_v13 = vadd.f32 %v10418_v57, %v3370_v52  ;;  %v2651_v49 = vadd.f32 %v2619_v44, %v2547_v22  ;;  %v3237_v38 = vmul.f32 %v10378_v1, %v10453_v45  ;;  %v10536_v28 = vld [vmem:[#allocation3 + $0x92] sm:$0xff]  ;;  %v10546_v59 = vld [vmem:[#allocation3 + $0x9a] sm:$0xff] }
 0x276   : > { %v10513_v55 = vpop.f32.mrb[1].mxu1  ;;  %v3341_v40 = vmul.f32 %v10394_v60, %v10462_v34  ;;  %v3165_v0 = vadd.f32 %v3133_v9, %v3060_v63  ;;  %v3371_v12 = vadd.f32 %v3339_v7, %v3267_v37  ;;  %v2750_v21 = vadd.f32 %v2718_v36, %v2646_v42  ;;  %v2681_v62 = vld [vmem:[#allocation3 + $0x7a] sm:$0xff] }
 0x277   : > { %v10517_v30 = vpop.f32.mrb[2].mxu1  ;;  %v10528_v19 = vadd.f32 %v3340_v43, %v3268_v2  ;;  %v3441_v46 = vmax.f32 %v3409_v13, 0.0  ;;  %v2823_v6 = vmul.f32 %v10315_v27, %v2506_v33  ;;  %v2545_v56 = vmul.f32 %v10287_v41, %v2506_v33  ;;  %v2578_v36 = vld [vmem:[#allocation3 + $0x81] sm:$0xff] }
 0x278   : > { %v10520_v10 = vpop.f32.mrb[3].mxu1  ;;  %v3269_v47 = vadd.f32 %v3237_v38, %v3165_v0  ;;  %v3410_v35 = vadd.f32 %v10418_v57, %v3371_v12  ;;  %v2957_v29 = vadd.f32 %v10471_v5, %v2853_v48  ;;  %v2617_v9 = vmul.f32 %v10292_v11, %v2577_v26  ;;  %v2507_v48 = vld [vmem:[#allocation3 + $0x80] sm:$0xff] }
 0x279   : > { %13196 = vst [vmem:[#allocation46_spill] sm:$0xff] %v10528_v19  ;;  %3474 = vst.msk [vmem:[#allocation4 + $0x31] sm:$0xff] %vm434_vm3, %v3441_v46  ;;  %v2855_v15 = vadd.f32 %v2823_v6, %v10481_v39  ;;  %v2927_v31 = vmul.f32 %v10329_v25, %v2577_v26  ;;  %v3134_v43 = vmul.f32 %v10364_v20, %v2506_v33  ;;  %v3600_v19 = vld [vmem:[#allocation4 + $0x18] sm:$0xff] }
 0x27a   : > { %v10543_v3 = vadd.f32 %v3341_v40, %v3269_v47  ;;  %v3442_v17 = vmax.f32 %v3410_v35, 0.0  ;;  %v3061_v50 = vadd.f32 %v3029_v16, %v2957_v29  ;;  %v2548_v5 = vmul.f32 %v10287_v41, %v2509_v8  ;;  %v2682_v47 = vld [vmem:[#allocation3 + $0x82] sm:$0xff] }
 0x27b   : > { %v2959_v54 = vadd.f32 %v2927_v31, %v2855_v15  ;;  %v2620_v61 = vmul.f32 %v10292_v11, %v10534_v18  ;;  %v2723_v22 = vmul.f32 %v10304_v32, %v10536_v28  ;;  %v2854_v39 = vadd.f32 %v10486_v58, %v2750_v21 }
 0x27c   : > { %13197 = vst [vmem:[#allocation48_spill] sm:$0xff] %v10543_v3  ;;  %3475 = vst.msk [vmem:[#allocation4 + $0x39] sm:$0xff] %vm434_vm3, %v3442_v17  ;;  %v3166_v42 = vadd.f32 %v3134_v43, %v3061_v50  ;;  %v2724_v16 = vmul.f32 %v10304_v32, %v10546_v59  ;;  %v2926_v37 = vmul.f32 %v10329_v25, %v10453_v45 }
 0x27d   : > { %v2652_v52 = vadd.f32 %v2620_v61, %v2548_v5  ;;  %v10556_v44 = vadd.f32 %v2723_v22, %v2651_v49  ;;  %v3030_v7 = vmul.f32 %v10359_v14, %v10462_v34  ;;  %v2649_v58 = vadd.f32 %v2617_v9, %v2545_v56 }
 0x27e   : > { %v3238_v33 = vmul.f32 %v10378_v1, %v2577_v26  ;;  %v2825_v13 = vmul.f32 %v10315_v27, %v10497_v23  ;;  %v2929_v49 = vmul.f32 %v10329_v25, %v10502_v24  ;;  %v2721_v40 = vmul.f32 %v10304_v32, %v2681_v62 }
 0x27f   : > { %v10571_v38 = vadd.f32 %v2724_v16, %v2652_v52  ;;  %v3136_v34 = vmul.f32 %v10364_v20, %v10497_v23  ;;  %v2824_v12 = vmul.f32 %v10315_v27, %v2507_v48  ;;  %v2958_v26 = vadd.f32 %v2926_v37, %v2854_v39 }
 0x280   : > { %v3270_v0 = vadd.f32 %v3238_v33, %v3166_v42  ;;  %v2546_v46 = vmul.f32 %v10287_v41, %v2507_v48  ;;  %v2618_v6 = vmul.f32 %v10292_v11, %v2578_v36  ;;  %v2928_v35 = vmul.f32 %v10329_v25, %v2578_v36 }
 0x281   : > { %v10558_v63 = vpop.f32.mrb[4].mxu1  ;;  %v3031_v56 = vmul.f32 %v10359_v14, %v2681_v62  ;;  %v2753_v29 = vadd.f32 %v2721_v40, %v2649_v58  ;;  %v2856_v9 = vadd.f32 %v2824_v12, %v10488_v4  ;;  %v3062_v15 = vadd.f32 %v3030_v7, %v2958_v26  ;;  %v2510_v58 = vld [vmem:[#allocation3 + $0xa8] sm:$0xff] }
 0x282   : > { %v10565_v2 = vpop.f32.mrb[5].mxu1  ;;  %v3135_v23 = vmul.f32 %v10364_v20, %v2507_v48  ;;  %v3240_v31 = vmul.f32 %v10378_v1, %v10502_v24  ;;  %v2826_v43 = vmul.f32 %v10315_v27, %v2509_v8  ;;  %v3342_v50 = vmul.f32 %v10394_v60, %v2681_v62 }
 0x283   : > { %v10574_v45 = vpop.f32.mrb[6].mxu1  ;;  %v3063_v17 = vadd.f32 %v3031_v56, %v2959_v54  ;;  %v2960_v5 = vadd.f32 %v2928_v35, %v2856_v9  ;;  %v3032_v61 = vmul.f32 %v10359_v14, %v2682_v47  ;;  %v3239_v39 = vmul.f32 %v10378_v1, %v2578_v36 }
 0x284   : > { %v10579_v21 = vpop.f32.mrb[7].mxu1  ;;  %v3167_v22 = vadd.f32 %v3135_v23, %v3062_v15  ;;  %v3137_v42 = vmul.f32 %v10364_v20, %v2509_v8  ;;  %v2650_v4 = vadd.f32 %v2618_v6, %v2546_v46  ;;  %v3374_v16 = vadd.f32 %v3342_v50, %v3270_v0  ;;  %v2581_v0 = vld [vmem:[#allocation3 + $0xa9] sm:$0xff] }
 0x285   : > { %v3168_v52 = vadd.f32 %v3136_v34, %v3063_v17  ;;  %v2857_v48 = vadd.f32 %v2825_v13, %v2753_v29  ;;  %v3064_v37 = vadd.f32 %v3032_v61, %v2960_v5  ;;  %v3343_v24 = vmul.f32 %v10394_v60, %v2682_v47 }
 0x286   : > { %v3271_v7 = vadd.f32 %v3239_v39, %v3167_v22  ;;  %v3033_v54 = vmul.f32 %v10359_v14, %v10536_v28  ;;  %v3344_v62 = vmul.f32 %v10394_v60, %v10536_v28  ;;  %v3413_v36 = vadd.f32 %v10418_v57, %v3374_v16  ;;  %v2583_v39 = vld [vmem:[#allocation3 + $0xc1] sm:$0xff] }
 0x287   : > { %v3272_v33 = vadd.f32 %v3240_v31, %v3168_v52  ;;  %v3241_v8 = vmul.f32 %v10378_v1, %v10534_v18  ;;  %v2722_v40 = vmul.f32 %v10304_v32, %v2682_v47  ;;  %v3169_v13 = vadd.f32 %v3137_v42, %v3064_v37  ;;  %v2512_v47 = vld [vmem:[#allocation3 + $0xc0] sm:$0xff] }
 0x288   : > { %v3375_v34 = vadd.f32 %v3343_v24, %v3271_v7  ;;  %v3345_v12 = vmul.f32 %v10394_v60, %v10546_v59  ;;  %v3445_v46 = vmax.f32 %v3413_v36, 0.0  ;;  %v2827_v6 = vmul.f32 %v10315_v27, %v2510_v58 }
 0x289   : > { %v10605_v26 = vadd.f32 %v3344_v62, %v3272_v33  ;;  %v2754_v35 = vadd.f32 %v2722_v40, %v2650_v4  ;;  %v3273_v56 = vadd.f32 %v3241_v8, %v3169_v13  ;;  %v2961_v9 = vadd.f32 %v2929_v49, %v2857_v48  ;;  %v10629_v48 = vld [vmem:[#allocation3 + $0xc9] sm:$0xff]  ;;  %v2582_v62 = vld [vmem:[#allocation3 + $0xb1] sm:$0xff] }
 0x28a   : > { %v3414_v29 = vadd.f32 %v10418_v57, %v3375_v34  ;;  %3478 = vst.msk [vmem:[#allocation4 + $0x61] sm:$0xff] %vm434_vm3, %v3445_v46  ;;  %v2549_v23 = vmul.f32 %v10287_v41, %v2510_v58  ;;  %v2859_v31 = vadd.f32 %v2827_v6, %v10556_v44  ;;  %v2931_v17 = vmul.f32 %v10329_v25, %v2581_v0  ;;  %v10627_v44 = vld [vmem:[#allocation3 + $0xc8] sm:$0xff]  ;;  %v2686_v46 = vld [vmem:[#allocation3 + $0xb2] sm:$0xff] }
 0x28b   : > { %13198 = vst [vmem:[#allocation47_spill] sm:$0xff] %v10605_v26  ;;  %v3138_v50 = vmul.f32 %v10364_v20, %v2510_v58  ;;  %v10620_v61 = vadd.f32 %v3345_v12, %v3273_v56  ;;  %v2621_v49 = vmul.f32 %v10292_v11, %v2581_v0  ;;  %v3065_v42 = vadd.f32 %v3033_v54, %v2961_v9  ;;  %v2511_v54 = vld [vmem:[#allocation3 + $0xb0] sm:$0xff]  ;;  %v10653_v12 = vld [vmem:[#allocation3 + $0xc2] sm:$0xff] }
 0x28c   : > { %v3446_v22 = vmax.f32 %v3414_v29, 0.0  ;;  %v2930_v52 = vmul.f32 %v10329_v25, %v10534_v18  ;;  %v2963_v16 = vadd.f32 %v2931_v17, %v2859_v31  ;;  %v3034_v37 = vmul.f32 %v10359_v14, %v10546_v59  ;;  %v2685_v33 = vld [vmem:[#allocation3 + $0xaa] sm:$0xff] }
 0x28d   : > { %v10608_v28 = vpop.f32.mrb[8].mxu1  ;;  %13199 = vst [vmem:[#allocation49_spill] sm:$0xff] %v10620_v61  ;;  %v2858_v7 = vadd.f32 %v2826_v43, %v2754_v35  ;;  %v10635_v24 = vmul.f32 %v10287_v41, %v2512_v47  ;;  %v3170_v58 = vadd.f32 %v3138_v50, %v3065_v42  ;;  %v10638_v18 = vmul.f32 %v10292_v11, %v2583_v39  ;;  %v3539_v61 = vld [vmem:[#allocation4 + $0x21] sm:$0xff] }
 0x28e   : > { %v10611_v15 = vpop.f32.mrb[9].mxu1  ;;  %3479 = vst.msk [vmem:[#allocation4 + $0x69] sm:$0xff] %vm434_vm3, %v3446_v22  ;;  %v10641_v36 = vmul.f32 %v10315_v27, %v2512_v47  ;;  %v10644_v8 = vmul.f32 %v10329_v25, %v2583_v39  ;;  %v3140_v59 = vmul.f32 %v10364_v20, %v2512_v47  ;;  %v3244_v43 = vmul.f32 %v10378_v1, %v2583_v39  ;;  %v3601_v39 = vld [vmem:[#allocation4 + $0x20] sm:$0xff] }
 0x28f   : > { %v10618_v5 = vpop.f32.mrb[10].mxu1  ;;  %v2653_v40 = vadd.f32 %v2621_v49, %v2549_v23  ;;  %v3242_v13 = vmul.f32 %v10378_v1, %v2581_v0  ;;  %v10651_v34 = vmul.f32 %v10287_v41, %v10627_v44  ;;  %v10657_v6 = vmul.f32 %v10292_v11, %v10629_v48 }
 0x290   : > { %v10623_v4 = vpop.f32.mrb[11].mxu1  ;;  %v2550_v35 = vmul.f32 %v10287_v41, %v2511_v54  ;;  %v2622_v56 = vmul.f32 %v10292_v11, %v2582_v62  ;;  %v2725_v29 = vmul.f32 %v10304_v32, %v2685_v33  ;;  %v3141_v0 = vmul.f32 %v10364_v20, %v10627_v44 }
 0x291   : > { %13200 = vst [vmem:[#allocation52_spill] sm:$0xff] %v10651_v34  ;;  %13201 = vst [vmem:[#allocation51_spill] sm:$0xff] %v10657_v6  ;;  %v3274_v9 = vadd.f32 %v3242_v13, %v3170_v58  ;;  %v2828_v47 = vmul.f32 %v10315_v27, %v2511_v54  ;;  %v2962_v23 = vadd.f32 %v2930_v52, %v2858_v7 }
 0x292   : > { %v3348_v31 = vmul.f32 %v10394_v60, %v10653_v12  ;;  %v2726_v17 = vmul.f32 %v10304_v32, %v2686_v46  ;;  %v2932_v50 = vmul.f32 %v10329_v25, %v2582_v62  ;;  %v3035_v22 = vmul.f32 %v10359_v14, %v2685_v33 }
 0x293   : > { %v2654_v49 = vadd.f32 %v2622_v56, %v2550_v35  ;;  %v2860_v42 = vadd.f32 %v2828_v47, %v10571_v38  ;;  %v3066_v58 = vadd.f32 %v3034_v37, %v2962_v23  ;;  %v3139_v13 = vmul.f32 %v10364_v20, %v2511_v54  ;;  %v3538_v56 = vld [vmem:[#allocation4 + $0x19] sm:$0xff] }
 0x294   : > { %v2757_v26 = vadd.f32 %v2725_v29, %v2653_v40  ;;  %v3036_v52 = vmul.f32 %v10359_v14, %v2686_v46  ;;  %v3067_v7 = vadd.f32 %v3035_v22, %v2963_v16  ;;  %v3346_v3 = vmul.f32 %v10394_v60, %v2685_v33 }
 0x295   : > { %v2964_v41 = vadd.f32 %v2932_v50, %v2860_v42  ;;  %v3171_v6 = vadd.f32 %v3139_v13, %v3066_v58  ;;  %v3243_v34 = vmul.f32 %v10378_v1, %v2582_v62  ;;  %v7683_v35 = vpack.i.bf16 %v3601_v39, %v3600_v19  ;;  %v3570_v62 = vld [vmem:[#allocation4 + $0x1a] sm:$0xff]  ;;  %v3571_v19 = vld [vmem:[#allocation4 + $0x22] sm:$0xff] }
 0x296   : > { %v3172_v37 = vadd.f32 %v3140_v59, %v3067_v7  ;;  %v3347_v54 = vmul.f32 %v10394_v60, %v2686_v46  ;;  %v3378_v47 = vadd.f32 %v3346_v3, %v3274_v9  ;;  %v7673_v40 = vpack.i.bf16 %v3539_v61, %v3538_v56  ;;  %v10683_v39 = vld [vmem:[#allocation3 + $0xca] sm:$0xff] }
 0x297   : > { %v3068_v23 = vadd.f32 %v3036_v52, %v2964_v41  ;;  %v3275_v16 = vadd.f32 %v3243_v34, %v3171_v6  ;;  %7684 = vrot.lane.b32.xlu0 %v7683_v35, %s8351_s14  ;;  %v2409_v33 = vadd.f32 %v10508_v51, %v10282_v53  ;;  %v2401_v50 = vadd.f32 %v10282_v53, %v10513_v55  ;;  %v3635_v56 = vld [vmem:[#allocation4 + $0x39] sm:$0xff] }
 0x298   : > { %v2758_v59 = vadd.f32 %v2726_v17, %v2654_v49  ;;  %v3276_v46 = vadd.f32 %v3244_v43, %v3172_v37  ;;  %v3417_v3 = vadd.f32 %v10418_v57, %v3378_v47  ;;  %7674 = vrot.lane.b32.xlu1 %v7673_v40, %s8347_s25  ;;  %v2412_v41 = vadd.f32 %v10517_v30, %v10282_v53  ;;  %v3603_v17 = vld [vmem:[#allocation4 + $0x38] sm:$0xff] }
 0x299   : > { %v10674_v11 = vpop.f32.mrb[12].mxu1  ;;  %v3245_v51 = vmul.f32 %v10378_v1, %v10629_v48  ;;  %v3173_v61 = vadd.f32 %v3141_v0, %v3068_v23  ;;  %v3379_v34 = vadd.f32 %v3347_v54, %v3275_v16  ;;  %2482 = vst.msk [vmem:[#allocation3 + $0xf1] sm:$0xff] %vm434_vm3, %v2409_v33  ;;  %2480 = vst.msk [vmem:[#allocation3 + $0xd9] sm:$0xff] %vm434_vm3, %v2401_v50  ;;  %v13202_v23 = vld [vmem:[#allocation52_spill] sm:$0xff]  ;;  %v13203_v16 = vld [vmem:[#allocation51_spill] sm:$0xff] }
 0x29a   : > { %v2448_v38 = vpop.f32.mrb[13].mxu1  ;;  %v2404_v55 = vadd.f32 %v10282_v53, %v10520_v10  ;;  %v2830_v43 = vmul.f32 %v10315_v27, %v10627_v44  ;;  %v10697_v6 = vadd.f32 %v3348_v31, %v3276_v46  ;;  %v3449_v9 = vmax.f32 %v3417_v3, 0.0  ;;  %2483 = vst.msk [vmem:[#allocation3 + $0xf9] sm:$0xff] %vm434_vm3, %v2412_v41  ;;  %v3602_v44 = vld [vmem:[#allocation4 + $0x30] sm:$0xff] }
 0x29b   : > { %v6915_v29 = vpop.f32.mrb[14].mxu1  ;;  %v7678_v30 = vpack.i.bf16 %v3571_v19, %v3570_v62  ;;  %v3349_v0 = vmul.f32 %v10394_v60, %v10683_v39  ;;  %v2861_v49 = vadd.f32 %v10641_v36, %v2757_v26  ;;  %v3277_v42 = vadd.f32 %v3245_v51, %v3173_v61  ;;  %7689 = vrot.lane.b32.xlu0 %v7673_v40, %s8353_s21  ;;  %v13205_v3 = vld [vmem:[#allocation44_spill] sm:$0xff] }
 0x29c   : > { %v2451_v22 = vpop.f32.mrb[15].mxu1  ;;  %v3418_v58 = vadd.f32 %v10418_v57, %v3379_v34  ;;  %2481 = vst.msk [vmem:[#allocation3 + $0xe1] sm:$0xff] %vm434_vm3, %v2404_v55  ;;  %v2862_v10 = vadd.f32 %v2830_v43, %v2758_v59  ;;  %3482 = vst.msk [vmem:[#allocation4 + $0x91] sm:$0xff] %vm434_vm3, %v3449_v9  ;;  %v2425_v31 = vadd.f32 %v10558_v63, %v10282_v53  ;;  %v13204_v59 = vld [vmem:[#allocation45_spill] sm:$0xff] }
 0x29d   : > { %7679 = vrot.lane.b32.xlu1 %v7678_v30, %s8349_s27  ;;  %v2417_v13 = vadd.f32 %v10282_v53, %v10565_v2  ;;  %v2428_v26 = vadd.f32 %v10574_v45, %v10282_v53  ;;  %v10714_v36 = vadd.f32 %v3349_v0, %v3277_v42  ;;  %v10716_v7 = vpack.i.bf16 %v3603_v17, %v3602_v44 }
 0x29e   : > { %v3450_v52 = vmax.f32 %v3418_v58, 0.0  ;;  %v2420_v35 = vadd.f32 %v10282_v53, %v10579_v21  ;;  %2486 = vst.msk [vmem:[#allocation3 + $0x121] sm:$0xff] %vm434_vm3, %v2425_v31  ;;  %v2441_v63 = vadd.f32 %v10608_v28, %v10282_v53  ;;  %v2433_v2 = vadd.f32 %v10282_v53, %v10611_v15 }
 0x29f   : > { %2484 = vst.msk [vmem:[#allocation3 + $0x109] sm:$0xff] %vm434_vm3, %v2417_v13  ;;  %2487 = vst.msk [vmem:[#allocation3 + $0x129] sm:$0xff] %vm434_vm3, %v2428_v26  ;;  %v2444_v45 = vadd.f32 %v10618_v5, %v10282_v53  ;;  %v2436_v37 = vadd.f32 %v10282_v53, %v10623_v4  ;;  %7694 = vrot.lane.b32.xlu0 %v7678_v30, %s8354_s16  ;;  %v2457_v21 = vadd.f32 %v10674_v11, %v10282_v53  ;;  %v3634_v4 = vld [vmem:[#allocation4 + $0x31] sm:$0xff] }
 0x2a0   : > { %3483 = vst.msk [vmem:[#allocation4 + $0x99] sm:$0xff] %vm434_vm3, %v3450_v52  ;;  %2485 = vst.msk [vmem:[#allocation3 + $0x111] sm:$0xff] %vm434_vm3, %v2420_v35  ;;  %v2449_v28 = vadd.f32 %v10282_v53, %v2448_v38  ;;  %v2460_v15 = vadd.f32 %v6915_v29, %v10282_v53  ;;  %v2452_v54 = vadd.f32 %v10282_v53, %v2451_v22  ;;  %v2514_v5 = vld [vmem:[#allocation3 + $0xd8] sm:$0xff]  ;;  %v3667_v29 = vld [vmem:[#allocation4 + $0x3a] sm:$0xff] }
 0x2a1   : > { %v2965_v47 = vadd.f32 %v10644_v8, %v2861_v49  ;;  %7709 = vrot.lane.b32.xlu1 %v10716_v7, %s8351_s14  ;;  %2490 = vst.msk [vmem:[#allocation3 + $0x151] sm:$0xff] %vm434_vm3, %v2441_v63  ;;  %2488 = vst.msk [vmem:[#allocation3 + $0x139] sm:$0xff] %vm434_vm3, %v2433_v2  ;;  %v2655_v11 = vadd.f32 %v10638_v18, %v10635_v24  ;;  %v2727_v53 = vmul.f32 %v10304_v32, %v10653_v12  ;;  %v2585_v38 = vld [vmem:[#allocation3 + $0xd9] sm:$0xff]  ;;  %v3666_v18 = vld [vmem:[#allocation4 + $0x32] sm:$0xff] }
 0x2a2   : > { %2491 = vst.msk [vmem:[#allocation3 + $0x159] sm:$0xff] %vm434_vm3, %v2444_v45  ;;  %2489 = vst.msk [vmem:[#allocation3 + $0x141] sm:$0xff] %vm434_vm3, %v2436_v37  ;;  %v2934_v8 = vmul.f32 %v10329_v25, %v10629_v48  ;;  %v10752_v40 = vpack.i.bf16 %v3635_v56, %v3634_v4  ;;  %v3037_v24 = vmul.f32 %v10359_v14, %v10653_v12  ;;  %v2516_v48 = vld [vmem:[#allocation3 + $0xf0] sm:$0xff]  ;;  %v13207_v52 = vld [vmem:[#allocation48_spill] sm:$0xff] }
 0x2a3   : > { %2494 = vst.msk [vmem:[#allocation3 + $0x181] sm:$0xff] %vm434_vm3, %v2457_v21  ;;  %2492 = vst.msk [vmem:[#allocation3 + $0x169] sm:$0xff] %vm434_vm3, %v2449_v28  ;;  %v2656_v33 = vadd.f32 %v13203_v16, %v13202_v23  ;;  %v2587_v50 = vld [vmem:[#allocation3 + $0xf1] sm:$0xff]  ;;  %v2831_v62 = vmul.f32 %v10315_v27, %v2514_v5  ;;  %v3142_v19 = vmul.f32 %v10364_v20, %v2514_v5  ;;  %v2689_v17 = vld [vmem:[#allocation3 + $0xda] sm:$0xff] }
 0x2a4   : > { %2495 = vst.msk [vmem:[#allocation3 + $0x189] sm:$0xff] %vm434_vm3, %v2460_v15  ;;  %2493 = vst.msk [vmem:[#allocation3 + $0x171] sm:$0xff] %vm434_vm3, %v2452_v54  ;;  %v2966_v22 = vadd.f32 %v2934_v8, %v2862_v10  ;;  %7699 = vrot.lane.b32.xlu0 %v10752_v40, %s8347_s25  ;;  %v2553_v46 = vmul.f32 %v13204_v59, %v2514_v5  ;;  %v2625_v41 = vmul.f32 %v13205_v3, %v2585_v38  ;;  %v2515_v42 = vld [vmem:[#allocation3 + $0xe0] sm:$0xff]  ;;  %v13206_v10 = vld [vmem:[#allocation46_spill] sm:$0xff] }
 0x2a5   : > { %v3069_v12 = vadd.f32 %v3037_v24, %v2965_v47  ;;  %7714 = vrot.lane.b32.xlu1 %v10752_v40, %s8353_s21  ;;  %v2728_v51 = vmul.f32 %v10304_v32, %v10683_v39  ;;  %v2759_v61 = vadd.f32 %v2727_v53, %v2655_v11  ;;  %v3038_v34 = vmul.f32 %v10359_v14, %v10683_v39  ;;  %v2586_v26 = vld [vmem:[#allocation3 + $0xe1] sm:$0xff]  ;;  %v2517_v15 = vld [vmem:[#allocation3 + $0xf8] sm:$0xff]  ;;  %v10811_v11 = vld [vmem:[%s12907_s3] ss:$0 sm:$0xff] }
 0x2a6   : > { %v10774_v55 = vpack.i.bf16 %v3667_v29, %v3666_v18  ;;  %v2555_v43 = vmul.f32 %v13204_v59, %v2516_v48  ;;  %v2627_v9 = vmul.f32 %v13205_v3, %v2587_v50  ;;  %v10782_v44 = vadd.f32 %v10418_v57, %v13206_v10  ;;  %v10803_v54 = vld [vmem:[#allocation3 + $0xf9] sm:$0xff]  ;;  %v10817_v53 = vld [vmem:[%s12907_s3 + $0x1] ss:$0 sm:$0xff]  ;;  %v2690_v24 = vld [vmem:[#allocation3 + $0xe2] sm:$0xff] }
 0x2a7   : > { %v3174_v30 = vadd.f32 %v3142_v19, %v3069_v12  ;;  %v2760_v0 = vadd.f32 %v2728_v51, %v2656_v33  ;;  %v2863_v49 = vadd.f32 %v2831_v62, %v2759_v61  ;;  %v3070_v58 = vadd.f32 %v3038_v34, %v2966_v22  ;;  %v10806_v4 = vld [vmem:[#allocation3 + $0xf2] sm:$0xff] }
 0x2a8   : > { %7704 = vrot.lane.b32.xlu0 %v10774_v55, %s8349_s27  ;;  %v2833_v39 = vmul.f32 %v10315_v27, %v2516_v48  ;;  %v2657_v31 = vadd.f32 %v2625_v41, %v2553_v46  ;;  %v3246_v13 = vmul.f32 %v10378_v1, %v2585_v38  ;;  %v10790_v35 = vadd.f32 %v10418_v57, %v13207_v52 }
 0x2a9   : > { %7719 = vrot.lane.b32.xlu1 %v10774_v55, %s8354_s16  ;;  %v10793_v56 = vmul.f32 %v10329_v25, %v2587_v50  ;;  %v10796_v63 = vmul.f32 %v10364_v20, %v2516_v48  ;;  %v2935_v2 = vmul.f32 %v10329_v25, %v2585_v38  ;;  %v2729_v45 = vmul.f32 %v10304_v32, %v2689_v17 }
 0x2aa   : > { %v2659_v37 = vadd.f32 %v2627_v9, %v2555_v43  ;;  %v10801_v21 = vmul.f32 %v10378_v1, %v2587_v50  ;;  %v3278_v28 = vadd.f32 %v3246_v13, %v3174_v30  ;;  %v2832_v5 = vmul.f32 %v10315_v27, %v2515_v42  ;;  %v10823_v27 = vld [vmem:[#allocation3 + $0xfa] sm:$0xff]  ;;  %v10849_v30 = vld [vmem:[%s12907_s3 + $0x3] ss:$0 sm:$0xff] }
 0x2ab   : > { %v2967_v47 = vadd.f32 %v2935_v2, %v2863_v49  ;;  %v2554_v32 = vmul.f32 %v10811_v11, %v2515_v42  ;;  %v2626_v8 = vmul.f32 %v10817_v53, %v2586_v26  ;;  %v3143_v38 = vmul.f32 %v10364_v20, %v2515_v42  ;;  %v2518_v42 = vld [vmem:[#allocation3 + $0x108] sm:$0xff]  ;;  %v2520_v13 = vld [vmem:[#allocation3 + $0x120] sm:$0xff] }
 0x2ac   : > { %7724 = vrot.lane.b32.xlu0 %v10716_v7, %s8355_s26  ;;  %v2761_v18 = vadd.f32 %v2729_v45, %v2657_v31  ;;  %v2864_v29 = vadd.f32 %v2832_v5, %v2760_v0  ;;  %v2936_v23 = vmul.f32 %v10329_v25, %v2586_v26  ;;  %v3350_v16 = vmul.f32 %v10394_v60, %v2689_v17  ;;  %v10834_v7 = vld [vmem:[%s12907_s3 + $0x2] ss:$0 sm:$0xff]  ;;  %v2589_v5 = vld [vmem:[#allocation3 + $0x109] sm:$0xff] }
 0x2ad   : > { %v2556_v33 = vmul.f32 %v10811_v11, %v2517_v15  ;;  %v2628_v48 = vmul.f32 %v10817_v53, %v10803_v54  ;;  %v3175_v50 = vadd.f32 %v3143_v38, %v3070_v58  ;;  %v3247_v62 = vmul.f32 %v10378_v1, %v2586_v26  ;;  %v2591_v26 = vld [vmem:[#allocation3 + $0x121] sm:$0xff] }
 0x2ae   : > { %v2731_v19 = vmul.f32 %v10834_v7, %v10806_v4  ;;  %v2968_v22 = vadd.f32 %v2936_v23, %v2864_v29  ;;  %v3039_v25 = vmul.f32 %v10359_v14, %v2689_v17  ;;  %v3382_v59 = vadd.f32 %v3350_v16, %v3278_v28  ;;  %v2521_v16 = vld [vmem:[#allocation3 + $0x128] sm:$0xff] }
 0x2af   : > { %v2732_v46 = vmul.f32 %v10834_v7, %v10823_v27  ;;  %v2658_v3 = vadd.f32 %v2626_v8, %v2554_v32  ;;  %v3279_v41 = vadd.f32 %v3247_v62, %v3175_v50  ;;  %v3351_v12 = vmul.f32 %v10394_v60, %v2690_v24 }
 0x2b0   : > { %7729 = vrot.lane.b32.xlu0 %v10752_v40, %s8356_s30  ;;  %v2865_v51 = vadd.f32 %v2833_v39, %v2761_v18  ;;  %v3040_v61 = vmul.f32 %v10359_v14, %v2690_v24  ;;  %v3071_v34 = vadd.f32 %v3039_v25, %v2967_v47  ;;  %v3421_v43 = vadd.f32 %v10418_v57, %v3382_v59  ;;  %v10856_v40 = vld [vmem:[%s12907_s3 + $0x4] ss:$0 sm:$0xff]  ;;  %v2693_v25 = vld [vmem:[#allocation3 + $0x10a] sm:$0xff] }
 0x2b1   : > { %v2660_v9 = vadd.f32 %v2628_v48, %v2556_v33  ;;  %v2834_v17 = vmul.f32 %v10849_v30, %v2517_v15  ;;  %v2730_v0 = vmul.f32 %v10834_v7, %v2690_v24  ;;  %v3383_v49 = vadd.f32 %v3351_v12, %v3279_v41 }
 0x2b2   : > { %v2938_v58 = vmul.f32 %v10856_v40, %v10803_v54  ;;  %v3041_v10 = vmul.f32 %v10359_v14, %v10806_v4  ;;  %v3072_v39 = vadd.f32 %v3040_v61, %v2968_v22  ;;  %v3453_v31 = vmax.f32 %v3421_v43, 0.0  ;;  %v2519_v22 = vld [vmem:[#allocation3 + $0x110] sm:$0xff] }
 0x2b3   : > { %v2763_v52 = vadd.f32 %v2731_v19, %v2659_v37  ;;  %v3145_v2 = vmul.f32 %v10364_v20, %v2517_v15  ;;  %v2762_v45 = vadd.f32 %v2730_v0, %v2658_v3  ;;  %v3422_v28 = vadd.f32 %v10418_v57, %v3383_v49  ;;  %v10888_v19 = vld [vmem:[#allocation3 + $0x129] sm:$0xff] }
 0x2b4   : > { %7734 = vrot.lane.b32.xlu0 %v10774_v55, %s8357_s22  ;;  %v3176_v47 = vadd.f32 %v10796_v63, %v3071_v34  ;;  %3486 = vst.msk [vmem:[#allocation4 + $0xc1] sm:$0xff] %vm434_vm3, %v3453_v31  ;;  %v2835_v32 = vmul.f32 %v10849_v30, %v2518_v42  ;;  %v2969_v8 = vadd.f32 %v10793_v56, %v2865_v51  ;;  %v2590_v51 = vld [vmem:[#allocation3 + $0x111] sm:$0xff]  ;;  %v2695_v49 = vld [vmem:[#allocation3 + $0x122] sm:$0xff] }
 0x2b5   : > { %v3146_v37 = vmul.f32 %v10364_v20, %v2518_v42  ;;  %v3042_v15 = vmul.f32 %v10359_v14, %v10823_v27  ;;  %v3454_v38 = vmax.f32 %v3422_v28, 0.0  ;;  %v2559_v57 = vmul.f32 %v10811_v11, %v2520_v13  ;;  %v10923_v28 = vld [vmem:[%s12907_s3 + $0x5] ss:$0 sm:$0xff] }
 0x2b6   : > { %v2631_v24 = vmul.f32 %v10817_v53, %v2591_v26  ;;  %v3177_v18 = vadd.f32 %v3145_v2, %v3072_v39  ;;  %v2557_v55 = vmul.f32 %v10811_v11, %v2518_v42  ;;  %v2629_v63 = vmul.f32 %v10817_v53, %v2589_v5  ;;  %v2696_v42 = vld [vmem:[#allocation3 + $0x12a] sm:$0xff]  ;;  %v2694_v39 = vld [vmem:[#allocation3 + $0x112] sm:$0xff] }
 0x2b7   : > { %v3073_v29 = vadd.f32 %v3041_v10, %v2969_v8  ;;  %v2764_v23 = vadd.f32 %v2732_v46, %v2660_v9  ;;  %v3249_v56 = vmul.f32 %v10378_v1, %v10803_v54  ;;  %v10881_v20 = vmul.f32 %v10394_v60, %v10806_v4  ;;  %3487 = vst.msk [vmem:[#allocation4 + $0xc9] sm:$0xff] %vm434_vm3, %v3454_v38  ;;  %v10896_v60 = vld [vmem:[%s12907_s3 + $0x6] ss:$0 sm:$0xff]  ;;  %v10902_v4 = vld [vmem:[%s12907_s3 + $0x7] ss:$0 sm:$0xff] }
 0x2b8   : > { %v2866_v14 = vadd.f32 %v2834_v17, %v2762_v45  ;;  %v10885_v33 = vadd.f32 %v10801_v21, %v3176_v47  ;;  %v2837_v48 = vmul.f32 %v10849_v30, %v2520_v13  ;;  %v2867_v50 = vadd.f32 %v2835_v32, %v2763_v52 }
 0x2b9   : > { %v3178_v62 = vadd.f32 %v3146_v37, %v3073_v29  ;;  %v2663_v1 = vadd.f32 %v2631_v24, %v2559_v57  ;;  %v10891_v54 = vmul.f32 %v10856_v40, %v2591_v26  ;;  %v3148_v21 = vmul.f32 %v10896_v60, %v2520_v13 }
 0x2ba   : > { %v10905_v59 = vmul.f32 %v10902_v4, %v2591_v26  ;;  %v10907_v46 = vadd.f32 %v3249_v56, %v3177_v18  ;;  %v2661_v3 = vadd.f32 %v2629_v63, %v2557_v55  ;;  %v2939_v41 = vmul.f32 %v10856_v40, %v2589_v5 }
 0x2bb   : > { %v3250_v12 = vmul.f32 %v10902_v4, %v2589_v5  ;;  %v2560_v61 = vmul.f32 %v10811_v11, %v2521_v16  ;;  %v2632_v34 = vmul.f32 %v10817_v53, %v10888_v19  ;;  %v2733_v43 = vmul.f32 %v10834_v7, %v2693_v25 }
 0x2bc   : > { %v2836_v9 = vmul.f32 %v10849_v30, %v2519_v22  ;;  %v2971_v17 = vadd.f32 %v2939_v41, %v2867_v50  ;;  %v2558_v10 = vmul.f32 %v10811_v11, %v2519_v22  ;;  %v2970_v31 = vadd.f32 %v2938_v58, %v2866_v14  ;;  %v10929_v58 = vld [vmem:[%s12907_s3 + $0x8] ss:$0 sm:$0xff] }
 0x2bd   : > { %v3282_v0 = vadd.f32 %v3250_v12, %v3178_v62  ;;  %v2630_v13 = vmul.f32 %v10817_v53, %v2590_v51  ;;  %v2940_v52 = vmul.f32 %v10856_v40, %v2590_v51  ;;  %v3147_v2 = vmul.f32 %v10896_v60, %v2519_v22  ;;  %v10942_v22 = vld [vmem:[%s12908_s4] ss:$0 sm:$0xff] }
 0x2be   : > { %v2868_v26 = vadd.f32 %v2836_v9, %v2764_v23  ;;  %v2765_v45 = vadd.f32 %v2733_v43, %v2661_v3  ;;  %v3043_v5 = vmul.f32 %v10923_v28, %v2693_v25  ;;  %v3074_v47 = vadd.f32 %v3042_v15, %v2970_v31  ;;  %v2524_v3 = vld [vmem:[#allocation3 + $0x150] sm:$0xff]  ;;  %v2593_v31 = vld [vmem:[#allocation3 + $0x139] sm:$0xff] }
 0x2bf   : > { %v3354_v32 = vmul.f32 %v10929_v58, %v2693_v25  ;;  %v2735_v8 = vmul.f32 %v10834_v7, %v2695_v49  ;;  %v2736_v37 = vmul.f32 %v10834_v7, %v2696_v42  ;;  %v3044_v57 = vmul.f32 %v10923_v28, %v2694_v39  ;;  %v2595_v43 = vld [vmem:[#allocation3 + $0x151] sm:$0xff] }
 0x2c0   : > { %v2972_v38 = vadd.f32 %v2940_v52, %v2868_v26  ;;  %v3075_v24 = vadd.f32 %v3043_v5, %v2971_v17  ;;  %v3179_v18 = vadd.f32 %v3147_v2, %v3074_v47  ;;  %v3251_v55 = vmul.f32 %v10902_v4, %v2590_v51 }
 0x2c1   : > { %v3386_v63 = vadd.f32 %v3354_v32, %v3282_v0  ;;  %v2838_v15 = vmul.f32 %v10849_v30, %v2521_v16  ;;  %v3149_v29 = vmul.f32 %v10896_v60, %v2521_v16  ;;  %v2662_v23 = vadd.f32 %v2630_v13, %v2558_v10 }
 0x2c2   : > { %v3076_v56 = vadd.f32 %v3044_v57, %v2972_v38  ;;  %v2869_v14 = vadd.f32 %v2837_v48, %v2765_v45  ;;  %v3283_v50 = vadd.f32 %v3251_v55, %v3179_v18  ;;  %v3355_v62 = vmul.f32 %v10929_v58, %v2694_v39  ;;  %v2522_v48 = vld [vmem:[#allocation3 + $0x138] sm:$0xff] }
 0x2c3   : > { %v3425_v25 = vadd.f32 %v10942_v22, %v3386_v63  ;;  %v2664_v41 = vadd.f32 %v2632_v34, %v2560_v61  ;;  %v2767_v12 = vadd.f32 %v2735_v8, %v2663_v1  ;;  %v2942_v51 = vmul.f32 %v10856_v40, %v10888_v19 }
 0x2c4   : > { %v2734_v16 = vmul.f32 %v10834_v7, %v2694_v39  ;;  %v3180_v9 = vadd.f32 %v3148_v21, %v3075_v24  ;;  %v3181_v17 = vadd.f32 %v3149_v29, %v3076_v56  ;;  %v3387_v0 = vadd.f32 %v3355_v62, %v3283_v50  ;;  %v2523_v56 = vld [vmem:[#allocation3 + $0x140] sm:$0xff] }
 0x2c5   : > { %v3457_v10 = vmax.f32 %v3425_v25, 0.0  ;;  %v3045_v13 = vmul.f32 %v10923_v28, %v2695_v49  ;;  %v3253_v26 = vmul.f32 %v10902_v4, %v10888_v19  ;;  %v2563_v1 = vmul.f32 %v10811_v11, %v2524_v3  ;;  %v2596_v62 = vld [vmem:[#allocation3 + $0x159] sm:$0xff] }
 0x2c6   : > { %v2766_v52 = vadd.f32 %v2734_v16, %v2662_v23  ;;  %v3426_v61 = vadd.f32 %v10942_v22, %v3387_v0  ;;  %v2635_v34 = vmul.f32 %v10817_v53, %v2595_v43  ;;  %v2973_v21 = vadd.f32 %v10891_v54, %v2869_v14  ;;  %v2697_v14 = vld [vmem:[#allocation3 + $0x13a] sm:$0xff] }
 0x2c7   : > { %3490 = vst.msk [vmem:[#allocation4 + $0xf1] sm:$0xff] %vm434_vm3, %v3457_v10  ;;  %v3150_v39 = vmul.f32 %v10896_v60, %v2522_v48  ;;  %v3046_v2 = vmul.f32 %v10923_v28, %v2696_v42  ;;  %v2561_v45 = vmul.f32 %v10811_v11, %v2522_v48  ;;  %v2633_v5 = vmul.f32 %v10817_v53, %v2593_v31 }
 0x2c8   : > { %v2839_v19 = vmul.f32 %v10849_v30, %v2522_v48  ;;  %v3284_v47 = vadd.f32 %v10905_v59, %v3180_v9  ;;  %v3285_v32 = vadd.f32 %v3253_v26, %v3181_v17  ;;  %v3458_v8 = vmax.f32 %v3426_v61, 0.0  ;;  %v2594_v59 = vld [vmem:[#allocation3 + $0x141] sm:$0xff]  ;;  %v2699_v9 = vld [vmem:[#allocation3 + $0x152] sm:$0xff] }
 0x2c9   : > { %v3077_v38 = vadd.f32 %v3045_v13, %v2973_v21  ;;  %v2768_v57 = vadd.f32 %v2736_v37, %v2664_v41  ;;  %v3356_v24 = vmul.f32 %v10929_v58, %v2695_v49  ;;  %v3357_v54 = vmul.f32 %v10929_v58, %v2696_v42  ;;  %v2700_v17 = vld [vmem:[#allocation3 + $0x15a] sm:$0xff] }
 0x2ca   : > { %v2870_v18 = vadd.f32 %v2838_v15, %v2766_v52  ;;  %3491 = vst.msk [vmem:[#allocation4 + $0xf9] sm:$0xff] %vm434_vm3, %v3458_v8  ;;  %v2667_v55 = vadd.f32 %v2635_v34, %v2563_v1  ;;  %v2841_v63 = vmul.f32 %v10849_v30, %v2524_v3  ;;  %v10967_v29 = vmul.f32 %v10856_v40, %v2595_v43  ;;  %v2525_v15 = vld [vmem:[#allocation3 + $0x158] sm:$0xff] }
 0x2cb   : > { %v3182_v23 = vadd.f32 %v3150_v39, %v3077_v38  ;;  %v3152_v50 = vmul.f32 %v10896_v60, %v2524_v3  ;;  %v10971_v37 = vmul.f32 %v10902_v4, %v2595_v43  ;;  %v2665_v49 = vadd.f32 %v2633_v5, %v2561_v45  ;;  %v2698_v45 = vld [vmem:[#allocation3 + $0x142] sm:$0xff] }
 0x2cc   : > { %v2871_v42 = vadd.f32 %v2839_v19, %v2767_v12  ;;  %v10973_v25 = vadd.f32 %v3356_v24, %v3284_v47  ;;  %v10975_v41 = vadd.f32 %v3357_v54, %v3285_v32  ;;  %v2943_v16 = vmul.f32 %v10856_v40, %v2593_v31 }
 0x2cd   : > { %v3254_v48 = vmul.f32 %v10902_v4, %v2593_v31  ;;  %v2562_v0 = vmul.f32 %v10811_v11, %v2523_v56  ;;  %v2634_v3 = vmul.f32 %v10817_v53, %v2594_v59  ;;  %v2737_v43 = vmul.f32 %v10834_v7, %v2697_v14 }
 0x2ce   : > { %v2840_v12 = vmul.f32 %v10849_v30, %v2523_v56  ;;  %v2564_v13 = vmul.f32 %v10811_v11, %v2525_v15  ;;  %v2636_v26 = vmul.f32 %v10817_v53, %v2596_v62  ;;  %v2974_v52 = vadd.f32 %v2942_v51, %v2870_v18 }
 0x2cf   : > { %v3286_v10 = vadd.f32 %v3254_v48, %v3182_v23  ;;  %v2975_v1 = vadd.f32 %v2943_v16, %v2871_v42  ;;  %v2739_v61 = vmul.f32 %v10834_v7, %v2699_v9  ;;  %v2769_v31 = vadd.f32 %v2737_v43, %v2665_v49 }
 0x2d0   : > { %v3151_v34 = vmul.f32 %v10896_v60, %v2523_v56  ;;  %v2740_v21 = vmul.f32 %v10834_v7, %v2700_v17  ;;  %v2842_v39 = vmul.f32 %v10849_v30, %v2525_v15  ;;  %v3078_v5 = vadd.f32 %v3046_v2, %v2974_v52  ;;  %v2526_v2 = vld [vmem:[#allocation3 + $0x168] sm:$0xff] }
 0x2d1   : > { %v3358_v19 = vmul.f32 %v10929_v58, %v2697_v14  ;;  %v2946_v47 = vmul.f32 %v10856_v40, %v2596_v62  ;;  %v2666_v32 = vadd.f32 %v2634_v3, %v2562_v0  ;;  %v2872_v8 = vadd.f32 %v2840_v12, %v2768_v57 }
 0x2d2   : > { %v3047_v51 = vmul.f32 %v10923_v28, %v2697_v14  ;;  %v2668_v38 = vadd.f32 %v2636_v26, %v2564_v13  ;;  %v3183_v24 = vadd.f32 %v3151_v34, %v3078_v5  ;;  %v3255_v54 = vmul.f32 %v10902_v4, %v2594_v59 }
 0x2d3   : > { %v3390_v18 = vadd.f32 %v3358_v19, %v3286_v10  ;;  %v2738_v23 = vmul.f32 %v10834_v7, %v2698_v45  ;;  %v2873_v56 = vadd.f32 %v2841_v63, %v2769_v31  ;;  %v2944_v49 = vmul.f32 %v10856_v40, %v2594_v59 }
 0x2d4   : > { %v3079_v42 = vadd.f32 %v3047_v51, %v2975_v1  ;;  %v2771_v16 = vadd.f32 %v2739_v61, %v2667_v55  ;;  %v3287_v48 = vadd.f32 %v3255_v54, %v3183_v24  ;;  %v3359_v43 = vmul.f32 %v10929_v58, %v2698_v45  ;;  %v2597_v1 = vld [vmem:[#allocation3 + $0x169] sm:$0xff]  ;;  %v2598_v51 = vld [vmem:[#allocation3 + $0x171] sm:$0xff] }
 0x2d5   : > { %v3429_v57 = vadd.f32 %v10942_v22, %v3390_v18  ;;  %v3049_v14 = vmul.f32 %v10923_v28, %v2699_v9  ;;  %v3050_v0 = vmul.f32 %v10923_v28, %v2700_v17  ;;  %v2770_v3 = vadd.f32 %v2738_v23, %v2666_v32  ;;  %v2701_v23 = vld [vmem:[#allocation3 + $0x16a] sm:$0xff] }
 0x2d6   : > { %v2976_v12 = vadd.f32 %v2944_v49, %v2872_v8  ;;  %v3153_v10 = vmul.f32 %v10896_v60, %v2525_v15  ;;  %v3391_v13 = vadd.f32 %v3359_v43, %v3287_v48  ;;  %v2843_v59 = vmul.f32 %v10849_v30, %v2526_v2  ;;  %v2805_v15 = vld [vmem:[#allocation3 + $0x180] sm:$0xff]  ;;  %v2527_v8 = vld [vmem:[#allocation3 + $0x170] sm:$0xff] }
 0x2d7   : > { %v3461_v63 = vmax.f32 %v3429_v57, 0.0  ;;  %v11002_v26 = vmul.f32 %v10902_v4, %v2596_v62  ;;  %v3048_v55 = vmul.f32 %v10923_v28, %v2698_v45  ;;  %v3184_v52 = vadd.f32 %v3152_v50, %v3079_v42  ;;  %v2702_v48 = vld [vmem:[#allocation3 + $0x172] sm:$0xff] }
 0x2d8   : > { %v2977_v61 = vadd.f32 %v10967_v29, %v2873_v56  ;;  %v2772_v31 = vadd.f32 %v2740_v21, %v2668_v38  ;;  %v11007_v34 = vmul.f32 %v10929_v58, %v2699_v9  ;;  %v3430_v5 = vadd.f32 %v10942_v22, %v3391_v13  ;;  %v11015_v21 = vld [vmem:[#allocation3 + $0x181] sm:$0xff] }
 0x2d9   : > { %3494 = vst.msk [vmem:[#allocation4 + $0x121] sm:$0xff] %vm434_vm3, %v3461_v63  ;;  %v3154_v19 = vmul.f32 %v10896_v60, %v2526_v2  ;;  %v11013_v62 = vmul.f32 %v10929_v58, %v2700_v17  ;;  %v2874_v32 = vadd.f32 %v2842_v39, %v2770_v3  ;;  %v3080_v45 = vadd.f32 %v3048_v55, %v2976_v12  ;;  %v3619_v63 = vld [vmem:[#allocation4 + $0xf8] sm:$0xff] }
 0x2da   : > { %v3081_v50 = vadd.f32 %v3049_v14, %v2977_v61  ;;  %v3462_v29 = vmax.f32 %v3430_v5, 0.0  ;;  %v2565_v9 = vmul.f32 %v10811_v11, %v2526_v2  ;;  %v2637_v38 = vmul.f32 %v10817_v53, %v2597_v1  ;;  %v3557_v5 = vld [vmem:[#allocation4 + $0xf9] sm:$0xff] }
 0x2db   : > { %v2875_v24 = vadd.f32 %v2843_v59, %v2771_v16  ;;  %v3288_v54 = vadd.f32 %v10971_v37, %v3184_v52  ;;  %v11021_v18 = vmul.f32 %v10849_v30, %v2805_v15  ;;  %v3156_v17 = vmul.f32 %v10896_v60, %v2805_v15  ;;  %v2806_v15 = vld [vmem:[#allocation3 + $0x188] sm:$0xff] }
 0x2dc   : > { %v3186_v39 = vadd.f32 %v3154_v19, %v3081_v50  ;;  %3495 = vst.msk [vmem:[#allocation4 + $0x129] sm:$0xff] %vm434_vm3, %v3462_v29  ;;  %v2947_v56 = vmul.f32 %v10856_v40, %v2597_v1  ;;  %v3258_v49 = vmul.f32 %v10902_v4, %v2597_v1  ;;  %v2566_v42 = vmul.f32 %v10811_v11, %v2527_v8 }
 0x2dd   : > { %v2638_v2 = vmul.f32 %v10817_v53, %v2598_v51  ;;  %v3185_v16 = vadd.f32 %v3153_v10, %v3080_v45  ;;  %v11031_v37 = vmul.f32 %v10902_v4, %v11015_v21  ;;  %v2844_v43 = vmul.f32 %v10849_v30, %v2527_v8 }
 0x2de   : > { %v2978_v57 = vadd.f32 %v2946_v47, %v2874_v32  ;;  %v2669_v14 = vadd.f32 %v2637_v38, %v2565_v9  ;;  %v2979_v3 = vadd.f32 %v2947_v56, %v2875_v24  ;;  %v3290_v12 = vadd.f32 %v3258_v49, %v3186_v39  ;;  %v3618_v47 = vld [vmem:[#allocation4 + $0xf0] sm:$0xff] }
 0x2df   : > { %v2741_v13 = vmul.f32 %v10834_v7, %v2701_v23  ;;  %v2876_v59 = vadd.f32 %v2844_v43, %v2772_v31  ;;  %v2948_v11 = vmul.f32 %v10856_v40, %v2598_v51  ;;  %v3155_v53 = vmul.f32 %v10896_v60, %v2527_v8  ;;  %v3556_v9 = vld [vmem:[#allocation4 + $0xf1] sm:$0xff]  ;;  %v2910_v43 = vld [vmem:[#allocation3 + $0x189] sm:$0xff] }
 0x2e0   : > { %v3082_v55 = vadd.f32 %v3050_v0, %v2978_v57  ;;  %v2670_v10 = vadd.f32 %v2638_v2, %v2566_v42  ;;  %v3051_v52 = vmul.f32 %v10923_v28, %v2701_v23  ;;  %v3052_v1 = vmul.f32 %v10923_v28, %v2702_v48  ;;  %v3588_v42 = vld [vmem:[#allocation4 + $0xf2] sm:$0xff]  ;;  %v3589_v2 = vld [vmem:[#allocation4 + $0xfa] sm:$0xff] }
 0x2e1   : > { %v3362_v61 = vmul.f32 %v10929_v58, %v2701_v23  ;;  %v2980_v19 = vadd.f32 %v2948_v11, %v2876_v59  ;;  %v3259_v45 = vmul.f32 %v10902_v4, %v2598_v51  ;;  %v11041_v31 = vpack.i.bf16 %v3619_v63, %v3618_v47  ;;  %v13209_v47 = vld [vmem:[#allocation49_spill] sm:$0xff] }
 0x2e2   : > { %v3187_v32 = vadd.f32 %v3155_v53, %v3082_v55  ;;  %v2742_v0 = vmul.f32 %v10834_v7, %v2702_v48  ;;  %v3083_v50 = vadd.f32 %v3051_v52, %v2979_v3  ;;  %v3363_v8 = vmul.f32 %v10929_v58, %v2702_v48  ;;  %v13208_v55 = vld [vmem:[#allocation47_spill] sm:$0xff] }
 0x2e3   : > { %v3394_v29 = vadd.f32 %v3362_v61, %v3290_v12  ;;  %v3084_v38 = vadd.f32 %v3052_v1, %v2980_v19  ;;  %7749 = vrot.lane.b32.xlu1 %v11041_v31, %s8351_s14  ;;  %v11047_v39 = vpack.i.bf16 %v3557_v5, %v3556_v9  ;;  %v3443_v23 = vmax.f32 %v10782_v44, 0.0 }
 0x2e4   : > { %v3291_v24 = vadd.f32 %v3259_v45, %v3187_v32  ;;  %v3289_v51 = vadd.f32 %v11002_v26, %v3185_v16  ;;  %v3157_v56 = vmul.f32 %v10896_v60, %v2806_v15  ;;  %v2773_v49 = vadd.f32 %v2741_v13, %v2669_v14  ;;  %v8306_v13 = vld [vmem:[%s12909_s5] sm:$0xff]  }
 0x2e5   : > { %v3433_v7 = vadd.f32 %v10942_v22, %v3394_v29  ;;  %v3392_v48 = vadd.f32 %v11007_v34, %v3288_v54  ;;  %v2774_v57 = vadd.f32 %v2742_v0, %v2670_v10  ;;  %7739 = vrot.lane.b32.xlu0 %v11047_v39, %s8347_s25  ;;  %v3444_v12 = vmax.f32 %v10790_v35, 0.0  ;;  %3476 = vst.msk [vmem:[#allocation4 + $0x49] sm:$0xff] %vm434_vm3, %v3443_v23  ;;  %v3014_v10 = vld [vmem:[#allocation3 + $0x18a] sm:$0xff] }
 0x2e6   : > { %v3395_v3 = vadd.f32 %v3363_v8, %v3291_v24  ;;  %v2846_v44 = vmul.f32 %v10849_v30, %v2806_v15  ;;  %v3188_v26 = vadd.f32 %v3156_v17, %v3083_v50  ;;  %v3189_v16 = vadd.f32 %v3157_v56, %v3084_v38  ;;  %v3013_v17 = vld [vmem:[#allocation3 + $0x182] sm:$0xff]  ;;  %6916 = vmatprep.subr.bf16.mxu1 %v8306_v13  ;;  %v8307_v15 = vld [vmem:[%s12909_s5 + $0x8] sm:$0xff]  }
 0x2e7   : > { %v3465_v14 = vmax.f32 %v3433_v7, 0.0  ;;  %3477 = vst.msk [vmem:[#allocation4 + $0x51] sm:$0xff] %vm434_vm3, %v3444_v12  ;;  %v11064_v54 = vpack.i.bf16 %v3589_v2, %v3588_v42  ;;  %v3427_v35 = vadd.f32 %v10942_v22, %v10973_v25  ;;  %v3428_v63 = vadd.f32 %v10942_v22, %v10975_v41  ;;  %6917 = vmatpush3.bf16.msra.mxu1 %v8306_v13  ;;  %v3118_v38 = vld [vmem:[#allocation3 + $0x198] sm:$0xff]  ;;  %v3119_v24 = vld [vmem:[#allocation3 + $0x1a0] sm:$0xff] }
 0x2e8   : > { %v3434_v34 = vadd.f32 %v10942_v22, %v3395_v3  ;;  %v3393_v30 = vadd.f32 %v11013_v62, %v3289_v51  ;;  %v3261_v59 = vmul.f32 %v10902_v4, %v2910_v43  ;;  %v2877_v11 = vadd.f32 %v11021_v18, %v2773_v49  ;;  %6918 = vmatprep.subr.bf16.mxu1 %v8307_v15 }
 0x2e9   : > { %3498 = vst.msk [vmem:[#allocation4 + $0x151] sm:$0xff] %vm434_vm3, %v3465_v14  ;;  %v3415_v53 = vadd.f32 %v10942_v22, %v13208_v55  ;;  %v2878_v52 = vadd.f32 %v2846_v44, %v2774_v57  ;;  %7744 = vrot.lane.b32.xlu0 %v11064_v54, %s8349_s27  ;;  %v3459_v25 = vmax.f32 %v3427_v35, 0.0  ;;  %v3460_v41 = vmax.f32 %v3428_v63, 0.0  ;;  %v8308_v57 = vld [vmem:[%s12909_s5 + $0x10] sm:$0xff]  }
 0x2ea   : > { %v3466_v1 = vmax.f32 %v3434_v34, 0.0  ;;  %v3292_v62 = vadd.f32 %v11031_v37, %v3188_v26  ;;  %v3293_v61 = vadd.f32 %v3261_v59, %v3189_v16  ;;  %v3416_v18 = vadd.f32 %v10942_v22, %v13209_v47  ;;  %v8310_v47 = vld [vmem:[%s12909_s5 + $0x20] ss:$0 sps:$4 sm:$0xff]  }
 0x2eb   : > { %v3447_v5 = vmax.f32 %v3415_v53, 0.0  ;;  %v3353_v19 = vmul.f32 %v10929_v58, %v10823_v27  ;;  %v2949_v32 = vmul.f32 %v10856_v40, %v11015_v21  ;;  %v2950_v45 = vmul.f32 %v10856_v40, %v2910_v43  ;;  %3492 = vst.msk [vmem:[#allocation4 + $0x109] sm:$0xff] %vm434_vm3, %v3459_v25  ;;  %3493 = vst.msk [vmem:[#allocation4 + $0x111] sm:$0xff] %vm434_vm3, %v3460_v41  ;;  %v3222_v53 = vld [vmem:[#allocation3 + $0x199] sm:$0xff]  ;;  %v3327_v25 = vld [vmem:[#allocation3 + $0x1a2] sm:$0xff] }
 0x2ec   : > { %v3364_v0 = vmul.f32 %v10929_v58, %v3013_v17  ;;  %3499 = vst.msk [vmem:[#allocation4 + $0x159] sm:$0xff] %vm434_vm3, %v3466_v1  ;;  %v3365_v37 = vmul.f32 %v10929_v58, %v3014_v10  ;;  %v3448_v50 = vmax.f32 %v3416_v18, 0.0  ;;  %v3431_v27 = vadd.f32 %v10942_v22, %v3392_v48  ;;  %6919 = vmatpush3.bf16.msra.mxu1 %v8307_v15  ;;  %v3542_v56 = vld [vmem:[#allocation4 + $0x49] sm:$0xff] }
 0x2ed   : > { %3480 = vst.msk [vmem:[#allocation4 + $0x79] sm:$0xff] %vm434_vm3, %v3447_v5  ;;  %v3432_v8 = vadd.f32 %v10942_v22, %v3393_v30  ;;  %v3384_v40 = vadd.f32 %v10881_v20, %v10885_v33  ;;  %v3385_v21 = vadd.f32 %v3353_v19, %v10907_v46  ;;  %v2981_v29 = vadd.f32 %v2949_v32, %v2877_v11  ;;  %v11104_v20 = vld [vmem:[#allocation4 + $0x48] sm:$0xff] }
 0x2ee   : > { %v2982_v9 = vadd.f32 %v2950_v45, %v2878_v52  ;;  %v3396_v23 = vadd.f32 %v3364_v0, %v3292_v62  ;;  %v3397_v51 = vadd.f32 %v3365_v37, %v3293_v61  ;;  %v3543_v49 = vld [vmem:[#allocation4 + $0x51] sm:$0xff]  ;;  %3481 = vst.msk [vmem:[#allocation4 + $0x81] sm:$0xff] %vm434_vm3, %v3448_v50  ;;  %v3463_v7 = vmax.f32 %v3431_v27, 0.0  ;;  %6920 = vmatprep.subr.bf16.mxu1 %v8308_v57  ;;  %v3545_v19 = vld [vmem:[#allocation4 + $0x69] sm:$0xff]  ;;  %v3544_v37 = vld [vmem:[#allocation4 + $0x61] sm:$0xff] }
 0x2ef   : > { %v3464_v42 = vmax.f32 %v3432_v8, 0.0  ;;  %v3053_v2 = vmul.f32 %v10923_v28, %v3013_v17  ;;  %v11102_v48 = vpack.i.bf16 %v3543_v49, %v3542_v56  ;;  %v11106_v33 = vld [vmem:[#allocation4 + $0x50] sm:$0xff]  ;;  %v3419_v46 = vadd.f32 %v10942_v22, %v10697_v6  ;;  %v8309_v62 = vld [vmem:[%s12909_s5 + $0x18] sm:$0xff]  }
 0x2f0   : > { %v3420_v43 = vadd.f32 %v10942_v22, %v10714_v36  ;;  %v3054_v3 = vmul.f32 %v10923_v28, %v3014_v10  ;;  %v3158_v12 = vmul.f32 %v10896_v60, %v3118_v38  ;;  %v3159_v44 = vmul.f32 %v10896_v60, %v3119_v24  ;;  %v3574_v26 = vld [vmem:[#allocation4 + $0x4a] sm:$0xff]  ;;  %v3575_v16 = vld [vmem:[#allocation4 + $0x52] sm:$0xff]  ;;  %3496 = vst.msk [vmem:[#allocation4 + $0x139] sm:$0xff] %vm434_vm3, %v3463_v7  ;;  %v11165_v7 = vld [vmem:[#allocation4 + $0x60] sm:$0xff] }
 0x2f1   : > { %v7763_v14 = vpack.i.bf16 %v11106_v33, %v11104_v20  ;;  %3497 = vst.msk [vmem:[#allocation4 + $0x141] sm:$0xff] %vm434_vm3, %v3464_v42  ;;  %v3085_v6 = vadd.f32 %v3053_v2, %v2981_v29  ;;  %7754 = vrot.lane.b32.xlu1 %v11102_v48, %s8347_s25  ;;  %v3451_v36 = vmax.f32 %v3419_v46, 0.0  ;;  %v3423_v28 = vadd.f32 %v10942_v22, %v3384_v40  ;;  %v3223_v52 = vld [vmem:[#allocation3 + $0x1a1] sm:$0xff] }
 0x2f2   : > { %v3452_v13 = vmax.f32 %v3420_v43, 0.0  ;;  %v3086_v34 = vadd.f32 %v3054_v3, %v2982_v9  ;;  %v3424_v60 = vadd.f32 %v10942_v22, %v3385_v21  ;;  %v3435_v35 = vadd.f32 %v10942_v22, %v3396_v23  ;;  %6921 = vmatpush3.bf16.msra.mxu1 %v8308_v57  ;;  %v3326_v1 = vld [vmem:[#allocation3 + $0x19a] sm:$0xff]  ;;  %v3591_v2 = vld [vmem:[#allocation4 + $0x112] sm:$0xff] }
 0x2f3   : > { %7764 = vrot.lane.b32.xlu0 %v7763_v14, %s8351_s14  ;;  %v3436_v63 = vadd.f32 %v10942_v22, %v3397_v51  ;;  %v7758_v30 = vpack.i.bf16 %v3575_v16, %v3574_v26  ;;  %3484 = vst.msk [vmem:[#allocation4 + $0xa9] sm:$0xff] %vm434_vm3, %v3451_v36  ;;  %v3455_v17 = vmax.f32 %v3423_v28, 0.0  ;;  %v3190_v10 = vadd.f32 %v3158_v12, %v3085_v6  ;;  %v3577_v40 = vld [vmem:[#allocation4 + $0x6a] sm:$0xff]  ;;  %v6342_v12 = vld [vmem:[%s12913_s9] sm:$0x3]  ;;  %v13211_v28 = vld [vmem:[#allocation9_spill] sm:$0xff] }
 0x2f4   : > { %3485 = vst.msk [vmem:[#allocation4 + $0xb1] sm:$0xff] %vm434_vm3, %v3452_v13  ;;  %v3456_v59 = vmax.f32 %v3424_v60, 0.0  ;;  %v3467_v11 = vmax.f32 %v3435_v35, 0.0  ;;  %v3191_v41 = vadd.f32 %v3159_v44, %v3086_v34  ;;  %v3262_v61 = vmul.f32 %v10902_v4, %v3222_v53  ;;  %6922 = vmatprep.subr.bf16.mxu1 %v8309_v62  ;;  %v3559_v38 = vld [vmem:[#allocation4 + $0x111] sm:$0xff]  ;;  %v11158_v51 = vld [vmem:[#allocation4 + $0x68] sm:$0xff]  ;;  %7001 = vmatprep.subr.msk.bf16.mxu0 %vm2298_vm4, %v6342_v12  ;;  %v13212_v60 = vld [vmem:[#allocation6_spill] sm:$0xff] }
 0x2f5   : > { %v3468_v55 = vmax.f32 %v3436_v63, 0.0  ;;  %7759 = vrot.lane.b32.xlu1 %v7758_v30, %s8349_s27  ;;  %3488 = vst.msk [vmem:[#allocation4 + $0xd9] sm:$0xff] %vm434_vm3, %v3455_v17  ;;  %v3263_v18 = vmul.f32 %v10902_v4, %v3223_v52  ;;  %v3366_v5 = vmul.f32 %v10929_v58, %v3326_v1  ;;  %v3367_v15 = vmul.f32 %v10929_v58, %v3327_v25  ;;  %v3576_v4 = vld [vmem:[#allocation4 + $0x62] sm:$0xff]  ;;  %v11152_v58 = vpop.permute.xlu0 %7664  ;;  %v3590_v42 = vld [vmem:[#allocation4 + $0x10a] sm:$0xff]  ;;  %v3578_v52 = vld [vmem:[#allocation4 + $0x7a] sm:$0xff] }
 0x2f6   : > { %3489 = vst.msk [vmem:[#allocation4 + $0xe1] sm:$0xff] %vm434_vm3, %v3456_v59  ;;  %3500 = vst.msk [vmem:[#allocation4 + $0x169] sm:$0xff] %vm434_vm3, %v3467_v11  ;;  %6923 = vmatpush3.bf16.msra.mxu1 %v8309_v62  ;;  %v3294_v32 = vadd.f32 %v3262_v61, %v3190_v10  ;;  %v5187_v45 = vsel %vm5185_vm14, %v8310_v47, 0  ;;  %v7803_v27 = vpack.i.bf16 %v3545_v19, %v3544_v37  ;;  %v3558_v56 = vld [vmem:[#allocation4 + $0x109] sm:$0xff]  ;;  %v3560_v44 = vld [vmem:[#allocation4 + $0x121] sm:$0xff]  ;;  %v6399_v26 = vsel %vm2298_vm4, %v6342_v12, 0 }
 0x2f7   : > { %7784 = vrot.lane.b32.xlu0 %v11102_v48, %s8353_s21  ;;  %3501 = vst.msk [vmem:[#allocation4 + $0x171] sm:$0xff] %vm434_vm3, %v3468_v55  ;;  %7000 = vmatprep.subr.msk.bf16.mxu1 %vm5185_vm14, %v8310_v47  ;;  %v3295_v0 = vadd.f32 %v3263_v18, %v3191_v41  ;;  %v7808_v24 = vpack.i.bf16 %v3577_v40, %v3576_v4  ;;  %v3561_v57 = vld [vmem:[#allocation4 + $0x129] sm:$0xff]  ;;  %v11198_v59 = vld [vmem:[#allocation4 + $0x80] sm:$0xff]  ;;  %v11204_v10 = vld [vmem:[#allocation4 + $0x78] sm:$0xff]  ;;  %v7667_v41 = vunpack.i.h.bf16 %v11152_v58  ;;  %v7666_v62 = vunpack.i.l.bf16 %v11152_v58 }
 0x2f8   : > { %v3398_v50 = vadd.f32 %v3366_v5, %v3294_v32  ;;  %v11163_v49 = vpack.i.bf16 %v3559_v38, %v3558_v56  ;;  %v11172_v46 = vpack.i.bf16 %v3591_v2, %v3590_v42  ;;  %v7843_v16 = vpack.i.bf16 %v3561_v57, %v3560_v44  ;;  %6959 = vmatpush3.bf16.msra.mxu0 %v6399_v26  ;;  %v3593_v6 = vld [vmem:[#allocation4 + $0x12a] sm:$0xff]  ;;  %v3546_v55 = vld [vmem:[#allocation4 + $0x79] sm:$0xff]  ;;  %v3579_v1 = vld [vmem:[#allocation4 + $0x82] sm:$0xff] }
 0x2f9   : > { %7769 = vrot.lane.b32.xlu1 %v7763_v14, %s8355_s26  ;;  %v3399_v8 = vadd.f32 %v3367_v15, %v3295_v0  ;;  %v3592_v14 = vld [vmem:[#allocation4 + $0x122] sm:$0xff]  ;;  %v13210_v13 = vld [vmem:[#allocation8_spill] sm:$0xff]  ;;  %v7878_v25 = vpack.i.bf16 %v11198_v59, %v11204_v10  ;;  %v7858_v5 = vpack.i.bf16 %v3579_v1, %v3578_v52  ;;  %v3549_v58 = vld [vmem:[#allocation4 + $0x99] sm:$0xff]  ;;  %vm5044_vm4 = vcmask 523264  }
 0x2fa   : > { %6925 = vmatpush3.bf16.msra.mxu1 %v5187_v45  ;;  %v3437_v21 = vadd.f32 %v10942_v22, %v3398_v50  ;;  %v6326_v34 = vpack.c.bf16 %v13211_v28, %v13210_v13  ;;  %v13213_v35 = vld [vmem:[#allocation7_spill] sm:$0xff]  ;;  %v7848_v17 = vpack.i.bf16 %v3593_v6, %v3592_v14  ;;  %v3504_v47 = vld [vmem:[#allocation4] sm:$0xff]  ;;  %v11248_v1 = vld [vmem:[#allocation4 + $0x90] sm:$0xff] }
 0x2fb   : > { %7789 = vrot.lane.b32.xlu0 %v7758_v30, %s8354_s16  ;;  %v3438_v29 = vadd.f32 %v10942_v22, %v3399_v8  ;;  %v7670_v22 = vpop.permute.xlu0 %7669  ;;  %v6327_v63 = vpack.c.bf16 %v13213_v35, %v13212_v60  ;;  %v3505_v18 = vld [vmem:[#allocation4 + $0x8] sm:$0xff]  ;;  %v4817_v45 = vsel %vm434_vm3, %v3504_v47, %v7666_v62  ;;  %v3581_v12 = vld [vmem:[#allocation4 + $0x9a] sm:$0xff] }
 0x2fc   : > { %v3469_v9 = vmax.f32 %v3437_v21, 0.0  ;;  %6960 = vmatprep.mubr.msk.bf16.mxu0 %vm388_vm0, %v6326_v34  ;;  %v7672_v15 = vunpack.i.h.bf16 %v7670_v22  ;;  %v7671_v19 = vunpack.i.l.bf16 %v7670_v22  ;;  %v4818_v32 = vsel %vm434_vm3, %v3505_v18, %v7667_v41  ;;  %v3563_v60 = vld [vmem:[#allocation4 + $0x141] sm:$0xff]  ;;  %v3565_v18 = vld [vmem:[#allocation4 + $0x159] sm:$0xff] }
 0x2fd   : > { %7774 = vrot.lane.b32.xlu1 %v11102_v48, %s8356_s30  ;;  %v3470_v23 = vmax.f32 %v3438_v29, 0.0  ;;  %v7828_v48 = vpack.i.bf16 %v11158_v51, %v11165_v7  ;;  %6961 = vmatmul.mubr.msk.bf16.vlgmr.msra.gmra.mrb[16].mxu0 %vm388_vm0, %v6327_v63  ;;  %v3595_v41 = vld [vmem:[#allocation4 + $0x142] sm:$0xff] }
 0x2fe   : > { %3502 = vst.msk [vmem:[#allocation4 + $0x181] sm:$0xff] %vm434_vm3, %v3469_v9  ;;  %v4850_v8 = vsel %vm2041_vm7, %v4818_v32, %v7672_v15  ;;  %v3597_v32 = vld [vmem:[#allocation4 + $0x15a] sm:$0xff] }
 0x2ff   : > { %7804 = vrot.lane.b32.xlu0 %v7803_v27, %s8347_s25  ;;  %3503 = vst.msk [vmem:[#allocation4 + $0x189] sm:$0xff] %vm434_vm3, %v3470_v23  ;;  %v3548_v23 = vld [vmem:[#allocation4 + $0x91] sm:$0xff] }
 0x301   : > { %7779 = vrot.lane.b32.xlu1 %v7758_v30, %s8357_s22  ;;  %v3547_v30 = vld [vmem:[#allocation4 + $0x81] sm:$0xff] }
 0x302   : > { %v7853_v53 = vpack.i.bf16 %v3547_v30, %v3546_v55 }
 0x303   : > { %7809 = vrot.lane.b32.xlu0 %v7808_v24, %s8349_s27 }
 0x305   : > { %7794 = vrot.lane.b32.xlu1 %v11163_v49, %s8347_s25 }
 0x307   : > { %7829 = vrot.lane.b32.xlu0 %v7828_v48, %s8355_s26 }
 0x309   : > { %7799 = vrot.lane.b32.xlu1 %v11172_v46, %s8349_s27  ;;  %v11176_v43 = vpop.permute.xlu0 %7684 }
 0x30a   : > { %v7687_v37 = vunpack.i.h.bf16 %v11176_v43  ;;  %v7686_v50 = vunpack.i.l.bf16 %v11176_v43 }
 0x30b   : > { %7834 = vrot.lane.b32.xlu0 %v7803_v27, %s8356_s30 }
 0x30c   : > { %v4882_v56 = vsel %vm2107_vm9, %v4850_v8, %v7687_v37 }
 0x30d   : > { %7814 = vrot.lane.b32.xlu1 %v7828_v48, %s8351_s14  ;;  %v11180_v3 = vpop.permute.xlu0 %7689  ;;  %v7903_v48 = vpack.i.bf16 %v3549_v58, %v3548_v23  ;;  %v3613_v58 = vld [vmem:[#allocation4 + $0xb0] sm:$0xff] }
 0x30e   : > { %v7692_v4 = vunpack.i.h.bf16 %v11180_v3  ;;  %v7691_v40 = vunpack.i.l.bf16 %v11180_v3  ;;  %v3580_v3 = vld [vmem:[#allocation4 + $0x92] sm:$0xff] }
 0x30f   : > { %7839 = vrot.lane.b32.xlu0 %v7808_v24, %s8357_s22  ;;  %v7908_v35 = vpack.i.bf16 %v3581_v12, %v3580_v3  ;;  %v3553_v3 = vld [vmem:[#allocation4 + $0xc9] sm:$0xff]  ;;  %v3552_v12 = vld [vmem:[#allocation4 + $0xc1] sm:$0xff] }
 0x310   : > { %v4914_v57 = vsel %vm2173_vm11, %v4882_v56, %v7692_v4  ;;  %v3551_v4 = vld [vmem:[#allocation4 + $0xb1] sm:$0xff]  ;;  %v11279_v56 = vpop.permute.xlu1 %7674 }
 0x311   : > { %7819 = vrot.lane.b32.xlu1 %v7803_v27, %s8353_s21  ;;  %v11189_v36 = vpop.permute.xlu0 %7694  ;;  %v4849_v27 = vsel %vm2041_vm7, %v4817_v45, %v7671_v19  ;;  %v3596_v19 = vld [vmem:[#allocation4 + $0x152] sm:$0xff]  ;;  %v13214_v45 = vld [vmem:[#allocation10_spill] sm:$0xff] }
 0x312   : > { %v7697_v21 = vunpack.i.h.bf16 %v11189_v36  ;;  %v7696_v29 = vunpack.i.l.bf16 %v11189_v36  ;;  %v4881_v22 = vsel %vm2107_vm9, %v4849_v27, %v7686_v50  ;;  %v13216_v50 = vld [vmem:[#allocation12_spill] sm:$0xff]  ;;  %v13217_v27 = vld [vmem:[#allocation13_spill] sm:$0xff] }
 0x313   : > { %7844 = vrot.lane.b32.xlu0 %v7843_v16, %s8347_s25  ;;  %v4913_v43 = vsel %vm2173_vm11, %v4881_v22, %v7691_v40  ;;  %v6329_v8 = vpack.c.bf16 %v13217_v27, %v13216_v50  ;;  %v11272_v40 = vpack.i.bf16 %v3597_v32, %v3596_v19  ;;  %v3587_v19 = vld [vmem:[#allocation4 + $0xe2] sm:$0xff] }
 0x314   : > { %v4946_v44 = vsel %vm4945_vm15, %v4913_v43, %v7696_v29  ;;  %v4947_v26 = vsel %vm4945_vm15, %v4914_v57, %v7697_v21  ;;  %v3550_v21 = vld [vmem:[#allocation4 + $0xa9] sm:$0xff] }
 0x315   : > { %7824 = vrot.lane.b32.xlu1 %v7808_v24, %s8354_s16  ;;  %v7953_v29 = vpack.i.bf16 %v3551_v4, %v3550_v21  ;;  %v13219_v50 = vld [vmem:[#allocation15_spill] sm:$0xff]  ;;  %v13221_v4 = vld [vmem:[#allocation17_spill] sm:$0xff] }
 0x316   : > { %v11200_v11 = vpop.permute.xlu0 %7699 }
 0x317   : > { %7849 = vrot.lane.b32.xlu0 %v7848_v17, %s8349_s27  ;;  %v11243_v17 = vld [vmem:[#allocation4 + $0x98] sm:$0xff] }
 0x318   : > { %v7928_v62 = vpack.i.bf16 %v11243_v17, %v11248_v1 }
 0x319   : > { %7854 = vrot.lane.b32.xlu1 %v7853_v53, %s8347_s25 }
 0x31a   : > { %v11211_v61 = vpop.permute.xlu0 %7704 }
 0x31b   : > { %7879 = vrot.lane.b32.xlu0 %v7878_v25, %s8351_s14 }
 0x31d   : > { %7859 = vrot.lane.b32.xlu1 %v7858_v5, %s8349_s27 }
 0x31e   : > { %v7725_v0 = vpop.permute.xlu0 %7724 }
 0x31f   : > { %7884 = vrot.lane.b32.xlu0 %v7853_v53, %s8353_s21  ;;  %v7727_v38 = vunpack.i.h.bf16 %v7725_v0  ;;  %v7726_v24 = vunpack.i.l.bf16 %v7725_v0  ;;  %v13215_v0 = vld [vmem:[#allocation11_spill] sm:$0xff] }
 0x320   : > { %v6328_v37 = vpack.c.bf16 %v13215_v0, %v13214_v45 }
 0x321   : > { %7864 = vrot.lane.b32.xlu1 %v7878_v25, %s8355_s26  ;;  %v4980_v14 = vsel %vm4978_vm1, %v4947_v26, %v7727_v38  ;;  %v4979_v6 = vsel %vm4978_vm1, %v4946_v44, %v7726_v24  ;;  %v3594_v25 = vld [vmem:[#allocation4 + $0x13a] sm:$0xff]  ;;  %v3582_v38 = vld [vmem:[#allocation4 + $0xaa] sm:$0xff]  ;;  %v3583_v24 = vld [vmem:[#allocation4 + $0xb2] sm:$0xff]  ;;  %v11293_v26 = vpack.i.bf16 %v3553_v3, %v3552_v12 }
 0x322   : > { %v7730_v9 = vpop.permute.xlu0 %7729  ;;  %v11256_v47 = vpack.i.bf16 %v3595_v41, %v3594_v25  ;;  %6964 = vmatprep.mubr.msk.bf16.mxu0 %vm388_vm0, %v6328_v37  ;;  %v7958_v22 = vpack.i.bf16 %v3583_v24, %v3582_v38  ;;  %v3567_v44 = vld [vmem:[#allocation4 + $0x171] sm:$0xff]  ;;  %v13218_v37 = vld [vmem:[#allocation14_spill] sm:$0xff]  ;;  %v7677_v24 = vunpack.i.h.bf16 %v11279_v56 }
 0x323   : > { %7889 = vrot.lane.b32.xlu0 %v7858_v5, %s8354_s16  ;;  %v7732_v42 = vunpack.i.h.bf16 %v7730_v9  ;;  %v7731_v2 = vunpack.i.l.bf16 %v7730_v9  ;;  %6965 = vmatmul.mubr.msk.bf16.gmra.mrb[20].mxu0 %vm388_vm0, %v6329_v8  ;;  %v3612_v9 = vld [vmem:[#allocation4 + $0xa8] sm:$0xff]  ;;  %v6330_v27 = vpack.c.bf16 %v13219_v50, %v13218_v37  ;;  %v13220_v8 = vld [vmem:[#allocation16_spill] sm:$0xff] }
 0x324   : > { %v7978_v23 = vpack.i.bf16 %v3613_v58, %v3612_v9  ;;  %v6331_v58 = vpack.c.bf16 %v13221_v4, %v13220_v8 }
 0x325   : > { %7869 = vrot.lane.b32.xlu1 %v7853_v53, %s8356_s30  ;;  %v5012_v28 = vsel %vm5011_vm2, %v4979_v6, %v7731_v2  ;;  %v5013_v34 = vsel %vm5011_vm2, %v4980_v14, %v7732_v42  ;;  %v3562_v53 = vld [vmem:[#allocation4 + $0x139] sm:$0xff]  ;;  %v11285_v42 = vpop.permute.xlu1 %7679  ;;  %v3585_v14 = vld [vmem:[#allocation4 + $0xca] sm:$0xff]  ;;  %6968 = vmatprep.mubr.msk.bf16.mxu0 %vm388_vm0, %v6330_v27 }
 0x326   : > { %v7735_v16 = vpop.permute.xlu0 %7734  ;;  %v11246_v52 = vpack.i.bf16 %v3563_v60, %v3562_v53  ;;  %v3617_v2 = vld [vmem:[#allocation4 + $0xe0] sm:$0xff]  ;;  %v3566_v6 = vld [vmem:[#allocation4 + $0x169] sm:$0xff] }
 0x327   : > { %7904 = vrot.lane.b32.xlu0 %v7903_v48, %s8347_s25  ;;  %v7737_v36 = vunpack.i.h.bf16 %v7735_v16  ;;  %v7736_v13 = vunpack.i.l.bf16 %v7735_v16  ;;  %v3584_v16 = vld [vmem:[#allocation4 + $0xc2] sm:$0xff] }
 0x328   : > { %v11302_v60 = vpack.i.bf16 %v3585_v14, %v3584_v16  ;;  %v3507_v16 = vld [vmem:[#allocation4 + $0x20] sm:$0xff] }
 0x329   : > { %v5045_v63 = vsel %vm5044_vm4, %v5012_v28, %v7736_v13  ;;  %v5046_v30 = vsel %vm5044_vm4, %v5013_v34, %v7737_v36  ;;  %7874 = vrot.lane.b32.xlu1 %v7858_v5, %s8357_s22  ;;  %v3564_v5 = vld [vmem:[#allocation4 + $0x151] sm:$0xff]  ;;  %v11289_v57 = vpop.permute.xlu1 %7709  ;;  %v11300_v13 = vpack.i.bf16 %v3567_v44, %v3566_v6 }
 0x32a   : > { %v5077_v55 = vpack.c.bf16 %v5046_v30, %v5045_v63  ;;  %v11263_v15 = vpack.i.bf16 %v3565_v18, %v3564_v5  ;;  %v3598_v28 = vld [vmem:[#allocation4 + $0x16a] sm:$0xff]  ;;  %v3599_v34 = vld [vmem:[#allocation4 + $0x172] sm:$0xff]  ;;  %v3709_v30 = vld [vmem:[#allocation4 + $0xc0] sm:$0xff]  ;;  %v7712_v3 = vunpack.i.h.bf16 %v11289_v57  ;;  %v7711_v12 = vunpack.i.l.bf16 %v11289_v57 }
 0x32b   : > { %7909 = vrot.lane.b32.xlu0 %v7908_v35, %s8349_s27  ;;  %v11308_v63 = vpack.i.bf16 %v3599_v34, %v3598_v28  ;;  %v3586_v5 = vld [vmem:[#allocation4 + $0xda] sm:$0xff]  ;;  %6969 = vmatmul.mubr.msk.bf16.gmra.mrb[24].mxu0 %vm388_vm0, %v6331_v58 }
 0x32c   : > { %6926 = vmatprep.mubr.msk.bf16.mxu1 %vm5136_vm5, %v5077_v55  ;;  %v3555_v55 = vld [vmem:[#allocation4 + $0xe1] sm:$0xff]  ;;  %v8008_v0 = vpack.i.bf16 %v3587_v19, %v3586_v5  ;;  %v3506_v44 = vld [vmem:[#allocation4 + $0x18] sm:$0xff] }
 0x32d   : > { %7894 = vrot.lane.b32.xlu1 %v11246_v52, %s8347_s25  ;;  %v11298_v36 = vpop.permute.xlu1 %7714 }
 0x32e   : > { %v7717_v14 = vunpack.i.h.bf16 %v11298_v36  ;;  %v7716_v6 = vunpack.i.l.bf16 %v11298_v36 }
 0x32f   : > { %7929 = vrot.lane.b32.xlu0 %v7928_v62, %s8355_s26 }
 0x331   : > { %7899 = vrot.lane.b32.xlu1 %v11256_v47, %s8349_s27  ;;  %v7720_v41 = vpop.permute.xlu1 %7719 }
 0x332   : > { %v7722_v28 = vunpack.i.h.bf16 %v7720_v41  ;;  %v7721_v34 = vunpack.i.l.bf16 %v7720_v41 }
 0x333   : > { %7934 = vrot.lane.b32.xlu0 %v7903_v48, %s8356_s30 }
 0x335   : > { %7914 = vrot.lane.b32.xlu1 %v7928_v62, %s8351_s14  ;;  %v3554_v62 = vld [vmem:[#allocation4 + $0xd9] sm:$0xff] }
 0x336   : > { %v8003_v18 = vpack.i.bf16 %v3555_v55, %v3554_v62 }
 0x337   : > { %7939 = vrot.lane.b32.xlu0 %v7908_v35, %s8357_s22 }
 0x339   : > { %7919 = vrot.lane.b32.xlu1 %v7903_v48, %s8353_s21  ;;  %v3616_v48 = vld [vmem:[#allocation4 + $0xd8] sm:$0xff] }
 0x33a   : > { %v8028_v43 = vpack.i.bf16 %v3617_v2, %v3616_v48  ;;  %v7682_v2 = vunpack.i.h.bf16 %v11285_v42  ;;  %v7681_v48 = vunpack.i.l.bf16 %v11285_v42  ;;  %v4820_v42 = vsel %vm434_vm3, %v3507_v16, %v7677_v24 }
 0x33b   : > { %7944 = vrot.lane.b32.xlu0 %v11263_v15, %s8347_s25  ;;  %v7702_v16 = vunpack.i.h.bf16 %v11200_v11 }
 0x33d   : > { %7924 = vrot.lane.b32.xlu1 %v7908_v35, %s8354_s16  ;;  %v3710_v35 = vld [vmem:[#allocation4 + $0xc8] sm:$0xff] }
 0x33e   : > { %v8058_v53 = vpack.i.bf16 %v3710_v35, %v3709_v30  ;;  %v4852_v30 = vsel %vm2041_vm7, %v4820_v42, %v7682_v2 }
 0x33f   : > { %7949 = vrot.lane.b32.xlu0 %v11272_v40, %s8349_s27  ;;  %v4884_v36 = vsel %vm2107_vm9, %v4852_v30, %v7712_v3 }
 0x340   : > { %v4916_v41 = vsel %vm2173_vm11, %v4884_v36, %v7717_v14  ;;  %v7701_v14 = vunpack.i.l.bf16 %v11200_v11  ;;  %v3508_v11 = vld [vmem:[#allocation4 + $0x30] sm:$0xff] }
 0x341   : > { %7954 = vrot.lane.b32.xlu1 %v7953_v29, %s8347_s25  ;;  %v4949_v50 = vsel %vm4945_vm15, %v4916_v41, %v7722_v28  ;;  %v7706_v28 = vunpack.i.l.bf16 %v11211_v61 }
 0x343   : > { %7979 = vrot.lane.b32.xlu0 %v7978_v23, %s8351_s14 }
 0x345   : > { %7959 = vrot.lane.b32.xlu1 %v7958_v22, %s8349_s27 }
 0x347   : > { %7984 = vrot.lane.b32.xlu0 %v7953_v29, %s8353_s21 }
 0x349   : > { %7964 = vrot.lane.b32.xlu1 %v7978_v23, %s8355_s26  ;;  %v7676_v23 = vunpack.i.l.bf16 %v11279_v56 }
 0x34b   : > { %7989 = vrot.lane.b32.xlu0 %v7958_v22, %s8354_s16  ;;  %v4819_v56 = vsel %vm434_vm3, %v3506_v44, %v7676_v23 }
 0x34c   : > { %v4851_v57 = vsel %vm2041_vm7, %v4819_v56, %v7681_v48  ;;  %v3651_v56 = vld [vmem:[#allocation4 + $0xf9] sm:$0xff] }
 0x34d   : > { %7969 = vrot.lane.b32.xlu1 %v7953_v29, %s8356_s30  ;;  %v4883_v5 = vsel %vm2107_vm9, %v4851_v57, %v7711_v12  ;;  %v3526_v12 = vld [vmem:[#allocation4 + $0x108] sm:$0xff]  ;;  %v3509_v57 = vld [vmem:[#allocation4 + $0x38] sm:$0xff] }
 0x34e   : > { %v4822_v36 = vsel %vm434_vm3, %v3509_v57, %v7702_v16  ;;  %v3748_v57 = vld [vmem:[#allocation4 + $0x111] sm:$0xff] }
 0x34f   : > { %8029 = vrot.lane.b32.xlu0 %v8028_v43, %s8351_s14 }
 0x351   : > { %7974 = vrot.lane.b32.xlu1 %v7958_v22, %s8357_s22 }
 0x353   : > { %8034 = vrot.lane.b32.xlu0 %v11293_v26, %s8347_s25 }
 0x355   : > { %7994 = vrot.lane.b32.xlu1 %v11300_v13, %s8347_s25  ;;  %v11316_v32 = vpop.permute.xlu1 %7749 }
 0x357   : > { %8039 = vrot.lane.b32.xlu0 %v11302_v60, %s8349_s27  ;;  %v11310_v25 = vpop.permute.xlu0 %7739 }
 0x359   : > { %7999 = vrot.lane.b32.xlu1 %v11308_v63, %s8349_s27 }
 0x35b   : > { %8059 = vrot.lane.b32.xlu0 %v8058_v53, %s8355_s26  ;;  %v11320_v45 = vpop.permute.xlu0 %7744 }
 0x35d   : > { %8004 = vrot.lane.b32.xlu1 %v8003_v18, %s8347_s25 }
 0x35f   : > { %8064 = vrot.lane.b32.xlu0 %v11293_v26, %s8356_s30 }
 0x361   : > { %8009 = vrot.lane.b32.xlu1 %v8008_v0, %s8349_s27 }
 0x363   : > { %8069 = vrot.lane.b32.xlu0 %v11302_v60, %s8357_s22  ;;  %v11330_v21 = vpop.permute.xlu1 %7754 }
 0x365   : > { %v11333_v29 = vpop.permute.xlu0 %7764  ;;  %8014 = vrot.lane.b32.xlu1 %v8028_v43, %s8355_s26 }
 0x367   : > { %8074 = vrot.lane.b32.xlu0 %v8003_v18, %s8353_s21  ;;  %v11337_v9 = vpop.permute.xlu1 %7759 }
 0x369   : > { %v11339_v38 = vpop.permute.xlu0 %7784  ;;  %8019 = vrot.lane.b32.xlu1 %v8003_v18, %s8356_s30 }
 0x36a   : > { %v7787_v30 = vunpack.i.h.bf16 %v11339_v38 }
 0x36b   : > { %8084 = vrot.lane.b32.xlu0 %v8008_v0, %s8354_s16  ;;  %v7770_v22 = vpop.permute.xlu1 %7769 }
 0x36c   : > { %v7772_v55 = vunpack.i.h.bf16 %v7770_v22  ;;  %v7771_v62 = vunpack.i.l.bf16 %v7770_v22 }
 0x36d   : > { %v11347_v43 = vpop.permute.xlu0 %7789  ;;  %8024 = vrot.lane.b32.xlu1 %v8008_v0, %s8357_s22  ;;  %v4915_v0 = vsel %vm2173_vm11, %v4883_v5, %v7716_v6 }
 0x36e   : > { %v4948_v37 = vsel %vm4945_vm15, %v4915_v0, %v7721_v34  ;;  %v4982_v4 = vsel %vm4978_vm1, %v4949_v50, %v7772_v55  ;;  %v7766_v34 = vunpack.i.l.bf16 %v11333_v29  ;;  %v7786_v55 = vunpack.i.l.bf16 %v11339_v38  ;;  %v3683_v0 = vld [vmem:[#allocation4 + $0xfa] sm:$0xff] }
 0x36f   : > { %8094 = vrot.lane.b32.xlu0 %v11041_v31, %s8355_s26  ;;  %v7775_v35 = vpop.permute.xlu1 %7774  ;;  %v4981_v8 = vsel %vm4978_vm1, %v4948_v37, %v7771_v62  ;;  %v7792_v5 = vunpack.i.h.bf16 %v11347_v43 }
 0x370   : > { %v7777_v31 = vunpack.i.h.bf16 %v7775_v35  ;;  %v7776_v19 = vunpack.i.l.bf16 %v7775_v35  ;;  %v3650_v35 = vld [vmem:[#allocation4 + $0xf1] sm:$0xff] }
 0x371   : > { %v11360_v18 = vpop.permute.xlu0 %7804  ;;  %8044 = vrot.lane.b32.xlu1 %v8058_v53, %s8351_s14 }
 0x372   : > { %v5014_v53 = vsel %vm5011_vm2, %v4981_v8, %v7776_v19  ;;  %v5015_v22 = vsel %vm5011_vm2, %v4982_v4, %v7777_v31  ;;  %v3682_v19 = vld [vmem:[#allocation4 + $0xf2] sm:$0xff] }
 0x373   : > { %8104 = vrot.lane.b32.xlu0 %v11047_v39, %s8356_s30  ;;  %v7780_v27 = vpop.permute.xlu1 %7779  ;;  %v3527_v39 = vld [vmem:[#allocation4 + $0x110] sm:$0xff] }
 0x374   : > { %v7782_v58 = vunpack.i.h.bf16 %v7780_v27  ;;  %v7781_v24 = vunpack.i.l.bf16 %v7780_v27  ;;  %v8123_v42 = vpack.i.bf16 %v3527_v39, %v3526_v12 }
 0x375   : > { %v11373_v23 = vpop.permute.xlu0 %7809  ;;  %8049 = vrot.lane.b32.xlu1 %v11293_v26, %s8353_s21  ;;  %v7707_v26 = vunpack.i.h.bf16 %v11211_v61  ;;  %v8078_v61 = vpack.i.bf16 %v3651_v56, %v3650_v35 }
 0x376   : > { %v5047_v2 = vsel %vm5044_vm4, %v5014_v53, %v7781_v24  ;;  %v5048_v48 = vsel %vm5044_vm4, %v5015_v22, %v7782_v58  ;;  %v8088_v22 = vpack.i.bf16 %v3683_v0, %v3682_v19  ;;  %v3779_v19 = vld [vmem:[#allocation4 + $0x10a] sm:$0xff]  ;;  %v3780_v0 = vld [vmem:[#allocation4 + $0x112] sm:$0xff] }
 0x377   : > { %8114 = vrot.lane.b32.xlu0 %v11064_v54, %s8357_s22  ;;  %v5078_v3 = vpack.c.bf16 %v5048_v48, %v5047_v2  ;;  %v11383_v44 = vpop.permute.xlu1 %7794  ;;  %v7767_v54 = vunpack.i.h.bf16 %v11333_v29  ;;  %v7791_v29 = vunpack.i.l.bf16 %v11347_v43  ;;  %v4854_v37 = vsel %vm2041_vm7, %v4822_v36, %v7707_v26  ;;  %v3747_v36 = vld [vmem:[#allocation4 + $0x109] sm:$0xff] }
 0x379   : > { %v7830_v6 = vpop.permute.xlu0 %7829  ;;  %8054 = vrot.lane.b32.xlu1 %v11302_v60, %s8354_s16  ;;  %6927 = vmatmul.mubr.msk.bf16.vlgmr.msra.gmra.mrb[16].mxu1 %vm5136_vm5, %v5078_v3  ;;  %v4821_v60 = vsel %vm434_vm3, %v3508_v11, %v7701_v14  ;;  %v4886_v8 = vsel %vm2107_vm9, %v4854_v37, %v7767_v54  ;;  %v3529_v14 = vld [vmem:[#allocation4 + $0x128] sm:$0xff] }
 0x37a   : > { %v4853_v41 = vsel %vm2041_vm7, %v4821_v60, %v7706_v28  ;;  %v7832_v50 = vunpack.i.h.bf16 %v7830_v6  ;;  %v7831_v38 = vunpack.i.l.bf16 %v7830_v6  ;;  %v4918_v24 = vsel %vm2173_vm11, %v4886_v8, %v7787_v30 }
 0x37b   : > { %8124 = vrot.lane.b32.xlu0 %v8123_v42, %s8351_s14  ;;  %v11397_v62 = vpop.permute.xlu1 %7799  ;;  %v4885_v27 = vsel %vm2107_vm9, %v4853_v41, %v7766_v34  ;;  %v4951_v2 = vsel %vm4945_vm15, %v4918_v24, %v7792_v5  ;;  %v3528_v34 = vld [vmem:[#allocation4 + $0x120] sm:$0xff]  ;;  %v8108_v5 = vpack.i.bf16 %v3748_v57, %v3747_v36  ;;  %v7762_v57 = vunpack.i.h.bf16 %v11337_v9 }
 0x37c   : > { %v4917_v43 = vsel %vm2173_vm11, %v4885_v27, %v7786_v55  ;;  %v4984_v12 = vsel %vm4978_vm1, %v4951_v2, %v7832_v50  ;;  %v8153_v30 = vpack.i.bf16 %v3529_v14, %v3528_v34  ;;  %v3750_v55 = vld [vmem:[#allocation4 + $0x129] sm:$0xff]  ;;  %v8118_v2 = vpack.i.bf16 %v3780_v0, %v3779_v19  ;;  %v11485_v19 = vld [vmem:[#allocation4 + $0x158] sm:$0xff] }
 0x37d   : > { %v7835_v31 = vpop.permute.xlu0 %7834  ;;  %8079 = vrot.lane.b32.xlu1 %v8078_v61, %s8353_s21  ;;  %v4950_v39 = vsel %vm4945_vm15, %v4917_v43, %v7791_v29  ;;  %v3749_v29 = vld [vmem:[#allocation4 + $0x121] sm:$0xff] }
 0x37e   : > { %v7837_v4 = vunpack.i.h.bf16 %v7835_v31  ;;  %v7836_v58 = vunpack.i.l.bf16 %v7835_v31  ;;  %v4983_v3 = vsel %vm4978_vm1, %v4950_v39, %v7831_v38  ;;  %v8163_v41 = vpack.i.bf16 %v3750_v55, %v3749_v29  ;;  %v3781_v50 = vld [vmem:[#allocation4 + $0x122] sm:$0xff]  ;;  %v3782_v38 = vld [vmem:[#allocation4 + $0x12a] sm:$0xff] }
 0x37f   : > { %8134 = vrot.lane.b32.xlu0 %v11163_v49, %s8353_s21  ;;  %v11412_v53 = vpop.permute.xlu1 %7814  ;;  %v7761_v55 = vunpack.i.l.bf16 %v11337_v9 }
 0x380   : > { %v5016_v6 = vsel %vm5011_vm2, %v4983_v3, %v7836_v58  ;;  %v5017_v56 = vsel %vm5011_vm2, %v4984_v12, %v7837_v4  ;;  %v13222_v4 = vld [vmem:[#allocation18_spill] sm:$0xff]  ;;  %v13223_v58 = vld [vmem:[#allocation19_spill] sm:$0xff]  ;;  %v8173_v3 = vpack.i.bf16 %v3782_v38, %v3781_v50  ;;  %v7816_v36 = vunpack.i.l.bf16 %v11412_v53 }
 0x381   : > { %v7840_v48 = vpop.permute.xlu0 %7839  ;;  %8089 = vrot.lane.b32.xlu1 %v8088_v22, %s8354_s16  ;;  %v6332_v43 = vpack.c.bf16 %v13223_v58, %v13222_v4  ;;  %v11450_v12 = vld [vmem:[#allocation4 + $0x140] sm:$0xff]  ;;  %v7807_v4 = vunpack.i.h.bf16 %v11360_v18  ;;  %v7806_v58 = vunpack.i.l.bf16 %v11360_v18 }
 0x382   : > { %v7842_v16 = vunpack.i.h.bf16 %v7840_v48  ;;  %v7841_v49 = vunpack.i.l.bf16 %v7840_v48 }
 0x383   : > { %8144 = vrot.lane.b32.xlu0 %v11172_v46, %s8354_s16  ;;  %v11423_v26 = vpop.permute.xlu1 %7819  ;;  %6972 = vmatprep.mubr.msk.bf16.mxu0 %vm388_vm0, %v6332_v43 }
 0x384   : > { %v5049_v28 = vsel %vm5044_vm4, %v5016_v6, %v7841_v49  ;;  %v5050_v54 = vsel %vm5044_vm4, %v5017_v56, %v7842_v16  ;;  %v13224_v16 = vld [vmem:[#allocation20_spill] sm:$0xff]  ;;  %v13225_v49 = vld [vmem:[#allocation21_spill] sm:$0xff] }
 0x385   : > { %v5079_v35 = vpack.c.bf16 %v5050_v54, %v5049_v28  ;;  %v7845_v11 = vpop.permute.xlu0 %7844  ;;  %8099 = vrot.lane.b32.xlu1 %v8123_v42, %s8355_s26  ;;  %v11457_v56 = vld [vmem:[#allocation4 + $0x138] sm:$0xff] }
 0x386   : > { %v7847_v61 = vunpack.i.h.bf16 %v7845_v11  ;;  %v7846_v60 = vunpack.i.l.bf16 %v7845_v11  ;;  %v8183_v54 = vpack.i.bf16 %v11450_v12, %v11457_v56 }
 0x387   : > { %8154 = vrot.lane.b32.xlu0 %v8153_v30, %s8355_s26  ;;  %6930 = vmatprep.mubr.msk.bf16.mxu1 %vm5136_vm5, %v5079_v35  ;;  %v11430_v46 = vpop.permute.xlu1 %7824  ;;  %v7756_v35 = vunpack.i.l.bf16 %v11330_v21 }
 0x388   : > { %v4842_v27 = vsel %vm434_vm3, %v3529_v14, %v7847_v61  ;;  %v4841_v8 = vsel %vm434_vm3, %v3528_v34, %v7846_v60  ;;  %v6333_v14 = vpack.c.bf16 %v13225_v49, %v13224_v16  ;;  %v7757_v34 = vunpack.i.h.bf16 %v11330_v21 }
 0x389   : > { %v7850_v31 = vpop.permute.xlu0 %7849  ;;  %8109 = vrot.lane.b32.xlu1 %v8108_v5, %s8356_s30  ;;  %v7817_v60 = vunpack.i.h.bf16 %v11412_v53  ;;  %v7821_v5 = vunpack.i.l.bf16 %v11423_v26  ;;  %v4823_v9 = vsel %vm434_vm3, %v11104_v20, %v7756_v35  ;;  %v7827_v29 = vunpack.i.h.bf16 %v11430_v46  ;;  %v3752_v35 = vld [vmem:[#allocation4 + $0x141] sm:$0xff] }
 0x38a   : > { %v7852_v37 = vunpack.i.h.bf16 %v7850_v31  ;;  %v7851_v42 = vunpack.i.l.bf16 %v7850_v31  ;;  %6973 = vmatmul.mubr.msk.bf16.gmra.mrb[28].mxu0 %vm388_vm0, %v6333_v14  ;;  %v4824_v21 = vsel %vm434_vm3, %v11106_v33, %v7757_v34  ;;  %v7826_v31 = vunpack.i.l.bf16 %v11430_v46  ;;  %v11494_v46 = vld [vmem:[#allocation4 + $0x150] sm:$0xff] }
 0x38b   : > { %8164 = vrot.lane.b32.xlu0 %v8163_v41, %s8356_s30  ;;  %v11438_v24 = vpop.permute.xlu1 %7854  ;;  %v4855_v0 = vsel %vm2041_vm7, %v4823_v9, %v7761_v55 }
 0x38c   : > { %v11441_v22 = vsel %vm2041_vm7, %v4841_v8, %v7851_v42  ;;  %v11444_v39 = vsel %vm2041_vm7, %v4842_v27, %v7852_v37  ;;  %v4887_v33 = vsel %vm2107_vm9, %v4855_v0, %v7816_v36  ;;  %v11502_v8 = vpack.i.bf16 %v11485_v19, %v11494_v46 }
 0x38d   : > { %v11446_v48 = vpop.permute.xlu0 %7879  ;;  %8119 = vrot.lane.b32.xlu1 %v8118_v2, %s8357_s22  ;;  %v4919_v38 = vsel %vm2173_vm11, %v4887_v33, %v7821_v5  ;;  %v13226_v5 = vld [vmem:[#allocation22_spill] sm:$0xff] }
 0x38e   : > { %v4952_v43 = vsel %vm4945_vm15, %v4919_v38, %v7826_v31  ;;  %v13229_v31 = vld [vmem:[#allocation25_spill] sm:$0xff]  ;;  %v7881_v0 = vunpack.i.l.bf16 %v11446_v48  ;;  %v3784_v33 = vld [vmem:[#allocation4 + $0x142] sm:$0xff] }
 0x38f   : > { %8174 = vrot.lane.b32.xlu0 %v8173_v3, %s8357_s22  ;;  %v11455_v6 = vpop.permute.xlu1 %7859 }
 0x391   : > { %v11459_v28 = vpop.permute.xlu0 %7884  ;;  %8129 = vrot.lane.b32.xlu1 %v8153_v30, %s8351_s14  ;;  %v7822_v30 = vunpack.i.h.bf16 %v11423_v26  ;;  %v4856_v26 = vsel %vm2041_vm7, %v4824_v21, %v7762_v57  ;;  %v7811_v57 = vunpack.i.l.bf16 %v11373_v23  ;;  %v13227_v21 = vld [vmem:[#allocation23_spill] sm:$0xff] }
 0x392   : > { %v4888_v42 = vsel %vm2107_vm9, %v4856_v26, %v7817_v60  ;;  %v6334_v9 = vpack.c.bf16 %v13227_v21, %v13226_v5  ;;  %v11564_v5 = vld [vmem:[#allocation4 + $0x168] sm:$0xff] }
 0x393   : > { %8184 = vrot.lane.b32.xlu0 %v8183_v54, %s8351_s14  ;;  %v7865_v11 = vpop.permute.xlu1 %7864  ;;  %v4920_v27 = vsel %vm2173_vm11, %v4888_v42, %v7822_v30  ;;  %v3751_v30 = vld [vmem:[#allocation4 + $0x139] sm:$0xff] }
 0x394   : > { %v7866_v37 = vunpack.i.l.bf16 %v7865_v11  ;;  %v4953_v2 = vsel %vm4945_vm15, %v4920_v27, %v7827_v29  ;;  %v13228_v29 = vld [vmem:[#allocation24_spill] sm:$0xff]  ;;  %6976 = vmatprep.mubr.msk.bf16.mxu0 %vm388_vm0, %v6334_v9 }
 0x395   : > { %v11470_v61 = vpop.permute.xlu0 %7889  ;;  %8139 = vrot.lane.b32.xlu1 %v8163_v41, %s8353_s21  ;;  %v7867_v41 = vunpack.i.h.bf16 %v7865_v11  ;;  %v7812_v11 = vunpack.i.h.bf16 %v11373_v23  ;;  %v6335_v23 = vpack.c.bf16 %v13229_v31, %v13228_v29  ;;  %v3659_v31 = vld [vmem:[#allocation4 + $0x159] sm:$0xff] }
 0x396   : > { %v4985_v16 = vsel %vm4978_vm1, %v4952_v43, %v7866_v37  ;;  %v3783_v37 = vld [vmem:[#allocation4 + $0x13a] sm:$0xff] }
 0x397   : > { %8194 = vrot.lane.b32.xlu0 %v11246_v52, %s8353_s21  ;;  %v7870_v53 = vpop.permute.xlu1 %7869  ;;  %v4986_v49 = vsel %vm4978_vm1, %v4953_v2, %v7867_v41  ;;  %v8168_v41 = vpack.i.bf16 %v3752_v35, %v3751_v30  ;;  %v8178_v2 = vpack.i.bf16 %v3784_v33, %v3783_v37  ;;  %6977 = vmatmul.mubr.msk.bf16.gmra.mrb[32].mxu0 %vm388_vm0, %v6335_v23  ;;  %v3658_v37 = vld [vmem:[#allocation4 + $0x151] sm:$0xff] }
 0x398   : > { %v7872_v20 = vunpack.i.h.bf16 %v7870_v53  ;;  %v7871_v50 = vunpack.i.l.bf16 %v7870_v53  ;;  %v7882_v53 = vunpack.i.h.bf16 %v11446_v48 }
 0x399   : > { %v11489_v52 = vpop.permute.xlu0 %7904  ;;  %8149 = vrot.lane.b32.xlu1 %v8173_v3, %s8354_s16 }
 0x39a   : > { %v5018_v18 = vsel %vm5011_vm2, %v4985_v16, %v7871_v50  ;;  %v5019_v55 = vsel %vm5011_vm2, %v4986_v49, %v7872_v20  ;;  %v4826_v20 = vsel %vm434_vm3, %v11158_v51, %v7807_v4  ;;  %v4825_v50 = vsel %vm434_vm3, %v11165_v7, %v7806_v58 }
 0x39b   : > { %8204 = vrot.lane.b32.xlu0 %v11256_v47, %s8354_s16  ;;  %v7875_v3 = vpop.permute.xlu1 %7874  ;;  %v4857_v48 = vsel %vm2041_vm7, %v4825_v50, %v7811_v57  ;;  %v4858_v43 = vsel %vm2041_vm7, %v4826_v20, %v7812_v11  ;;  %v7887_v4 = vunpack.i.h.bf16 %v11459_v28  ;;  %v7886_v58 = vunpack.i.l.bf16 %v11459_v28 }
 0x39c   : > { %v7877_v14 = vunpack.i.h.bf16 %v7875_v3  ;;  %v7876_v34 = vunpack.i.l.bf16 %v7875_v3  ;;  %v4889_v51 = vsel %vm2107_vm9, %v4857_v48, %v7881_v0  ;;  %v4890_v7 = vsel %vm2107_vm9, %v4858_v43, %v7882_v53  ;;  %v3690_v48 = vld [vmem:[#allocation4 + $0x152] sm:$0xff] }
 0x39d   : > { %v11510_v47 = vpop.permute.xlu0 %7909  ;;  %8159 = vrot.lane.b32.xlu1 %v8183_v54, %s8355_s26  ;;  %v7892_v16 = vunpack.i.h.bf16 %v11470_v61  ;;  %v7891_v49 = vunpack.i.l.bf16 %v11470_v61  ;;  %v8198_v50 = vpack.i.bf16 %v3659_v31, %v3658_v37  ;;  %v3787_v31 = vld [vmem:[#allocation4 + $0x16a] sm:$0xff] }
 0x39e   : > { %v5051_v60 = vsel %vm5044_vm4, %v5018_v18, %v7876_v34  ;;  %v5052_v36 = vsel %vm5044_vm4, %v5019_v55, %v7877_v14  ;;  %v11550_v55 = vld [vmem:[#allocation4 + $0x170] sm:$0xff] }
 0x39f   : > { %8214 = vrot.lane.b32.xlu0 %v11502_v8, %s8355_s26  ;;  %v5080_v26 = vpack.c.bf16 %v5052_v36, %v5051_v60  ;;  %v7895_v54 = vpop.permute.xlu1 %7894  ;;  %v8243_v23 = vpack.i.bf16 %v11550_v55, %v11564_v5 }
 0x3a0   : > { %v7897_v38 = vunpack.i.h.bf16 %v7895_v54  ;;  %v7896_v27 = vunpack.i.l.bf16 %v7895_v54 }
 0x3a1   : > { %v7930_v42 = vpop.permute.xlu0 %7929  ;;  %8169 = vrot.lane.b32.xlu1 %v8168_v41, %s8356_s30  ;;  %6931 = vmatmul.mubr.msk.bf16.gmra.mrb[20].mxu1 %vm5136_vm5, %v5080_v26 }
 0x3a2   : > { %v4843_v11 = vsel %vm434_vm3, %v11457_v56, %v7896_v27  ;;  %v7932_v57 = vunpack.i.h.bf16 %v7930_v42  ;;  %v7931_v18 = vunpack.i.l.bf16 %v7930_v42  ;;  %v4922_v56 = vsel %vm2173_vm11, %v4890_v7, %v7887_v4 }
 0x3a3   : > { %8224 = vrot.lane.b32.xlu0 %v11263_v15, %s8356_s30  ;;  %v7900_v3 = vpop.permute.xlu1 %7899  ;;  %v4844_v15 = vsel %vm434_vm3, %v11450_v12, %v7897_v38  ;;  %v4921_v12 = vsel %vm2173_vm11, %v4889_v51, %v7886_v58  ;;  %v4955_v9 = vsel %vm4945_vm15, %v4922_v56, %v7892_v16  ;;  %v3726_v16 = vld [vmem:[#allocation4 + $0x188] sm:$0xff] }
 0x3a4   : > { %v7902_v14 = vunpack.i.h.bf16 %v7900_v3  ;;  %v7901_v34 = vunpack.i.l.bf16 %v7900_v3  ;;  %v4954_v21 = vsel %vm4945_vm15, %v4921_v12, %v7891_v49  ;;  %v13233_v12 = vld [vmem:[#allocation29_spill] sm:$0xff] }
 0x3a5   : > { %v7935_v35 = vpop.permute.xlu0 %7934  ;;  %8179 = vrot.lane.b32.xlu1 %v8178_v2, %s8357_s22  ;;  %v4987_v53 = vsel %vm4978_vm1, %v4954_v21, %v7931_v18 }
 0x3a6   : > { %v11553_v28 = vsel %vm2041_vm7, %v4843_v11, %v7901_v34  ;;  %v11556_v61 = vsel %vm2041_vm7, %v4844_v15, %v7902_v14  ;;  %v7937_v60 = vunpack.i.h.bf16 %v7935_v35  ;;  %v7936_v36 = vunpack.i.l.bf16 %v7935_v35  ;;  %v3725_v11 = vld [vmem:[#allocation4 + $0x180] sm:$0xff] }
 0x3a7   : > { %8234 = vrot.lane.b32.xlu0 %v11272_v40, %s8357_s22  ;;  %v11562_v30 = vpop.permute.xlu1 %7914  ;;  %v4988_v40 = vsel %vm4978_vm1, %v4955_v9, %v7932_v57  ;;  %v8273_v18 = vpack.i.bf16 %v3726_v16, %v3725_v11  ;;  %v3757_v9 = vld [vmem:[#allocation4 + $0x181] sm:$0xff] }
 0x3a8   : > { %v5020_v54 = vsel %vm5011_vm2, %v4987_v53, %v7936_v36  ;;  %v5021_v41 = vsel %vm5011_vm2, %v4988_v40, %v7937_v60  ;;  %v13231_v60 = vld [vmem:[#allocation27_spill] sm:$0xff]  ;;  %v13232_v36 = vld [vmem:[#allocation28_spill] sm:$0xff] }
 0x3a9   : > { %v7940_v29 = vpop.permute.xlu0 %7939  ;;  %8189 = vrot.lane.b32.xlu1 %v11502_v8, %s8351_s14  ;;  %v3691_v8 = vld [vmem:[#allocation4 + $0x15a] sm:$0xff]  ;;  %v6337_v56 = vpack.c.bf16 %v13233_v12, %v13232_v36  ;;  %v3788_v53 = vld [vmem:[#allocation4 + $0x172] sm:$0xff] }
 0x3aa   : > { %v7942_v0 = vunpack.i.h.bf16 %v7940_v29  ;;  %v7941_v26 = vunpack.i.l.bf16 %v7940_v29  ;;  %v8208_v7 = vpack.i.bf16 %v3691_v8, %v3690_v48  ;;  %v8238_v37 = vpack.i.bf16 %v3788_v53, %v3787_v31 }
 0x3ab   : > { %8244 = vrot.lane.b32.xlu0 %v8243_v23, %s8351_s14  ;;  %v11577_v33 = vpop.permute.xlu1 %7919 }
 0x3ac   : > { %v5053_v42 = vsel %vm5044_vm4, %v5020_v54, %v7941_v26  ;;  %v5054_v20 = vsel %vm5044_vm4, %v5021_v41, %v7942_v0  ;;  %v3790_v0 = vld [vmem:[#allocation4 + $0x18a] sm:$0xff]  ;;  %v7857_v26 = vunpack.i.h.bf16 %v11438_v24  ;;  %v7856_v54 = vunpack.i.l.bf16 %v11438_v24 }
 0x3ad   : > { %v5081_v38 = vpack.c.bf16 %v5054_v20, %v5053_v42  ;;  %v7945_v27 = vpop.permute.xlu0 %7944  ;;  %8199 = vrot.lane.b32.xlu1 %v8198_v50, %s8353_s21  ;;  %v7862_v42 = vunpack.i.h.bf16 %v11455_v6  ;;  %v7861_v20 = vunpack.i.l.bf16 %v11455_v6  ;;  %v7922_v48 = vunpack.i.h.bf16 %v11577_v33 }
 0x3ae   : > { %v7947_v43 = vunpack.i.h.bf16 %v7945_v27  ;;  %v7946_v2 = vunpack.i.l.bf16 %v7945_v27  ;;  %v7916_v27 = vunpack.i.l.bf16 %v11562_v30  ;;  %v7921_v8 = vunpack.i.l.bf16 %v11577_v33 }
 0x3af   : > { %8254 = vrot.lane.b32.xlu0 %v11300_v13, %s8353_s21  ;;  %6934 = vmatprep.mubr.msk.bf16.mxu1 %vm5136_vm5, %v5081_v38  ;;  %v11585_v51 = vpop.permute.xlu1 %7924  ;;  %v4828_v24 = vsel %vm434_vm3, %v11198_v59, %v7857_v26  ;;  %v4827_v6 = vsel %vm434_vm3, %v11204_v10, %v7856_v54 }
 0x3b0   : > { %v4846_v49 = vsel %vm434_vm3, %v11485_v19, %v7947_v43  ;;  %v4845_v14 = vsel %vm434_vm3, %v11494_v46, %v7946_v2  ;;  %v3758_v19 = vld [vmem:[#allocation4 + $0x189] sm:$0xff]  ;;  %v13230_v46 = vld [vmem:[#allocation26_spill] sm:$0xff]  ;;  %v7927_v43 = vunpack.i.h.bf16 %v11585_v51  ;;  %v7926_v2 = vunpack.i.l.bf16 %v11585_v51 }
 0x3b1   : > { %v7950_v4 = vpop.permute.xlu0 %7949  ;;  %8209 = vrot.lane.b32.xlu1 %v8208_v7, %s8354_s16  ;;  %v8283_v40 = vpack.i.bf16 %v3758_v19, %v3757_v9 }
 0x3b2   : > { %v7952_v58 = vunpack.i.h.bf16 %v7950_v4  ;;  %v7951_v3 = vunpack.i.l.bf16 %v7950_v4  ;;  %v4860_v4 = vsel %vm2041_vm7, %v4828_v24, %v7862_v42  ;;  %v3760_v42 = vld [vmem:[#allocation4 + $0x1a1] sm:$0xff]  ;;  %v7906_v24 = vunpack.i.l.bf16 %v11489_v52 }
 0x3b3   : > { %8264 = vrot.lane.b32.xlu0 %v11308_v63, %s8354_s16  ;;  %v11594_v34 = vpop.permute.xlu1 %7954  ;;  %v6336_v63 = vpack.c.bf16 %v13231_v60, %v13230_v46 }
 0x3b4   : > { %v11597_v35 = vsel %vm2041_vm7, %v4845_v14, %v7951_v3  ;;  %v11600_v15 = vsel %vm2041_vm7, %v4846_v49, %v7952_v58 }
 0x3b5   : > { %v11602_v57 = vpop.permute.xlu0 %7979  ;;  %8219 = vrot.lane.b32.xlu1 %v8243_v23, %s8355_s26  ;;  %6980 = vmatprep.mubr.msk.bf16.mxu0 %vm388_vm0, %v6336_v63  ;;  %v3789_v23 = vld [vmem:[#allocation4 + $0x182] sm:$0xff] }
 0x3b6   : > { %6981 = vmatmul.mubr.msk.bf16.gmra.mrb[36].mxu0 %vm388_vm0, %v6337_v56  ;;  %v8293_v38 = vpack.i.bf16 %v3790_v0, %v3789_v23  ;;  %v3727_v23 = vld [vmem:[#allocation4 + $0x198] sm:$0xff]  ;;  %v3728_v0 = vld [vmem:[#allocation4 + $0x1a0] sm:$0xff] }
 0x3b7   : > { %8274 = vrot.lane.b32.xlu0 %v8273_v18, %s8355_s26  ;;  %v11610_v21 = vpop.permute.xlu1 %7959 }
 0x3b9   : > { %v11612_v29 = vpop.permute.xlu0 %7984  ;;  %8229 = vrot.lane.b32.xlu1 %v11300_v13, %s8356_s30  ;;  %v7917_v13 = vunpack.i.h.bf16 %v11562_v30  ;;  %v4859_v30 = vsel %vm2041_vm7, %v4827_v6, %v7861_v20 }
 0x3ba   : > { %v4891_v16 = vsel %vm2107_vm9, %v4859_v30, %v7916_v27  ;;  %v8278_v27 = vpack.i.bf16 %v3728_v0, %v3727_v23  ;;  %v3792_v30 = vld [vmem:[#allocation4 + $0x1a2] sm:$0xff] }
 0x3bb   : > { %8284 = vrot.lane.b32.xlu0 %v8283_v40, %s8356_s30  ;;  %v7965_v41 = vpop.permute.xlu1 %7964  ;;  %v4892_v59 = vsel %vm2107_vm9, %v4860_v4, %v7917_v13  ;;  %v4923_v10 = vsel %vm2173_vm11, %v4891_v16, %v7921_v8  ;;  %v7907_v8 = vunpack.i.h.bf16 %v11489_v52  ;;  %v7912_v4 = vunpack.i.h.bf16 %v11510_v47 }
 0x3bc   : > { %v7967_v58 = vunpack.i.h.bf16 %v7965_v41  ;;  %v7966_v3 = vunpack.i.l.bf16 %v7965_v41  ;;  %v4924_v51 = vsel %vm2173_vm11, %v4892_v59, %v7922_v48  ;;  %v4956_v11 = vsel %vm4945_vm15, %v4923_v10, %v7926_v2 }
 0x3bd   : > { %v11623_v50 = vpop.permute.xlu0 %7989  ;;  %8239 = vrot.lane.b32.xlu1 %v8238_v37, %s8357_s22  ;;  %v4957_v19 = vsel %vm4945_vm15, %v4924_v51, %v7927_v43  ;;  %v3759_v37 = vld [vmem:[#allocation4 + $0x199] sm:$0xff]  ;;  %v7982_v16 = vunpack.i.h.bf16 %v11602_v57  ;;  %v7981_v52 = vunpack.i.l.bf16 %v11602_v57  ;;  %v4829_v51 = vsel %vm434_vm3, %v11248_v1, %v7906_v24 }
 0x3be   : > { %v4989_v60 = vsel %vm4978_vm1, %v4956_v11, %v7966_v3  ;;  %v4990_v63 = vsel %vm4978_vm1, %v4957_v19, %v7967_v58  ;;  %v8288_v48 = vpack.i.bf16 %v3760_v42, %v3759_v37  ;;  %v7911_v58 = vunpack.i.l.bf16 %v11510_v47  ;;  %v13234_v24 = vld [vmem:[#allocation30_spill] sm:$0xff] }
 0x3bf   : > { %8294 = vrot.lane.b32.xlu0 %v8293_v38, %s8357_s22  ;;  %v7970_v7 = vpop.permute.xlu1 %7969  ;;  %v7987_v47 = vunpack.i.h.bf16 %v11612_v29  ;;  %v7992_v57 = vunpack.i.h.bf16 %v11623_v50  ;;  %v7991_v11 = vunpack.i.l.bf16 %v11623_v50 }
 0x3c0   : > { %v7972_v49 = vunpack.i.h.bf16 %v7970_v7  ;;  %v7971_v14 = vunpack.i.l.bf16 %v7970_v7  ;;  %v3791_v7 = vld [vmem:[#allocation4 + $0x19a] sm:$0xff] }
 0x3c1   : > { %v11639_v33 = vpop.permute.xlu0 %8029  ;;  %8249 = vrot.lane.b32.xlu1 %v8273_v18, %s8351_s14  ;;  %v8298_v10 = vpack.i.bf16 %v3792_v30, %v3791_v7  ;;  %v13237_v7 = vld [vmem:[#allocation33_spill] sm:$0xff] }
 0x3c2   : > { %v5022_v9 = vsel %vm5011_vm2, %v4989_v60, %v7971_v14  ;;  %v5023_v18 = vsel %vm5011_vm2, %v4990_v63, %v7972_v49  ;;  %v7986_v14 = vunpack.i.l.bf16 %v11612_v29 }
 0x3c3   : > { %v7975_v46 = vpop.permute.xlu1 %7974 }
 0x3c4   : > { %v7977_v36 = vunpack.i.h.bf16 %v7975_v46  ;;  %v7976_v12 = vunpack.i.l.bf16 %v7975_v46  ;;  %v4861_v46 = vsel %vm2041_vm7, %v4829_v51, %v7911_v58 }
 0x3c5   : > { %v11650_v56 = vpop.permute.xlu0 %8034  ;;  %8259 = vrot.lane.b32.xlu1 %v8283_v40, %s8353_s21 }
 0x3c6   : > { %v5055_v31 = vsel %vm5044_vm4, %v5022_v9, %v7976_v12  ;;  %v5056_v53 = vsel %vm5044_vm4, %v5023_v18, %v7977_v36  ;;  %v4893_v36 = vsel %vm2107_vm9, %v4861_v46, %v7981_v52  ;;  %v7962_v46 = vunpack.i.h.bf16 %v11610_v21 }
 0x3c7   : > { %v5082_v26 = vpack.c.bf16 %v5056_v53, %v5055_v31  ;;  %v7995_v54 = vpop.permute.xlu1 %7994  ;;  %v4925_v1 = vsel %vm2173_vm11, %v4893_v36, %v7986_v14 }
 0x3c8   : > { %v7997_v20 = vunpack.i.h.bf16 %v7995_v54  ;;  %v7996_v13 = vunpack.i.l.bf16 %v7995_v54  ;;  %v4958_v31 = vsel %vm4945_vm15, %v4925_v1, %v7991_v11  ;;  %v7956_v11 = vunpack.i.l.bf16 %v11594_v34 }
 0x3c9   : > { %v11657_v41 = vpop.permute.xlu0 %8039  ;;  %8269 = vrot.lane.b32.xlu1 %v8293_v38, %s8354_s16  ;;  %6935 = vmatmul.mubr.msk.bf16.gmra.mrb[24].mxu1 %vm5136_vm5, %v5082_v26 }
 0x3ca   : > { %v4848_v38 = vsel %vm434_vm3, %v11550_v55, %v7997_v20  ;;  %v4847_v3 = vsel %vm434_vm3, %v11564_v5, %v7996_v13  ;;  %v4830_v5 = vsel %vm434_vm3, %v11243_v17, %v7907_v8 }
 0x3cb   : > { %v8000_v40 = vpop.permute.xlu1 %7999  ;;  %v4862_v60 = vsel %vm2041_vm7, %v4830_v5, %v7912_v4  ;;  %v13239_v5 = vld [vmem:[#allocation35_spill] sm:$0xff] }
 0x3cc   : > { %v8002_v6 = vunpack.i.h.bf16 %v8000_v40  ;;  %v8001_v43 = vunpack.i.l.bf16 %v8000_v40  ;;  %v4894_v17 = vsel %vm2107_vm9, %v4862_v60, %v7982_v16  ;;  %v8041_v16 = vunpack.i.l.bf16 %v11657_v41  ;;  %v3521_v60 = vld [vmem:[#allocation4 + $0xc8] sm:$0xff] }
 0x3cd   : > { %v8060_v2 = vpop.permute.xlu0 %8059  ;;  %8279 = vrot.lane.b32.xlu1 %v8278_v27, %s8355_s26  ;;  %v4926_v18 = vsel %vm2173_vm11, %v4894_v17, %v7987_v47  ;;  %v8042_v47 = vunpack.i.h.bf16 %v11657_v41  ;;  %v3518_v17 = vld [vmem:[#allocation4 + $0xa8] sm:$0xff] }
 0x3ce   : > { %v11673_v59 = vsel %vm2041_vm7, %v4847_v3, %v8001_v43  ;;  %v11676_v49 = vsel %vm2041_vm7, %v4848_v38, %v8002_v6  ;;  %v8062_v63 = vunpack.i.h.bf16 %v8060_v2  ;;  %v8061_v29 = vunpack.i.l.bf16 %v8060_v2  ;;  %v13235_v6 = vld [vmem:[#allocation31_spill] sm:$0xff]  ;;  %v13236_v2 = vld [vmem:[#allocation32_spill] sm:$0xff] }
 0x3cf   : > { %v11680_v55 = vpop.permute.xlu1 %8004  ;;  %v4959_v53 = vsel %vm4945_vm15, %v4926_v18, %v7992_v57  ;;  %v6338_v43 = vpack.c.bf16 %v13235_v6, %v13234_v24  ;;  %v6339_v30 = vpack.c.bf16 %v13237_v7, %v13236_v2  ;;  %v8036_v38 = vunpack.i.l.bf16 %v11650_v56 }
 0x3d0   : > { %v4991_v0 = vsel %vm4978_vm1, %v4958_v31, %v8061_v29  ;;  %v4992_v26 = vsel %vm4978_vm1, %v4959_v53, %v8062_v63  ;;  %v8037_v3 = vunpack.i.h.bf16 %v11650_v56  ;;  %v7957_v57 = vunpack.i.h.bf16 %v11594_v34  ;;  %v11749_v7 = vpop.f32.mrb[16].mxu0 }
 0x3d1   : > { %v8065_v19 = vpop.permute.xlu0 %8064  ;;  %8289 = vrot.lane.b32.xlu1 %v8288_v48, %s8356_s30  ;;  %6984 = vmatprep.mubr.msk.bf16.mxu0 %vm388_vm0, %v6338_v43  ;;  %v7961_v56 = vunpack.i.l.bf16 %v11610_v21  ;;  %v4831_v53 = vsel %vm434_vm3, %v3518_v17, %v7956_v11 }
 0x3d2   : > { %v8067_v12 = vunpack.i.h.bf16 %v8065_v19  ;;  %v8066_v9 = vunpack.i.l.bf16 %v8065_v19  ;;  %6985 = vmatmul.mubr.msk.bf16.gmra.mrb[40].mxu0 %vm388_vm0, %v6339_v30  ;;  %v3520_v19 = vld [vmem:[#allocation4 + $0xc0] sm:$0xff]  ;;  %v4834_v41 = vsel %vm434_vm3, %v3521_v60, %v8037_v3 }
 0x3d3   : > { %v11695_v50 = vpop.permute.xlu1 %8009  ;;  %v4833_v63 = vsel %vm434_vm3, %v3520_v19, %v8036_v38  ;;  %v4866_v34 = vsel %vm2041_vm7, %v4834_v41, %v8042_v47 }
 0x3d4   : > { %v5024_v42 = vsel %vm5011_vm2, %v4991_v0, %v8066_v9  ;;  %v5025_v20 = vsel %vm5011_vm2, %v4992_v26, %v8067_v12  ;;  %v4865_v29 = vsel %vm2041_vm7, %v4833_v63, %v8041_v16  ;;  %v3519_v12 = vld [vmem:[#allocation4 + $0xb0] sm:$0xff]  ;;  %v8031_v9 = vunpack.i.l.bf16 %v11639_v33  ;;  %v11753_v16 = vpop.f32.mrb[17].mxu0 }
 0x3d5   : > { %v8070_v23 = vpop.permute.xlu0 %8069  ;;  %8299 = vrot.lane.b32.xlu1 %v8298_v10, %s8357_s22  ;;  %v13238_v10 = vld [vmem:[#allocation34_spill] sm:$0xff]  ;;  %v4832_v21 = vsel %vm434_vm3, %v3519_v12, %v7957_v57  ;;  %v4863_v26 = vsel %vm2041_vm7, %v4831_v53, %v7961_v56  ;;  %v13241_v12 = vld [vmem:[#allocation37_spill] sm:$0xff] }
 0x3d6   : > { %v8072_v54 = vunpack.i.h.bf16 %v8070_v23  ;;  %v8071_v37 = vunpack.i.l.bf16 %v8070_v23  ;;  %v6340_v51 = vpack.c.bf16 %v13239_v5, %v13238_v10  ;;  %v8032_v23 = vunpack.i.h.bf16 %v11639_v33 }
 0x3d7   : > { %v11704_v13 = vpop.permute.xlu1 %8014 }
 0x3d8   : > { %v5057_v27 = vsel %vm5044_vm4, %v5024_v42, %v8071_v37  ;;  %v5058_v40 = vsel %vm5044_vm4, %v5025_v20, %v8072_v54  ;;  %6988 = vmatprep.mubr.msk.bf16.mxu0 %vm388_vm0, %v6340_v51  ;;  %v4864_v54 = vsel %vm2041_vm7, %v4832_v21, %v7962_v46  ;;  %v4897_v37 = vsel %vm2107_vm9, %v4865_v29, %v8031_v9 }
 0x3d9   : > { %v5083_v48 = vpack.c.bf16 %v5058_v40, %v5057_v27  ;;  %v8075_v8 = vpop.permute.xlu0 %8074  ;;  %v8017_v20 = vunpack.i.h.bf16 %v11704_v13  ;;  %v4898_v27 = vsel %vm2107_vm9, %v4866_v34, %v8032_v23  ;;  %v8016_v24 = vunpack.i.l.bf16 %v11704_v13  ;;  %v11768_v34 = vpop.f32.mrb[18].mxu0 }
 0x3da   : > { %v8077_v1 = vunpack.i.h.bf16 %v8075_v8  ;;  %v8076_v18 = vunpack.i.l.bf16 %v8075_v8  ;;  %v11774_v53 = vpop.f32.mrb[19].mxu0 }
 0x3db   : > { %6938 = vmatprep.mubr.msk.bf16.mxu1 %vm5136_vm5, %v5083_v48  ;;  %v11714_v4 = vpop.permute.xlu1 %8019 }
 0x3dc   : > { %v8022_v6 = vunpack.i.h.bf16 %v11714_v4  ;;  %v4929_v33 = vsel %vm2173_vm11, %v4897_v37, %v8076_v18  ;;  %v4930_v43 = vsel %vm2173_vm11, %v4898_v27, %v8077_v1  ;;  %v8021_v30 = vunpack.i.l.bf16 %v11714_v4 }
 0x3dd   : > { %v8085_v58 = vpop.permute.xlu0 %8084 }
 0x3de   : > { %v8086_v0 = vunpack.i.l.bf16 %v8085_v58  ;;  %v8087_v42 = vunpack.i.h.bf16 %v8085_v58 }
 0x3df   : > { %v11720_v52 = vpop.permute.xlu1 %8024 }
 0x3e0   : > { %v4962_v58 = vsel %vm4945_vm15, %v4929_v33, %v8086_v0  ;;  %v8027_v47 = vunpack.i.h.bf16 %v11720_v52  ;;  %v4963_v13 = vsel %vm4945_vm15, %v4930_v43, %v8087_v42  ;;  %v8026_v29 = vunpack.i.l.bf16 %v11720_v52 }
 0x3e1   : > { %v11723_v14 = vpop.permute.xlu0 %8094  ;;  %v8006_v33 = vunpack.i.l.bf16 %v11680_v55  ;;  %v8012_v43 = vunpack.i.h.bf16 %v11695_v50 }
 0x3e2   : > { %v8097_v10 = vunpack.i.h.bf16 %v11723_v14  ;;  %v8096_v5 = vunpack.i.l.bf16 %v11723_v14  ;;  %v13240_v14 = vld [vmem:[#allocation36_spill] sm:$0xff] }
 0x3e3   : > { %v8045_v36 = vpop.permute.xlu1 %8044  ;;  %v6341_v9 = vpack.c.bf16 %v13241_v12, %v13240_v14 }
 0x3e4   : > { %v8047_v40 = vunpack.i.h.bf16 %v8045_v36  ;;  %v8046_v48 = vunpack.i.l.bf16 %v8045_v36  ;;  %v4995_v1 = vsel %vm4978_vm1, %v4962_v58, %v8096_v5  ;;  %v4996_v18 = vsel %vm4978_vm1, %v4963_v13, %v8097_v10  ;;  %v3523_v5 = vld [vmem:[#allocation4 + $0xe0] sm:$0xff] }
 0x3e5   : > { %v8105_v31 = vpop.permute.xlu0 %8104  ;;  %6989 = vmatmul.mubr.msk.bf16.gmra.mrb[44].mxu0 %vm388_vm0, %v6341_v9  ;;  %v7746_v10 = vunpack.i.l.bf16 %v11320_v45 }
 0x3e6   : > { %v4895_v51 = vsel %vm2107_vm9, %v4863_v26, %v8046_v48  ;;  %v4896_v57 = vsel %vm2107_vm9, %v4864_v54, %v8047_v40  ;;  %v8107_v11 = vunpack.i.h.bf16 %v8105_v31  ;;  %v8106_v4 = vunpack.i.l.bf16 %v8105_v31 }
 0x3e7   : > { %v8050_v8 = vpop.permute.xlu1 %8049 }
 0x3e8   : > { %v8052_v38 = vunpack.i.h.bf16 %v8050_v8  ;;  %v8051_v3 = vunpack.i.l.bf16 %v8050_v8  ;;  %v5028_v52 = vsel %vm5011_vm2, %v4995_v1, %v8106_v4  ;;  %v5029_v23 = vsel %vm5011_vm2, %v4996_v18, %v8107_v11 }
 0x3e9   : > { %v8115_v2 = vpop.permute.xlu0 %8114  ;;  %v8007_v8 = vunpack.i.h.bf16 %v11680_v55  ;;  %v3522_v55 = vld [vmem:[#allocation4 + $0xd8] sm:$0xff] }
 0x3ea   : > { %v8117_v60 = vunpack.i.h.bf16 %v8115_v2  ;;  %v8116_v63 = vunpack.i.l.bf16 %v8115_v2  ;;  %v4927_v36 = vsel %vm2173_vm11, %v4895_v51, %v8051_v3  ;;  %v4928_v17 = vsel %vm2173_vm11, %v4896_v57, %v8052_v38 }
 0x3eb   : > { %v8055_v19 = vpop.permute.xlu1 %8054  ;;  %v8011_v2 = vunpack.i.l.bf16 %v11695_v50  ;;  %v7742_v38 = vunpack.i.h.bf16 %v11310_v25  ;;  %v7741_v3 = vunpack.i.l.bf16 %v11310_v25  ;;  %v4836_v51 = vsel %vm434_vm3, %v3523_v5, %v8007_v8 }
 0x3ec   : > { %v8057_v46 = vunpack.i.h.bf16 %v8055_v19  ;;  %v8056_v56 = vunpack.i.l.bf16 %v8055_v19  ;;  %v5061_v37 = vsel %vm5044_vm4, %v5028_v52, %v8116_v63  ;;  %v5062_v42 = vsel %vm5044_vm4, %v5029_v23, %v8117_v60  ;;  %v8322_v60 = vld [vmem:[#allocation4 + $0xf0] sm:$0xff] }
 0x3ed   : > { %v11761_v41 = vpop.permute.xlu0 %8124  ;;  %v4835_v50 = vsel %vm434_vm3, %v3522_v55, %v8006_v33  ;;  %v4868_v25 = vsel %vm2041_vm7, %v4836_v51, %v8012_v43  ;;  %v7751_v19 = vunpack.i.l.bf16 %v11316_v32  ;;  %v4837_v63 = vsel %vm434_vm3, %v8322_v60, %v7741_v3 }
 0x3ee   : > { %v4960_v31 = vsel %vm4945_vm15, %v4927_v36, %v8056_v56  ;;  %v4961_v21 = vsel %vm4945_vm15, %v4928_v17, %v8057_v46  ;;  %v4867_v57 = vsel %vm2041_vm7, %v4835_v50, %v8011_v2  ;;  %v8127_v11 = vunpack.i.h.bf16 %v11761_v41  ;;  %v8321_v46 = vld [vmem:[#allocation4 + $0xf8] sm:$0xff] }
 0x3ef   : > { %v4993_v0 = vsel %vm4978_vm1, %v4960_v31, %v8016_v24  ;;  %v4994_v26 = vsel %vm4978_vm1, %v4961_v21, %v8017_v20  ;;  %v8080_v54 = vpop.permute.xlu1 %8079  ;;  %v8126_v4 = vunpack.i.l.bf16 %v11761_v41  ;;  %v4838_v56 = vsel %vm434_vm3, %v8321_v46, %v7742_v38 }
 0x3f0   : > { %v5026_v40 = vsel %vm5011_vm2, %v4993_v0, %v8021_v30  ;;  %v5027_v48 = vsel %vm5011_vm2, %v4994_v26, %v8022_v6  ;;  %v5085_v30 = vpack.c.bf16 %v5062_v42, %v5061_v37  ;;  %v7747_v6 = vunpack.i.h.bf16 %v11320_v45 }
 0x3f1   : > { %v8135_v27 = vpop.permute.xlu0 %8134  ;;  %v5059_v24 = vsel %vm5044_vm4, %v5026_v40, %v8026_v29  ;;  %v5060_v20 = vsel %vm5044_vm4, %v5027_v48, %v8027_v47  ;;  %v7752_v45 = vunpack.i.h.bf16 %v11316_v32  ;;  %v4869_v36 = vsel %vm2041_vm7, %v4837_v63, %v7746_v10 }
 0x3f2   : > { %v5084_v58 = vpack.c.bf16 %v5060_v20, %v5059_v24  ;;  %v4870_v17 = vsel %vm2041_vm7, %v4838_v56, %v7747_v6  ;;  %v8082_v14 = vunpack.i.h.bf16 %v8080_v54  ;;  %v8081_v12 = vunpack.i.l.bf16 %v8080_v54 }
 0x3f3   : > { %v8090_v13 = vpop.permute.xlu1 %8089  ;;  %v4899_v41 = vsel %vm2107_vm9, %v4867_v57, %v7751_v19  ;;  %v4900_v1 = vsel %vm2107_vm9, %v4868_v25, %v7752_v45  ;;  %v8137_v18 = vunpack.i.h.bf16 %v8135_v27  ;;  %v8136_v32 = vunpack.i.l.bf16 %v8135_v27 }
 0x3f4   : > { %6939 = vmatmul.mubr.msk.bf16.gmra.mrb[28].mxu1 %vm5136_vm5, %v5084_v58  ;;  %v4901_v31 = vsel %vm2107_vm9, %v4869_v36, %v8126_v4  ;;  %v4902_v21 = vsel %vm2107_vm9, %v4870_v17, %v8127_v11  ;;  %v8092_v52 = vunpack.i.h.bf16 %v8090_v13  ;;  %v8091_v23 = vunpack.i.l.bf16 %v8090_v13 }
 0x3f5   : > { %v8145_v47 = vpop.permute.xlu0 %8144  ;;  %6942 = vmatprep.mubr.msk.bf16.mxu1 %vm5136_vm5, %v5085_v30  ;;  %v4931_v54 = vsel %vm2173_vm11, %v4899_v41, %v8081_v12  ;;  %v4932_v48 = vsel %vm2173_vm11, %v4900_v1, %v8082_v14  ;;  %v4933_v27 = vsel %vm2173_vm11, %v4901_v31, %v8136_v32  ;;  %v4934_v20 = vsel %vm2173_vm11, %v4902_v21, %v8137_v18 }
 0x3f6   : > { %v8147_v37 = vunpack.i.h.bf16 %v8145_v47  ;;  %v8146_v42 = vunpack.i.l.bf16 %v8145_v47  ;;  %v4964_v58 = vsel %vm4945_vm15, %v4931_v54, %v8091_v23  ;;  %v4965_v38 = vsel %vm4945_vm15, %v4932_v48, %v8092_v52  ;;  %v8324_v48 = vld [vmem:[#allocation4 + $0x108] sm:$0xff] }
 0x3f7   : > { %v8100_v29 = vpop.permute.xlu1 %8099  ;;  %v7797_v18 = vunpack.i.h.bf16 %v11383_v44  ;;  %v7796_v32 = vunpack.i.l.bf16 %v11383_v44  ;;  %v7802_v21 = vunpack.i.h.bf16 %v11397_v62  ;;  %v7801_v52 = vunpack.i.l.bf16 %v11397_v62 }
 0x3f8   : > { %v8102_v0 = vunpack.i.h.bf16 %v8100_v29  ;;  %v8101_v26 = vunpack.i.l.bf16 %v8100_v29  ;;  %v4966_v10 = vsel %vm4945_vm15, %v4933_v27, %v8146_v42  ;;  %v4967_v55 = vsel %vm4945_vm15, %v4934_v20, %v8147_v37 }
 0x3f9   : > { %v8155_v9 = vpop.permute.xlu0 %8154 }
 0x3fa   : > { %v8157_v8 = vunpack.i.h.bf16 %v8155_v9  ;;  %v8156_v33 = vunpack.i.l.bf16 %v8155_v9  ;;  %v4997_v13 = vsel %vm4978_vm1, %v4964_v58, %v8101_v26  ;;  %v4998_v6 = vsel %vm4978_vm1, %v4965_v38, %v8102_v0 }
 0x3fb   : > { %v8110_v40 = vpop.permute.xlu1 %8109 }
 0x3fc   : > { %v8112_v43 = vunpack.i.h.bf16 %v8110_v40  ;;  %v8111_v2 = vunpack.i.l.bf16 %v8110_v40  ;;  %v4999_v47 = vsel %vm4978_vm1, %v4966_v10, %v8156_v33  ;;  %v5000_v51 = vsel %vm4978_vm1, %v4967_v55, %v8157_v8  ;;  %v8323_v40 = vld [vmem:[#allocation4 + $0x110] sm:$0xff] }
 0x3fd   : > { %v8165_v24 = vpop.permute.xlu0 %8164  ;;  %v4840_v54 = vsel %vm434_vm3, %v8323_v40, %v7797_v18  ;;  %v4839_v8 = vsel %vm434_vm3, %v8324_v48, %v7796_v32 }
 0x3fe   : > { %v8167_v3 = vunpack.i.h.bf16 %v8165_v24  ;;  %v8166_v30 = vunpack.i.l.bf16 %v8165_v24  ;;  %v5030_v11 = vsel %vm5011_vm2, %v4997_v13, %v8111_v2  ;;  %v5031_v4 = vsel %vm5011_vm2, %v4998_v6, %v8112_v43 }
 0x3ff   : > { %v8120_v5 = vpop.permute.xlu1 %8119  ;;  %v4871_v24 = vsel %vm2041_vm7, %v4839_v8, %v7801_v52  ;;  %v4872_v44 = vsel %vm2041_vm7, %v4840_v54, %v7802_v21 }
 0x400   : > { %v8122_v50 = vunpack.i.h.bf16 %v8120_v5  ;;  %v8121_v57 = vunpack.i.l.bf16 %v8120_v5  ;;  %v5032_v60 = vsel %vm5011_vm2, %v4999_v47, %v8166_v30  ;;  %v5033_v63 = vsel %vm5011_vm2, %v5000_v51, %v8167_v3  ;;  %v11845_v3 = vpop.f32.mrb[20].mxu0 }
 0x401   : > { %v8175_v25 = vpop.permute.xlu0 %8174  ;;  %v11851_v55 = vpop.f32.mrb[21].mxu0 }
 0x402   : > { %v8177_v45 = vunpack.i.h.bf16 %v8175_v25  ;;  %v8176_v19 = vunpack.i.l.bf16 %v8175_v25  ;;  %v5063_v46 = vsel %vm5044_vm4, %v5030_v11, %v8121_v57  ;;  %v5064_v56 = vsel %vm5044_vm4, %v5031_v4, %v8122_v50  ;;  %v11865_v52 = vpop.f32.mrb[22].mxu0 }
 0x403   : > { %v5086_v29 = vpack.c.bf16 %v5064_v56, %v5063_v46  ;;  %v8130_v36 = vpop.permute.xlu1 %8129 }
 0x404   : > { %v5065_v17 = vsel %vm5044_vm4, %v5032_v60, %v8176_v19  ;;  %v5066_v14 = vsel %vm5044_vm4, %v5033_v63, %v8177_v45  ;;  %v8132_v0 = vunpack.i.h.bf16 %v8130_v36  ;;  %v8131_v26 = vunpack.i.l.bf16 %v8130_v36 }
 0x405   : > { %v5087_v12 = vpack.c.bf16 %v5066_v14, %v5065_v17  ;;  %v8185_v9 = vpop.permute.xlu0 %8184  ;;  %6943 = vmatmul.mubr.msk.bf16.gmra.mrb[32].mxu1 %vm5136_vm5, %v5086_v29 }
 0x406   : > { %v8187_v37 = vunpack.i.h.bf16 %v8185_v9  ;;  %v8186_v42 = vunpack.i.l.bf16 %v8185_v9  ;;  %v4903_v62 = vsel %vm2107_vm9, %v4871_v24, %v8131_v26  ;;  %v4904_v2 = vsel %vm2107_vm9, %v4872_v44, %v8132_v0 }
 0x407   : > { %6946 = vmatprep.mubr.msk.bf16.mxu1 %vm5136_vm5, %v5087_v12  ;;  %v8140_v41 = vpop.permute.xlu1 %8139 }
 0x408   : > { %v8142_v27 = vunpack.i.h.bf16 %v8140_v41  ;;  %v8141_v20 = vunpack.i.l.bf16 %v8140_v41  ;;  %v4905_v30 = vsel %vm2107_vm9, %v11441_v22, %v8186_v42  ;;  %v4906_v13 = vsel %vm2107_vm9, %v11444_v39, %v8187_v37  ;;  %v11869_v42 = vpop.f32.mrb[23].mxu0 }
 0x409   : > { %v8195_v1 = vpop.permute.xlu0 %8194 }
 0x40a   : > { %v8197_v58 = vunpack.i.h.bf16 %v8195_v1  ;;  %v8196_v38 = vunpack.i.l.bf16 %v8195_v1  ;;  %v4935_v25 = vsel %vm2173_vm11, %v4903_v62, %v8141_v20  ;;  %v4936_v11 = vsel %vm2173_vm11, %v4904_v2, %v8142_v27 }
 0x40b   : > { %v8150_v31 = vpop.permute.xlu1 %8149 }
 0x40c   : > { %v8152_v6 = vunpack.i.h.bf16 %v8150_v31  ;;  %v8151_v10 = vunpack.i.l.bf16 %v8150_v31  ;;  %v4937_v22 = vsel %vm2173_vm11, %v4905_v30, %v8196_v38  ;;  %v4938_v39 = vsel %vm2173_vm11, %v4906_v13, %v8197_v58 }
 0x40d   : > { %v8205_v23 = vpop.permute.xlu0 %8204 }
 0x40e   : > { %v8207_v51 = vunpack.i.h.bf16 %v8205_v23  ;;  %v8206_v50 = vunpack.i.l.bf16 %v8205_v23  ;;  %v4968_v60 = vsel %vm4945_vm15, %v4935_v25, %v8151_v10  ;;  %v4969_v63 = vsel %vm4945_vm15, %v4936_v11, %v8152_v6 }
 0x40f   : > { %v8160_v33 = vpop.permute.xlu1 %8159 }
 0x410   : > { %v8162_v5 = vunpack.i.h.bf16 %v8160_v33  ;;  %v8161_v47 = vunpack.i.l.bf16 %v8160_v33  ;;  %v4970_v12 = vsel %vm4945_vm15, %v4937_v22, %v8206_v50  ;;  %v4971_v9 = vsel %vm4945_vm15, %v4938_v39, %v8207_v51 }
 0x411   : > { %v8215_v43 = vpop.permute.xlu0 %8214 }
 0x412   : > { %v8217_v4 = vunpack.i.h.bf16 %v8215_v43  ;;  %v8216_v45 = vunpack.i.l.bf16 %v8215_v43  ;;  %v5001_v17 = vsel %vm4978_vm1, %v4968_v60, %v8161_v47  ;;  %v5002_v14 = vsel %vm4978_vm1, %v4969_v63, %v8162_v5 }
 0x413   : > { %v8170_v57 = vpop.permute.xlu1 %8169 }
 0x414   : > { %v8172_v46 = vunpack.i.h.bf16 %v8170_v57  ;;  %v8171_v56 = vunpack.i.l.bf16 %v8170_v57  ;;  %v5003_v1 = vsel %vm4978_vm1, %v4970_v12, %v8216_v45  ;;  %v5004_v18 = vsel %vm4978_vm1, %v4971_v9, %v8217_v4 }
 0x415   : > { %v8225_v19 = vpop.permute.xlu0 %8224 }
 0x416   : > { %v8227_v29 = vunpack.i.h.bf16 %v8225_v19  ;;  %v8226_v36 = vunpack.i.l.bf16 %v8225_v19  ;;  %v5034_v23 = vsel %vm5011_vm2, %v5001_v17, %v8171_v56  ;;  %v5035_v0 = vsel %vm5011_vm2, %v5002_v14, %v8172_v46 }
 0x417   : > { %v8180_v41 = vpop.permute.xlu1 %8179 }
 0x418   : > { %v8182_v32 = vunpack.i.h.bf16 %v8180_v41  ;;  %v8181_v31 = vunpack.i.l.bf16 %v8180_v41  ;;  %v5036_v48 = vsel %vm5011_vm2, %v5003_v1, %v8226_v36  ;;  %v5037_v8 = vsel %vm5011_vm2, %v5004_v18, %v8227_v29 }
 0x419   : > { %v8235_v21 = vpop.permute.xlu0 %8234 }
 0x41a   : > { %v8237_v26 = vunpack.i.h.bf16 %v8235_v21  ;;  %v8236_v37 = vunpack.i.l.bf16 %v8235_v21  ;;  %v5067_v40 = vsel %vm5044_vm4, %v5034_v23, %v8181_v31  ;;  %v5068_v54 = vsel %vm5044_vm4, %v5035_v0, %v8182_v32 }
 0x41b   : > { %v5088_v33 = vpack.c.bf16 %v5068_v54, %v5067_v40  ;;  %v8190_v24 = vpop.permute.xlu1 %8189 }
 0x41c   : > { %v5069_v44 = vsel %vm5044_vm4, %v5036_v48, %v8236_v37  ;;  %v5070_v27 = vsel %vm5044_vm4, %v5037_v8, %v8237_v26  ;;  %v8192_v30 = vunpack.i.h.bf16 %v8190_v24  ;;  %v8191_v13 = vunpack.i.l.bf16 %v8190_v24 }
 0x41d   : > { %v5089_v20 = vpack.c.bf16 %v5070_v27, %v5069_v44  ;;  %v8245_v43 = vpop.permute.xlu0 %8244  ;;  %6947 = vmatmul.mubr.msk.bf16.gmra.mrb[36].mxu1 %vm5136_vm5, %v5088_v33 }
 0x41e   : > { %v8247_v6 = vunpack.i.h.bf16 %v8245_v43  ;;  %v8246_v10 = vunpack.i.l.bf16 %v8245_v43  ;;  %v4907_v57 = vsel %vm2107_vm9, %v11553_v28, %v8191_v13  ;;  %v4908_v25 = vsel %vm2107_vm9, %v11556_v61, %v8192_v30 }
 0x41f   : > { %6950 = vmatprep.mubr.msk.bf16.mxu1 %vm5136_vm5, %v5089_v20  ;;  %v8200_v62 = vpop.permute.xlu1 %8199 }
 0x420   : > { %v8202_v47 = vunpack.i.h.bf16 %v8200_v62  ;;  %v8201_v51 = vunpack.i.l.bf16 %v8200_v62  ;;  %v4909_v45 = vsel %vm2107_vm9, %v11597_v35, %v8246_v10  ;;  %v4910_v19 = vsel %vm2107_vm9, %v11600_v15, %v8247_v6 }
 0x421   : > { %v8255_v2 = vpop.permute.xlu0 %8254 }
 0x422   : > { %v8257_v11 = vunpack.i.h.bf16 %v8255_v2  ;;  %v8256_v4 = vunpack.i.l.bf16 %v8255_v2  ;;  %v4939_v28 = vsel %vm2173_vm11, %v4907_v57, %v8201_v51  ;;  %v4940_v36 = vsel %vm2173_vm11, %v4908_v25, %v8202_v47 }
 0x423   : > { %v8210_v58 = vpop.permute.xlu1 %8209 }
 0x424   : > { %v8212_v22 = vunpack.i.h.bf16 %v8210_v58  ;;  %v8211_v39 = vunpack.i.l.bf16 %v8210_v58  ;;  %v4941_v12 = vsel %vm2173_vm11, %v4909_v45, %v8256_v4  ;;  %v4942_v35 = vsel %vm2173_vm11, %v4910_v19, %v8257_v11 }
 0x425   : > { %v8265_v38 = vpop.permute.xlu0 %8264 }
 0x426   : > { %v8267_v60 = vunpack.i.h.bf16 %v8265_v38  ;;  %v8266_v63 = vunpack.i.l.bf16 %v8265_v38  ;;  %v4972_v41 = vsel %vm4945_vm15, %v4939_v28, %v8211_v39  ;;  %v4973_v1 = vsel %vm4945_vm15, %v4940_v36, %v8212_v22 }
 0x427   : > { %v8220_v5 = vpop.permute.xlu1 %8219 }
 0x428   : > { %v8222_v46 = vunpack.i.h.bf16 %v8220_v5  ;;  %v8221_v56 = vunpack.i.l.bf16 %v8220_v5  ;;  %v4974_v23 = vsel %vm4945_vm15, %v4941_v12, %v8266_v63  ;;  %v4975_v0 = vsel %vm4945_vm15, %v4942_v35, %v8267_v60  ;;  %v11909_v5 = vpop.f32.mrb[24].mxu0 }
 0x429   : > { %v8275_v50 = vpop.permute.xlu0 %8274  ;;  %v11911_v47 = vpop.f32.mrb[25].mxu0 }
 0x42a   : > { %v8277_v61 = vunpack.i.h.bf16 %v8275_v50  ;;  %v8276_v17 = vunpack.i.l.bf16 %v8275_v50  ;;  %v5005_v31 = vsel %vm4978_vm1, %v4972_v41, %v8221_v56  ;;  %v5006_v21 = vsel %vm4978_vm1, %v4973_v1, %v8222_v46  ;;  %v11913_v57 = vpop.f32.mrb[26].mxu0 }
 0x42b   : > { %v8230_v29 = vpop.permute.xlu1 %8229  ;;  %v11915_v4 = vpop.f32.mrb[27].mxu0 }
 0x42c   : > { %v8232_v9 = vunpack.i.h.bf16 %v8230_v29  ;;  %v8231_v15 = vunpack.i.l.bf16 %v8230_v29  ;;  %v5007_v37 = vsel %vm4978_vm1, %v4974_v23, %v8276_v17  ;;  %v5008_v40 = vsel %vm4978_vm1, %v4975_v0, %v8277_v61  ;;  %v11939_v23 = vld [vmem:[%s12911_s7] ss:$0 sm:$0xff] }
 0x42d   : > { %v8285_v14 = vpop.permute.xlu0 %8284 }
 0x42e   : > { %v8287_v18 = vunpack.i.h.bf16 %v8285_v14  ;;  %v8286_v32 = vunpack.i.l.bf16 %v8285_v14  ;;  %v5038_v33 = vsel %vm5011_vm2, %v5005_v31, %v8231_v15  ;;  %v5039_v24 = vsel %vm5011_vm2, %v5006_v21, %v8232_v9  ;;  %v11934_v31 = vld [vmem:[%s12910_s6] ss:$0 sm:$0xff] }
 0x42f   : > { %v8240_v26 = vpop.permute.xlu1 %8239 }
 0x430   : > { %v8242_v54 = vunpack.i.h.bf16 %v8240_v26  ;;  %v8241_v48 = vunpack.i.l.bf16 %v8240_v26  ;;  %v5040_v62 = vsel %vm5011_vm2, %v5007_v37, %v8286_v32  ;;  %v5041_v2 = vsel %vm5011_vm2, %v5008_v40, %v8287_v18  ;;  %v11944_v26 = vld [vmem:[%s12911_s7 + $0x1] ss:$0 sm:$0xff]  ;;  %v5383_v37 = vld [vmem:[#allocation5] sm:$0xff] }
 0x431   : > { %v8295_v8 = vpop.permute.xlu0 %8294  ;;  %v5454_v40 = vld [vmem:[#allocation5 + $0x1] sm:$0xff] }
 0x432   : > { %v8297_v44 = vunpack.i.h.bf16 %v8295_v8  ;;  %v8296_v27 = vunpack.i.l.bf16 %v8295_v8  ;;  %v5071_v20 = vsel %vm5044_vm4, %v5038_v33, %v8241_v48  ;;  %v5072_v43 = vsel %vm5044_vm4, %v5039_v24, %v8242_v54 }
 0x433   : > { %v5090_v58 = vpack.c.bf16 %v5072_v43, %v5071_v20  ;;  %v8250_v38 = vpop.permute.xlu1 %8249  ;;  %v5494_v20 = vmul.f32 %v11944_v26, %v5454_v40  ;;  %v5384_v43 = vld [vmem:[#allocation5 + $0x8] sm:$0xff] }
 0x434   : > { %v5073_v30 = vsel %vm5044_vm4, %v5040_v62, %v8296_v27  ;;  %v5074_v13 = vsel %vm5044_vm4, %v5041_v2, %v8297_v44  ;;  %v8252_v25 = vunpack.i.h.bf16 %v8250_v38  ;;  %v8251_v11 = vunpack.i.l.bf16 %v8250_v38  ;;  %v5455_v62 = vld [vmem:[#allocation5 + $0x9] sm:$0xff] }
 0x435   : > { %v5091_v6 = vpack.c.bf16 %v5074_v13, %v5073_v30  ;;  %6951 = vmatmul.mubr.msk.bf16.gmra.mrb[40].mxu1 %vm5136_vm5, %v5090_v58  ;;  %v5422_v27 = vmul.f32 %v11939_v23, %v5383_v37  ;;  %v11958_v58 = vld [vmem:[%s12911_s7 + $0x2] ss:$0 sm:$0xff]  ;;  %v5558_v38 = vld [vmem:[#allocation5 + $0x2] sm:$0xff]  ;;  %v5423_v30 = vmul.f32 %v11939_v23, %v5384_v43  ;;  %v5495_v13 = vmul.f32 %v11944_v26, %v5455_v62  ;;  %v12009_v37 = vld [vmem:[%s12911_s7 + $0x8] ss:$0 sm:$0xff] }
 0x436   : > { %v4911_v63 = vsel %vm2107_vm9, %v11673_v59, %v8251_v11  ;;  %v4912_v29 = vsel %vm2107_vm9, %v11676_v49, %v8252_v25 }
 0x437   : > { %6954 = vmatprep.mubr.msk.bf16.mxu1 %vm5136_vm5, %v5091_v6  ;;  %v8260_v10 = vpop.permute.xlu1 %8259  ;;  %v5526_v6 = vadd.f32 %v5494_v20, %v5422_v27  ;;  %v5527_v25 = vadd.f32 %v5495_v13, %v5423_v30 }
 0x438   : > { %v8262_v45 = vunpack.i.h.bf16 %v8260_v10  ;;  %v8261_v19 = vunpack.i.l.bf16 %v8260_v10  ;;  %v5598_v10 = vmul.f32 %v11958_v58, %v5558_v38 }
 0x43a   : > { %v4943_v61 = vsel %vm2173_vm11, %v4911_v63, %v8261_v19  ;;  %v4944_v17 = vsel %vm2173_vm11, %v4912_v29, %v8262_v45  ;;  %v5630_v19 = vadd.f32 %v5598_v10, %v5526_v6 }
 0x43b   : > { %v8270_v51 = vpop.permute.xlu1 %8269 }
 0x43c   : > { %v8272_v22 = vunpack.i.h.bf16 %v8270_v51  ;;  %v8271_v39 = vunpack.i.l.bf16 %v8270_v51  ;;  %v5559_v51 = vld [vmem:[#allocation5 + $0xa] sm:$0xff] }
 0x43d   : > { %v5599_v11 = vmul.f32 %v11958_v58, %v5559_v51 }
 0x43e   : > { %v4976_v14 = vsel %vm4945_vm15, %v4943_v61, %v8271_v39  ;;  %v4977_v12 = vsel %vm4945_vm15, %v4944_v17, %v8272_v22  ;;  %v11974_v22 = vld [vmem:[%s12911_s7 + $0x4] ss:$0 sm:$0xff] }
 0x43f   : > { %v8280_v50 = vpop.permute.xlu1 %8279  ;;  %v5631_v29 = vadd.f32 %v5599_v11, %v5527_v25 }
 0x440   : > { %v8282_v56 = vunpack.i.h.bf16 %v8280_v50  ;;  %v8281_v60 = vunpack.i.l.bf16 %v8280_v50  ;;  %v11968_v50 = vld [vmem:[%s12911_s7 + $0x3] ss:$0 sm:$0xff] }
 0x442   : > { %v5009_v9 = vsel %vm4978_vm1, %v4976_v14, %v8281_v60  ;;  %v5010_v15 = vsel %vm4978_vm1, %v4977_v12, %v8282_v56  ;;  %v11980_v60 = vld [vmem:[%s12911_s7 + $0x5] ss:$0 sm:$0xff]  ;;  %v11988_v14 = vld [vmem:[%s12911_s7 + $0x6] ss:$0 sm:$0xff] }
 0x443   : > { %v8290_v46 = vpop.permute.xlu1 %8289 }
 0x444   : > { %v8292_v28 = vunpack.i.h.bf16 %v8290_v46  ;;  %v8291_v36 = vunpack.i.l.bf16 %v8290_v46 }
 0x446   : > { %v5042_v1 = vsel %vm5011_vm2, %v5009_v9, %v8291_v36  ;;  %v5043_v49 = vsel %vm5011_vm2, %v5010_v15, %v8292_v28 }
 0x447   : > { %v8300_v35 = vpop.permute.xlu1 %8299 }
 0x448   : > { %v8302_v41 = vunpack.i.h.bf16 %v8300_v35  ;;  %v8301_v59 = vunpack.i.l.bf16 %v8300_v35 }
 0x44a   : > { %v5075_v18 = vsel %vm5044_vm4, %v5042_v1, %v8301_v59  ;;  %v5076_v32 = vsel %vm5044_vm4, %v5043_v49, %v8302_v41  ;;  %v11997_v59 = vld [vmem:[%s12911_s7 + $0x7] ss:$0 sm:$0xff] }
 0x44b   : > { %v5092_v21 = vpack.c.bf16 %v5076_v32, %v5075_v18 }
 0x44c   : > { %v6928_v0 = vpop.f32.mrb[16].mxu1 }
 0x44d   : > { %v5232_v54 = vadd.f32 %v6928_v0, %v11934_v31  ;;  %v5223_v48 = vpop.f32.mrb[17].mxu1  ;;  %6955 = vmatmul.mubr.msk.bf16.gmra.mrb[44].mxu1 %vm5136_vm5, %v5092_v21 }
 0x44e   : > { %v5224_v8 = vadd.f32 %v11934_v31, %v5223_v48  ;;  %v6929_v33 = vpop.f32.mrb[18].mxu1 }
 0x44f   : > { %5353 = vst.msk [vmem:[#allocation5 + $0x31] sm:$0xff] %vm434_vm3, %v5232_v54  ;;  %v5235_v24 = vadd.f32 %v6929_v33, %v11934_v31  ;;  %v5226_v44 = vpop.f32.mrb[19].mxu1 }
 0x450   : > { %5351 = vst.msk [vmem:[#allocation5 + $0x19] sm:$0xff] %vm434_vm3, %v5224_v8  ;;  %v5227_v2 = vadd.f32 %v11934_v31, %v5226_v44 }
 0x451   : > { %5354 = vst.msk [vmem:[#allocation5 + $0x39] sm:$0xff] %vm434_vm3, %v5235_v24  ;;  %v12019_v24 = vld [vmem:[%s12914_s10] ss:$0 sm:$0xff] }
 0x452   : > { %5352 = vst.msk [vmem:[#allocation5 + $0x21] sm:$0xff] %vm434_vm3, %v5227_v2  ;;  %v12030_v2 = vld [vmem:[%s12912_s8] ss:$0 sm:$0xff]  ;;  %v6436_v6 = vadd.f32 %v12019_v24, %v11753_v16 }
 0x456   : > { %v11983_v17 = vld [vmem:[#allocation5 + $0x30] sm:$0xff] }
 0x457   : > { %v5385_v45 = vld [vmem:[#allocation5 + $0x18] sm:$0xff]  ;;  %v6015_v21 = vmul.f32 %v11988_v14, %v11983_v17 }
 0x458   : > { %v5456_v39 = vld [vmem:[#allocation5 + $0x19] sm:$0xff]  ;;  %v5702_v46 = vmul.f32 %v11968_v50, %v5385_v45  ;;  %v11992_v41 = vld [vmem:[#allocation5 + $0x31] sm:$0xff] }
 0x459   : > { %v5386_v56 = vld [vmem:[#allocation5 + $0x20] sm:$0xff]  ;;  %v5806_v61 = vmul.f32 %v11974_v22, %v5456_v39  ;;  %v12000_v18 = vld [vmem:[#allocation5 + $0x38] sm:$0xff]  ;;  %v6119_v33 = vmul.f32 %v11997_v59, %v11992_v41 }
 0x45a   : > { %v5560_v63 = vld [vmem:[#allocation5 + $0x1a] sm:$0xff]  ;;  %v5734_v36 = vadd.f32 %v5702_v46, %v5630_v19  ;;  %v5703_v12 = vmul.f32 %v11968_v50, %v5386_v56  ;;  %v5561_v35 = vld [vmem:[#allocation5 + $0x22] sm:$0xff]  ;;  %v12004_v0 = vld [vmem:[#allocation5 + $0x32] sm:$0xff]  ;;  %v6016_v27 = vmul.f32 %v11988_v14, %v12000_v18  ;;  %v6439_v19 = vadd.f32 %v12019_v24, %v11774_v53 }
 0x45b   : > { %v5457_v28 = vld [vmem:[#allocation5 + $0x21] sm:$0xff]  ;;  %v5910_v15 = vmul.f32 %v11980_v60, %v5560_v63  ;;  %v5911_v54 = vmul.f32 %v11980_v60, %v5561_v35  ;;  %v12012_v48 = vld [vmem:[#allocation5 + $0x39] sm:$0xff]  ;;  %v6223_v62 = vmul.f32 %v12009_v37, %v12004_v0 }
 0x45c   : > { %v5838_v9 = vadd.f32 %v5806_v61, %v5734_v36  ;;  %v5735_v1 = vadd.f32 %v5703_v12, %v5631_v29  ;;  %v5807_v49 = vmul.f32 %v11974_v22, %v5457_v28  ;;  %v12023_v20 = vld [vmem:[#allocation5 + $0x3a] sm:$0xff]  ;;  %v6120_v30 = vmul.f32 %v11997_v59, %v12012_v48 }
 0x45d   : > { %v6224_v51 = vmul.f32 %v12009_v37, %v12023_v20  ;;  %v5424_v36 = vmul.f32 %v11939_v23, %v5385_v45  ;;  %v5496_v61 = vmul.f32 %v11944_v26, %v5456_v39  ;;  %v12053_v53 = vpop.f32.mrb[28].mxu0 }
 0x45e   : > { %v5942_v32 = vadd.f32 %v5910_v15, %v5838_v9  ;;  %v5839_v40 = vadd.f32 %v5807_v49, %v5735_v1  ;;  %v5425_v15 = vmul.f32 %v11939_v23, %v5386_v56  ;;  %v5497_v1 = vmul.f32 %v11944_v26, %v5457_v28 }
 0x45f   : > { %v5528_v49 = vadd.f32 %v5496_v61, %v5424_v36  ;;  %v5704_v56 = vmul.f32 %v11968_v50, %v11983_v17 }
 0x460   : > { %v6047_v8 = vadd.f32 %v6015_v21, %v5942_v32  ;;  %v5943_v44 = vadd.f32 %v5911_v54, %v5839_v40  ;;  %v5600_v32 = vmul.f32 %v11958_v58, %v5560_v63  ;;  %v5529_v21 = vadd.f32 %v5497_v1, %v5425_v15  ;;  %v12060_v40 = vpop.f32.mrb[29].mxu0 }
 0x461   : > { %v12062_v54 = vpop.f32.mrb[30].mxu0 }
 0x462   : > { %v6151_v43 = vadd.f32 %v6119_v33, %v6047_v8  ;;  %v6048_v38 = vadd.f32 %v6016_v27, %v5943_v44  ;;  %v5632_v45 = vadd.f32 %v5600_v32, %v5528_v49  ;;  %v5601_v8 = vmul.f32 %v11958_v58, %v5561_v35  ;;  %v12069_v27 = vpop.f32.mrb[31].mxu0 }
 0x464   : > { %v6255_v13 = vadd.f32 %v6223_v62, %v6151_v43  ;;  %v6152_v10 = vadd.f32 %v6120_v30, %v6048_v38  ;;  %v5633_v43 = vadd.f32 %v5601_v8, %v5529_v21  ;;  %v5736_v30 = vadd.f32 %v5704_v56, %v5632_v45 }
 0x466   : > { %v6294_v25 = vadd.f32 %v12030_v2, %v6255_v13  ;;  %v6256_v11 = vadd.f32 %v6224_v51, %v6152_v10  ;;  %v5705_v13 = vmul.f32 %v11968_v50, %v12000_v18  ;;  %v5426_v51 = vmul.f32 %v11939_v23, %v11983_v17 }
 0x468   : > { %v6562_v46 = vadd.f32 %v6436_v6, %v6294_v25  ;;  %v6295_v16 = vadd.f32 %v12030_v2, %v6256_v11  ;;  %v5808_v6 = vmul.f32 %v11974_v22, %v11992_v41  ;;  %v5737_v10 = vadd.f32 %v5705_v13, %v5633_v43 }
 0x469   : > { %v5498_v25 = vmul.f32 %v11944_v26, %v11992_v41  ;;  %v5427_v41 = vmul.f32 %v11939_v23, %v12000_v18  ;;  %v5603_v13 = vmul.f32 %v11958_v58, %v12023_v20 }
 0x46a   : > { %v6594_v29 = vmax.f32 %v6562_v46, 0.0  ;;  %v6563_v12 = vadd.f32 %v6439_v19, %v6295_v16  ;;  %v12085_v11 = vpop.f32.mrb[32].mxu0  ;;  %v5840_v19 = vadd.f32 %v5808_v6, %v5736_v30  ;;  %v5809_v46 = vmul.f32 %v11974_v22, %v12012_v48 }
 0x46b   : > { %v5912_v16 = vmul.f32 %v11980_v60, %v12004_v0  ;;  %v12103_v49 = vpop.f32.mrb[33].mxu0  ;;  %v6444_v6 = vadd.f32 %v11749_v7, %v12019_v24 }
 0x46c   : > { %6626 = vst.msk [vmem:[%s12046_s23] sm:$0xff] %vm434_vm3, %v6594_v29  ;;  %v6595_v9 = vmax.f32 %v6563_v12, 0.0  ;;  %v5602_v29 = vmul.f32 %v11958_v58, %v12004_v0  ;;  %v5841_v17 = vadd.f32 %v5809_v46, %v5737_v10  ;;  %v5530_v12 = vadd.f32 %v5498_v25, %v5426_v51  ;;  %v12111_v45 = vpop.f32.mrb[34].mxu0 }
 0x46d   : > { %v5944_v15 = vadd.f32 %v5912_v16, %v5840_v19  ;;  %v5913_v0 = vmul.f32 %v11980_v60, %v12023_v20 }
 0x46e   : > { %6627 = vst.msk [vmem:[%s12046_s23 + $0x8] sm:$0xff] %vm434_vm3, %v6595_v9  ;;  %v5499_v9 = vmul.f32 %v11944_v26, %v12012_v48  ;;  %v5634_v56 = vadd.f32 %v5602_v29, %v5530_v12  ;;  %v6447_v12 = vadd.f32 %v11768_v34, %v12019_v24 }
 0x474   : > { %v6932_v39 = vpop.f32.mrb[20].mxu1 }
 0x475   : > { %v5248_v33 = vadd.f32 %v6932_v39, %v11934_v31  ;;  %v5239_v44 = vpop.f32.mrb[21].mxu1 }
 0x476   : > { %v5240_v28 = vadd.f32 %v11934_v31, %v5239_v44  ;;  %v6933_v63 = vpop.f32.mrb[22].mxu1 }
 0x477   : > { %5357 = vst.msk [vmem:[#allocation5 + $0x61] sm:$0xff] %vm434_vm3, %v5248_v33  ;;  %v5251_v62 = vadd.f32 %v6933_v63, %v11934_v31  ;;  %v5242_v38 = vpop.f32.mrb[23].mxu1  ;;  %v5945_v33 = vadd.f32 %v5913_v0, %v5841_v17 }
 0x478   : > { %5355 = vst.msk [vmem:[#allocation5 + $0x49] sm:$0xff] %vm434_vm3, %v5240_v28  ;;  %v5243_v35 = vadd.f32 %v11934_v31, %v5242_v38  ;;  %v5531_v28 = vadd.f32 %v5499_v9, %v5427_v41 }
 0x479   : > { %5358 = vst.msk [vmem:[#allocation5 + $0x69] sm:$0xff] %vm434_vm3, %v5251_v62 }
 0x47a   : > { %5356 = vst.msk [vmem:[#allocation5 + $0x51] sm:$0xff] %vm434_vm3, %v5243_v35  ;;  %v5635_v16 = vadd.f32 %v5603_v13, %v5531_v28 }
 0x47e   : > { %v12133_v25 = vld [vmem:[#allocation5 + $0x60] sm:$0xff] }
 0x47f   : > { %v12093_v36 = vld [vmem:[#allocation5 + $0x48] sm:$0xff] }
 0x480   : > { %v12095_v61 = vld [vmem:[#allocation5 + $0x49] sm:$0xff]  ;;  %v6017_v1 = vmul.f32 %v11988_v14, %v12093_v36  ;;  %v5706_v21 = vmul.f32 %v11968_v50, %v12093_v36  ;;  %v12144_v41 = vld [vmem:[#allocation5 + $0x61] sm:$0xff] }
 0x481   : > { %v12107_v32 = vld [vmem:[#allocation5 + $0x50] sm:$0xff]  ;;  %v6121_v48 = vmul.f32 %v11997_v59, %v12095_v61  ;;  %v5810_v51 = vmul.f32 %v11974_v22, %v12095_v61  ;;  %v12148_v0 = vld [vmem:[#allocation5 + $0x68] sm:$0xff] }
 0x482   : > { %v6049_v18 = vadd.f32 %v6017_v1, %v5944_v15  ;;  %v12115_v39 = vld [vmem:[#allocation5 + $0x51] sm:$0xff]  ;;  %v6018_v44 = vmul.f32 %v11988_v14, %v12107_v32  ;;  %v5738_v35 = vadd.f32 %v5706_v21, %v5634_v56  ;;  %v5707_v29 = vmul.f32 %v11968_v50, %v12107_v32  ;;  %v12157_v28 = vld [vmem:[#allocation5 + $0x69] sm:$0xff] }
 0x483   : > { %v12117_v8 = vld [vmem:[#allocation5 + $0x4a] sm:$0xff]  ;;  %v12121_v43 = vld [vmem:[#allocation5 + $0x52] sm:$0xff]  ;;  %v6122_v30 = vmul.f32 %v11997_v59, %v12115_v39  ;;  %v5811_v1 = vmul.f32 %v11974_v22, %v12115_v39  ;;  %v6020_v13 = vmul.f32 %v11988_v14, %v12148_v0 }
 0x484   : > { %v6153_v63 = vadd.f32 %v6121_v48, %v6049_v18  ;;  %v6225_v62 = vmul.f32 %v12009_v37, %v12117_v8  ;;  %v6050_v38 = vadd.f32 %v6018_v44, %v5945_v33  ;;  %v6226_v46 = vmul.f32 %v12009_v37, %v12121_v43  ;;  %v12152_v33 = vld [vmem:[#allocation5 + $0x62] sm:$0xff] }
 0x485   : > { %v5842_v20 = vadd.f32 %v5810_v51, %v5738_v35  ;;  %v5914_v7 = vmul.f32 %v11980_v60, %v12117_v8  ;;  %v5739_v15 = vadd.f32 %v5707_v29, %v5635_v16  ;;  %v6019_v48 = vmul.f32 %v11988_v14, %v12133_v25 }
 0x486   : > { %v6257_v10 = vadd.f32 %v6225_v62, %v6153_v63  ;;  %v6154_v19 = vadd.f32 %v6122_v30, %v6050_v38  ;;  %v5915_v56 = vmul.f32 %v11980_v60, %v12121_v43  ;;  %v6123_v38 = vmul.f32 %v11997_v59, %v12144_v41 }
 0x487   : > { %v5946_v18 = vadd.f32 %v5914_v7, %v5842_v20  ;;  %v5843_v34 = vadd.f32 %v5811_v1, %v5739_v15  ;;  %v6227_v51 = vmul.f32 %v12009_v37, %v12152_v33  ;;  %v6124_v29 = vmul.f32 %v11997_v59, %v12157_v28 }
 0x488   : > { %v6296_v17 = vadd.f32 %v12030_v2, %v6257_v10  ;;  %v6258_v9 = vadd.f32 %v6226_v46, %v6154_v19  ;;  %v12169_v19 = vpop.f32.mrb[35].mxu0  ;;  %v6452_v20 = vadd.f32 %v12019_v24, %v11851_v55  ;;  %v6455_v1 = vadd.f32 %v12019_v24, %v11869_v42 }
 0x489   : > { %v6051_v62 = vadd.f32 %v6019_v48, %v5946_v18  ;;  %v5947_v35 = vadd.f32 %v5915_v56, %v5843_v34  ;;  %v5428_v18 = vmul.f32 %v11939_v23, %v12093_v36  ;;  %v5500_v55 = vmul.f32 %v11944_v26, %v12095_v61 }
 0x48a   : > { %v6564_v21 = vadd.f32 %v6444_v6, %v6296_v17  ;;  %v6297_v44 = vadd.f32 %v12030_v2, %v6258_v9  ;;  %v12163_v6 = vld [vmem:[#allocation5 + $0x6a] sm:$0xff]  ;;  %v5429_v34 = vmul.f32 %v11939_v23, %v12107_v32  ;;  %v5501_v56 = vmul.f32 %v11944_v26, %v12115_v39 }
 0x48b   : > { %v6155_v10 = vadd.f32 %v6123_v38, %v6051_v62  ;;  %v6052_v16 = vadd.f32 %v6020_v13, %v5947_v35  ;;  %v5532_v62 = vadd.f32 %v5500_v55, %v5428_v18  ;;  %v5604_v38 = vmul.f32 %v11958_v58, %v12117_v8 }
 0x48c   : > { %v6596_v63 = vmax.f32 %v6564_v21, 0.0  ;;  %v6565_v30 = vadd.f32 %v6447_v12, %v6297_v44  ;;  %v6228_v12 = vmul.f32 %v12009_v37, %v12163_v6  ;;  %v12182_v21 = vpop.f32.mrb[36].mxu0  ;;  %v5533_v35 = vadd.f32 %v5501_v56, %v5429_v34 }
 0x48d   : > { %v6259_v17 = vadd.f32 %v6227_v51, %v6155_v10  ;;  %v6156_v7 = vadd.f32 %v6124_v29, %v6052_v16  ;;  %v12197_v36 = vpop.f32.mrb[37].mxu0  ;;  %v5605_v32 = vmul.f32 %v11958_v58, %v12121_v43  ;;  %v5636_v39 = vadd.f32 %v5604_v38, %v5532_v62 }
 0x48e   : > { %6628 = vst.msk [vmem:[%s12046_s23 + $0x10] sm:$0xff] %vm434_vm3, %v6596_v63  ;;  %v6597_v46 = vmax.f32 %v6565_v30, 0.0  ;;  %v12199_v30 = vpop.f32.mrb[38].mxu0  ;;  %v5708_v8 = vmul.f32 %v11968_v50, %v12133_v25  ;;  %v5709_v43 = vmul.f32 %v11968_v50, %v12148_v0  ;;  %v5502_v18 = vmul.f32 %v11944_v26, %v12144_v41 }
 0x48f   : > { %v6298_v9 = vadd.f32 %v12030_v2, %v6259_v17  ;;  %v6260_v15 = vadd.f32 %v6228_v12, %v6156_v7  ;;  %v5813_v55 = vmul.f32 %v11974_v22, %v12157_v28  ;;  %v5916_v34 = vmul.f32 %v11980_v60, %v12152_v33 }
 0x490   : > { %6629 = vst.msk [vmem:[%s12046_s23 + $0x18] sm:$0xff] %vm434_vm3, %v6597_v46  ;;  %v5637_v46 = vadd.f32 %v5605_v32, %v5533_v35  ;;  %v5740_v7 = vadd.f32 %v5708_v8, %v5636_v39  ;;  %v5503_v38 = vmul.f32 %v11944_v26, %v12157_v28  ;;  %v5917_v32 = vmul.f32 %v11980_v60, %v12163_v6 }
 0x491   : > { %v6566_v48 = vadd.f32 %v6452_v20, %v6298_v9  ;;  %v6299_v44 = vadd.f32 %v12030_v2, %v6260_v15  ;;  %v5812_v9 = vmul.f32 %v11974_v22, %v12144_v41  ;;  %v5431_v41 = vmul.f32 %v11939_v23, %v12148_v0 }
 0x492   : > { %v5741_v15 = vadd.f32 %v5709_v43, %v5637_v46 }
 0x493   : > { %v6598_v63 = vmax.f32 %v6566_v48, 0.0  ;;  %v6567_v42 = vadd.f32 %v6455_v1, %v6299_v44  ;;  %v5430_v1 = vmul.f32 %v11939_v23, %v12133_v25  ;;  %v5844_v48 = vadd.f32 %v5812_v9, %v5740_v7  ;;  %v12225_v44 = vpop.f32.mrb[39].mxu0 }
 0x494   : > { %v5845_v56 = vadd.f32 %v5813_v55, %v5741_v15  ;;  %v5606_v25 = vmul.f32 %v11958_v58, %v12152_v33  ;;  %v5607_v9 = vmul.f32 %v11958_v58, %v12163_v6  ;;  %v6460_v15 = vadd.f32 %v11845_v3, %v12019_v24 }
 0x495   : > { %6630 = vst.msk [vmem:[%s12046_s23 + $0x20] sm:$0xff] %vm434_vm3, %v6598_v63  ;;  %v6599_v61 = vmax.f32 %v6567_v42, 0.0  ;;  %v5534_v62 = vadd.f32 %v5502_v18, %v5430_v1 }
 0x496   : > { %v5949_v28 = vadd.f32 %v5917_v32, %v5845_v56 }
 0x497   : > { %6631 = vst.msk [vmem:[%s12046_s23 + $0x28] sm:$0xff] %vm434_vm3, %v6599_v61  ;;  %v5948_v61 = vadd.f32 %v5916_v34, %v5844_v48  ;;  %v5638_v46 = vadd.f32 %v5606_v25, %v5534_v62 }
 0x49c   : > { %v6936_v13 = vpop.f32.mrb[24].mxu1 }
 0x49d   : > { %v5264_v10 = vadd.f32 %v6936_v13, %v11934_v31  ;;  %v5255_v51 = vpop.f32.mrb[25].mxu1 }
 0x49e   : > { %v5256_v16 = vadd.f32 %v11934_v31, %v5255_v51  ;;  %v6937_v29 = vpop.f32.mrb[26].mxu1 }
 0x49f   : > { %5361 = vst.msk [vmem:[#allocation5 + $0x91] sm:$0xff] %vm434_vm3, %v5264_v10  ;;  %v5267_v17 = vadd.f32 %v6937_v29, %v11934_v31  ;;  %v5258_v20 = vpop.f32.mrb[27].mxu1 }
 0x4a0   : > { %5359 = vst.msk [vmem:[#allocation5 + $0x79] sm:$0xff] %vm434_vm3, %v5256_v16  ;;  %v5259_v12 = vadd.f32 %v11934_v31, %v5258_v20  ;;  %v5535_v16 = vadd.f32 %v5503_v38, %v5431_v41 }
 0x4a1   : > { %5362 = vst.msk [vmem:[#allocation5 + $0x99] sm:$0xff] %vm434_vm3, %v5267_v17 }
 0x4a2   : > { %5360 = vst.msk [vmem:[#allocation5 + $0x81] sm:$0xff] %vm434_vm3, %v5259_v12  ;;  %v5639_v56 = vadd.f32 %v5607_v9, %v5535_v16 }
 0x4a5   : > { %v12273_v25 = vpop.f32.mrb[40].mxu0 }
 0x4a6   : > { %v12267_v55 = vld [vmem:[#allocation5 + $0x90] sm:$0xff]  ;;  %v12278_v38 = vpop.f32.mrb[41].mxu0 }
 0x4a7   : > { %v12229_v63 = vld [vmem:[#allocation5 + $0x78] sm:$0xff]  ;;  %v6023_v16 = vmul.f32 %v11988_v14, %v12267_v55 }
 0x4a8   : > { %v12231_v42 = vld [vmem:[#allocation5 + $0x79] sm:$0xff]  ;;  %v6021_v35 = vmul.f32 %v11988_v14, %v12229_v63  ;;  %v5710_v13 = vmul.f32 %v11968_v50, %v12229_v63 }
 0x4a9   : > { %v12243_v39 = vld [vmem:[#allocation5 + $0x80] sm:$0xff]  ;;  %v6125_v33 = vmul.f32 %v11997_v59, %v12231_v42  ;;  %v5814_v18 = vmul.f32 %v11974_v22, %v12231_v42 }
 0x4aa   : > { %v6053_v10 = vadd.f32 %v6021_v35, %v5948_v61  ;;  %v12249_v0 = vld [vmem:[#allocation5 + $0x81] sm:$0xff]  ;;  %v6022_v8 = vmul.f32 %v11988_v14, %v12243_v39  ;;  %v5742_v12 = vadd.f32 %v5710_v13, %v5638_v46  ;;  %v5711_v62 = vmul.f32 %v11968_v50, %v12243_v39  ;;  %v12282_v35 = vld [vmem:[#allocation5 + $0x91] sm:$0xff] }
 0x4ab   : > { %v12251_v51 = vld [vmem:[#allocation5 + $0x7a] sm:$0xff]  ;;  %v12255_v17 = vld [vmem:[#allocation5 + $0x82] sm:$0xff]  ;;  %v6126_v7 = vmul.f32 %v11997_v59, %v12249_v0  ;;  %v6463_v61 = vadd.f32 %v11865_v52, %v12019_v24 }
 0x4ac   : > { %v6157_v29 = vadd.f32 %v6125_v33, %v6053_v10  ;;  %v6229_v20 = vmul.f32 %v12009_v37, %v12251_v51  ;;  %v6054_v43 = vadd.f32 %v6022_v8, %v5949_v28  ;;  %v6230_v34 = vmul.f32 %v12009_v37, %v12255_v17  ;;  %v12286_v33 = vpop.f32.mrb[42].mxu0  ;;  %v12288_v28 = vld [vmem:[#allocation5 + $0x98] sm:$0xff] }
 0x4ad   : > { %v5846_v41 = vadd.f32 %v5814_v18, %v5742_v12  ;;  %v5918_v3 = vmul.f32 %v11980_v60, %v12251_v51  ;;  %v5743_v13 = vadd.f32 %v5711_v62, %v5639_v56  ;;  %v5815_v10 = vmul.f32 %v11974_v22, %v12249_v0 }
 0x4ae   : > { %v6261_v1 = vadd.f32 %v6229_v20, %v6157_v29  ;;  %v6158_v48 = vadd.f32 %v6126_v7, %v6054_v43  ;;  %v12292_v29 = vld [vmem:[#allocation5 + $0x92] sm:$0xff]  ;;  %v5919_v43 = vmul.f32 %v11980_v60, %v12255_v17 }
 0x4af   : > { %v5950_v46 = vadd.f32 %v5918_v3, %v5846_v41  ;;  %v5847_v20 = vadd.f32 %v5815_v10, %v5743_v13  ;;  %v12297_v7 = vld [vmem:[#allocation5 + $0x99] sm:$0xff]  ;;  %v6231_v62 = vmul.f32 %v12009_v37, %v12292_v29 }
 0x4b0   : > { %v6300_v6 = vadd.f32 %v12030_v2, %v6261_v1  ;;  %v6262_v32 = vadd.f32 %v6230_v34, %v6158_v48  ;;  %v6024_v48 = vmul.f32 %v11988_v14, %v12288_v28  ;;  %v12303_v34 = vld [vmem:[#allocation5 + $0x9a] sm:$0xff]  ;;  %v6128_v3 = vmul.f32 %v11997_v59, %v12297_v7 }
 0x4b1   : > { %v6055_v9 = vadd.f32 %v6023_v16, %v5950_v46  ;;  %v5951_v18 = vadd.f32 %v5919_v43, %v5847_v20  ;;  %v6232_v10 = vmul.f32 %v12009_v37, %v12303_v34  ;;  %v6471_v16 = vadd.f32 %v12019_v24, %v11915_v4  ;;  %v12322_v43 = vpop.f32.mrb[43].mxu0 }
 0x4b2   : > { %v6568_v8 = vadd.f32 %v6460_v15, %v6300_v6  ;;  %v6301_v52 = vadd.f32 %v12030_v2, %v6262_v32  ;;  %v6127_v15 = vmul.f32 %v11997_v59, %v12282_v35  ;;  %13242 = vst [vmem:[#allocation50_spill] sm:$0xff] %v12322_v43 }
 0x4b3   : > { %v6056_v41 = vadd.f32 %v6024_v48, %v5951_v18  ;;  %v5608_v48 = vmul.f32 %v11958_v58, %v12251_v51  ;;  %v5713_v51 = vmul.f32 %v11968_v50, %v12288_v28 }
 0x4b4   : > { %v6600_v12 = vmax.f32 %v6568_v8, 0.0  ;;  %v6569_v1 = vadd.f32 %v6463_v61, %v6301_v52  ;;  %v6159_v56 = vadd.f32 %v6127_v15, %v6055_v9  ;;  %v6468_v61 = vadd.f32 %v12019_v24, %v11911_v47 }
 0x4b5   : > { %v6160_v13 = vadd.f32 %v6128_v3, %v6056_v41  ;;  %v5432_v52 = vmul.f32 %v11939_v23, %v12229_v63  ;;  %v5504_v47 = vmul.f32 %v11944_v26, %v12231_v42  ;;  %v5505_v9 = vmul.f32 %v11944_v26, %v12249_v0 }
 0x4b6   : > { %6632 = vst.msk [vmem:[%s12046_s23 + $0x30] sm:$0xff] %vm434_vm3, %v6600_v12  ;;  %v6601_v6 = vmax.f32 %v6569_v1, 0.0  ;;  %v6263_v32 = vadd.f32 %v6231_v62, %v6159_v56  ;;  %v5433_v12 = vmul.f32 %v11939_v23, %v12243_v39  ;;  %v5609_v42 = vmul.f32 %v11958_v58, %v12255_v17 }
 0x4b7   : > { %v6264_v46 = vadd.f32 %v6232_v10, %v6160_v13  ;;  %v5536_v63 = vadd.f32 %v5504_v47, %v5432_v52  ;;  %v5712_v3 = vmul.f32 %v11968_v50, %v12267_v55  ;;  %v5506_v47 = vmul.f32 %v11944_v26, %v12282_v35 }
 0x4b8   : > { %6633 = vst.msk [vmem:[%s12046_s23 + $0x38] sm:$0xff] %vm434_vm3, %v6601_v6  ;;  %v6302_v8 = vadd.f32 %v12030_v2, %v6263_v32  ;;  %v5537_v18 = vadd.f32 %v5505_v9, %v5433_v12  ;;  %v12335_v62 = vpop.f32.mrb[44].mxu0  ;;  %v5435_v12 = vmul.f32 %v11939_v23, %v12288_v28  ;;  %v5507_v9 = vmul.f32 %v11944_v26, %v12297_v7 }
 0x4b9   : > { %v6303_v15 = vadd.f32 %v12030_v2, %v6264_v46  ;;  %13243 = vst [vmem:[#allocation53_spill] sm:$0xff] %v12335_v62  ;;  %v5640_v39 = vadd.f32 %v5608_v48, %v5536_v63  ;;  %v12341_v6 = vpop.f32.mrb[45].mxu0  ;;  %v5610_v48 = vmul.f32 %v11958_v58, %v12292_v29 }
 0x4ba   : > { %v6570_v20 = vadd.f32 %v6468_v61, %v6302_v8  ;;  %v5641_v0 = vadd.f32 %v5609_v42, %v5537_v18  ;;  %13244 = vst [vmem:[#allocation54_spill] sm:$0xff] %v12341_v6  ;;  %v12343_v41 = vpop.f32.mrb[46].mxu0  ;;  %v5921_v42 = vmul.f32 %v11980_v60, %v12303_v34 }
 0x4bb   : > { %v6571_v4 = vadd.f32 %v6471_v16, %v6303_v15  ;;  %13245 = vst [vmem:[#allocation56_spill] sm:$0xff] %v12343_v41  ;;  %v5744_v10 = vadd.f32 %v5712_v3, %v5640_v39  ;;  %v5434_v16 = vmul.f32 %v11939_v23, %v12267_v55  ;;  %v12361_v15 = vpop.f32.mrb[47].mxu0  ;;  %v12381_v39 = vadd.f32 %v11909_v5, %v12019_v24 }
 0x4bc   : > { %v6602_v1 = vmax.f32 %v6570_v20, 0.0  ;;  %v5745_v17 = vadd.f32 %v5713_v51, %v5641_v0  ;;  %13246 = vst [vmem:[#allocation57_spill] sm:$0xff] %v12361_v15  ;;  %v12385_v0 = vadd.f32 %v11913_v57, %v12019_v24 }
 0x4bd   : > { %v6603_v56 = vmax.f32 %v6571_v4, 0.0  ;;  %v5817_v4 = vmul.f32 %v11974_v22, %v12297_v7  ;;  %v5538_v18 = vadd.f32 %v5506_v47, %v5434_v16  ;;  %v5611_v7 = vmul.f32 %v11958_v58, %v12303_v34 }
 0x4be   : > { %6634 = vst.msk [vmem:[%s12046_s23 + $0x40] sm:$0xff] %vm434_vm3, %v6602_v1  ;;  %v5816_v1 = vmul.f32 %v11974_v22, %v12282_v35  ;;  %v5920_v35 = vmul.f32 %v11980_v60, %v12292_v29 }
 0x4bf   : > { %6635 = vst.msk [vmem:[%s12046_s23 + $0x48] sm:$0xff] %vm434_vm3, %v6603_v56  ;;  %v5849_v28 = vadd.f32 %v5817_v4, %v5745_v17  ;;  %v5539_v56 = vadd.f32 %v5507_v9, %v5435_v12 }
 0x4c0   : > { %v5848_v63 = vadd.f32 %v5816_v1, %v5744_v10  ;;  %v5642_v10 = vadd.f32 %v5610_v48, %v5538_v18 }
 0x4c1   : > { %v12391_v17 = vadd.f32 %v5611_v7, %v5539_v56 }
 0x4c7   : > { %v6940_v32 = vpop.f32.mrb[28].mxu1 }
 0x4c8   : > { %v5280_v61 = vadd.f32 %v6940_v32, %v11934_v31  ;;  %v5271_v13 = vpop.f32.mrb[29].mxu1  ;;  %v5952_v32 = vadd.f32 %v5920_v35, %v5848_v63 }
 0x4c9   : > { %v5272_v8 = vadd.f32 %v11934_v31, %v5271_v13  ;;  %v6941_v46 = vpop.f32.mrb[30].mxu1  ;;  %v5953_v13 = vadd.f32 %v5921_v42, %v5849_v28 }
 0x4ca   : > { %5365 = vst.msk [vmem:[#allocation5 + $0xc1] sm:$0xff] %vm434_vm3, %v5280_v61  ;;  %v5283_v52 = vadd.f32 %v6941_v46, %v11934_v31  ;;  %v5274_v20 = vpop.f32.mrb[31].mxu1 }
 0x4cb   : > { %5363 = vst.msk [vmem:[#allocation5 + $0xa9] sm:$0xff] %vm434_vm3, %v5272_v8  ;;  %v5275_v55 = vadd.f32 %v11934_v31, %v5274_v20 }
 0x4cc   : > { %5366 = vst.msk [vmem:[#allocation5 + $0xc9] sm:$0xff] %vm434_vm3, %v5283_v52 }
 0x4cd   : > { %5364 = vst.msk [vmem:[#allocation5 + $0xb1] sm:$0xff] %vm434_vm3, %v5275_v55 }
 0x4d1   : > { %v12387_v3 = vld [vmem:[#allocation5 + $0xc0] sm:$0xff] }
 0x4d2   : > { %v12389_v51 = vld [vmem:[#allocation5 + $0xc1] sm:$0xff]  ;;  %v6089_v61 = vld [vmem:[#allocation5 + $0xa9] sm:$0xff]  ;;  %v5716_v57 = vmul.f32 %v11968_v50, %v12387_v3  ;;  %v6027_v9 = vmul.f32 %v11988_v14, %v12387_v3 }
 0x4d3   : > { %v5985_v29 = vld [vmem:[#allocation5 + $0xa8] sm:$0xff]  ;;  %v5508_v8 = vmul.f32 %v11944_v26, %v6089_v61  ;;  %v6129_v46 = vmul.f32 %v11997_v59, %v6089_v61  ;;  %v5820_v47 = vmul.f32 %v11974_v22, %v12389_v51  ;;  %v5818_v28 = vmul.f32 %v11974_v22, %v6089_v61 }
 0x4d4   : > { %v6025_v34 = vmul.f32 %v11988_v14, %v5985_v29  ;;  %v5436_v5 = vmul.f32 %v11939_v23, %v5985_v29  ;;  %v5986_v16 = vld [vmem:[#allocation5 + $0xb0] sm:$0xff]  ;;  %v5714_v12 = vmul.f32 %v11968_v50, %v5985_v29 }
 0x4d5   : > { %v6090_v52 = vld [vmem:[#allocation5 + $0xb1] sm:$0xff]  ;;  %v6026_v55 = vmul.f32 %v11988_v14, %v5986_v16 }
 0x4d6   : > { %v6193_v20 = vld [vmem:[#allocation5 + $0xaa] sm:$0xff]  ;;  %v6057_v1 = vadd.f32 %v6025_v34, %v5952_v32  ;;  %v6130_v4 = vmul.f32 %v11997_v59, %v6090_v52  ;;  %v12406_v63 = vld [vmem:[#allocation5 + $0xb2] sm:$0xff]  ;;  %v5540_v48 = vadd.f32 %v5508_v8, %v5436_v5  ;;  %v5746_v35 = vadd.f32 %v5714_v12, %v5642_v10 }
 0x4d7   : > { %v6233_v18 = vmul.f32 %v12009_v37, %v6193_v20  ;;  %v5612_v56 = vmul.f32 %v11958_v58, %v6193_v20  ;;  %v6058_v7 = vadd.f32 %v6026_v55, %v5953_v13  ;;  %v6234_v29 = vmul.f32 %v12009_v37, %v12406_v63  ;;  %v12419_v10 = vld [vmem:[#allocation5 + $0xc8] sm:$0xff] }
 0x4d8   : > { %v6161_v42 = vadd.f32 %v6129_v46, %v6057_v1  ;;  %v5437_v32 = vmul.f32 %v11939_v23, %v5986_v16  ;;  %v6944_v34 = vpop.f32.mrb[32].mxu1  ;;  %v5850_v15 = vadd.f32 %v5818_v28, %v5746_v35  ;;  %v5922_v62 = vmul.f32 %v11980_v60, %v6193_v20  ;;  %v12422_v55 = vld [vmem:[#allocation5 + $0xc2] sm:$0xff] }
 0x4d9   : > { %v5644_v41 = vadd.f32 %v5612_v56, %v5540_v48  ;;  %v5509_v61 = vmul.f32 %v11944_v26, %v6090_v52  ;;  %v6162_v6 = vadd.f32 %v6130_v4, %v6058_v7  ;;  %v5296_v5 = vadd.f32 %v6944_v34, %v11934_v31  ;;  %v5287_v8 = vpop.f32.mrb[33].mxu1 }
 0x4da   : > { %v6265_v43 = vadd.f32 %v6233_v18, %v6161_v42  ;;  %v5613_v13 = vmul.f32 %v11958_v58, %v12406_v63  ;;  %v5288_v46 = vadd.f32 %v11934_v31, %v5287_v8  ;;  %v6945_v12 = vpop.f32.mrb[34].mxu1  ;;  %v5954_v28 = vadd.f32 %v5922_v62, %v5850_v15  ;;  %v12429_v42 = vld [vmem:[#allocation5 + $0xc9] sm:$0xff] }
 0x4db   : > { %v5748_v1 = vadd.f32 %v5716_v57, %v5644_v41  ;;  %v5541_v20 = vadd.f32 %v5509_v61, %v5437_v32  ;;  %v6266_v48 = vadd.f32 %v6234_v29, %v6162_v6  ;;  %5369 = vst.msk [vmem:[#allocation5 + $0xf1] sm:$0xff] %vm434_vm3, %v5296_v5  ;;  %v5299_v18 = vadd.f32 %v6945_v12, %v11934_v31  ;;  %v5290_v56 = vpop.f32.mrb[35].mxu1 }
 0x4dc   : > { %v6304_v4 = vadd.f32 %v12030_v2, %v6265_v43  ;;  %v6131_v35 = vmul.f32 %v11997_v59, %v12389_v51  ;;  %5367 = vst.msk [vmem:[#allocation5 + $0xd9] sm:$0xff] %vm434_vm3, %v5288_v46  ;;  %v5291_v41 = vadd.f32 %v11934_v31, %v5290_v56  ;;  %v6059_v57 = vadd.f32 %v6027_v9, %v5954_v28  ;;  %v12449_v46 = vld [vmem:[#allocation5 + $0xca] sm:$0xff] }
 0x4dd   : > { %v5645_v62 = vadd.f32 %v5613_v13, %v5541_v20  ;;  %v5717_v6 = vmul.f32 %v11968_v50, %v12419_v10  ;;  %v6305_v43 = vadd.f32 %v12030_v2, %v6266_v48  ;;  %5370 = vst.msk [vmem:[#allocation5 + $0xf9] sm:$0xff] %vm434_vm3, %v5299_v18  ;;  %v6235_v7 = vmul.f32 %v12009_v37, %v12422_v55 }
 0x4de   : > { %v6572_v15 = vadd.f32 %v12381_v39, %v6304_v4  ;;  %v5715_v29 = vmul.f32 %v11968_v50, %v5986_v16  ;;  %5368 = vst.msk [vmem:[#allocation5 + $0xe1] sm:$0xff] %vm434_vm3, %v5291_v41  ;;  %v5852_v31 = vadd.f32 %v5820_v47, %v5748_v1  ;;  %v6163_v9 = vadd.f32 %v6131_v35, %v6059_v57 }
 0x4df   : > { %v5749_v32 = vadd.f32 %v5717_v6, %v5645_v62  ;;  %v5821_v34 = vmul.f32 %v11974_v22, %v12429_v42  ;;  %v6573_v61 = vadd.f32 %v12385_v0, %v6305_v43  ;;  %v5819_v8 = vmul.f32 %v11974_v22, %v6090_v52 }
 0x4e0   : > { %v6604_v39 = vmax.f32 %v6572_v15, 0.0  ;;  %v5747_v5 = vadd.f32 %v5715_v29, %v12391_v17  ;;  %v6267_v13 = vadd.f32 %v6235_v7, %v6163_v9  ;;  %v6484_v16 = vadd.f32 %v12019_v24, %v12060_v40 }
 0x4e1   : > { %v6605_v47 = vmax.f32 %v6573_v61, 0.0  ;;  %v5924_v12 = vmul.f32 %v11980_v60, %v12422_v55  ;;  %v5853_v1 = vadd.f32 %v5821_v34, %v5749_v32  ;;  %v12457_v28 = vadd.f32 %v12053_v53, %v12019_v24 }
 0x4e2   : > { %6636 = vst.msk [vmem:[%s12046_s23 + $0x50] sm:$0xff] %vm434_vm3, %v6604_v39  ;;  %v5851_v0 = vadd.f32 %v5819_v8, %v5747_v5  ;;  %v6306_v17 = vadd.f32 %v12030_v2, %v6267_v13  ;;  %v12462_v52 = vadd.f32 %v12062_v54, %v12019_v24  ;;  %v12466_v40 = vadd.f32 %v12019_v24, %v12069_v27 }
 0x4e3   : > { %6637 = vst.msk [vmem:[%s12046_s23 + $0x58] sm:$0xff] %vm434_vm3, %v6605_v47  ;;  %v5401_v20 = vld [vmem:[#allocation5 + $0xd8] sm:$0xff]  ;;  %v5956_v4 = vadd.f32 %v5924_v12, %v5852_v31  ;;  %v5925_v18 = vmul.f32 %v11980_v60, %v12449_v46  ;;  %v5923_v53 = vmul.f32 %v11980_v60, %v12406_v63  ;;  %v6028_v56 = vmul.f32 %v11988_v14, %v12419_v10  ;;  %v12503_v47 = vld [vmem:[#allocation5 + $0xf0] sm:$0xff] }
 0x4e4   : > { %v5472_v48 = vld [vmem:[#allocation5 + $0xd9] sm:$0xff]  ;;  %v5440_v54 = vmul.f32 %v11939_v23, %v5401_v20  ;;  %v6029_v27 = vmul.f32 %v11988_v14, %v5401_v20  ;;  %v6132_v41 = vmul.f32 %v11997_v59, %v12429_v42  ;;  %v6574_v6 = vadd.f32 %v6484_v16, %v6306_v17 }
 0x4e5   : > { %v5512_v35 = vmul.f32 %v11944_v26, %v5472_v48  ;;  %v12481_v57 = vld [vmem:[#allocation5 + $0xe0] sm:$0xff]  ;;  %v5957_v43 = vadd.f32 %v5925_v18, %v5853_v1  ;;  %v5955_v15 = vadd.f32 %v5923_v53, %v5851_v0  ;;  %v5438_v63 = vmul.f32 %v11939_v23, %v12387_v3  ;;  %v12508_v0 = vld [vmem:[#allocation5 + $0xf8] sm:$0xff] }
 0x4e6   : > { %v12483_v62 = vld [vmem:[#allocation5 + $0xe1] sm:$0xff]  ;;  %v5441_v29 = vmul.f32 %v11939_v23, %v12481_v57  ;;  %v5510_v34 = vmul.f32 %v11944_v26, %v12389_v51  ;;  %v6061_v39 = vadd.f32 %v6029_v27, %v5956_v4  ;;  %v6133_v5 = vmul.f32 %v11997_v59, %v5472_v48 }
 0x4e7   : > { %v5544_v7 = vadd.f32 %v5512_v35, %v5440_v54  ;;  %v5513_v31 = vmul.f32 %v11944_v26, %v12483_v62  ;;  %v5576_v9 = vld [vmem:[#allocation5 + $0xda] sm:$0xff]  ;;  %v12491_v32 = vld [vmem:[#allocation5 + $0xe2] sm:$0xff]  ;;  %v5614_v3 = vmul.f32 %v11958_v58, %v12422_v55  ;;  %v6606_v13 = vmax.f32 %v6574_v6, 0.0 }
 0x4e8   : > { %v5616_v61 = vmul.f32 %v11958_v58, %v5576_v9  ;;  %v5617_v23 = vmul.f32 %v11958_v58, %v12491_v32  ;;  %v6030_v16 = vmul.f32 %v11988_v14, %v12481_v57  ;;  %v6165_v26 = vadd.f32 %v6133_v5, %v6061_v39 }
 0x4e9   : > { %v5545_v8 = vadd.f32 %v5513_v31, %v5441_v29  ;;  %v6237_v51 = vmul.f32 %v12009_v37, %v5576_v9  ;;  %v6134_v12 = vmul.f32 %v11997_v59, %v12483_v62  ;;  %v6060_v1 = vadd.f32 %v6028_v56, %v5955_v15  ;;  %6638 = vst.msk [vmem:[%s12046_s23 + $0x60] sm:$0xff] %vm434_vm3, %v6606_v13 }
 0x4ea   : > { %v5648_v55 = vadd.f32 %v5616_v61, %v5544_v7  ;;  %v6062_v17 = vadd.f32 %v6030_v16, %v5957_v43  ;;  %v5542_v58 = vadd.f32 %v5510_v34, %v5438_v63  ;;  %v5718_v4 = vmul.f32 %v11968_v50, %v5401_v20 }
 0x4eb   : > { %v5649_v18 = vadd.f32 %v5617_v23, %v5545_v8  ;;  %v6269_v53 = vadd.f32 %v6237_v51, %v6165_v26  ;;  %v6164_v54 = vadd.f32 %v6132_v41, %v6060_v1  ;;  %v6236_v35 = vmul.f32 %v12009_v37, %v12449_v46  ;;  %v5784_v8 = vld [vmem:[#allocation5 + $0xf1] sm:$0xff] }
 0x4ec   : > { %v5720_v27 = vmul.f32 %v11968_v50, %v12503_v47  ;;  %v6166_v6 = vadd.f32 %v6134_v12, %v6062_v17  ;;  %v6238_v56 = vmul.f32 %v12009_v37, %v12491_v32  ;;  %v5646_v15 = vadd.f32 %v5614_v3, %v5542_v58  ;;  %v5888_v1 = vld [vmem:[#allocation5 + $0xf2] sm:$0xff] }
 0x4ed   : > { %v5721_v43 = vmul.f32 %v11968_v50, %v12508_v0  ;;  %v6308_v63 = vadd.f32 %v12030_v2, %v6269_v53  ;;  %v6268_v20 = vadd.f32 %v6236_v35, %v6164_v54  ;;  %v6031_v41 = vmul.f32 %v11988_v14, %v12503_v47  ;;  %v12530_v50 = vld [vmem:[%s12911_s7] ss:$0 sm:$0xff] }
 0x4ee   : > { %v5752_v7 = vadd.f32 %v5720_v27, %v5648_v55  ;;  %v6270_v29 = vadd.f32 %v6238_v56, %v6166_v6  ;;  %v5750_v31 = vadd.f32 %v5718_v4, %v5646_v15  ;;  %v5822_v34 = vmul.f32 %v11974_v22, %v5472_v48 }
 0x4ef   : > { %v5753_v61 = vadd.f32 %v5721_v43, %v5649_v18  ;;  %v6576_v39 = vadd.f32 %v12457_v28, %v6308_v63  ;;  %v6307_v5 = vadd.f32 %v12030_v2, %v6268_v20  ;;  %v5439_v3 = vmul.f32 %v12530_v50, %v12419_v10  ;;  %v12539_v28 = vld [vmem:[%s12911_s7 + $0x1] ss:$0 sm:$0xff]  ;;  %v12547_v10 = vld [vmem:[%s12910_s6] ss:$0 sm:$0xff] }
 0x4f0   : > { %v6309_v14 = vadd.f32 %v12030_v2, %v6270_v29  ;;  %v6948_v23 = vpop.f32.mrb[36].mxu1  ;;  %v5854_v13 = vadd.f32 %v5822_v34, %v5750_v31  ;;  %v5926_v22 = vmul.f32 %v11980_v60, %v5576_v9  ;;  %v5511_v48 = vmul.f32 %v12539_v28, %v12429_v42  ;;  %v12553_v9 = vld [vmem:[%s12911_s7 + $0x2] ss:$0 sm:$0xff]  ;;  %v5785_v42 = vld [vmem:[#allocation5 + $0xf9] sm:$0xff] }
 0x4f1   : > { %v6608_v16 = vmax.f32 %v6576_v39, 0.0  ;;  %v6575_v26 = vadd.f32 %v12466_v40, %v6307_v5  ;;  %v5312_v51 = vadd.f32 %v12547_v10, %v6948_v23  ;;  %v5303_v60 = vpop.f32.mrb[37].mxu1  ;;  %v5615_v12 = vmul.f32 %v12553_v9, %v12449_v46 }
 0x4f2   : > { %v6577_v40 = vadd.f32 %v12462_v52, %v6309_v14  ;;  %v5304_v55 = vadd.f32 %v12547_v10, %v5303_v60  ;;  %v5958_v17 = vadd.f32 %v5926_v22, %v5854_v13  ;;  %v6949_v58 = vpop.f32.mrb[38].mxu1  ;;  %v5543_v4 = vadd.f32 %v5511_v48, %v5439_v3  ;;  %v12567_v52 = vld [vmem:[%s12911_s7 + $0x3] ss:$0 sm:$0xff]  ;;  %v12627_v60 = vld [vmem:[%s12911_s7 + $0x6] ss:$0 sm:$0xff] }
 0x4f3   : > { %6640 = vst.msk [vmem:[%s12046_s23 + $0x70] sm:$0xff] %vm434_vm3, %v6608_v16  ;;  %v6607_v18 = vmax.f32 %v6575_v26, 0.0  ;;  %5373 = vst.msk [vmem:[#allocation5 + $0x121] sm:$0xff] %vm434_vm3, %v5312_v51  ;;  %v6135_v53 = vmul.f32 %v11997_v59, %v5784_v8  ;;  %v5315_v54 = vadd.f32 %v12547_v10, %v6949_v58  ;;  %v5306_v46 = vpop.f32.mrb[39].mxu1  ;;  %v5719_v35 = vmul.f32 %v12567_v52, %v12481_v57  ;;  %v12576_v59 = vld [vmem:[%s12911_s7 + $0x4] ss:$0 sm:$0xff] }
 0x4f4   : > { %v6609_v27 = vmax.f32 %v6577_v40, 0.0  ;;  %5371 = vst.msk [vmem:[#allocation5 + $0x109] sm:$0xff] %vm434_vm3, %v5304_v55  ;;  %v6063_v6 = vadd.f32 %v6031_v41, %v5958_v17  ;;  %v5307_v56 = vadd.f32 %v12547_v10, %v5306_v46  ;;  %v5647_v15 = vadd.f32 %v5615_v12, %v5543_v4  ;;  %v5889_v41 = vld [vmem:[#allocation5 + $0xfa] sm:$0xff]  ;;  %v12637_v40 = vld [vmem:[%s12911_s7 + $0x7] ss:$0 sm:$0xff] }
 0x4f5   : > { %v5824_v43 = vmul.f32 %v12576_v59, %v5784_v8  ;;  %v5825_v63 = vmul.f32 %v12576_v59, %v5785_v42  ;;  %6639 = vst.msk [vmem:[%s12046_s23 + $0x68] sm:$0xff] %vm434_vm3, %v6607_v18  ;;  %v12584_v57 = vadd.f32 %v12085_v11, %v12019_v24  ;;  %v6239_v20 = vmul.f32 %v12009_v37, %v5888_v1 }
 0x4f6   : > { %5374 = vst.msk [vmem:[#allocation5 + $0x129] sm:$0xff] %vm434_vm3, %v5315_v54  ;;  %6641 = vst.msk [vmem:[%s12046_s23 + $0x78] sm:$0xff] %vm434_vm3, %v6609_v27  ;;  %v6167_v29 = vadd.f32 %v6135_v53, %v6063_v6  ;;  %v5751_v31 = vadd.f32 %v5719_v35, %v5647_v15  ;;  %v5442_v34 = vmul.f32 %v12530_v50, %v12503_v47 }
 0x4f7   : > { %5372 = vst.msk [vmem:[#allocation5 + $0x111] sm:$0xff] %vm434_vm3, %v5307_v56  ;;  %v5514_v39 = vmul.f32 %v12539_v28, %v5784_v8  ;;  %v5856_v5 = vadd.f32 %v5824_v43, %v5752_v7  ;;  %v6500_v11 = vadd.f32 %v12019_v24, %v12103_v49  ;;  %v5857_v3 = vadd.f32 %v5825_v63, %v5753_v61  ;;  %v12613_v49 = vld [vmem:[%s12911_s7 + $0x5] ss:$0 sm:$0xff] }
 0x4f8   : > { %v5823_v37 = vmul.f32 %v12576_v59, %v12483_v62  ;;  %v6271_v14 = vadd.f32 %v6239_v20, %v6167_v29  ;;  %v12600_v23 = vadd.f32 %v12111_v45, %v12019_v24  ;;  %v12604_v13 = vadd.f32 %v12019_v24, %v12169_v19 }
 0x4f9   : > { %v12608_v47 = vadd.f32 %v12019_v24, %v12197_v36  ;;  %v5928_v62 = vmul.f32 %v12613_v49, %v5888_v1  ;;  %v5929_v7 = vmul.f32 %v12613_v49, %v5889_v41  ;;  %v5618_v45 = vmul.f32 %v12553_v9, %v5888_v1 }
 0x4fa   : > { %v5855_v61 = vadd.f32 %v5823_v37, %v5751_v31  ;;  %v6310_v8 = vadd.f32 %v12030_v2, %v6271_v14  ;;  %v5546_v19 = vadd.f32 %v5514_v39, %v5442_v34  ;;  %v5443_v22 = vmul.f32 %v12530_v50, %v12508_v0  ;;  %v12631_v12 = vld [vmem:[#allocation5 + $0x120] sm:$0xff] }
 0x4fb   : > { %v5515_v24 = vmul.f32 %v12539_v28, %v5785_v42  ;;  %v5405_v36 = vld [vmem:[#allocation5 + $0x108] sm:$0xff]  ;;  %v5960_v16 = vadd.f32 %v5928_v62, %v5856_v5  ;;  %v5961_v26 = vadd.f32 %v5929_v7, %v5857_v3  ;;  %v5927_v51 = vmul.f32 %v12613_v49, %v12491_v32  ;;  %v12643_v32 = vld [vmem:[%s12911_s7 + $0x8] ss:$0 sm:$0xff] }
 0x4fc   : > { %v5476_v48 = vld [vmem:[#allocation5 + $0x109] sm:$0xff]  ;;  %v6032_v2 = vmul.f32 %v12627_v60, %v12508_v0  ;;  %v6033_v1 = vmul.f32 %v12627_v60, %v5405_v36  ;;  %v6136_v55 = vmul.f32 %v12637_v40, %v5785_v42  ;;  %v6240_v17 = vmul.f32 %v12643_v32, %v5889_v41  ;;  %v12649_v35 = vld [vmem:[#allocation5 + $0x121] sm:$0xff] }
 0x4fd   : > { %v5619_v0 = vmul.f32 %v12553_v9, %v5889_v41  ;;  %v5444_v58 = vmul.f32 %v12530_v50, %v5405_v36  ;;  %v5516_v4 = vmul.f32 %v12539_v28, %v5476_v48  ;;  %v6578_v18 = vadd.f32 %v6500_v11, %v6310_v8 }
 0x4fe   : > { %v5406_v53 = vld [vmem:[#allocation5 + $0x110] sm:$0xff]  ;;  %v5959_v46 = vadd.f32 %v5927_v51, %v5855_v61  ;;  %v6065_v42 = vadd.f32 %v6033_v1, %v5960_v16  ;;  %v6137_v27 = vmul.f32 %v12637_v40, %v5476_v48  ;;  %v5650_v56 = vadd.f32 %v5618_v45, %v5546_v19  ;;  %v5685_v16 = vld [vmem:[#allocation5 + $0x128] sm:$0xff] }
 0x4ff   : > { %v5477_v54 = vld [vmem:[#allocation5 + $0x111] sm:$0xff]  ;;  %v5547_v15 = vadd.f32 %v5515_v24, %v5443_v22  ;;  %v5724_v43 = vmul.f32 %v12567_v52, %v12631_v12  ;;  %v6610_v63 = vmax.f32 %v6578_v18, 0.0  ;;  %v5445_v20 = vmul.f32 %v12530_v50, %v5406_v53 }
 0x500   : > { %v5580_v6 = vld [vmem:[#allocation5 + $0x10a] sm:$0xff]  ;;  %v5517_v41 = vmul.f32 %v12539_v28, %v5477_v54  ;;  %v6169_v29 = vadd.f32 %v6137_v27, %v6065_v42  ;;  %v5581_v31 = vld [vmem:[#allocation5 + $0x112] sm:$0xff]  ;;  %v6034_v34 = vmul.f32 %v12627_v60, %v5406_v53  ;;  %v6035_v5 = vmul.f32 %v12627_v60, %v12631_v12 }
 0x501   : > { %v6241_v39 = vmul.f32 %v12643_v32, %v5580_v6  ;;  %v5548_v11 = vadd.f32 %v5516_v4, %v5444_v58  ;;  %6642 = vst.msk [vmem:[%s12046_s23 + $0x80] sm:$0xff] %vm434_vm3, %v6610_v63  ;;  %v5620_v3 = vmul.f32 %v12553_v9, %v5580_v6  ;;  %v6064_v37 = vadd.f32 %v6032_v2, %v5959_v46  ;;  %v12672_v2 = vld [vmem:[%s12912_s8] ss:$0 sm:$0xff] }
 0x502   : > { %v6139_v14 = vmul.f32 %v12637_v40, %v12649_v35  ;;  %v6066_v62 = vadd.f32 %v6034_v34, %v5961_v26  ;;  %v6138_v7 = vmul.f32 %v12637_v40, %v5477_v54  ;;  %v5722_v45 = vmul.f32 %v12567_v52, %v5405_v36 }
 0x503   : > { %v6273_v61 = vadd.f32 %v6241_v39, %v6169_v29  ;;  %v5549_v8 = vadd.f32 %v5517_v41, %v5445_v20  ;;  %v5621_v19 = vmul.f32 %v12553_v9, %v5581_v31  ;;  %v6242_v22 = vmul.f32 %v12643_v32, %v5581_v31 }
 0x504   : > { %v6168_v24 = vadd.f32 %v6136_v55, %v6064_v37  ;;  %v6170_v51 = vadd.f32 %v6138_v7, %v6066_v62  ;;  %v5754_v1 = vadd.f32 %v5722_v45, %v5650_v56  ;;  %v5826_v58 = vmul.f32 %v12576_v59, %v5476_v48  ;;  %v5892_v48 = vld [vmem:[#allocation5 + $0x122] sm:$0xff] }
 0x505   : > { %v6312_v26 = vadd.f32 %v12672_v2, %v6273_v61  ;;  %v5652_v4 = vadd.f32 %v5620_v3, %v5548_v11  ;;  %v5930_v18 = vmul.f32 %v12613_v49, %v5580_v6  ;;  %v5651_v46 = vadd.f32 %v5619_v0, %v5547_v15  ;;  %v5789_v45 = vld [vmem:[#allocation5 + $0x129] sm:$0xff] }
 0x506   : > { %v6272_v36 = vadd.f32 %v6240_v17, %v6168_v24  ;;  %v6274_v42 = vadd.f32 %v6242_v22, %v6170_v51  ;;  %v5858_v27 = vadd.f32 %v5826_v58, %v5754_v1  ;;  %v5723_v63 = vmul.f32 %v12567_v52, %v5406_v53 }
 0x507   : > { %v6580_v55 = vadd.f32 %v12584_v57, %v6312_v26  ;;  %v5725_v20 = vmul.f32 %v12567_v52, %v5685_v16  ;;  %v5653_v41 = vadd.f32 %v5621_v19, %v5549_v8  ;;  %v5827_v56 = vmul.f32 %v12576_v59, %v5477_v54 }
 0x508   : > { %v6311_v29 = vadd.f32 %v12672_v2, %v6272_v36  ;;  %v6313_v17 = vadd.f32 %v12672_v2, %v6274_v42  ;;  %v6952_v6 = vpop.f32.mrb[40].mxu1  ;;  %v5962_v0 = vadd.f32 %v5930_v18, %v5858_v27  ;;  %v5755_v15 = vadd.f32 %v5723_v63, %v5651_v46  ;;  %v12714_v42 = vld [vmem:[%s12914_s10] ss:$0 sm:$0xff] }
 0x509   : > { %v6612_v34 = vmax.f32 %v6580_v55, 0.0  ;;  %v5756_v39 = vadd.f32 %v5724_v43, %v5652_v4  ;;  %v5328_v53 = vadd.f32 %v12547_v10, %v6952_v6  ;;  %v5319_v11 = vpop.f32.mrb[41].mxu1  ;;  %v5931_v3 = vmul.f32 %v12613_v49, %v5581_v31  ;;  %v5893_v27 = vld [vmem:[#allocation5 + $0x12a] sm:$0xff] }
 0x50a   : > { %v6579_v57 = vadd.f32 %v12604_v13, %v6311_v29  ;;  %v6581_v37 = vadd.f32 %v12600_v23, %v6313_v17  ;;  %v5320_v54 = vadd.f32 %v12547_v10, %v5319_v11  ;;  %v6067_v62 = vadd.f32 %v6035_v5, %v5962_v0  ;;  %v6953_v7 = vpop.f32.mrb[42].mxu1 }
 0x50b   : > { %6644 = vst.msk [vmem:[%s12046_s23 + $0x90] sm:$0xff] %vm434_vm3, %v6612_v34  ;;  %v5859_v61 = vadd.f32 %v5827_v56, %v5755_v15  ;;  %5377 = vst.msk [vmem:[#allocation5 + $0x151] sm:$0xff] %vm434_vm3, %v5328_v53  ;;  %v6243_v13 = vmul.f32 %v12643_v32, %v5892_v48  ;;  %v5331_v43 = vadd.f32 %v12547_v10, %v6953_v7  ;;  %v5322_v31 = vpop.f32.mrb[43].mxu1 }
 0x50c   : > { %v6611_v8 = vmax.f32 %v6579_v57, 0.0  ;;  %v6036_v23 = vmul.f32 %v12627_v60, %v5685_v16  ;;  %v6613_v19 = vmax.f32 %v6581_v37, 0.0  ;;  %5375 = vst.msk [vmem:[#allocation5 + $0x139] sm:$0xff] %vm434_vm3, %v5320_v54  ;;  %v6171_v22 = vadd.f32 %v6139_v14, %v6067_v62 }
 0x50d   : > { %v5323_v5 = vadd.f32 %v12547_v10, %v5322_v31  ;;  %v5963_v24 = vadd.f32 %v5931_v3, %v5859_v61  ;;  %v5828_v51 = vmul.f32 %v12576_v59, %v12649_v35  ;;  %v5757_v26 = vadd.f32 %v5725_v20, %v5653_v41  ;;  %5378 = vst.msk [vmem:[#allocation5 + $0x159] sm:$0xff] %vm434_vm3, %v5331_v43 }
 0x50e   : > { %6643 = vst.msk [vmem:[%s12046_s23 + $0x88] sm:$0xff] %vm434_vm3, %v6611_v8  ;;  %v5446_v1 = vmul.f32 %v12530_v50, %v12631_v12  ;;  %v5518_v58 = vmul.f32 %v12539_v28, %v12649_v35  ;;  %6645 = vst.msk [vmem:[%s12046_s23 + $0x98] sm:$0xff] %vm434_vm3, %v6613_v19  ;;  %v6275_v14 = vadd.f32 %v6243_v13, %v6171_v22 }
 0x50f   : > { %5376 = vst.msk [vmem:[#allocation5 + $0x141] sm:$0xff] %vm434_vm3, %v5323_v5  ;;  %v6068_v4 = vadd.f32 %v6036_v23, %v5963_v24  ;;  %v5447_v36 = vmul.f32 %v12530_v50, %v5685_v16  ;;  %v5519_v18 = vmul.f32 %v12539_v28, %v5789_v45  ;;  %v5829_v46 = vmul.f32 %v12576_v59, %v5789_v45 }
 0x510   : > { %v12718_v12 = vadd.f32 %v12714_v42, %v12182_v21  ;;  %v5860_v35 = vadd.f32 %v5828_v51, %v5756_v39  ;;  %v6140_v55 = vmul.f32 %v12637_v40, %v5789_v45  ;;  %v5932_v63 = vmul.f32 %v12613_v49, %v5892_v48 }
 0x511   : > { %v6314_v16 = vadd.f32 %v12672_v2, %v6275_v14  ;;  %v12725_v20 = vadd.f32 %v12714_v42, %v12199_v30  ;;  %v6519_v41 = vadd.f32 %v12714_v42, %v12225_v44  ;;  %v5861_v29 = vadd.f32 %v5829_v46, %v5757_v26 }
 0x512   : > { %v6172_v56 = vadd.f32 %v6140_v55, %v6068_v4  ;;  %v5550_v17 = vadd.f32 %v5518_v58, %v5446_v1  ;;  %v5622_v21 = vmul.f32 %v12553_v9, %v5892_v48  ;;  %v12733_v6 = vadd.f32 %v12714_v42, %v12273_v25  ;;  %v12751_v37 = vld [vmem:[#allocation5 + $0x151] sm:$0xff] }
 0x513   : > { %v6582_v34 = vadd.f32 %v12608_v47, %v6314_v16  ;;  %v12737_v0 = vadd.f32 %v12714_v42, %v12278_v38  ;;  %v5551_v30 = vadd.f32 %v5519_v18, %v5447_v36  ;;  %v5933_v15 = vmul.f32 %v12613_v49, %v5893_v27  ;;  %v5409_v39 = vld [vmem:[#allocation5 + $0x138] sm:$0xff]  ;;  %v12745_v47 = vld [vmem:[#allocation5 + $0x150] sm:$0xff] }
 0x514   : > { %v5480_v44 = vld [vmem:[#allocation5 + $0x139] sm:$0xff]  ;;  %v5964_v57 = vadd.f32 %v5932_v63, %v5860_v35  ;;  %v6244_v53 = vmul.f32 %v12643_v32, %v5893_v27  ;;  %v12743_v48 = vadd.f32 %v12714_v42, %v12286_v33  ;;  %v5448_v25 = vmul.f32 %v12530_v50, %v5409_v39 }
 0x515   : > { %v5520_v11 = vmul.f32 %v12539_v28, %v5480_v44  ;;  %v6037_v38 = vmul.f32 %v12627_v60, %v5409_v39  ;;  %v5623_v3 = vmul.f32 %v12553_v9, %v5893_v27  ;;  %v6614_v54 = vmax.f32 %v6582_v34, 0.0 }
 0x516   : > { %v5410_v62 = vld [vmem:[#allocation5 + $0x140] sm:$0xff]  ;;  %v5965_v61 = vadd.f32 %v5933_v15, %v5861_v29  ;;  %v6276_v45 = vadd.f32 %v6244_v53, %v6172_v56  ;;  %v5654_v33 = vadd.f32 %v5622_v21, %v5550_v17  ;;  %v6141_v13 = vmul.f32 %v12637_v40, %v5480_v44  ;;  %v5689_v21 = vld [vmem:[#allocation5 + $0x158] sm:$0xff] }
 0x517   : > { %v5481_v7 = vld [vmem:[#allocation5 + $0x141] sm:$0xff]  ;;  %v6069_v8 = vadd.f32 %v6037_v38, %v5964_v57  ;;  %v5449_v43 = vmul.f32 %v12530_v50, %v5410_v62  ;;  %v5655_v23 = vadd.f32 %v5623_v3, %v5551_v30  ;;  %v5552_v19 = vadd.f32 %v5520_v11, %v5448_v25  ;;  %6646 = vst.msk [vmem:[%s12046_s23 + $0xa0] sm:$0xff] %vm434_vm3, %v6614_v54  ;;  %v5896_v38 = vld [vmem:[#allocation5 + $0x152] sm:$0xff] }
 0x518   : > { %v5584_v31 = vld [vmem:[#allocation5 + $0x13a] sm:$0xff]  ;;  %v5521_v22 = vmul.f32 %v12539_v28, %v5481_v7  ;;  %v5585_v5 = vld [vmem:[#allocation5 + $0x142] sm:$0xff]  ;;  %v6038_v51 = vmul.f32 %v12627_v60, %v5410_v62  ;;  %v5728_v26 = vmul.f32 %v12567_v52, %v12745_v47  ;;  %v12764_v1 = vmul.f32 %v12576_v59, %v12751_v37 }
 0x519   : > { %v5624_v24 = vmul.f32 %v12553_v9, %v5584_v31  ;;  %v6173_v58 = vadd.f32 %v6141_v13, %v6069_v8  ;;  %v6245_v14 = vmul.f32 %v12643_v32, %v5584_v31  ;;  %v6142_v18 = vmul.f32 %v12637_v40, %v5481_v7 }
 0x51a   : > { %v5553_v4 = vadd.f32 %v5521_v22, %v5449_v43  ;;  %v6070_v36 = vadd.f32 %v6038_v51, %v5965_v61  ;;  %v6315_v46 = vadd.f32 %v12672_v2, %v6276_v45  ;;  %v5625_v35 = vmul.f32 %v12553_v9, %v5585_v5 }
 0x51b   : > { %v6277_v55 = vadd.f32 %v6245_v14, %v6173_v58  ;;  %v5726_v27 = vmul.f32 %v12567_v52, %v5409_v39  ;;  %v6039_v63 = vmul.f32 %v12627_v60, %v12745_v47  ;;  %v5656_v16 = vadd.f32 %v5624_v24, %v5552_v19 }
 0x51c   : > { %v6174_v29 = vadd.f32 %v6142_v18, %v6070_v36  ;;  %v6246_v56 = vmul.f32 %v12643_v32, %v5585_v5  ;;  %v6583_v17 = vadd.f32 %v6519_v41, %v6315_v46  ;;  %v5830_v15 = vmul.f32 %v12576_v59, %v5480_v44 }
 0x51d   : > { %v6316_v34 = vadd.f32 %v12672_v2, %v6277_v55  ;;  %v5758_v30 = vadd.f32 %v5726_v27, %v5654_v33  ;;  %v5727_v57 = vmul.f32 %v12567_v52, %v5410_v62  ;;  %v5657_v53 = vadd.f32 %v5625_v35, %v5553_v4 }
 0x51e   : > { %v6278_v25 = vadd.f32 %v6246_v56, %v6174_v29  ;;  %v6615_v39 = vmax.f32 %v6583_v17, 0.0  ;;  %v5934_v11 = vmul.f32 %v12613_v49, %v5584_v31  ;;  %v5831_v41 = vmul.f32 %v12576_v59, %v5481_v7  ;;  %v13247_v17 = vld [vmem:[#allocation50_spill] sm:$0xff] }
 0x51f   : > { %v6584_v3 = vadd.f32 %v12718_v12, %v6316_v34  ;;  %v5862_v54 = vadd.f32 %v5830_v15, %v5758_v30  ;;  %v5759_v61 = vadd.f32 %v5727_v57, %v5655_v23  ;;  %v5729_v45 = vmul.f32 %v12567_v52, %v5689_v21  ;;  %v5793_v23 = vld [vmem:[#allocation5 + $0x159] sm:$0xff] }
 0x520   : > { %v5760_v33 = vadd.f32 %v5728_v26, %v5656_v16  ;;  %v6317_v44 = vadd.f32 %v12672_v2, %v6278_v25  ;;  %6647 = vst.msk [vmem:[%s12046_s23 + $0xa8] sm:$0xff] %vm434_vm3, %v6615_v39  ;;  %v6143_v62 = vmul.f32 %v12637_v40, %v12751_v37  ;;  %v6956_v13 = vpop.f32.mrb[44].mxu1  ;;  %v5935_v12 = vmul.f32 %v12613_v49, %v5585_v5  ;;  %v5897_v5 = vld [vmem:[#allocation5 + $0x15a] sm:$0xff] }
 0x521   : > { %v6616_v8 = vmax.f32 %v6584_v3, 0.0  ;;  %v5966_v43 = vadd.f32 %v5934_v11, %v5862_v54  ;;  %v5863_v31 = vadd.f32 %v5831_v41, %v5759_v61  ;;  %v5761_v19 = vadd.f32 %v5729_v45, %v5657_v53  ;;  %v5335_v24 = vpop.f32.mrb[45].mxu1  ;;  %v6005_v34 = vld [vmem:[#allocation5 + $0x198] sm:$0xff] }
 0x522   : > { %v6585_v7 = vadd.f32 %v12725_v20, %v6317_v44  ;;  %v5344_v22 = vadd.f32 %v12547_v10, %v6956_v13  ;;  %v6247_v51 = vmul.f32 %v12643_v32, %v5896_v38  ;;  %v5336_v26 = vadd.f32 %v12547_v10, %v5335_v24  ;;  %v6957_v14 = vpop.f32.mrb[46].mxu1  ;;  %v6109_v25 = vld [vmem:[#allocation5 + $0x199] sm:$0xff] }
 0x523   : > { %6648 = vst.msk [vmem:[%s12046_s23 + $0xb0] sm:$0xff] %vm434_vm3, %v6616_v8  ;;  %v6071_v58 = vadd.f32 %v6039_v63, %v5966_v43  ;;  %v5967_v4 = vadd.f32 %v5935_v12, %v5863_v31  ;;  %v6040_v36 = vmul.f32 %v12627_v60, %v5689_v21  ;;  %v5347_v20 = vadd.f32 %v12547_v10, %v6957_v14  ;;  %v5338_v46 = vpop.f32.mrb[47].mxu1  ;;  %v6213_v39 = vld [vmem:[#allocation5 + $0x19a] sm:$0xff] }
 0x524   : > { %v6617_v18 = vmax.f32 %v6585_v7, 0.0  ;;  %5381 = vst.msk [vmem:[#allocation5 + $0x181] sm:$0xff] %vm434_vm3, %v5344_v22  ;;  %v5450_v35 = vmul.f32 %v12530_v50, %v12745_v47  ;;  %v5522_v55 = vmul.f32 %v12539_v28, %v12751_v37  ;;  %5379 = vst.msk [vmem:[#allocation5 + $0x169] sm:$0xff] %vm434_vm3, %v5336_v26  ;;  %v5339_v63 = vadd.f32 %v12547_v10, %v5338_v46 }
 0x525   : > { %v6175_v27 = vadd.f32 %v6143_v62, %v6071_v58  ;;  %v6072_v16 = vadd.f32 %v6040_v36, %v5967_v4  ;;  %v6144_v29 = vmul.f32 %v12637_v40, %v5793_v23  ;;  %v5833_v56 = vmul.f32 %v12576_v59, %v5793_v23  ;;  %5382 = vst.msk [vmem:[#allocation5 + $0x189] sm:$0xff] %vm434_vm3, %v5347_v20 }
 0x526   : > { %6649 = vst.msk [vmem:[%s12046_s23 + $0xb8] sm:$0xff] %vm434_vm3, %v6617_v18  ;;  %v6535_v47 = vadd.f32 %v12714_v42, %v13247_v17  ;;  %v5451_v37 = vmul.f32 %v12530_v50, %v5689_v21  ;;  %v5523_v30 = vmul.f32 %v12539_v28, %v5793_v23  ;;  %v5864_v15 = vadd.f32 %v12764_v1, %v5760_v33  ;;  %v13248_v23 = vld [vmem:[#allocation54_spill] sm:$0xff] }
 0x527   : > { %v6279_v10 = vadd.f32 %v6247_v51, %v6175_v27  ;;  %5380 = vst.msk [vmem:[#allocation5 + $0x171] sm:$0xff] %vm434_vm3, %v5339_v63  ;;  %v6176_v57 = vadd.f32 %v6144_v29, %v6072_v16  ;;  %v6248_v53 = vmul.f32 %v12643_v32, %v5897_v5  ;;  %v5865_v11 = vadd.f32 %v5833_v56, %v5761_v19 }
 0x528   : > { %v5554_v3 = vadd.f32 %v5522_v55, %v5450_v35  ;;  %v5626_v54 = vmul.f32 %v12553_v9, %v5896_v38  ;;  %v5555_v61 = vadd.f32 %v5523_v30, %v5451_v37  ;;  %v5936_v41 = vmul.f32 %v12613_v49, %v5896_v38 }
 0x529   : > { %v6318_v21 = vadd.f32 %v12672_v2, %v6279_v10  ;;  %v6280_v45 = vadd.f32 %v6248_v53, %v6176_v57  ;;  %v12818_v1 = vmul.f32 %v12627_v60, %v6005_v34  ;;  %v5937_v33 = vmul.f32 %v12613_v49, %v5897_v5 }
 0x52a   : > { %v12822_v44 = vmul.f32 %v12637_v40, %v6109_v25  ;;  %v12825_v62 = vmul.f32 %v12643_v32, %v6213_v39  ;;  %v5627_v8 = vmul.f32 %v12553_v9, %v5897_v5  ;;  %v5968_v13 = vadd.f32 %v5936_v41, %v5864_v15 }
 0x52b   : > { %v6586_v43 = vadd.f32 %v12737_v0, %v6318_v21  ;;  %v6319_v38 = vadd.f32 %v12672_v2, %v6280_v45  ;;  %v5692_v31 = vld [vmem:[#allocation5 + $0x180] sm:$0xff]  ;;  %v12832_v19 = vadd.f32 %v12714_v42, %v13248_v23  ;;  %v6001_v7 = vld [vmem:[#allocation5 + $0x168] sm:$0xff]  ;;  %v5969_v24 = vadd.f32 %v5937_v33, %v5865_v11 }
 0x52c   : > { %v5796_v12 = vld [vmem:[#allocation5 + $0x181] sm:$0xff]  ;;  %v6105_v22 = vld [vmem:[#allocation5 + $0x169] sm:$0xff]  ;;  %v5732_v51 = vmul.f32 %v12567_v52, %v5692_v31  ;;  %v5658_v26 = vadd.f32 %v5626_v54, %v5554_v3  ;;  %v5659_v58 = vadd.f32 %v5627_v8, %v5555_v61  ;;  %v6041_v14 = vmul.f32 %v12627_v60, %v6001_v7 }
 0x52d   : > { %v6618_v4 = vmax.f32 %v6586_v43, 0.0  ;;  %v6587_v0 = vadd.f32 %v6535_v47, %v6319_v38  ;;  %v5836_v36 = vmul.f32 %v12576_v59, %v5796_v12  ;;  %v5452_v46 = vmul.f32 %v12530_v50, %v6001_v7  ;;  %v5900_v57 = vld [vmem:[#allocation5 + $0x182] sm:$0xff] }
 0x52e   : > { %v6002_v5 = vld [vmem:[#allocation5 + $0x170] sm:$0xff]  ;;  %v5524_v35 = vmul.f32 %v12539_v28, %v6105_v22  ;;  %v5730_v55 = vmul.f32 %v12567_v52, %v6001_v7  ;;  %v6043_v27 = vmul.f32 %v12627_v60, %v5692_v31  ;;  %v6073_v63 = vadd.f32 %v6041_v14, %v5968_v13  ;;  %v5693_v33 = vld [vmem:[#allocation5 + $0x188] sm:$0xff] }
 0x52f   : > { %v6106_v18 = vld [vmem:[#allocation5 + $0x171] sm:$0xff]  ;;  %v6145_v16 = vmul.f32 %v12637_v40, %v6105_v22  ;;  %6650 = vst.msk [vmem:[%s12046_s23 + $0xc0] sm:$0xff] %vm434_vm3, %v6618_v4  ;;  %v6042_v29 = vmul.f32 %v12627_v60, %v6002_v5  ;;  %v6619_v34 = vmax.f32 %v6587_v0, 0.0  ;;  %v5834_v25 = vmul.f32 %v12576_v59, %v6105_v22 }
 0x530   : > { %v6209_v20 = vld [vmem:[#allocation5 + $0x16a] sm:$0xff]  ;;  %v6146_v56 = vmul.f32 %v12637_v40, %v6106_v18  ;;  %v6210_v17 = vld [vmem:[#allocation5 + $0x172] sm:$0xff]  ;;  %v5556_v37 = vadd.f32 %v5524_v35, %v5452_v46  ;;  %v5762_v53 = vadd.f32 %v5730_v55, %v5658_v26  ;;  %v5453_v54 = vmul.f32 %v12530_v50, %v6002_v5 }
 0x531   : > { %v6249_v47 = vmul.f32 %v12643_v32, %v6209_v20  ;;  %v5628_v30 = vmul.f32 %v12553_v9, %v6209_v20  ;;  %v6177_v15 = vadd.f32 %v6145_v16, %v6073_v63  ;;  %v6074_v10 = vadd.f32 %v6042_v29, %v5969_v24  ;;  %6651 = vst.msk [vmem:[%s12046_s23 + $0xc8] sm:$0xff] %vm434_vm3, %v6619_v34  ;;  %v5797_v24 = vld [vmem:[#allocation5 + $0x189] sm:$0xff] }
 0x532   : > { %v6250_v39 = vmul.f32 %v12643_v32, %v6210_v17  ;;  %v5938_v3 = vmul.f32 %v12613_v49, %v6209_v20  ;;  %v5866_v21 = vadd.f32 %v5834_v25, %v5762_v53  ;;  %v5525_v45 = vmul.f32 %v12539_v28, %v6106_v18  ;;  %v5901_v35 = vld [vmem:[#allocation5 + $0x18a] sm:$0xff] }
 0x533   : > { %v5660_v11 = vadd.f32 %v5628_v30, %v5556_v37  ;;  %v6178_v61 = vadd.f32 %v6146_v56, %v6074_v10  ;;  %v6281_v41 = vadd.f32 %v6249_v47, %v6177_v15  ;;  %v5940_v13 = vmul.f32 %v12613_v49, %v5900_v57  ;;  %v13249_v53 = vld [vmem:[#allocation53_spill] sm:$0xff] }
 0x534   : > { %v6147_v43 = vmul.f32 %v12637_v40, %v5796_v12  ;;  %v5629_v38 = vmul.f32 %v12553_v9, %v6210_v17  ;;  %v5970_v7 = vadd.f32 %v5938_v3, %v5866_v21  ;;  %v5557_v22 = vadd.f32 %v5525_v45, %v5453_v54  ;;  %v6006_v9 = vld [vmem:[#allocation5 + $0x1a0] sm:$0xff] }
 0x535   : > { %v5764_v8 = vadd.f32 %v5732_v51, %v5660_v11  ;;  %v6282_v31 = vadd.f32 %v6250_v39, %v6178_v61  ;;  %v6320_v23 = vadd.f32 %v12672_v2, %v6281_v41  ;;  %v6251_v26 = vmul.f32 %v12643_v32, %v5900_v57 }
 0x536   : > { %v5733_v14 = vmul.f32 %v12567_v52, %v5693_v33  ;;  %v5731_v28 = vmul.f32 %v12567_v52, %v6002_v5  ;;  %v6075_v12 = vadd.f32 %v6043_v27, %v5970_v7  ;;  %v5661_v0 = vadd.f32 %v5629_v38, %v5557_v22  ;;  %v6110_v27 = vld [vmem:[#allocation5 + $0x1a1] sm:$0xff] }
 0x537   : > { %v5868_v50 = vadd.f32 %v5836_v36, %v5764_v8  ;;  %v6321_v51 = vadd.f32 %v12672_v2, %v6282_v31  ;;  %v6588_v4 = vadd.f32 %v12733_v6, %v6320_v23  ;;  %v5837_v46 = vmul.f32 %v12576_v59, %v5797_v24  ;;  %v13251_v38 = vld [vmem:[#allocation56_spill] sm:$0xff] }
 0x538   : > { %v5763_v55 = vadd.f32 %v5731_v28, %v5659_v58  ;;  %v5835_v36 = vmul.f32 %v12576_v59, %v6106_v18  ;;  %v6179_v29 = vadd.f32 %v6147_v43, %v6075_v12  ;;  %v5765_v52 = vadd.f32 %v5733_v14, %v5661_v0  ;;  %v6214_v18 = vld [vmem:[#allocation5 + $0x1a2] sm:$0xff] }
 0x539   : > { %v5972_v20 = vadd.f32 %v5940_v13, %v5868_v50  ;;  %v6589_v63 = vadd.f32 %v12743_v48, %v6321_v51  ;;  %v6620_v16 = vmax.f32 %v6588_v4, 0.0  ;;  %v6046_v6 = vmul.f32 %v12627_v60, %v6006_v9 }
 0x53a   : > { %v5867_v56 = vadd.f32 %v5835_v36, %v5763_v55  ;;  %v5939_v47 = vmul.f32 %v12613_v49, %v6210_v17  ;;  %v6283_v58 = vadd.f32 %v6251_v26, %v6179_v29  ;;  %v5869_v37 = vadd.f32 %v5837_v46, %v5765_v52 }
 0x53b   : > { %v6077_v5 = vadd.f32 %v12818_v1, %v5972_v20  ;;  %v6621_v34 = vmax.f32 %v6589_v63, 0.0  ;;  %6652 = vst.msk [vmem:[%s12046_s23 + $0xd0] sm:$0xff] %vm434_vm3, %v6620_v16  ;;  %v5941_v59 = vmul.f32 %v12613_v49, %v5901_v35  ;;  %v6044_v15 = vmul.f32 %v12627_v60, %v5693_v33  ;;  %v13250_v33 = vld [vmem:[#allocation57_spill] sm:$0xff] }
 0x53c   : > { %v5971_v30 = vadd.f32 %v5939_v47, %v5867_v56  ;;  %v6322_v1 = vadd.f32 %v12672_v2, %v6283_v58  ;;  %v6150_v17 = vmul.f32 %v12637_v40, %v6110_v27  ;;  %v6556_v25 = vadd.f32 %v12714_v42, %v13249_v53 }
 0x53d   : > { %v6181_v48 = vadd.f32 %v12822_v44, %v6077_v5  ;;  %6653 = vst.msk [vmem:[%s12046_s23 + $0xd8] sm:$0xff] %vm434_vm3, %v6621_v34  ;;  %v5973_v10 = vadd.f32 %v5941_v59, %v5869_v37  ;;  %v6148_v44 = vmul.f32 %v12637_v40, %v5797_v24  ;;  %v6254_v60 = vmul.f32 %v12643_v32, %v6214_v18 }
 0x53e   : > { %v6076_v49 = vadd.f32 %v6044_v15, %v5971_v30  ;;  %v6590_v39 = vadd.f32 %v12832_v19, %v6322_v1  ;;  %v6252_v61 = vmul.f32 %v12643_v32, %v5901_v35  ;;  %v6551_v40 = vadd.f32 %v12714_v42, %v13250_v33 }
 0x53f   : > { %v6285_v57 = vadd.f32 %v12825_v62, %v6181_v48  ;;  %v6078_v11 = vadd.f32 %v6046_v6, %v5973_v10  ;;  %v6559_v32 = vadd.f32 %v12714_v42, %v13251_v38 }
 0x540   : > { %v6180_v54 = vadd.f32 %v6148_v44, %v6076_v49  ;;  %v6622_v41 = vmax.f32 %v6590_v39, 0.0 }
 0x541   : > { %v6324_v3 = vadd.f32 %v12672_v2, %v6285_v57  ;;  %v6182_v62 = vadd.f32 %v6150_v17, %v6078_v11 }
 0x542   : > { %v6284_v45 = vadd.f32 %v6252_v61, %v6180_v54  ;;  %6654 = vst.msk [vmem:[%s12046_s23 + $0xe0] sm:$0xff] %vm434_vm3, %v6622_v41 }
 0x543   : > { %v6592_v21 = vadd.f32 %v6556_v25, %v6324_v3  ;;  %v6286_v19 = vadd.f32 %v6254_v60, %v6182_v62 }
 0x544   : > { %v6323_v13 = vadd.f32 %v12672_v2, %v6284_v45 }
 0x545   : > { %v6624_v8 = vmax.f32 %v6592_v21, 0.0  ;;  %v6325_v43 = vadd.f32 %v12672_v2, %v6286_v19 }
 0x546   : > { %v6591_v31 = vadd.f32 %v6551_v40, %v6323_v13 }
 0x547   : > { %6656 = vst.msk [vmem:[%s12046_s23 + $0xf0] sm:$0xff] %vm434_vm3, %v6624_v8  ;;  %v6593_v23 = vadd.f32 %v6559_v32, %v6325_v43 }
 0x548   : > { %v6623_v7 = vmax.f32 %v6591_v31, 0.0 }
 0x549   : > { %v6625_v22 = vmax.f32 %v6593_v23, 0.0 }
 0x54a   : > { %6655 = vst.msk [vmem:[%s12046_s23 + $0xe8] sm:$0xff] %vm434_vm3, %v6623_v7 }
 0x54b   : > { %6657 = vst.msk [vmem:[%s12046_s23 + $0xf8] sm:$0xff] %vm434_vm3, %v6625_v22 }
 0x54c PF: > { %s21_s17 = sadd.s32 1, %s8343_s17  }
 0x54d   : > { %p18_p4 = scmp.ge.s32.totalorder %s21_s17, 4  }
 0x54f   :  { %20 = sbr.rel (!%p18_p4) target bundleno = 1 (0x1), region = 122 }

</bundles_post_ra>
